<compile_context>
chip_gen: v6e
topology: v6e:2x2x1
jax: 0.10.0
libtpu: 0.0.40
codegen_flags: <defaults>
</compile_context>

<pallas_src>
import functools

import jax
import jax.numpy as jnp
from jax.experimental import pallas as pl
from jax.experimental.pallas import tpu as pltpu


def _round_up(x, m):
    return (x + m - 1) // m * m


# ---------------------------------------------------------------------------
# Static LeNet geometry (3x32x32 input, required so the flatten is 16*5*5).
# ---------------------------------------------------------------------------
K = 5                                   # conv kernel size
C_IN, H_IN, W_IN = 3, 32, 32
OC1, OC2 = 6, 16
FC1_OUT, FC2_OUT = 120, 84
FEAT = OC2 * 5 * 5                      # 400

# padded sizes (sublane / lane alignment)
C_PAD = 8                               # 3  -> 8 sublanes
OC1_PAD = 8                             # 6  -> 8
OC2_PAD = 16                            # 16 -> 16
FC_IN_PAD = _round_up(FEAT, 128)        # 512
FC1_PAD = _round_up(FC1_OUT, 128)       # 128
FC2_PAD = _round_up(FC2_OUT, 128)       # 128

# ---------------------------------------------------------------------------
# Flat-lane widths for the fused features kernel (per image).
# Everything is sized from the inside out so every static lane slice stays in
# bounds and 128-aligned:
#   conv1 tap (kh,kw)      -> lane offset kh*W + kw               (max 132)
#   pool1 (2x2, stride 2)  -> max of lane shifts {0, 1, W, W+1}   (max 33)
#   pool1 output (i,j)     -> lane 2i*W + 2j  (sparse layout)
#   conv2 tap (kh,kw)      -> lane offset kh*2W + 2kw             (max 264)
#   pool2 (2x2, stride 2)  -> max of lane shifts {0, 2, 2W, 2W+2} (max 66)
#   pool2 output (i,j)     -> lane 128i + 4j  (extracted outside the kernel)
# ---------------------------------------------------------------------------
OUT_W = _round_up(H_IN * W_IN, 128)                          # 1024
POOL2_MAX_SHIFT = 2 * W_IN + 2                               # 66
Z2 = _round_up(OUT_W + POOL2_MAX_SHIFT, 128)                 # 1152
CONV2_MAX_OFF = (K - 1) * (2 * W_IN) + (K - 1) * 2           # 264
Z1M = _round_up(Z2 + CONV2_MAX_OFF, 128)                     # 1536
POOL1_MAX_SHIFT = W_IN + 1                                   # 33
Z1 = _round_up(Z1M + POOL1_MAX_SHIFT, 128)                   # 1664
CONV1_MAX_OFF = (K - 1) * W_IN + (K - 1)                     # 132
X_PER = _round_up(Z1 + CONV1_MAX_OFF, 128)                   # 1920


# ---------------------------------------------------------------------------
# Kernel 1: fused features (conv1 + ReLU + pool1 + conv2 + ReLU + pool2)
# ---------------------------------------------------------------------------
def _features_kernel(x_ref, w1_ref, b1_ref, w2_ref, b2_ref, o_ref):
    """Processes ONE image.

    x_ref : (C_PAD, X_PER)           channel-major, spatial flattened h*W + w
    w1_ref: (K*K, OC1_PAD, C_PAD)    conv1 weights per tap (t = kh*K + kw)
    b1_ref: (OC1_PAD, 1)
    w2_ref: (K*K, OC2_PAD, OC1_PAD)  conv2 weights per tap
    b2_ref: (OC2_PAD, 1)
    o_ref : (OC2_PAD, OUT_W)         pool2 output on the sparse 32x32 flat
                                     grid: value (c, i, j) at lane 128*i + 4*j
    Padded channel rows / padded bias rows are zero, so padded channels stay
    exactly zero through both stages.
    """
    x = x_ref[...]

    # ---- conv1 (+ bias, ReLU): 25 taps == 25 constant-lane-offset dots -----
    acc1 = jnp.zeros((OC1_PAD, Z1), jnp.float32)
    for kh in range(K):
        for kw in range(K):
            off = kh * W_IN + kw
            acc1 = acc1 + jnp.dot(
                w1_ref[kh * K + kw], x[:, off:off + Z1],
                preferred_element_type=jnp.float32)
    acc1 = jnp.maximum(acc1 + b1_ref[...], 0.0)

    # ---- pool1: 2x2 / stride 2 == max of four lane-shifted views -----------
    m1 = jnp.maximum(
        jnp.maximum(acc1[:, 0:Z1M], acc1[:, 1:1 + Z1M]),
        jnp.maximum(acc1[:, W_IN:W_IN + Z1M],
                    acc1[:, W_IN + 1:W_IN + 1 + Z1M]))
    # valid pooled value (c, i, j) now lives at lane 2*i*W_IN + 2*j

    # ---- conv2 on the sparse layout: row stride 2*W_IN, col stride 2 -------
    acc2 = jnp.zeros((OC2_PAD, Z2), jnp.float32)
    for kh in range(K):
        for kw in range(K):
            off = kh * (2 * W_IN) + kw * 2
            acc2 = acc2 + jnp.dot(
                w2_ref[kh * K + kw], m1[:, off:off + Z2],
                preferred_element_type=jnp.float32)
    acc2 = jnp.maximum(acc2 + b2_ref[...], 0.0)

    # ---- pool2 --------------------------------------------------------------
    out = jnp.maximum(
        jnp.maximum(acc2[:, 0:OUT_W], acc2[:, 2:2 + OUT_W]),
        jnp.maximum(acc2[:, 2 * W_IN:2 * W_IN + OUT_W],
                    acc2[:, 2 * W_IN + 2:2 * W_IN + 2 + OUT_W]))
    o_ref[...] = out


def _features_call(xf, w1t, b1, w2t, b2):
    B = xf.shape[0]
    return pl.pallas_call(
        _features_kernel,
        out_shape=jax.ShapeDtypeStruct((B, OC2_PAD, OUT_W), jnp.float32),
        grid=(B,),
        in_specs=[
            pl.BlockSpec((None, C_PAD, X_PER), lambda b: (b, 0, 0)),
            pl.BlockSpec((K * K, OC1_PAD, C_PAD), lambda b: (0, 0, 0)),
            pl.BlockSpec((OC1_PAD, 1), lambda b: (0, 0)),
            pl.BlockSpec((K * K, OC2_PAD, OC1_PAD), lambda b: (0, 0, 0)),
            pl.BlockSpec((OC2_PAD, 1), lambda b: (0, 0)),
        ],
        out_specs=pl.BlockSpec((None, OC2_PAD, OUT_W), lambda b: (b, 0, 0)),
        compiler_params=pltpu.CompilerParams(
            dimension_semantics=("parallel",)),  # v7x: 2 TCs split the batch
    )(xf, w1t, b1, w2t, b2)


# ---------------------------------------------------------------------------
# Kernel 2: fused classifier (fc1 + ReLU + fc2 + ReLU + fc3)
# ---------------------------------------------------------------------------
def _classifier_kernel(x_ref, w1_ref, b1_ref, w2_ref, b2_ref, w3_ref, b3_ref,
                       o_ref):
    h = jnp.dot(x_ref[...], w1_ref[...], preferred_element_type=jnp.float32)
    h = jnp.maximum(h + b1_ref[...], 0.0)
    h = jnp.dot(h, w2_ref[...], preferred_element_type=jnp.float32)
    h = jnp.maximum(h + b2_ref[...], 0.0)
    o = jnp.dot(h, w3_ref[...], preferred_element_type=jnp.float32)
    o_ref[...] = o + b3_ref[...]


def _classifier_call(xp, w1, b1, w2, b2, w3, b3, *, out_pad, block_m):
    Mp = xp.shape[0]
    return pl.pallas_call(
        _classifier_kernel,
        out_shape=jax.ShapeDtypeStruct((Mp, out_pad), jnp.float32),
        grid=(Mp // block_m,),
        in_specs=[
            pl.BlockSpec((block_m, FC_IN_PAD), lambda i: (i, 0)),
            pl.BlockSpec((FC_IN_PAD, FC1_PAD), lambda i: (0, 0)),
            pl.BlockSpec((1, FC1_PAD), lambda i: (0, 0)),
            pl.BlockSpec((FC1_PAD, FC2_PAD), lambda i: (0, 0)),
            pl.BlockSpec((1, FC2_PAD), lambda i: (0, 0)),
            pl.BlockSpec((FC2_PAD, out_pad), lambda i: (0, 0)),
            pl.BlockSpec((1, out_pad), lambda i: (0, 0)),
        ],
        out_specs=pl.BlockSpec((block_m, out_pad), lambda i: (i, 0)),
        compiler_params=pltpu.CompilerParams(
            dimension_semantics=("parallel",)),
    )(xp, w1, b1, w2, b2, w3, b3)


# ---------------------------------------------------------------------------
# Parameters: raw (PyTorch-layout) init + one-time packing
# ---------------------------------------------------------------------------
def init_params(key, classes):
    keys = jax.random.split(key, 10)
    scale = 0.1

    def w(k, shape):
        return scale * jax.random.normal(k, shape, dtype=jnp.float32)

    return {
        "conv1_w": w(keys[0], (OC1, C_IN, K, K)), "conv1_b": w(keys[1], (OC1,)),
        "conv2_w": w(keys[2], (OC2, OC1, K, K)),  "conv2_b": w(keys[3], (OC2,)),
        "fc1_w": w(keys[4], (FC1_OUT, FEAT)),     "fc1_b": w(keys[5], (FC1_OUT,)),
        "fc2_w": w(keys[6], (FC2_OUT, FC1_OUT)),  "fc2_b": w(keys[7], (FC2_OUT,)),
        "fc3_w": w(keys[8], (classes, FC2_OUT)),  "fc3_b": w(keys[9], (classes,)),
    }


def pack_params(raw):
    """One-time repack: per-tap conv matrices and pre-transposed, pre-padded
    FC weights, all (8,128)-aligned.  Zero padding keeps padded channels /
    features exactly zero through the network."""
    classes = raw["fc3_w"].shape[0]
    out_pad = _round_up(classes, 128)

    def conv_taps(w, oc_pad, c_pad):
        oc, c = w.shape[0], w.shape[1]
        t = w.transpose(2, 3, 0, 1).reshape(K * K, oc, c)   # [kh*K+kw, oc, c]
        return jnp.pad(t, ((0, 0), (0, oc_pad - oc), (0, c_pad - c)))

    def col_bias(b, pad):
        return jnp.pad(b, (0, pad - b.shape[0])).reshape(pad, 1)

    def fc(w, b, in_pad, o_pad):
        o, i = w.shape
        wt = jnp.pad(w.T, ((0, in_pad - i), (0, o_pad - o)))
        bp = jnp.pad(b, (0, o_pad - o)).reshape(1, o_pad)
        return wt, bp

    fc1_w, fc1_b = fc(raw["fc1_w"], raw["fc1_b"], FC_IN_PAD, FC1_PAD)
    fc2_w, fc2_b = fc(raw["fc2_w"], raw["fc2_b"], FC1_PAD, FC2_PAD)
    fc3_w, fc3_b = fc(raw["fc3_w"], raw["fc3_b"], FC2_PAD, out_pad)
    return {
        "conv1_w": conv_taps(raw["conv1_w"], OC1_PAD, C_PAD),
        "conv1_b": col_bias(raw["conv1_b"], OC1_PAD),
        "conv2_w": conv_taps(raw["conv2_w"], OC2_PAD, OC1_PAD),
        "conv2_b": col_bias(raw["conv2_b"], OC2_PAD),
        "fc1_w": fc1_w, "fc1_b": fc1_b,
        "fc2_w": fc2_w, "fc2_b": fc2_b,
        "fc3_w": fc3_w, "fc3_b": fc3_b,
    }


# ---------------------------------------------------------------------------
# Forward pass
# ---------------------------------------------------------------------------
@functools.partial(jax.jit, static_argnames=("classes",))
def lenet_forward(packed, x, *, classes):
    B, C, H, W = x.shape
    assert (C, H, W) == (C_IN, H_IN, W_IN), "LeNet expects 3x32x32 inputs"

    # ---- features: one fused Pallas kernel per image ------------------------
    xf = x.reshape(B, C, H * W)
    xf = jnp.pad(xf, ((0, 0), (0, C_PAD - C), (0, X_PER - H * W)))
    feat = _features_call(xf, packed["conv1_w"], packed["conv1_b"],
                          packed["conv2_w"], packed["conv2_b"])  # (B, 16, 1024)

    # Pooled 5x5 features live at lanes 128*i + 4*j == pixel (4i, 4j) of the
    # 32x32 flat grid; extract + flatten in torch's (c, h, w) view order.
    # TODO(synk): this stride-4 lane compaction stays as one tiny XLA strided
    # slice -- doing it in-kernel would need strided lane gathers.
    f = feat.reshape(B, OC2_PAD, H_IN, W_IN)[:, :OC2, 0:4 * 5:4, 0:4 * 5:4]
    f = f.reshape(B, FEAT)                                       # (B, 400)

    # ---- classifier: one fused Pallas kernel --------------------------------
    block_m = 256 if B >= 256 else 8
    Mp = _round_up(B, block_m)
    out_pad = _round_up(classes, 128)
    fp = jnp.pad(f, ((0, Mp - B), (0, FC_IN_PAD - FEAT)))
    logits = _classifier_call(fp,
                              packed["fc1_w"], packed["fc1_b"],
                              packed["fc2_w"], packed["fc2_b"],
                              packed["fc3_w"], packed["fc3_b"],
                              out_pad=out_pad, block_m=block_m)
    return logits[:B, :classes]


# ---------------------------------------------------------------------------
# Plain-JAX reference (mirrors the PyTorch module) for a sanity check
# ---------------------------------------------------------------------------
def reference_forward(raw, x):
    def conv_relu(y, w, b):
        y = jax.lax.conv_general_dilated(
            y, w, window_strides=(1, 1), padding="VALID",
            dimension_numbers=("NCHW", "OIHW", "NCHW"))
        return jax.nn.relu(y + b[None, :, None, None])

    def pool(y):
        return jax.lax.reduce_window(y, -jnp.inf, jax.lax.max,
                                     (1, 1, 2, 2), (1, 1, 2, 2), "VALID")

    y = pool(conv_relu(x, raw["conv1_w"], raw["conv1_b"]))
    y = pool(conv_relu(y, raw["conv2_w"], raw["conv2_b"]))
    y = y.reshape(y.shape[0], -1)
    y = jax.nn.relu(y @ raw["fc1_w"].T + raw["fc1_b"])
    y = jax.nn.relu(y @ raw["fc2_w"].T + raw["fc2_b"])
    return y @ raw["fc3_w"].T + raw["fc3_b"]


if __name__ == "__main__":
    classes = 10
    key = jax.random.PRNGKey(0)
    pkey, xkey = jax.random.split(key)
    raw = init_params(pkey, classes)
    packed = pack_params(raw)

    # LeNet needs 32x32 spatial input so the flatten gives 16*5*5 = 400.
    x = jax.random.normal(xkey, (2, C_IN, H_IN, W_IN), dtype=jnp.float32)

    out = lenet_forward(packed, x, classes=classes)
    out = jax.block_until_ready(out)
    assert out.shape == (2, classes), out.shape
    assert bool(jnp.all(jnp.isfinite(out)))

    ref = reference_forward(raw, x)
    max_err = float(jnp.max(jnp.abs(out - ref)))
    assert max_err < 5e-2, f"mismatch vs plain-JAX reference: {max_err}"

    print("KERNEL_OK")
</pallas_src>

<mosaic_0001>
module attributes {stable_mosaic.version = 11 : i64} {
  func.func @_features_kernel(%arg0: i32, %arg1: memref<1x8x1920xf32, #tpu.memory_space<vmem>>, %arg2: memref<25x8x8xf32, #tpu.memory_space<vmem>>, %arg3: memref<8x1xf32, #tpu.memory_space<vmem>>, %arg4: memref<25x16x8xf32, #tpu.memory_space<vmem>>, %arg5: memref<16x1xf32, #tpu.memory_space<vmem>>, %arg6: memref<1x16x1024xf32, #tpu.memory_space<vmem>>) attributes {dimension_semantics = [#tpu.dimension_semantics<parallel>], iteration_bounds = array<i64: 2>, scalar_prefetch = 0 : i64, scratch_operands = 0 : i64, tpu.core_type = #tpu.core_type<tc>, window_params = [{transform_indices = @transform_0, window_bounds = array<i64: 1, 8, 1920>}, {pipeline_mode = #tpu.pipeline_mode<synchronous>, transform_indices = @transform_1, window_bounds = array<i64: 25, 8, 8>}, {pipeline_mode = #tpu.pipeline_mode<synchronous>, transform_indices = @transform_2, window_bounds = array<i64: 8, 1>}, {pipeline_mode = #tpu.pipeline_mode<synchronous>, transform_indices = @transform_3, window_bounds = array<i64: 25, 16, 8>}, {pipeline_mode = #tpu.pipeline_mode<synchronous>, transform_indices = @transform_4, window_bounds = array<i64: 16, 1>}, {transform_indices = @transform_5, window_bounds = array<i64: 1, 16, 1024>}]} {
    %c0 = arith.constant 0 : index
    %c0_0 = arith.constant 0 : index
    %c0_1 = arith.constant 0 : index
    %0 = vector.load %arg1[%c0, %c0_0, %c0_1] : memref<1x8x1920xf32, #tpu.memory_space<vmem>>, vector<1x8x1920xf32>
    %1 = vector.shape_cast %0 : vector<1x8x1920xf32> to vector<8x1920xf32>
    %cst = arith.constant 0.000000e+00 : f32
    %2 = vector.broadcast %cst : f32 to vector<8x1664xf32>
    %c0_2 = arith.constant 0 : index
    %c0_3 = arith.constant 0 : index
    %c0_4 = arith.constant 0 : index
    %3 = vector.load %arg2[%c0_2, %c0_3, %c0_4] : memref<25x8x8xf32, #tpu.memory_space<vmem>>, vector<1x8x8xf32>
    %4 = vector.shape_cast %3 : vector<1x8x8xf32> to vector<8x8xf32>
    %5 = vector.extract_strided_slice %1 {offsets = [0, 0], sizes = [8, 1664], strides = [1, 1]} : vector<8x1920xf32> to vector<8x1664xf32>
    %cst_5 = arith.constant dense<0.000000e+00> : vector<8x1664xf32>
    %6 = tpu.matmul %4, %5, %cst_5 {dimension_numbers = #tpu.dot_dimension_numbers<[1], [0], [0], [1], [0, 0, 1, 1], [], []>} : vector<8x8xf32>, vector<8x1664xf32>, vector<8x1664xf32> -> vector<8x1664xf32>
    %7 = arith.addf %2, %6 : vector<8x1664xf32>
    %c1 = arith.constant 1 : index
    %c0_6 = arith.constant 0 : index
    %c0_7 = arith.constant 0 : index
    %8 = vector.load %arg2[%c1, %c0_6, %c0_7] : memref<25x8x8xf32, #tpu.memory_space<vmem>>, vector<1x8x8xf32>
    %9 = vector.shape_cast %8 : vector<1x8x8xf32> to vector<8x8xf32>
    %10 = vector.extract_strided_slice %1 {offsets = [0, 1], sizes = [8, 1664], strides = [1, 1]} : vector<8x1920xf32> to vector<8x1664xf32>
    %cst_8 = arith.constant dense<0.000000e+00> : vector<8x1664xf32>
    %11 = tpu.matmul %9, %10, %cst_8 {dimension_numbers = #tpu.dot_dimension_numbers<[1], [0], [0], [1], [0, 0, 1, 1], [], []>} : vector<8x8xf32>, vector<8x1664xf32>, vector<8x1664xf32> -> vector<8x1664xf32>
    %12 = arith.addf %7, %11 : vector<8x1664xf32>
    %c2 = arith.constant 2 : index
    %c0_9 = arith.constant 0 : index
    %c0_10 = arith.constant 0 : index
    %13 = vector.load %arg2[%c2, %c0_9, %c0_10] : memref<25x8x8xf32, #tpu.memory_space<vmem>>, vector<1x8x8xf32>
    %14 = vector.shape_cast %13 : vector<1x8x8xf32> to vector<8x8xf32>
    %15 = vector.extract_strided_slice %1 {offsets = [0, 2], sizes = [8, 1664], strides = [1, 1]} : vector<8x1920xf32> to vector<8x1664xf32>
    %cst_11 = arith.constant dense<0.000000e+00> : vector<8x1664xf32>
    %16 = tpu.matmul %14, %15, %cst_11 {dimension_numbers = #tpu.dot_dimension_numbers<[1], [0], [0], [1], [0, 0, 1, 1], [], []>} : vector<8x8xf32>, vector<8x1664xf32>, vector<8x1664xf32> -> vector<8x1664xf32>
    %17 = arith.addf %12, %16 : vector<8x1664xf32>
    %c3 = arith.constant 3 : index
    %c0_12 = arith.constant 0 : index
    %c0_13 = arith.constant 0 : index
    %18 = vector.load %arg2[%c3, %c0_12, %c0_13] : memref<25x8x8xf32, #tpu.memory_space<vmem>>, vector<1x8x8xf32>
    %19 = vector.shape_cast %18 : vector<1x8x8xf32> to vector<8x8xf32>
    %20 = vector.extract_strided_slice %1 {offsets = [0, 3], sizes = [8, 1664], strides = [1, 1]} : vector<8x1920xf32> to vector<8x1664xf32>
    %cst_14 = arith.constant dense<0.000000e+00> : vector<8x1664xf32>
    %21 = tpu.matmul %19, %20, %cst_14 {dimension_numbers = #tpu.dot_dimension_numbers<[1], [0], [0], [1], [0, 0, 1, 1], [], []>} : vector<8x8xf32>, vector<8x1664xf32>, vector<8x1664xf32> -> vector<8x1664xf32>
    %22 = arith.addf %17, %21 : vector<8x1664xf32>
    %c4 = arith.constant 4 : index
    %c0_15 = arith.constant 0 : index
    %c0_16 = arith.constant 0 : index
    %23 = vector.load %arg2[%c4, %c0_15, %c0_16] : memref<25x8x8xf32, #tpu.memory_space<vmem>>, vector<1x8x8xf32>
    %24 = vector.shape_cast %23 : vector<1x8x8xf32> to vector<8x8xf32>
    %25 = vector.extract_strided_slice %1 {offsets = [0, 4], sizes = [8, 1664], strides = [1, 1]} : vector<8x1920xf32> to vector<8x1664xf32>
    %cst_17 = arith.constant dense<0.000000e+00> : vector<8x1664xf32>
    %26 = tpu.matmul %24, %25, %cst_17 {dimension_numbers = #tpu.dot_dimension_numbers<[1], [0], [0], [1], [0, 0, 1, 1], [], []>} : vector<8x8xf32>, vector<8x1664xf32>, vector<8x1664xf32> -> vector<8x1664xf32>
    %27 = arith.addf %22, %26 : vector<8x1664xf32>
    %c5 = arith.constant 5 : index
    %c0_18 = arith.constant 0 : index
    %c0_19 = arith.constant 0 : index
    %28 = vector.load %arg2[%c5, %c0_18, %c0_19] : memref<25x8x8xf32, #tpu.memory_space<vmem>>, vector<1x8x8xf32>
    %29 = vector.shape_cast %28 : vector<1x8x8xf32> to vector<8x8xf32>
    %30 = vector.extract_strided_slice %1 {offsets = [0, 32], sizes = [8, 1664], strides = [1, 1]} : vector<8x1920xf32> to vector<8x1664xf32>
    %cst_20 = arith.constant dense<0.000000e+00> : vector<8x1664xf32>
    %31 = tpu.matmul %29, %30, %cst_20 {dimension_numbers = #tpu.dot_dimension_numbers<[1], [0], [0], [1], [0, 0, 1, 1], [], []>} : vector<8x8xf32>, vector<8x1664xf32>, vector<8x1664xf32> -> vector<8x1664xf32>
    %32 = arith.addf %27, %31 : vector<8x1664xf32>
    %c6 = arith.constant 6 : index
    %c0_21 = arith.constant 0 : index
    %c0_22 = arith.constant 0 : index
    %33 = vector.load %arg2[%c6, %c0_21, %c0_22] : memref<25x8x8xf32, #tpu.memory_space<vmem>>, vector<1x8x8xf32>
    %34 = vector.shape_cast %33 : vector<1x8x8xf32> to vector<8x8xf32>
    %35 = vector.extract_strided_slice %1 {offsets = [0, 33], sizes = [8, 1664], strides = [1, 1]} : vector<8x1920xf32> to vector<8x1664xf32>
    %cst_23 = arith.constant dense<0.000000e+00> : vector<8x1664xf32>
    %36 = tpu.matmul %34, %35, %cst_23 {dimension_numbers = #tpu.dot_dimension_numbers<[1], [0], [0], [1], [0, 0, 1, 1], [], []>} : vector<8x8xf32>, vector<8x1664xf32>, vector<8x1664xf32> -> vector<8x1664xf32>
    %37 = arith.addf %32, %36 : vector<8x1664xf32>
    %c7 = arith.constant 7 : index
    %c0_24 = arith.constant 0 : index
    %c0_25 = arith.constant 0 : index
    %38 = vector.load %arg2[%c7, %c0_24, %c0_25] : memref<25x8x8xf32, #tpu.memory_space<vmem>>, vector<1x8x8xf32>
    %39 = vector.shape_cast %38 : vector<1x8x8xf32> to vector<8x8xf32>
    %40 = vector.extract_strided_slice %1 {offsets = [0, 34], sizes = [8, 1664], strides = [1, 1]} : vector<8x1920xf32> to vector<8x1664xf32>
    %cst_26 = arith.constant dense<0.000000e+00> : vector<8x1664xf32>
    %41 = tpu.matmul %39, %40, %cst_26 {dimension_numbers = #tpu.dot_dimension_numbers<[1], [0], [0], [1], [0, 0, 1, 1], [], []>} : vector<8x8xf32>, vector<8x1664xf32>, vector<8x1664xf32> -> vector<8x1664xf32>
    %42 = arith.addf %37, %41 : vector<8x1664xf32>
    %c8 = arith.constant 8 : index
    %c0_27 = arith.constant 0 : index
    %c0_28 = arith.constant 0 : index
    %43 = vector.load %arg2[%c8, %c0_27, %c0_28] : memref<25x8x8xf32, #tpu.memory_space<vmem>>, vector<1x8x8xf32>
    %44 = vector.shape_cast %43 : vector<1x8x8xf32> to vector<8x8xf32>
    %45 = vector.extract_strided_slice %1 {offsets = [0, 35], sizes = [8, 1664], strides = [1, 1]} : vector<8x1920xf32> to vector<8x1664xf32>
    %cst_29 = arith.constant dense<0.000000e+00> : vector<8x1664xf32>
    %46 = tpu.matmul %44, %45, %cst_29 {dimension_numbers = #tpu.dot_dimension_numbers<[1], [0], [0], [1], [0, 0, 1, 1], [], []>} : vector<8x8xf32>, vector<8x1664xf32>, vector<8x1664xf32> -> vector<8x1664xf32>
    %47 = arith.addf %42, %46 : vector<8x1664xf32>
    %c9 = arith.constant 9 : index
    %c0_30 = arith.constant 0 : index
    %c0_31 = arith.constant 0 : index
    %48 = vector.load %arg2[%c9, %c0_30, %c0_31] : memref<25x8x8xf32, #tpu.memory_space<vmem>>, vector<1x8x8xf32>
    %49 = vector.shape_cast %48 : vector<1x8x8xf32> to vector<8x8xf32>
    %50 = vector.extract_strided_slice %1 {offsets = [0, 36], sizes = [8, 1664], strides = [1, 1]} : vector<8x1920xf32> to vector<8x1664xf32>
    %cst_32 = arith.constant dense<0.000000e+00> : vector<8x1664xf32>
    %51 = tpu.matmul %49, %50, %cst_32 {dimension_numbers = #tpu.dot_dimension_numbers<[1], [0], [0], [1], [0, 0, 1, 1], [], []>} : vector<8x8xf32>, vector<8x1664xf32>, vector<8x1664xf32> -> vector<8x1664xf32>
    %52 = arith.addf %47, %51 : vector<8x1664xf32>
    %c10 = arith.constant 10 : index
    %c0_33 = arith.constant 0 : index
    %c0_34 = arith.constant 0 : index
    %53 = vector.load %arg2[%c10, %c0_33, %c0_34] : memref<25x8x8xf32, #tpu.memory_space<vmem>>, vector<1x8x8xf32>
    %54 = vector.shape_cast %53 : vector<1x8x8xf32> to vector<8x8xf32>
    %55 = vector.extract_strided_slice %1 {offsets = [0, 64], sizes = [8, 1664], strides = [1, 1]} : vector<8x1920xf32> to vector<8x1664xf32>
    %cst_35 = arith.constant dense<0.000000e+00> : vector<8x1664xf32>
    %56 = tpu.matmul %54, %55, %cst_35 {dimension_numbers = #tpu.dot_dimension_numbers<[1], [0], [0], [1], [0, 0, 1, 1], [], []>} : vector<8x8xf32>, vector<8x1664xf32>, vector<8x1664xf32> -> vector<8x1664xf32>
    %57 = arith.addf %52, %56 : vector<8x1664xf32>
    %c11 = arith.constant 11 : index
    %c0_36 = arith.constant 0 : index
    %c0_37 = arith.constant 0 : index
    %58 = vector.load %arg2[%c11, %c0_36, %c0_37] : memref<25x8x8xf32, #tpu.memory_space<vmem>>, vector<1x8x8xf32>
    %59 = vector.shape_cast %58 : vector<1x8x8xf32> to vector<8x8xf32>
    %60 = vector.extract_strided_slice %1 {offsets = [0, 65], sizes = [8, 1664], strides = [1, 1]} : vector<8x1920xf32> to vector<8x1664xf32>
    %cst_38 = arith.constant dense<0.000000e+00> : vector<8x1664xf32>
    %61 = tpu.matmul %59, %60, %cst_38 {dimension_numbers = #tpu.dot_dimension_numbers<[1], [0], [0], [1], [0, 0, 1, 1], [], []>} : vector<8x8xf32>, vector<8x1664xf32>, vector<8x1664xf32> -> vector<8x1664xf32>
    %62 = arith.addf %57, %61 : vector<8x1664xf32>
    %c12 = arith.constant 12 : index
    %c0_39 = arith.constant 0 : index
    %c0_40 = arith.constant 0 : index
    %63 = vector.load %arg2[%c12, %c0_39, %c0_40] : memref<25x8x8xf32, #tpu.memory_space<vmem>>, vector<1x8x8xf32>
    %64 = vector.shape_cast %63 : vector<1x8x8xf32> to vector<8x8xf32>
    %65 = vector.extract_strided_slice %1 {offsets = [0, 66], sizes = [8, 1664], strides = [1, 1]} : vector<8x1920xf32> to vector<8x1664xf32>
    %cst_41 = arith.constant dense<0.000000e+00> : vector<8x1664xf32>
    %66 = tpu.matmul %64, %65, %cst_41 {dimension_numbers = #tpu.dot_dimension_numbers<[1], [0], [0], [1], [0, 0, 1, 1], [], []>} : vector<8x8xf32>, vector<8x1664xf32>, vector<8x1664xf32> -> vector<8x1664xf32>
    %67 = arith.addf %62, %66 : vector<8x1664xf32>
    %c13 = arith.constant 13 : index
    %c0_42 = arith.constant 0 : index
    %c0_43 = arith.constant 0 : index
    %68 = vector.load %arg2[%c13, %c0_42, %c0_43] : memref<25x8x8xf32, #tpu.memory_space<vmem>>, vector<1x8x8xf32>
    %69 = vector.shape_cast %68 : vector<1x8x8xf32> to vector<8x8xf32>
    %70 = vector.extract_strided_slice %1 {offsets = [0, 67], sizes = [8, 1664], strides = [1, 1]} : vector<8x1920xf32> to vector<8x1664xf32>
    %cst_44 = arith.constant dense<0.000000e+00> : vector<8x1664xf32>
    %71 = tpu.matmul %69, %70, %cst_44 {dimension_numbers = #tpu.dot_dimension_numbers<[1], [0], [0], [1], [0, 0, 1, 1], [], []>} : vector<8x8xf32>, vector<8x1664xf32>, vector<8x1664xf32> -> vector<8x1664xf32>
    %72 = arith.addf %67, %71 : vector<8x1664xf32>
    %c14 = arith.constant 14 : index
    %c0_45 = arith.constant 0 : index
    %c0_46 = arith.constant 0 : index
    %73 = vector.load %arg2[%c14, %c0_45, %c0_46] : memref<25x8x8xf32, #tpu.memory_space<vmem>>, vector<1x8x8xf32>
    %74 = vector.shape_cast %73 : vector<1x8x8xf32> to vector<8x8xf32>
    %75 = vector.extract_strided_slice %1 {offsets = [0, 68], sizes = [8, 1664], strides = [1, 1]} : vector<8x1920xf32> to vector<8x1664xf32>
    %cst_47 = arith.constant dense<0.000000e+00> : vector<8x1664xf32>
    %76 = tpu.matmul %74, %75, %cst_47 {dimension_numbers = #tpu.dot_dimension_numbers<[1], [0], [0], [1], [0, 0, 1, 1], [], []>} : vector<8x8xf32>, vector<8x1664xf32>, vector<8x1664xf32> -> vector<8x1664xf32>
    %77 = arith.addf %72, %76 : vector<8x1664xf32>
    %c15 = arith.constant 15 : index
    %c0_48 = arith.constant 0 : index
    %c0_49 = arith.constant 0 : index
    %78 = vector.load %arg2[%c15, %c0_48, %c0_49] : memref<25x8x8xf32, #tpu.memory_space<vmem>>, vector<1x8x8xf32>
    %79 = vector.shape_cast %78 : vector<1x8x8xf32> to vector<8x8xf32>
    %80 = vector.extract_strided_slice %1 {offsets = [0, 96], sizes = [8, 1664], strides = [1, 1]} : vector<8x1920xf32> to vector<8x1664xf32>
    %cst_50 = arith.constant dense<0.000000e+00> : vector<8x1664xf32>
    %81 = tpu.matmul %79, %80, %cst_50 {dimension_numbers = #tpu.dot_dimension_numbers<[1], [0], [0], [1], [0, 0, 1, 1], [], []>} : vector<8x8xf32>, vector<8x1664xf32>, vector<8x1664xf32> -> vector<8x1664xf32>
    %82 = arith.addf %77, %81 : vector<8x1664xf32>
    %c16 = arith.constant 16 : index
    %c0_51 = arith.constant 0 : index
    %c0_52 = arith.constant 0 : index
    %83 = vector.load %arg2[%c16, %c0_51, %c0_52] : memref<25x8x8xf32, #tpu.memory_space<vmem>>, vector<1x8x8xf32>
    %84 = vector.shape_cast %83 : vector<1x8x8xf32> to vector<8x8xf32>
    %85 = vector.extract_strided_slice %1 {offsets = [0, 97], sizes = [8, 1664], strides = [1, 1]} : vector<8x1920xf32> to vector<8x1664xf32>
    %cst_53 = arith.constant dense<0.000000e+00> : vector<8x1664xf32>
    %86 = tpu.matmul %84, %85, %cst_53 {dimension_numbers = #tpu.dot_dimension_numbers<[1], [0], [0], [1], [0, 0, 1, 1], [], []>} : vector<8x8xf32>, vector<8x1664xf32>, vector<8x1664xf32> -> vector<8x1664xf32>
    %87 = arith.addf %82, %86 : vector<8x1664xf32>
    %c17 = arith.constant 17 : index
    %c0_54 = arith.constant 0 : index
    %c0_55 = arith.constant 0 : index
    %88 = vector.load %arg2[%c17, %c0_54, %c0_55] : memref<25x8x8xf32, #tpu.memory_space<vmem>>, vector<1x8x8xf32>
    %89 = vector.shape_cast %88 : vector<1x8x8xf32> to vector<8x8xf32>
    %90 = vector.extract_strided_slice %1 {offsets = [0, 98], sizes = [8, 1664], strides = [1, 1]} : vector<8x1920xf32> to vector<8x1664xf32>
    %cst_56 = arith.constant dense<0.000000e+00> : vector<8x1664xf32>
    %91 = tpu.matmul %89, %90, %cst_56 {dimension_numbers = #tpu.dot_dimension_numbers<[1], [0], [0], [1], [0, 0, 1, 1], [], []>} : vector<8x8xf32>, vector<8x1664xf32>, vector<8x1664xf32> -> vector<8x1664xf32>
    %92 = arith.addf %87, %91 : vector<8x1664xf32>
    %c18 = arith.constant 18 : index
    %c0_57 = arith.constant 0 : index
    %c0_58 = arith.constant 0 : index
    %93 = vector.load %arg2[%c18, %c0_57, %c0_58] : memref<25x8x8xf32, #tpu.memory_space<vmem>>, vector<1x8x8xf32>
    %94 = vector.shape_cast %93 : vector<1x8x8xf32> to vector<8x8xf32>
    %95 = vector.extract_strided_slice %1 {offsets = [0, 99], sizes = [8, 1664], strides = [1, 1]} : vector<8x1920xf32> to vector<8x1664xf32>
    %cst_59 = arith.constant dense<0.000000e+00> : vector<8x1664xf32>
    %96 = tpu.matmul %94, %95, %cst_59 {dimension_numbers = #tpu.dot_dimension_numbers<[1], [0], [0], [1], [0, 0, 1, 1], [], []>} : vector<8x8xf32>, vector<8x1664xf32>, vector<8x1664xf32> -> vector<8x1664xf32>
    %97 = arith.addf %92, %96 : vector<8x1664xf32>
    %c19 = arith.constant 19 : index
    %c0_60 = arith.constant 0 : index
    %c0_61 = arith.constant 0 : index
    %98 = vector.load %arg2[%c19, %c0_60, %c0_61] : memref<25x8x8xf32, #tpu.memory_space<vmem>>, vector<1x8x8xf32>
    %99 = vector.shape_cast %98 : vector<1x8x8xf32> to vector<8x8xf32>
    %100 = vector.extract_strided_slice %1 {offsets = [0, 100], sizes = [8, 1664], strides = [1, 1]} : vector<8x1920xf32> to vector<8x1664xf32>
    %cst_62 = arith.constant dense<0.000000e+00> : vector<8x1664xf32>
    %101 = tpu.matmul %99, %100, %cst_62 {dimension_numbers = #tpu.dot_dimension_numbers<[1], [0], [0], [1], [0, 0, 1, 1], [], []>} : vector<8x8xf32>, vector<8x1664xf32>, vector<8x1664xf32> -> vector<8x1664xf32>
    %102 = arith.addf %97, %101 : vector<8x1664xf32>
    %c20 = arith.constant 20 : index
    %c0_63 = arith.constant 0 : index
    %c0_64 = arith.constant 0 : index
    %103 = vector.load %arg2[%c20, %c0_63, %c0_64] : memref<25x8x8xf32, #tpu.memory_space<vmem>>, vector<1x8x8xf32>
    %104 = vector.shape_cast %103 : vector<1x8x8xf32> to vector<8x8xf32>
    %105 = vector.extract_strided_slice %1 {offsets = [0, 128], sizes = [8, 1664], strides = [1, 1]} : vector<8x1920xf32> to vector<8x1664xf32>
    %cst_65 = arith.constant dense<0.000000e+00> : vector<8x1664xf32>
    %106 = tpu.matmul %104, %105, %cst_65 {dimension_numbers = #tpu.dot_dimension_numbers<[1], [0], [0], [1], [0, 0, 1, 1], [], []>} : vector<8x8xf32>, vector<8x1664xf32>, vector<8x1664xf32> -> vector<8x1664xf32>
    %107 = arith.addf %102, %106 : vector<8x1664xf32>
    %c21 = arith.constant 21 : index
    %c0_66 = arith.constant 0 : index
    %c0_67 = arith.constant 0 : index
    %108 = vector.load %arg2[%c21, %c0_66, %c0_67] : memref<25x8x8xf32, #tpu.memory_space<vmem>>, vector<1x8x8xf32>
    %109 = vector.shape_cast %108 : vector<1x8x8xf32> to vector<8x8xf32>
    %110 = vector.extract_strided_slice %1 {offsets = [0, 129], sizes = [8, 1664], strides = [1, 1]} : vector<8x1920xf32> to vector<8x1664xf32>
    %cst_68 = arith.constant dense<0.000000e+00> : vector<8x1664xf32>
    %111 = tpu.matmul %109, %110, %cst_68 {dimension_numbers = #tpu.dot_dimension_numbers<[1], [0], [0], [1], [0, 0, 1, 1], [], []>} : vector<8x8xf32>, vector<8x1664xf32>, vector<8x1664xf32> -> vector<8x1664xf32>
    %112 = arith.addf %107, %111 : vector<8x1664xf32>
    %c22 = arith.constant 22 : index
    %c0_69 = arith.constant 0 : index
    %c0_70 = arith.constant 0 : index
    %113 = vector.load %arg2[%c22, %c0_69, %c0_70] : memref<25x8x8xf32, #tpu.memory_space<vmem>>, vector<1x8x8xf32>
    %114 = vector.shape_cast %113 : vector<1x8x8xf32> to vector<8x8xf32>
    %115 = vector.extract_strided_slice %1 {offsets = [0, 130], sizes = [8, 1664], strides = [1, 1]} : vector<8x1920xf32> to vector<8x1664xf32>
    %cst_71 = arith.constant dense<0.000000e+00> : vector<8x1664xf32>
    %116 = tpu.matmul %114, %115, %cst_71 {dimension_numbers = #tpu.dot_dimension_numbers<[1], [0], [0], [1], [0, 0, 1, 1], [], []>} : vector<8x8xf32>, vector<8x1664xf32>, vector<8x1664xf32> -> vector<8x1664xf32>
    %117 = arith.addf %112, %116 : vector<8x1664xf32>
    %c23 = arith.constant 23 : index
    %c0_72 = arith.constant 0 : index
    %c0_73 = arith.constant 0 : index
    %118 = vector.load %arg2[%c23, %c0_72, %c0_73] : memref<25x8x8xf32, #tpu.memory_space<vmem>>, vector<1x8x8xf32>
    %119 = vector.shape_cast %118 : vector<1x8x8xf32> to vector<8x8xf32>
    %120 = vector.extract_strided_slice %1 {offsets = [0, 131], sizes = [8, 1664], strides = [1, 1]} : vector<8x1920xf32> to vector<8x1664xf32>
    %cst_74 = arith.constant dense<0.000000e+00> : vector<8x1664xf32>
    %121 = tpu.matmul %119, %120, %cst_74 {dimension_numbers = #tpu.dot_dimension_numbers<[1], [0], [0], [1], [0, 0, 1, 1], [], []>} : vector<8x8xf32>, vector<8x1664xf32>, vector<8x1664xf32> -> vector<8x1664xf32>
    %122 = arith.addf %117, %121 : vector<8x1664xf32>
    %c24 = arith.constant 24 : index
    %c0_75 = arith.constant 0 : index
    %c0_76 = arith.constant 0 : index
    %123 = vector.load %arg2[%c24, %c0_75, %c0_76] : memref<25x8x8xf32, #tpu.memory_space<vmem>>, vector<1x8x8xf32>
    %124 = vector.shape_cast %123 : vector<1x8x8xf32> to vector<8x8xf32>
    %125 = vector.extract_strided_slice %1 {offsets = [0, 132], sizes = [8, 1664], strides = [1, 1]} : vector<8x1920xf32> to vector<8x1664xf32>
    %cst_77 = arith.constant dense<0.000000e+00> : vector<8x1664xf32>
    %126 = tpu.matmul %124, %125, %cst_77 {dimension_numbers = #tpu.dot_dimension_numbers<[1], [0], [0], [1], [0, 0, 1, 1], [], []>} : vector<8x8xf32>, vector<8x1664xf32>, vector<8x1664xf32> -> vector<8x1664xf32>
    %127 = arith.addf %122, %126 : vector<8x1664xf32>
    %c0_78 = arith.constant 0 : index
    %c0_79 = arith.constant 0 : index
    %128 = vector.load %arg3[%c0_78, %c0_79] : memref<8x1xf32, #tpu.memory_space<vmem>>, vector<8x1xf32>
    %129 = vector.broadcast %128 : vector<8x1xf32> to vector<8x1664xf32>
    %130 = arith.addf %127, %129 : vector<8x1664xf32>
    %cst_80 = arith.constant 0.000000e+00 : f32
    %131 = vector.broadcast %cst_80 : f32 to vector<8x1664xf32>
    %132 = arith.maximumf %130, %131 : vector<8x1664xf32>
    %133 = vector.extract_strided_slice %132 {offsets = [0, 0], sizes = [8, 1536], strides = [1, 1]} : vector<8x1664xf32> to vector<8x1536xf32>
    %134 = vector.extract_strided_slice %132 {offsets = [0, 1], sizes = [8, 1536], strides = [1, 1]} : vector<8x1664xf32> to vector<8x1536xf32>
    %135 = arith.maximumf %133, %134 : vector<8x1536xf32>
    %136 = vector.extract_strided_slice %132 {offsets = [0, 32], sizes = [8, 1536], strides = [1, 1]} : vector<8x1664xf32> to vector<8x1536xf32>
    %137 = vector.extract_strided_slice %132 {offsets = [0, 33], sizes = [8, 1536], strides = [1, 1]} : vector<8x1664xf32> to vector<8x1536xf32>
    %138 = arith.maximumf %136, %137 : vector<8x1536xf32>
    %139 = arith.maximumf %135, %138 : vector<8x1536xf32>
    %cst_81 = arith.constant 0.000000e+00 : f32
    %140 = vector.broadcast %cst_81 : f32 to vector<16x1152xf32>
    %c0_82 = arith.constant 0 : index
    %c0_83 = arith.constant 0 : index
    %c0_84 = arith.constant 0 : index
    %141 = vector.load %arg4[%c0_82, %c0_83, %c0_84] : memref<25x16x8xf32, #tpu.memory_space<vmem>>, vector<1x16x8xf32>
    %142 = vector.shape_cast %141 : vector<1x16x8xf32> to vector<16x8xf32>
    %143 = vector.extract_strided_slice %139 {offsets = [0, 0], sizes = [8, 1152], strides = [1, 1]} : vector<8x1536xf32> to vector<8x1152xf32>
    %cst_85 = arith.constant dense<0.000000e+00> : vector<16x1152xf32>
    %144 = tpu.matmul %142, %143, %cst_85 {dimension_numbers = #tpu.dot_dimension_numbers<[1], [0], [0], [1], [0, 0, 1, 1], [], []>} : vector<16x8xf32>, vector<8x1152xf32>, vector<16x1152xf32> -> vector<16x1152xf32>
    %145 = arith.addf %140, %144 : vector<16x1152xf32>
    %c1_86 = arith.constant 1 : index
    %c0_87 = arith.constant 0 : index
    %c0_88 = arith.constant 0 : index
    %146 = vector.load %arg4[%c1_86, %c0_87, %c0_88] : memref<25x16x8xf32, #tpu.memory_space<vmem>>, vector<1x16x8xf32>
    %147 = vector.shape_cast %146 : vector<1x16x8xf32> to vector<16x8xf32>
    %148 = vector.extract_strided_slice %139 {offsets = [0, 2], sizes = [8, 1152], strides = [1, 1]} : vector<8x1536xf32> to vector<8x1152xf32>
    %cst_89 = arith.constant dense<0.000000e+00> : vector<16x1152xf32>
    %149 = tpu.matmul %147, %148, %cst_89 {dimension_numbers = #tpu.dot_dimension_numbers<[1], [0], [0], [1], [0, 0, 1, 1], [], []>} : vector<16x8xf32>, vector<8x1152xf32>, vector<16x1152xf32> -> vector<16x1152xf32>
    %150 = arith.addf %145, %149 : vector<16x1152xf32>
    %c2_90 = arith.constant 2 : index
    %c0_91 = arith.constant 0 : index
    %c0_92 = arith.constant 0 : index
    %151 = vector.load %arg4[%c2_90, %c0_91, %c0_92] : memref<25x16x8xf32, #tpu.memory_space<vmem>>, vector<1x16x8xf32>
    %152 = vector.shape_cast %151 : vector<1x16x8xf32> to vector<16x8xf32>
    %153 = vector.extract_strided_slice %139 {offsets = [0, 4], sizes = [8, 1152], strides = [1, 1]} : vector<8x1536xf32> to vector<8x1152xf32>
    %cst_93 = arith.constant dense<0.000000e+00> : vector<16x1152xf32>
    %154 = tpu.matmul %152, %153, %cst_93 {dimension_numbers = #tpu.dot_dimension_numbers<[1], [0], [0], [1], [0, 0, 1, 1], [], []>} : vector<16x8xf32>, vector<8x1152xf32>, vector<16x1152xf32> -> vector<16x1152xf32>
    %155 = arith.addf %150, %154 : vector<16x1152xf32>
    %c3_94 = arith.constant 3 : index
    %c0_95 = arith.constant 0 : index
    %c0_96 = arith.constant 0 : index
    %156 = vector.load %arg4[%c3_94, %c0_95, %c0_96] : memref<25x16x8xf32, #tpu.memory_space<vmem>>, vector<1x16x8xf32>
    %157 = vector.shape_cast %156 : vector<1x16x8xf32> to vector<16x8xf32>
    %158 = vector.extract_strided_slice %139 {offsets = [0, 6], sizes = [8, 1152], strides = [1, 1]} : vector<8x1536xf32> to vector<8x1152xf32>
    %cst_97 = arith.constant dense<0.000000e+00> : vector<16x1152xf32>
    %159 = tpu.matmul %157, %158, %cst_97 {dimension_numbers = #tpu.dot_dimension_numbers<[1], [0], [0], [1], [0, 0, 1, 1], [], []>} : vector<16x8xf32>, vector<8x1152xf32>, vector<16x1152xf32> -> vector<16x1152xf32>
    %160 = arith.addf %155, %159 : vector<16x1152xf32>
    %c4_98 = arith.constant 4 : index
    %c0_99 = arith.constant 0 : index
    %c0_100 = arith.constant 0 : index
    %161 = vector.load %arg4[%c4_98, %c0_99, %c0_100] : memref<25x16x8xf32, #tpu.memory_space<vmem>>, vector<1x16x8xf32>
    %162 = vector.shape_cast %161 : vector<1x16x8xf32> to vector<16x8xf32>
    %163 = vector.extract_strided_slice %139 {offsets = [0, 8], sizes = [8, 1152], strides = [1, 1]} : vector<8x1536xf32> to vector<8x1152xf32>
    %cst_101 = arith.constant dense<0.000000e+00> : vector<16x1152xf32>
    %164 = tpu.matmul %162, %163, %cst_101 {dimension_numbers = #tpu.dot_dimension_numbers<[1], [0], [0], [1], [0, 0, 1, 1], [], []>} : vector<16x8xf32>, vector<8x1152xf32>, vector<16x1152xf32> -> vector<16x1152xf32>
    %165 = arith.addf %160, %164 : vector<16x1152xf32>
    %c5_102 = arith.constant 5 : index
    %c0_103 = arith.constant 0 : index
    %c0_104 = arith.constant 0 : index
    %166 = vector.load %arg4[%c5_102, %c0_103, %c0_104] : memref<25x16x8xf32, #tpu.memory_space<vmem>>, vector<1x16x8xf32>
    %167 = vector.shape_cast %166 : vector<1x16x8xf32> to vector<16x8xf32>
    %168 = vector.extract_strided_slice %139 {offsets = [0, 64], sizes = [8, 1152], strides = [1, 1]} : vector<8x1536xf32> to vector<8x1152xf32>
    %cst_105 = arith.constant dense<0.000000e+00> : vector<16x1152xf32>
    %169 = tpu.matmul %167, %168, %cst_105 {dimension_numbers = #tpu.dot_dimension_numbers<[1], [0], [0], [1], [0, 0, 1, 1], [], []>} : vector<16x8xf32>, vector<8x1152xf32>, vector<16x1152xf32> -> vector<16x1152xf32>
    %170 = arith.addf %165, %169 : vector<16x1152xf32>
    %c6_106 = arith.constant 6 : index
    %c0_107 = arith.constant 0 : index
    %c0_108 = arith.constant 0 : index
    %171 = vector.load %arg4[%c6_106, %c0_107, %c0_108] : memref<25x16x8xf32, #tpu.memory_space<vmem>>, vector<1x16x8xf32>
    %172 = vector.shape_cast %171 : vector<1x16x8xf32> to vector<16x8xf32>
    %173 = vector.extract_strided_slice %139 {offsets = [0, 66], sizes = [8, 1152], strides = [1, 1]} : vector<8x1536xf32> to vector<8x1152xf32>
    %cst_109 = arith.constant dense<0.000000e+00> : vector<16x1152xf32>
    %174 = tpu.matmul %172, %173, %cst_109 {dimension_numbers = #tpu.dot_dimension_numbers<[1], [0], [0], [1], [0, 0, 1, 1], [], []>} : vector<16x8xf32>, vector<8x1152xf32>, vector<16x1152xf32> -> vector<16x1152xf32>
    %175 = arith.addf %170, %174 : vector<16x1152xf32>
    %c7_110 = arith.constant 7 : index
    %c0_111 = arith.constant 0 : index
    %c0_112 = arith.constant 0 : index
    %176 = vector.load %arg4[%c7_110, %c0_111, %c0_112] : memref<25x16x8xf32, #tpu.memory_space<vmem>>, vector<1x16x8xf32>
    %177 = vector.shape_cast %176 : vector<1x16x8xf32> to vector<16x8xf32>
    %178 = vector.extract_strided_slice %139 {offsets = [0, 68], sizes = [8, 1152], strides = [1, 1]} : vector<8x1536xf32> to vector<8x1152xf32>
    %cst_113 = arith.constant dense<0.000000e+00> : vector<16x1152xf32>
    %179 = tpu.matmul %177, %178, %cst_113 {dimension_numbers = #tpu.dot_dimension_numbers<[1], [0], [0], [1], [0, 0, 1, 1], [], []>} : vector<16x8xf32>, vector<8x1152xf32>, vector<16x1152xf32> -> vector<16x1152xf32>
    %180 = arith.addf %175, %179 : vector<16x1152xf32>
    %c8_114 = arith.constant 8 : index
    %c0_115 = arith.constant 0 : index
    %c0_116 = arith.constant 0 : index
    %181 = vector.load %arg4[%c8_114, %c0_115, %c0_116] : memref<25x16x8xf32, #tpu.memory_space<vmem>>, vector<1x16x8xf32>
    %182 = vector.shape_cast %181 : vector<1x16x8xf32> to vector<16x8xf32>
    %183 = vector.extract_strided_slice %139 {offsets = [0, 70], sizes = [8, 1152], strides = [1, 1]} : vector<8x1536xf32> to vector<8x1152xf32>
    %cst_117 = arith.constant dense<0.000000e+00> : vector<16x1152xf32>
    %184 = tpu.matmul %182, %183, %cst_117 {dimension_numbers = #tpu.dot_dimension_numbers<[1], [0], [0], [1], [0, 0, 1, 1], [], []>} : vector<16x8xf32>, vector<8x1152xf32>, vector<16x1152xf32> -> vector<16x1152xf32>
    %185 = arith.addf %180, %184 : vector<16x1152xf32>
    %c9_118 = arith.constant 9 : index
    %c0_119 = arith.constant 0 : index
    %c0_120 = arith.constant 0 : index
    %186 = vector.load %arg4[%c9_118, %c0_119, %c0_120] : memref<25x16x8xf32, #tpu.memory_space<vmem>>, vector<1x16x8xf32>
    %187 = vector.shape_cast %186 : vector<1x16x8xf32> to vector<16x8xf32>
    %188 = vector.extract_strided_slice %139 {offsets = [0, 72], sizes = [8, 1152], strides = [1, 1]} : vector<8x1536xf32> to vector<8x1152xf32>
    %cst_121 = arith.constant dense<0.000000e+00> : vector<16x1152xf32>
    %189 = tpu.matmul %187, %188, %cst_121 {dimension_numbers = #tpu.dot_dimension_numbers<[1], [0], [0], [1], [0, 0, 1, 1], [], []>} : vector<16x8xf32>, vector<8x1152xf32>, vector<16x1152xf32> -> vector<16x1152xf32>
    %190 = arith.addf %185, %189 : vector<16x1152xf32>
    %c10_122 = arith.constant 10 : index
    %c0_123 = arith.constant 0 : index
    %c0_124 = arith.constant 0 : index
    %191 = vector.load %arg4[%c10_122, %c0_123, %c0_124] : memref<25x16x8xf32, #tpu.memory_space<vmem>>, vector<1x16x8xf32>
    %192 = vector.shape_cast %191 : vector<1x16x8xf32> to vector<16x8xf32>
    %193 = vector.extract_strided_slice %139 {offsets = [0, 128], sizes = [8, 1152], strides = [1, 1]} : vector<8x1536xf32> to vector<8x1152xf32>
    %cst_125 = arith.constant dense<0.000000e+00> : vector<16x1152xf32>
    %194 = tpu.matmul %192, %193, %cst_125 {dimension_numbers = #tpu.dot_dimension_numbers<[1], [0], [0], [1], [0, 0, 1, 1], [], []>} : vector<16x8xf32>, vector<8x1152xf32>, vector<16x1152xf32> -> vector<16x1152xf32>
    %195 = arith.addf %190, %194 : vector<16x1152xf32>
    %c11_126 = arith.constant 11 : index
    %c0_127 = arith.constant 0 : index
    %c0_128 = arith.constant 0 : index
    %196 = vector.load %arg4[%c11_126, %c0_127, %c0_128] : memref<25x16x8xf32, #tpu.memory_space<vmem>>, vector<1x16x8xf32>
    %197 = vector.shape_cast %196 : vector<1x16x8xf32> to vector<16x8xf32>
    %198 = vector.extract_strided_slice %139 {offsets = [0, 130], sizes = [8, 1152], strides = [1, 1]} : vector<8x1536xf32> to vector<8x1152xf32>
    %cst_129 = arith.constant dense<0.000000e+00> : vector<16x1152xf32>
    %199 = tpu.matmul %197, %198, %cst_129 {dimension_numbers = #tpu.dot_dimension_numbers<[1], [0], [0], [1], [0, 0, 1, 1], [], []>} : vector<16x8xf32>, vector<8x1152xf32>, vector<16x1152xf32> -> vector<16x1152xf32>
    %200 = arith.addf %195, %199 : vector<16x1152xf32>
    %c12_130 = arith.constant 12 : index
    %c0_131 = arith.constant 0 : index
    %c0_132 = arith.constant 0 : index
    %201 = vector.load %arg4[%c12_130, %c0_131, %c0_132] : memref<25x16x8xf32, #tpu.memory_space<vmem>>, vector<1x16x8xf32>
    %202 = vector.shape_cast %201 : vector<1x16x8xf32> to vector<16x8xf32>
    %203 = vector.extract_strided_slice %139 {offsets = [0, 132], sizes = [8, 1152], strides = [1, 1]} : vector<8x1536xf32> to vector<8x1152xf32>
    %cst_133 = arith.constant dense<0.000000e+00> : vector<16x1152xf32>
    %204 = tpu.matmul %202, %203, %cst_133 {dimension_numbers = #tpu.dot_dimension_numbers<[1], [0], [0], [1], [0, 0, 1, 1], [], []>} : vector<16x8xf32>, vector<8x1152xf32>, vector<16x1152xf32> -> vector<16x1152xf32>
    %205 = arith.addf %200, %204 : vector<16x1152xf32>
    %c13_134 = arith.constant 13 : index
    %c0_135 = arith.constant 0 : index
    %c0_136 = arith.constant 0 : index
    %206 = vector.load %arg4[%c13_134, %c0_135, %c0_136] : memref<25x16x8xf32, #tpu.memory_space<vmem>>, vector<1x16x8xf32>
    %207 = vector.shape_cast %206 : vector<1x16x8xf32> to vector<16x8xf32>
    %208 = vector.extract_strided_slice %139 {offsets = [0, 134], sizes = [8, 1152], strides = [1, 1]} : vector<8x1536xf32> to vector<8x1152xf32>
    %cst_137 = arith.constant dense<0.000000e+00> : vector<16x1152xf32>
    %209 = tpu.matmul %207, %208, %cst_137 {dimension_numbers = #tpu.dot_dimension_numbers<[1], [0], [0], [1], [0, 0, 1, 1], [], []>} : vector<16x8xf32>, vector<8x1152xf32>, vector<16x1152xf32> -> vector<16x1152xf32>
    %210 = arith.addf %205, %209 : vector<16x1152xf32>
    %c14_138 = arith.constant 14 : index
    %c0_139 = arith.constant 0 : index
    %c0_140 = arith.constant 0 : index
    %211 = vector.load %arg4[%c14_138, %c0_139, %c0_140] : memref<25x16x8xf32, #tpu.memory_space<vmem>>, vector<1x16x8xf32>
    %212 = vector.shape_cast %211 : vector<1x16x8xf32> to vector<16x8xf32>
    %213 = vector.extract_strided_slice %139 {offsets = [0, 136], sizes = [8, 1152], strides = [1, 1]} : vector<8x1536xf32> to vector<8x1152xf32>
    %cst_141 = arith.constant dense<0.000000e+00> : vector<16x1152xf32>
    %214 = tpu.matmul %212, %213, %cst_141 {dimension_numbers = #tpu.dot_dimension_numbers<[1], [0], [0], [1], [0, 0, 1, 1], [], []>} : vector<16x8xf32>, vector<8x1152xf32>, vector<16x1152xf32> -> vector<16x1152xf32>
    %215 = arith.addf %210, %214 : vector<16x1152xf32>
    %c15_142 = arith.constant 15 : index
    %c0_143 = arith.constant 0 : index
    %c0_144 = arith.constant 0 : index
    %216 = vector.load %arg4[%c15_142, %c0_143, %c0_144] : memref<25x16x8xf32, #tpu.memory_space<vmem>>, vector<1x16x8xf32>
    %217 = vector.shape_cast %216 : vector<1x16x8xf32> to vector<16x8xf32>
    %218 = vector.extract_strided_slice %139 {offsets = [0, 192], sizes = [8, 1152], strides = [1, 1]} : vector<8x1536xf32> to vector<8x1152xf32>
    %cst_145 = arith.constant dense<0.000000e+00> : vector<16x1152xf32>
    %219 = tpu.matmul %217, %218, %cst_145 {dimension_numbers = #tpu.dot_dimension_numbers<[1], [0], [0], [1], [0, 0, 1, 1], [], []>} : vector<16x8xf32>, vector<8x1152xf32>, vector<16x1152xf32> -> vector<16x1152xf32>
    %220 = arith.addf %215, %219 : vector<16x1152xf32>
    %c16_146 = arith.constant 16 : index
    %c0_147 = arith.constant 0 : index
    %c0_148 = arith.constant 0 : index
    %221 = vector.load %arg4[%c16_146, %c0_147, %c0_148] : memref<25x16x8xf32, #tpu.memory_space<vmem>>, vector<1x16x8xf32>
    %222 = vector.shape_cast %221 : vector<1x16x8xf32> to vector<16x8xf32>
    %223 = vector.extract_strided_slice %139 {offsets = [0, 194], sizes = [8, 1152], strides = [1, 1]} : vector<8x1536xf32> to vector<8x1152xf32>
    %cst_149 = arith.constant dense<0.000000e+00> : vector<16x1152xf32>
    %224 = tpu.matmul %222, %223, %cst_149 {dimension_numbers = #tpu.dot_dimension_numbers<[1], [0], [0], [1], [0, 0, 1, 1], [], []>} : vector<16x8xf32>, vector<8x1152xf32>, vector<16x1152xf32> -> vector<16x1152xf32>
    %225 = arith.addf %220, %224 : vector<16x1152xf32>
    %c17_150 = arith.constant 17 : index
    %c0_151 = arith.constant 0 : index
    %c0_152 = arith.constant 0 : index
    %226 = vector.load %arg4[%c17_150, %c0_151, %c0_152] : memref<25x16x8xf32, #tpu.memory_space<vmem>>, vector<1x16x8xf32>
    %227 = vector.shape_cast %226 : vector<1x16x8xf32> to vector<16x8xf32>
    %228 = vector.extract_strided_slice %139 {offsets = [0, 196], sizes = [8, 1152], strides = [1, 1]} : vector<8x1536xf32> to vector<8x1152xf32>
    %cst_153 = arith.constant dense<0.000000e+00> : vector<16x1152xf32>
    %229 = tpu.matmul %227, %228, %cst_153 {dimension_numbers = #tpu.dot_dimension_numbers<[1], [0], [0], [1], [0, 0, 1, 1], [], []>} : vector<16x8xf32>, vector<8x1152xf32>, vector<16x1152xf32> -> vector<16x1152xf32>
    %230 = arith.addf %225, %229 : vector<16x1152xf32>
    %c18_154 = arith.constant 18 : index
    %c0_155 = arith.constant 0 : index
    %c0_156 = arith.constant 0 : index
    %231 = vector.load %arg4[%c18_154, %c0_155, %c0_156] : memref<25x16x8xf32, #tpu.memory_space<vmem>>, vector<1x16x8xf32>
    %232 = vector.shape_cast %231 : vector<1x16x8xf32> to vector<16x8xf32>
    %233 = vector.extract_strided_slice %139 {offsets = [0, 198], sizes = [8, 1152], strides = [1, 1]} : vector<8x1536xf32> to vector<8x1152xf32>
    %cst_157 = arith.constant dense<0.000000e+00> : vector<16x1152xf32>
    %234 = tpu.matmul %232, %233, %cst_157 {dimension_numbers = #tpu.dot_dimension_numbers<[1], [0], [0], [1], [0, 0, 1, 1], [], []>} : vector<16x8xf32>, vector<8x1152xf32>, vector<16x1152xf32> -> vector<16x1152xf32>
    %235 = arith.addf %230, %234 : vector<16x1152xf32>
    %c19_158 = arith.constant 19 : index
    %c0_159 = arith.constant 0 : index
    %c0_160 = arith.constant 0 : index
    %236 = vector.load %arg4[%c19_158, %c0_159, %c0_160] : memref<25x16x8xf32, #tpu.memory_space<vmem>>, vector<1x16x8xf32>
    %237 = vector.shape_cast %236 : vector<1x16x8xf32> to vector<16x8xf32>
    %238 = vector.extract_strided_slice %139 {offsets = [0, 200], sizes = [8, 1152], strides = [1, 1]} : vector<8x1536xf32> to vector<8x1152xf32>
    %cst_161 = arith.constant dense<0.000000e+00> : vector<16x1152xf32>
    %239 = tpu.matmul %237, %238, %cst_161 {dimension_numbers = #tpu.dot_dimension_numbers<[1], [0], [0], [1], [0, 0, 1, 1], [], []>} : vector<16x8xf32>, vector<8x1152xf32>, vector<16x1152xf32> -> vector<16x1152xf32>
    %240 = arith.addf %235, %239 : vector<16x1152xf32>
    %c20_162 = arith.constant 20 : index
    %c0_163 = arith.constant 0 : index
    %c0_164 = arith.constant 0 : index
    %241 = vector.load %arg4[%c20_162, %c0_163, %c0_164] : memref<25x16x8xf32, #tpu.memory_space<vmem>>, vector<1x16x8xf32>
    %242 = vector.shape_cast %241 : vector<1x16x8xf32> to vector<16x8xf32>
    %243 = vector.extract_strided_slice %139 {offsets = [0, 256], sizes = [8, 1152], strides = [1, 1]} : vector<8x1536xf32> to vector<8x1152xf32>
    %cst_165 = arith.constant dense<0.000000e+00> : vector<16x1152xf32>
    %244 = tpu.matmul %242, %243, %cst_165 {dimension_numbers = #tpu.dot_dimension_numbers<[1], [0], [0], [1], [0, 0, 1, 1], [], []>} : vector<16x8xf32>, vector<8x1152xf32>, vector<16x1152xf32> -> vector<16x1152xf32>
    %245 = arith.addf %240, %244 : vector<16x1152xf32>
    %c21_166 = arith.constant 21 : index
    %c0_167 = arith.constant 0 : index
    %c0_168 = arith.constant 0 : index
    %246 = vector.load %arg4[%c21_166, %c0_167, %c0_168] : memref<25x16x8xf32, #tpu.memory_space<vmem>>, vector<1x16x8xf32>
    %247 = vector.shape_cast %246 : vector<1x16x8xf32> to vector<16x8xf32>
    %248 = vector.extract_strided_slice %139 {offsets = [0, 258], sizes = [8, 1152], strides = [1, 1]} : vector<8x1536xf32> to vector<8x1152xf32>
    %cst_169 = arith.constant dense<0.000000e+00> : vector<16x1152xf32>
    %249 = tpu.matmul %247, %248, %cst_169 {dimension_numbers = #tpu.dot_dimension_numbers<[1], [0], [0], [1], [0, 0, 1, 1], [], []>} : vector<16x8xf32>, vector<8x1152xf32>, vector<16x1152xf32> -> vector<16x1152xf32>
    %250 = arith.addf %245, %249 : vector<16x1152xf32>
    %c22_170 = arith.constant 22 : index
    %c0_171 = arith.constant 0 : index
    %c0_172 = arith.constant 0 : index
    %251 = vector.load %arg4[%c22_170, %c0_171, %c0_172] : memref<25x16x8xf32, #tpu.memory_space<vmem>>, vector<1x16x8xf32>
    %252 = vector.shape_cast %251 : vector<1x16x8xf32> to vector<16x8xf32>
    %253 = vector.extract_strided_slice %139 {offsets = [0, 260], sizes = [8, 1152], strides = [1, 1]} : vector<8x1536xf32> to vector<8x1152xf32>
    %cst_173 = arith.constant dense<0.000000e+00> : vector<16x1152xf32>
    %254 = tpu.matmul %252, %253, %cst_173 {dimension_numbers = #tpu.dot_dimension_numbers<[1], [0], [0], [1], [0, 0, 1, 1], [], []>} : vector<16x8xf32>, vector<8x1152xf32>, vector<16x1152xf32> -> vector<16x1152xf32>
    %255 = arith.addf %250, %254 : vector<16x1152xf32>
    %c23_174 = arith.constant 23 : index
    %c0_175 = arith.constant 0 : index
    %c0_176 = arith.constant 0 : index
    %256 = vector.load %arg4[%c23_174, %c0_175, %c0_176] : memref<25x16x8xf32, #tpu.memory_space<vmem>>, vector<1x16x8xf32>
    %257 = vector.shape_cast %256 : vector<1x16x8xf32> to vector<16x8xf32>
    %258 = vector.extract_strided_slice %139 {offsets = [0, 262], sizes = [8, 1152], strides = [1, 1]} : vector<8x1536xf32> to vector<8x1152xf32>
    %cst_177 = arith.constant dense<0.000000e+00> : vector<16x1152xf32>
    %259 = tpu.matmul %257, %258, %cst_177 {dimension_numbers = #tpu.dot_dimension_numbers<[1], [0], [0], [1], [0, 0, 1, 1], [], []>} : vector<16x8xf32>, vector<8x1152xf32>, vector<16x1152xf32> -> vector<16x1152xf32>
    %260 = arith.addf %255, %259 : vector<16x1152xf32>
    %c24_178 = arith.constant 24 : index
    %c0_179 = arith.constant 0 : index
    %c0_180 = arith.constant 0 : index
    %261 = vector.load %arg4[%c24_178, %c0_179, %c0_180] : memref<25x16x8xf32, #tpu.memory_space<vmem>>, vector<1x16x8xf32>
    %262 = vector.shape_cast %261 : vector<1x16x8xf32> to vector<16x8xf32>
    %263 = vector.extract_strided_slice %139 {offsets = [0, 264], sizes = [8, 1152], strides = [1, 1]} : vector<8x1536xf32> to vector<8x1152xf32>
    %cst_181 = arith.constant dense<0.000000e+00> : vector<16x1152xf32>
    %264 = tpu.matmul %262, %263, %cst_181 {dimension_numbers = #tpu.dot_dimension_numbers<[1], [0], [0], [1], [0, 0, 1, 1], [], []>} : vector<16x8xf32>, vector<8x1152xf32>, vector<16x1152xf32> -> vector<16x1152xf32>
    %265 = arith.addf %260, %264 : vector<16x1152xf32>
    %c0_182 = arith.constant 0 : index
    %c0_183 = arith.constant 0 : index
    %266 = vector.load %arg5[%c0_182, %c0_183] : memref<16x1xf32, #tpu.memory_space<vmem>>, vector<16x1xf32>
    %267 = vector.broadcast %266 : vector<16x1xf32> to vector<16x1152xf32>
    %268 = arith.addf %265, %267 : vector<16x1152xf32>
    %cst_184 = arith.constant 0.000000e+00 : f32
    %269 = vector.broadcast %cst_184 : f32 to vector<16x1152xf32>
    %270 = arith.maximumf %268, %269 : vector<16x1152xf32>
    %271 = vector.extract_strided_slice %270 {offsets = [0, 0], sizes = [16, 1024], strides = [1, 1]} : vector<16x1152xf32> to vector<16x1024xf32>
    %272 = vector.extract_strided_slice %270 {offsets = [0, 2], sizes = [16, 1024], strides = [1, 1]} : vector<16x1152xf32> to vector<16x1024xf32>
    %273 = arith.maximumf %271, %272 : vector<16x1024xf32>
    %274 = vector.extract_strided_slice %270 {offsets = [0, 64], sizes = [16, 1024], strides = [1, 1]} : vector<16x1152xf32> to vector<16x1024xf32>
    %275 = vector.extract_strided_slice %270 {offsets = [0, 66], sizes = [16, 1024], strides = [1, 1]} : vector<16x1152xf32> to vector<16x1024xf32>
    %276 = arith.maximumf %274, %275 : vector<16x1024xf32>
    %277 = arith.maximumf %273, %276 : vector<16x1024xf32>
    %c0_185 = arith.constant 0 : index
    %c0_186 = arith.constant 0 : index
    %c0_187 = arith.constant 0 : index
    %278 = vector.load %arg6[%c0_185, %c0_186, %c0_187] : memref<1x16x1024xf32, #tpu.memory_space<vmem>>, vector<1x16x1024xf32>
    %279 = vector.shape_cast %278 : vector<1x16x1024xf32> to vector<16x1024xf32>
    %280 = vector.shape_cast %277 : vector<16x1024xf32> to vector<1x16x1024xf32>
    tpu.vector_store %arg6[%c0_185, %c0_186, %c0_187], %280 {strides = array<i32>} : memref<1x16x1024xf32, #tpu.memory_space<vmem>>, vector<1x16x1024xf32>,
    return
  }
  func.func @transform_0(%arg0: i32) -> (i32, i32, i32) {
    %c0_i32 = arith.constant 0 : i32
    %c0_i32_0 = arith.constant 0 : i32
    %c0_i32_1 = arith.constant 0 : i32
    return %arg0, %c0_i32, %c0_i32_0 : i32, i32, i32
  }
  func.func @transform_1(%arg0: i32) -> (i32, i32, i32) {
    %c0_i32 = arith.constant 0 : i32
    %c0_i32_0 = arith.constant 0 : i32
    %c0_i32_1 = arith.constant 0 : i32
    %c0_i32_2 = arith.constant 0 : i32
    return %c0_i32, %c0_i32_0, %c0_i32_1 : i32, i32, i32
  }
  func.func @transform_2(%arg0: i32) -> (i32, i32) {
    %c0_i32 = arith.constant 0 : i32
    %c0_i32_0 = arith.constant 0 : i32
    %c0_i32_1 = arith.constant 0 : i32
    return %c0_i32, %c0_i32_0 : i32, i32
  }
  func.func @transform_3(%arg0: i32) -> (i32, i32, i32) {
    %c0_i32 = arith.constant 0 : i32
    %c0_i32_0 = arith.constant 0 : i32
    %c0_i32_1 = arith.constant 0 : i32
    %c0_i32_2 = arith.constant 0 : i32
    return %c0_i32, %c0_i32_0, %c0_i32_1 : i32, i32, i32
  }
  func.func @transform_4(%arg0: i32) -> (i32, i32) {
    %c0_i32 = arith.constant 0 : i32
    %c0_i32_0 = arith.constant 0 : i32
    %c0_i32_1 = arith.constant 0 : i32
    return %c0_i32, %c0_i32_0 : i32, i32
  }
  func.func @transform_5(%arg0: i32) -> (i32, i32, i32) {
    %c0_i32 = arith.constant 0 : i32
    %c0_i32_0 = arith.constant 0 : i32
    %c0_i32_1 = arith.constant 0 : i32
    return %arg0, %c0_i32, %c0_i32_0 : i32, i32, i32
  }
}

module attributes {stable_mosaic.version = 11 : i64} {
  func.func @_classifier_kernel(%arg0: i32, %arg1: memref<8x512xf32, #tpu.memory_space<vmem>>, %arg2: memref<512x128xf32, #tpu.memory_space<vmem>>, %arg3: memref<1x128xf32, #tpu.memory_space<vmem>>, %arg4: memref<128x128xf32, #tpu.memory_space<vmem>>, %arg5: memref<1x128xf32, #tpu.memory_space<vmem>>, %arg6: memref<128x128xf32, #tpu.memory_space<vmem>>, %arg7: memref<1x128xf32, #tpu.memory_space<vmem>>, %arg8: memref<8x128xf32, #tpu.memory_space<vmem>>) attributes {dimension_semantics = [#tpu.dimension_semantics<parallel>], iteration_bounds = array<i64: 1>, scalar_prefetch = 0 : i64, scratch_operands = 0 : i64, tpu.core_type = #tpu.core_type<tc>, window_params = [{transform_indices = @transform_0, window_bounds = array<i64: 8, 512>}, {pipeline_mode = #tpu.pipeline_mode<synchronous>, transform_indices = @transform_1, window_bounds = array<i64: 512, 128>}, {pipeline_mode = #tpu.pipeline_mode<synchronous>, transform_indices = @transform_2, window_bounds = array<i64: 1, 128>}, {pipeline_mode = #tpu.pipeline_mode<synchronous>, transform_indices = @transform_3, window_bounds = array<i64: 128, 128>}, {pipeline_mode = #tpu.pipeline_mode<synchronous>, transform_indices = @transform_4, window_bounds = array<i64: 1, 128>}, {pipeline_mode = #tpu.pipeline_mode<synchronous>, transform_indices = @transform_5, window_bounds = array<i64: 128, 128>}, {pipeline_mode = #tpu.pipeline_mode<synchronous>, transform_indices = @transform_6, window_bounds = array<i64: 1, 128>}, {transform_indices = @transform_7, window_bounds = array<i64: 8, 128>}]} {
    %c0 = arith.constant 0 : index
    %c0_0 = arith.constant 0 : index
    %0 = vector.load %arg1[%c0, %c0_0] : memref<8x512xf32, #tpu.memory_space<vmem>>, vector<8x512xf32>
    %c0_1 = arith.constant 0 : index
    %c0_2 = arith.constant 0 : index
    %1 = vector.load %arg2[%c0_1, %c0_2] : memref<512x128xf32, #tpu.memory_space<vmem>>, vector<512x128xf32>
    %cst = arith.constant dense<0.000000e+00> : vector<8x128xf32>
    %2 = tpu.matmul %0, %1, %cst {dimension_numbers = #tpu.dot_dimension_numbers<[1], [0], [0], [1], [0, 0, 1, 1], [], []>} : vector<8x512xf32>, vector<512x128xf32>, vector<8x128xf32> -> vector<8x128xf32>
    %c0_3 = arith.constant 0 : index
    %c0_4 = arith.constant 0 : index
    %3 = vector.load %arg3[%c0_3, %c0_4] : memref<1x128xf32, #tpu.memory_space<vmem>>, vector<1x128xf32>
    %4 = vector.broadcast %3 : vector<1x128xf32> to vector<8x128xf32>
    %5 = arith.addf %2, %4 : vector<8x128xf32>
    %cst_5 = arith.constant 0.000000e+00 : f32
    %6 = vector.broadcast %cst_5 : f32 to vector<8x128xf32>
    %7 = arith.maximumf %5, %6 : vector<8x128xf32>
    %c0_6 = arith.constant 0 : index
    %c0_7 = arith.constant 0 : index
    %8 = vector.load %arg4[%c0_6, %c0_7] : memref<128x128xf32, #tpu.memory_space<vmem>>, vector<128x128xf32>
    %cst_8 = arith.constant dense<0.000000e+00> : vector<8x128xf32>
    %9 = tpu.matmul %7, %8, %cst_8 {dimension_numbers = #tpu.dot_dimension_numbers<[1], [0], [0], [1], [0, 0, 1, 1], [], []>} : vector<8x128xf32>, vector<128x128xf32>, vector<8x128xf32> -> vector<8x128xf32>
    %c0_9 = arith.constant 0 : index
    %c0_10 = arith.constant 0 : index
    %10 = vector.load %arg5[%c0_9, %c0_10] : memref<1x128xf32, #tpu.memory_space<vmem>>, vector<1x128xf32>
    %11 = vector.broadcast %10 : vector<1x128xf32> to vector<8x128xf32>
    %12 = arith.addf %9, %11 : vector<8x128xf32>
    %cst_11 = arith.constant 0.000000e+00 : f32
    %13 = vector.broadcast %cst_11 : f32 to vector<8x128xf32>
    %14 = arith.maximumf %12, %13 : vector<8x128xf32>
    %c0_12 = arith.constant 0 : index
    %c0_13 = arith.constant 0 : index
    %15 = vector.load %arg6[%c0_12, %c0_13] : memref<128x128xf32, #tpu.memory_space<vmem>>, vector<128x128xf32>
    %cst_14 = arith.constant dense<0.000000e+00> : vector<8x128xf32>
    %16 = tpu.matmul %14, %15, %cst_14 {dimension_numbers = #tpu.dot_dimension_numbers<[1], [0], [0], [1], [0, 0, 1, 1], [], []>} : vector<8x128xf32>, vector<128x128xf32>, vector<8x128xf32> -> vector<8x128xf32>
    %c0_15 = arith.constant 0 : index
    %c0_16 = arith.constant 0 : index
    %17 = vector.load %arg7[%c0_15, %c0_16] : memref<1x128xf32, #tpu.memory_space<vmem>>, vector<1x128xf32>
    %18 = vector.broadcast %17 : vector<1x128xf32> to vector<8x128xf32>
    %19 = arith.addf %16, %18 : vector<8x128xf32>
    %c0_17 = arith.constant 0 : index
    %c0_18 = arith.constant 0 : index
    %20 = vector.load %arg8[%c0_17, %c0_18] : memref<8x128xf32, #tpu.memory_space<vmem>>, vector<8x128xf32>
    tpu.vector_store %arg8[%c0_17, %c0_18], %19 {strides = array<i32>} : memref<8x128xf32, #tpu.memory_space<vmem>>, vector<8x128xf32>,
    return
  }
  func.func @transform_0(%arg0: i32) -> (i32, i32) {
    %c0_i32 = arith.constant 0 : i32
    %c0_i32_0 = arith.constant 0 : i32
    return %arg0, %c0_i32 : i32, i32
  }
  func.func @transform_1(%arg0: i32) -> (i32, i32) {
    %c0_i32 = arith.constant 0 : i32
    %c0_i32_0 = arith.constant 0 : i32
    %c0_i32_1 = arith.constant 0 : i32
    return %c0_i32, %c0_i32_0 : i32, i32
  }
  func.func @transform_2(%arg0: i32) -> (i32, i32) {
    %c0_i32 = arith.constant 0 : i32
    %c0_i32_0 = arith.constant 0 : i32
    %c0_i32_1 = arith.constant 0 : i32
    return %c0_i32, %c0_i32_0 : i32, i32
  }
  func.func @transform_3(%arg0: i32) -> (i32, i32) {
    %c0_i32 = arith.constant 0 : i32
    %c0_i32_0 = arith.constant 0 : i32
    %c0_i32_1 = arith.constant 0 : i32
    return %c0_i32, %c0_i32_0 : i32, i32
  }
  func.func @transform_4(%arg0: i32) -> (i32, i32) {
    %c0_i32 = arith.constant 0 : i32
    %c0_i32_0 = arith.constant 0 : i32
    %c0_i32_1 = arith.constant 0 : i32
    return %c0_i32, %c0_i32_0 : i32, i32
  }
  func.func @transform_5(%arg0: i32) -> (i32, i32) {
    %c0_i32 = arith.constant 0 : i32
    %c0_i32_0 = arith.constant 0 : i32
    %c0_i32_1 = arith.constant 0 : i32
    return %c0_i32, %c0_i32_0 : i32, i32
  }
  func.func @transform_6(%arg0: i32) -> (i32, i32) {
    %c0_i32 = arith.constant 0 : i32
    %c0_i32_0 = arith.constant 0 : i32
    %c0_i32_1 = arith.constant 0 : i32
    return %c0_i32, %c0_i32_0 : i32, i32
  }
  func.func @transform_7(%arg0: i32) -> (i32, i32) {
    %c0_i32 = arith.constant 0 : i32
    %c0_i32_0 = arith.constant 0 : i32
    return %arg0, %c0_i32 : i32, i32
  }
}

</mosaic_0001>

<bundles_post_ra>
// kernel: lenet_forward.3
= control target key start
LH: loop header
LB: loop body
LE: loop exit
PB: predicated region body
PF: predicated region fallthrough
CT: control target
= control target key end

     0   :  { %vm614_vm0 = vmmov 0   ;;  %s1001_s1 = inlined_call_operand.vmem [shape: f32[512,128], index: 1, kind: input, shape index: {}]   ;;  %s1002_s0 = inlined_call_operand.vmem [shape: f32[8,512], index: 0, kind: input, shape index: {}]   ;;  %s1003_s3 = inlined_call_operand.vmem [shape: f32[128,128], index: 3, kind: input, shape index: {}]   ;;  %s1004_s5 = inlined_call_operand.vmem [shape: f32[128,128], index: 5, kind: input, shape index: {}]   ;;  %s1005_s2 = inlined_call_operand.vmem [shape: f32[1,128], index: 2, kind: input, shape index: {}]   ;;  %s1006_s4 = inlined_call_operand.vmem [shape: f32[1,128], index: 4, kind: input, shape index: {}]   ;;  %s1007_s6 = inlined_call_operand.vmem [shape: f32[1,128], index: 6, kind: input, shape index: {}]   ;;  %s1008_s7 = inlined_call_operand.vmem [shape: f32[8,128], index: 7, kind: output, shape index: {}]  }
   0x1   :  { %v61_v0 = vld [vmem:[%s1001_s1 + $0xf8] sm:$0xff]  ;;  %v60_v4 = vld [vmem:[%s1001_s1 + $0xf0] sm:$0xff]  ;;  %v59_v8 = vld [vmem:[%s1001_s1 + $0xe8] sm:$0xff] }
   0x2   :  { %v93_v1 = vld [vmem:[%s1001_s1 + $0x1f8] sm:$0xff]  ;;  %437 = vmatprep.subr.mxu0 %v61_v0  ;;  %v92_v5 = vld [vmem:[%s1001_s1 + $0x1f0] sm:$0xff]  ;;  %v91_v9 = vld [vmem:[%s1001_s1 + $0x1e8] sm:$0xff] }
   0x3   :  { %v45_v2 = vld [vmem:[%s1001_s1 + $0x78] sm:$0xff]  ;;  %472 = vmatprep.subr.mxu1 %v93_v1  ;;  %v44_v6 = vld [vmem:[%s1001_s1 + $0x70] sm:$0xff]  ;;  %v43_v10 = vld [vmem:[%s1001_s1 + $0x68] sm:$0xff] }
   0x4   :  { %v77_v3 = vld [vmem:[%s1001_s1 + $0x178] sm:$0xff]  ;;  %438 = vmatpush3.msra.mxu0 %v45_v2  ;;  %v76_v7 = vld [vmem:[%s1001_s1 + $0x170] sm:$0xff]  ;;  %v75_v11 = vld [vmem:[%s1001_s1 + $0x168] sm:$0xff] }
   0x5   :  { %473 = vmatpush3.msra.mxu1 %v77_v3  ;;  %439 = vmatprep.subr.mxu0 %v60_v4  ;;  %v58_v12 = vld [vmem:[%s1001_s1 + $0xe0] sm:$0xff]  ;;  %v57_v16 = vld [vmem:[%s1001_s1 + $0xd8] sm:$0xff]  ;;  %v56_v20 = vld [vmem:[%s1001_s1 + $0xd0] sm:$0xff] }
   0x6   :  { %474 = vmatprep.subr.mxu1 %v92_v5  ;;  %440 = vmatpush3.msra.mxu0 %v44_v6  ;;  %v90_v13 = vld [vmem:[%s1001_s1 + $0x1e0] sm:$0xff]  ;;  %v89_v17 = vld [vmem:[%s1001_s1 + $0x1d8] sm:$0xff]  ;;  %v88_v21 = vld [vmem:[%s1001_s1 + $0x1d0] sm:$0xff]  ;;  %v613_v5 = vmov 0.0  }
   0x7   :  { %475 = vmatpush3.msra.mxu1 %v76_v7  ;;  %441 = vmatprep.subr.mxu0 %v59_v8  ;;  %v42_v14 = vld [vmem:[%s1001_s1 + $0x60] sm:$0xff]  ;;  %v41_v18 = vld [vmem:[%s1001_s1 + $0x58] sm:$0xff]  ;;  %v40_v22 = vld [vmem:[%s1001_s1 + $0x50] sm:$0xff] }
   0x8   :  { %476 = vmatprep.subr.mxu1 %v91_v9  ;;  %v74_v15 = vld [vmem:[%s1001_s1 + $0x160] sm:$0xff]  ;;  %442 = vmatpush3.msra.mxu0 %v43_v10  ;;  %v73_v19 = vld [vmem:[%s1001_s1 + $0x158] sm:$0xff]  ;;  %v72_v23 = vld [vmem:[%s1001_s1 + $0x150] sm:$0xff] }
   0x9   :  { %477 = vmatpush3.msra.mxu1 %v75_v11  ;;  %443 = vmatprep.subr.mxu0 %v58_v12  ;;  %v55_v24 = vld [vmem:[%s1001_s1 + $0xc8] sm:$0xff]  ;;  %v54_v28 = vld [vmem:[%s1001_s1 + $0xc0] sm:$0xff]  ;;  %v53_v32 = vld [vmem:[%s1001_s1 + $0xb8] sm:$0xff] }
   0xa   :  { %478 = vmatprep.subr.mxu1 %v90_v13  ;;  %444 = vmatpush3.msra.mxu0 %v42_v14  ;;  %v87_v25 = vld [vmem:[%s1001_s1 + $0x1c8] sm:$0xff]  ;;  %v86_v29 = vld [vmem:[%s1001_s1 + $0x1c0] sm:$0xff]  ;;  %v85_v33 = vld [vmem:[%s1001_s1 + $0x1b8] sm:$0xff] }
   0xb   :  { %479 = vmatpush3.msra.mxu1 %v74_v15  ;;  %445 = vmatprep.subr.mxu0 %v57_v16  ;;  %v39_v26 = vld [vmem:[%s1001_s1 + $0x48] sm:$0xff]  ;;  %v38_v30 = vld [vmem:[%s1001_s1 + $0x40] sm:$0xff]  ;;  %v37_v34 = vld [vmem:[%s1001_s1 + $0x38] sm:$0xff] }
   0xc   :  { %480 = vmatprep.subr.mxu1 %v89_v17  ;;  %446 = vmatpush3.msra.mxu0 %v41_v18  ;;  %v71_v27 = vld [vmem:[%s1001_s1 + $0x148] sm:$0xff]  ;;  %v70_v31 = vld [vmem:[%s1001_s1 + $0x140] sm:$0xff]  ;;  %v69_v35 = vld [vmem:[%s1001_s1 + $0x138] sm:$0xff] }
   0xd   :  { %481 = vmatpush3.msra.mxu1 %v73_v19  ;;  %447 = vmatprep.subr.mxu0 %v56_v20  ;;  %v52_v36 = vld [vmem:[%s1001_s1 + $0xb0] sm:$0xff]  ;;  %v51_v40 = vld [vmem:[%s1001_s1 + $0xa8] sm:$0xff]  ;;  %v50_v44 = vld [vmem:[%s1001_s1 + $0xa0] sm:$0xff] }
   0xe   :  { %482 = vmatprep.subr.mxu1 %v88_v21  ;;  %448 = vmatpush3.msra.mxu0 %v40_v22  ;;  %v84_v37 = vld [vmem:[%s1001_s1 + $0x1b0] sm:$0xff]  ;;  %v83_v41 = vld [vmem:[%s1001_s1 + $0x1a8] sm:$0xff]  ;;  %v82_v45 = vld [vmem:[%s1001_s1 + $0x1a0] sm:$0xff] }
   0xf   :  { %483 = vmatpush3.msra.mxu1 %v72_v23  ;;  %449 = vmatprep.subr.mxu0 %v55_v24  ;;  %v36_v38 = vld [vmem:[%s1001_s1 + $0x30] sm:$0xff]  ;;  %v35_v42 = vld [vmem:[%s1001_s1 + $0x28] sm:$0xff]  ;;  %v34_v46 = vld [vmem:[%s1001_s1 + $0x20] sm:$0xff] }
  0x10   :  { %484 = vmatprep.subr.mxu1 %v87_v25  ;;  %450 = vmatpush3.msra.mxu0 %v39_v26  ;;  %v68_v39 = vld [vmem:[%s1001_s1 + $0x130] sm:$0xff]  ;;  %v67_v43 = vld [vmem:[%s1001_s1 + $0x128] sm:$0xff]  ;;  %v66_v47 = vld [vmem:[%s1001_s1 + $0x120] sm:$0xff] }
  0x11   :  { %485 = vmatpush3.msra.mxu1 %v71_v27  ;;  %451 = vmatprep.subr.mxu0 %v54_v28  ;;  %v49_v48 = vld [vmem:[%s1001_s1 + $0x98] sm:$0xff]  ;;  %v48_v52 = vld [vmem:[%s1001_s1 + $0x90] sm:$0xff]  ;;  %v47_v56 = vld [vmem:[%s1001_s1 + $0x88] sm:$0xff] }
  0x12   :  { %486 = vmatprep.subr.mxu1 %v86_v29  ;;  %452 = vmatpush3.msra.mxu0 %v38_v30  ;;  %v81_v49 = vld [vmem:[%s1001_s1 + $0x198] sm:$0xff]  ;;  %v80_v53 = vld [vmem:[%s1001_s1 + $0x190] sm:$0xff]  ;;  %v79_v57 = vld [vmem:[%s1001_s1 + $0x188] sm:$0xff] }
  0x13   :  { %487 = vmatpush3.msra.mxu1 %v70_v31  ;;  %453 = vmatprep.subr.mxu0 %v53_v32  ;;  %v33_v50 = vld [vmem:[%s1001_s1 + $0x18] sm:$0xff]  ;;  %v32_v54 = vld [vmem:[%s1001_s1 + $0x10] sm:$0xff]  ;;  %v31_v58 = vld [vmem:[%s1001_s1 + $0x8] sm:$0xff] }
  0x14   :  { %488 = vmatprep.subr.mxu1 %v85_v33  ;;  %454 = vmatpush3.msra.mxu0 %v37_v34  ;;  %v65_v51 = vld [vmem:[%s1001_s1 + $0x118] sm:$0xff]  ;;  %v64_v55 = vld [vmem:[%s1001_s1 + $0x110] sm:$0xff]  ;;  %v63_v59 = vld [vmem:[%s1001_s1 + $0x108] sm:$0xff] }
  0x15   :  { %489 = vmatpush3.msra.mxu1 %v69_v35  ;;  %455 = vmatprep.subr.mxu0 %v52_v36  ;;  %v46_v60 = vld [vmem:[%s1001_s1 + $0x80] sm:$0xff]  ;;  %v27_v63 = vld [vmem:[%s1002_s0 + $0x8] sm:$0xff]  ;;  %v29_v1 = vld [vmem:[%s1002_s0 + $0x18] sm:$0xff] }
  0x16   :  { %490 = vmatprep.subr.mxu1 %v84_v37  ;;  %456 = vmatpush3.msra.mxu0 %v36_v38  ;;  %v78_v61 = vld [vmem:[%s1001_s1 + $0x180] sm:$0xff]  ;;  %v28_v3 = vld [vmem:[%s1002_s0 + $0x10] sm:$0xff]  ;;  %v257_v4 = vld [vmem:[%s1003_s3 + $0x78] sm:$0xff] }
  0x17   :  { %491 = vmatpush3.msra.mxu1 %v68_v39  ;;  %457 = vmatprep.subr.mxu0 %v51_v40  ;;  %v30_v62 = vld [vmem:[%s1001_s1] sm:$0xff]  ;;  %v256_v6 = vld [vmem:[%s1003_s3 + $0x70] sm:$0xff]  ;;  %v255_v7 = vld [vmem:[%s1003_s3 + $0x68] sm:$0xff] }
  0x18   :  { %492 = vmatprep.subr.mxu1 %v83_v41  ;;  %458 = vmatpush3.msra.mxu0 %v35_v42  ;;  %v62_v0 = vld [vmem:[%s1001_s1 + $0x100] sm:$0xff]  ;;  %v253_v9 = vld [vmem:[%s1003_s3 + $0x58] sm:$0xff]  ;;  %v252_v10 = vld [vmem:[%s1003_s3 + $0x50] sm:$0xff] }
  0x19   :  { %493 = vmatpush3.msra.mxu1 %v67_v43  ;;  %459 = vmatprep.subr.mxu0 %v50_v44  ;;  %v26_v2 = vld [vmem:[%s1002_s0] sm:$0xff]  ;;  %v251_v11 = vld [vmem:[%s1003_s3 + $0x48] sm:$0xff]  ;;  %v249_v13 = vld [vmem:[%s1003_s3 + $0x38] sm:$0xff] }
  0x1a   :  { %494 = vmatprep.subr.mxu1 %v82_v45  ;;  %460 = vmatpush3.msra.mxu0 %v34_v46  ;;  %v254_v8 = vld [vmem:[%s1003_s3 + $0x60] sm:$0xff]  ;;  %v248_v14 = vld [vmem:[%s1003_s3 + $0x30] sm:$0xff]  ;;  %v247_v15 = vld [vmem:[%s1003_s3 + $0x28] sm:$0xff] }
  0x1b   :  { %495 = vmatpush3.msra.mxu1 %v66_v47  ;;  %461 = vmatprep.subr.mxu0 %v49_v48  ;;  %v250_v12 = vld [vmem:[%s1003_s3 + $0x40] sm:$0xff]  ;;  %v245_v17 = vld [vmem:[%s1003_s3 + $0x18] sm:$0xff]  ;;  %v244_v18 = vld [vmem:[%s1003_s3 + $0x10] sm:$0xff] }
  0x1c   :  { %496 = vmatprep.subr.mxu1 %v81_v49  ;;  %462 = vmatpush3.msra.mxu0 %v33_v50  ;;  %v246_v16 = vld [vmem:[%s1003_s3 + $0x20] sm:$0xff]  ;;  %v243_v19 = vld [vmem:[%s1003_s3 + $0x8] sm:$0xff]  ;;  %v351_v21 = vld [vmem:[%s1004_s5 + $0x78] sm:$0xff] }
  0x1d   :  { %497 = vmatpush3.msra.mxu1 %v65_v51  ;;  %463 = vmatprep.subr.mxu0 %v48_v52  ;;  %v242_v20 = vld [vmem:[%s1003_s3] sm:$0xff]  ;;  %v350_v22 = vld [vmem:[%s1004_s5 + $0x70] sm:$0xff]  ;;  %v349_v23 = vld [vmem:[%s1004_s5 + $0x68] sm:$0xff] }
  0x1e   :  { %498 = vmatprep.subr.mxu1 %v80_v53  ;;  %464 = vmatpush3.msra.mxu0 %v32_v54  ;;  %v348_v24 = vld [vmem:[%s1004_s5 + $0x60] sm:$0xff]  ;;  %v347_v25 = vld [vmem:[%s1004_s5 + $0x58] sm:$0xff]  ;;  %v346_v26 = vld [vmem:[%s1004_s5 + $0x50] sm:$0xff] }
  0x1f   :  { %499 = vmatpush3.msra.mxu1 %v64_v55  ;;  %465 = vmatprep.subr.mxu0 %v47_v56  ;;  %v345_v27 = vld [vmem:[%s1004_s5 + $0x48] sm:$0xff]  ;;  %v344_v28 = vld [vmem:[%s1004_s5 + $0x40] sm:$0xff]  ;;  %v343_v29 = vld [vmem:[%s1004_s5 + $0x38] sm:$0xff] }
  0x20   :  { %500 = vmatprep.subr.mxu1 %v79_v57  ;;  %466 = vmatpush3.msra.mxu0 %v31_v58  ;;  %v342_v30 = vld [vmem:[%s1004_s5 + $0x30] sm:$0xff]  ;;  %v341_v31 = vld [vmem:[%s1004_s5 + $0x28] sm:$0xff]  ;;  %v340_v32 = vld [vmem:[%s1004_s5 + $0x20] sm:$0xff] }
  0x21   :  { %501 = vmatpush3.msra.mxu1 %v63_v59  ;;  %467 = vmatprep.subr.mxu0 %v46_v60  ;;  %v339_v33 = vld [vmem:[%s1004_s5 + $0x18] sm:$0xff]  ;;  %v434_v36 = vld [vmem:[%s1005_s2] ss:$0 sm:$0xff]  ;;  %v338_v44 = vld [vmem:[%s1004_s5 + $0x10] sm:$0xff] }
  0x22   :  { %502 = vmatprep.subr.mxu1 %v78_v61  ;;  %468 = vmatpush3.msra.mxu0 %v30_v62  ;;  %v337_v45 = vld [vmem:[%s1004_s5 + $0x8] sm:$0xff]  ;;  %v336_v46 = vld [vmem:[%s1004_s5] sm:$0xff] }
  0x23   :  { %165 = vmatprep.mubr.f32.mxu0 %v27_v63  ;;  %503 = vmatpush3.msra.mxu1 %v62_v0  ;;  %v435_v47 = vld [vmem:[%s1006_s4] ss:$0 sm:$0xff] }
  0x24   :  { %235 = vmatprep.mubr.f32.mxu1 %v29_v1  ;;  %166 = vmatmul.mubr.f32.vlgmr.msra.gmra.mxu0 %v26_v2  ;;  %v436_v52 = vld [vmem:[%s1007_s6] ss:$0 sm:$0xff] }
  0x25   :  { %236 = vmatmul.mubr.f32.vlgmr.msra.gmra.mxu1 %v28_v3  ;;  %541 = vmatprep.subr.mxu0 %v613_v5 }
  0x26   :  { %576 = vmatprep.subr.mxu1 %v613_v5  ;;  %542 = vmatpush3.msra.mxu0 %v257_v4 }
  0x27   :  { %543 = vmatprep.subr.mxu0 %v613_v5  ;;  %573 = vmatprep.mubr.msk.f32.mxu0 %vm614_vm0, %v613_v5 }
  0x28   :  { %544 = vmatpush3.msra.mxu0 %v256_v6  ;;  %608 = vmatprep.mubr.msk.f32.mxu1 %vm614_vm0, %v613_v5 }
  0x29   :  { %545 = vmatprep.subr.mxu0 %v613_v5  ;;  %577 = vmatpush3.msra.mxu1 %v351_v21 }
  0x2a   :  { %546 = vmatpush3.msra.mxu0 %v255_v7  ;;  %578 = vmatprep.subr.mxu1 %v613_v5 }
  0x2b   :  { %547 = vmatprep.subr.mxu0 %v613_v5  ;;  %579 = vmatpush3.msra.mxu1 %v350_v22 }
  0x2c   :  { %548 = vmatpush3.msra.mxu0 %v254_v8  ;;  %580 = vmatprep.subr.mxu1 %v613_v5 }
  0x2d   :  { %549 = vmatprep.subr.mxu0 %v613_v5  ;;  %581 = vmatpush3.msra.mxu1 %v349_v23 }
  0x2e   :  { %550 = vmatpush3.msra.mxu0 %v253_v9  ;;  %582 = vmatprep.subr.mxu1 %v613_v5 }
  0x2f   :  { %551 = vmatprep.subr.mxu0 %v613_v5  ;;  %583 = vmatpush3.msra.mxu1 %v348_v24 }
  0x30   :  { %552 = vmatpush3.msra.mxu0 %v252_v10  ;;  %584 = vmatprep.subr.mxu1 %v613_v5 }
  0x31   :  { %553 = vmatprep.subr.mxu0 %v613_v5  ;;  %585 = vmatpush3.msra.mxu1 %v347_v25 }
  0x32   :  { %554 = vmatpush3.msra.mxu0 %v251_v11  ;;  %586 = vmatprep.subr.mxu1 %v613_v5 }
  0x33   :  { %555 = vmatprep.subr.mxu0 %v613_v5  ;;  %587 = vmatpush3.msra.mxu1 %v346_v26 }
  0x34   :  { %556 = vmatpush3.msra.mxu0 %v250_v12  ;;  %588 = vmatprep.subr.mxu1 %v613_v5 }
  0x35   :  { %557 = vmatprep.subr.mxu0 %v613_v5  ;;  %589 = vmatpush3.msra.mxu1 %v345_v27 }
  0x36   :  { %558 = vmatpush3.msra.mxu0 %v249_v13  ;;  %590 = vmatprep.subr.mxu1 %v613_v5 }
  0x37   :  { %559 = vmatprep.subr.mxu0 %v613_v5  ;;  %591 = vmatpush3.msra.mxu1 %v344_v28 }
  0x38   :  { %560 = vmatpush3.msra.mxu0 %v248_v14  ;;  %592 = vmatprep.subr.mxu1 %v613_v5 }
  0x39   :  { %561 = vmatprep.subr.mxu0 %v613_v5  ;;  %593 = vmatpush3.msra.mxu1 %v343_v29 }
  0x3a   :  { %562 = vmatpush3.msra.mxu0 %v247_v15  ;;  %594 = vmatprep.subr.mxu1 %v613_v5 }
  0x3b   :  { %563 = vmatprep.subr.mxu0 %v613_v5  ;;  %595 = vmatpush3.msra.mxu1 %v342_v30 }
  0x3c   :  { %564 = vmatpush3.msra.mxu0 %v246_v16  ;;  %596 = vmatprep.subr.mxu1 %v613_v5 }
  0x3d   :  { %565 = vmatprep.subr.mxu0 %v613_v5  ;;  %597 = vmatpush3.msra.mxu1 %v341_v31 }
  0x3e   :  { %566 = vmatpush3.msra.mxu0 %v245_v17  ;;  %598 = vmatprep.subr.mxu1 %v613_v5 }
  0x3f   :  { %567 = vmatprep.subr.mxu0 %v613_v5  ;;  %599 = vmatpush3.msra.mxu1 %v340_v32 }
  0x40   :  { %568 = vmatpush3.msra.mxu0 %v244_v18  ;;  %600 = vmatprep.subr.mxu1 %v613_v5 }
  0x41   :  { %569 = vmatprep.subr.mxu0 %v613_v5  ;;  %601 = vmatpush3.msra.mxu1 %v339_v33 }
  0x42   :  { %570 = vmatpush3.msra.mxu0 %v243_v19  ;;  %602 = vmatprep.subr.mxu1 %v613_v5 }
  0x43   :  { %571 = vmatprep.subr.mxu0 %v613_v5  ;;  %603 = vmatpush3.msra.mxu1 %v338_v44 }
  0x44   :  { %572 = vmatpush3.msra.mxu0 %v242_v20  ;;  %604 = vmatprep.subr.mxu1 %v613_v5 }
  0x45   :  { %605 = vmatpush3.msra.mxu1 %v337_v45 }
  0x46   :  { %606 = vmatprep.subr.mxu1 %v613_v5 }
  0x47   :  { %607 = vmatpush3.msra.mxu1 %v336_v46 }
  0xe4   :  { %v469_v34 = vpop.f32.mrf.mxu0 }
  0xe5   :  { %v504_v35 = vpop.f32.mrf.mxu1 }
  0xe6   :  { %v470_v37 = vpop.f32.mrf.mxu0 }
  0xe7   :  { %v505_v38 = vpop.f32.mrf.mxu1  ;;  %v471_v39 = vadd.f32 %v470_v37, %v469_v34 }
  0xe8   :  { %v506_v41 = vadd.f32 %v505_v38, %v504_v35 }
  0xe9   :  { %v168_v40 = vadd.f32 %v471_v39, %v434_v36 }
  0xeb   :  { %v238_v42 = vadd.f32 %v506_v41, %v168_v40 }
  0xed   :  { %v241_v43 = vmax.f32 %v238_v42, 0.0 }
  0xef   :  { %574 = vmatmul.mubr.f32.vlgmr.msra.gmra.mxu0 %v241_v43 }
 0x1af   :  { %v331_v48 = vpop.f32.mrf.mxu0 }
 0x1b0   :  { %v332_v49 = vadd.f32 %v435_v47, %v331_v48 }
 0x1b1   :  { %v575_v50 = vpop.f32.mrf.mxu0 }
 0x1b2   :  { %v335_v51 = vmax.f32 %v332_v49, 0.0 }
 0x1b4   :  { %609 = vmatmul.mubr.f32.vlgmr.msra.gmra.mxu1 %v335_v51 }
 0x274   :  { %v425_v53 = vpop.f32.mrf.mxu1 }
 0x275   :  { %v426_v54 = vadd.f32 %v436_v52, %v425_v53 }
 0x276   :  { %v610_v55 = vpop.f32.mrf.mxu1 }
 0x277   :  { %429 = vst [vmem:[%s1008_s7] sm:$0xff] %v426_v54 }

// kernel: lenet_forward.2
= control target key start
LH: loop header
LB: loop body
LE: loop exit
PB: predicated region body
PF: predicated region fallthrough
CT: control target
= control target key end

     0   :  { %s26299_s18 = smov 0   ;;  %s31797_s0 = inlined_call_operand.vmem [shape: f32[2,8,1920], index: 0, kind: input, shape index: {}]   ;;  %s31798_s1 = inlined_call_operand.vmem [shape: f32[25,8,8], index: 1, kind: input, shape index: {}]   ;;  %s31799_s2 = inlined_call_operand.vmem [shape: f32[8,1], index: 2, kind: input, shape index: {}]   ;;  %s31800_s3 = inlined_call_operand.vmem [shape: f32[25,16,8], index: 3, kind: input, shape index: {}]   ;;  %s31801_s4 = inlined_call_operand.vmem [shape: f32[16,1], index: 4, kind: input, shape index: {}]   ;;  %s31802_s5 = inlined_call_operand.vmem [shape: f32[2,16,1024], index: 5, kind: output, shape index: {}]  }
   0x1 LB: > { %s25274_s19 = sadd.s32 4294967295, %s26241_s18   ;;  %p25278_p0 = scmp.ge.s32.totalorder %s26241_s18, 1  ;;  %s26241_s18 = sphi %s26299_s18, %s15_s18  }
   0x2   : > { %p187_p1 = scmp.lt.s32.totalorder %s26241_s18, 3 }
   0x4   : > { %p188_p2 = pnand %p25278_p0, %p187_p1 }
   0x6   : > { %191 = sbr.rel (%p188_p2) target bundleno = 2303 (0x8ff), region = 40 }
   0xb   : > { %p215_p3 = scmp.lt.s32.totalorder %s25274_s19, 1  ;;  %v31803_v2 = vmov 0.0   ;;  %s26244_s24 = smov 127   ;;  %vm285_vm0 = vcmask 1039360   ;;  %v26485_v20 = vld [vmem:[%s31798_s1 + $0x8] sm:$0xff]  ;;  %vm312_vm1 = vcmask 64512  }
   0xc   : > { %380 = vmatprep.mubr.f32.mxu0 %v31803_v2  ;;  %451 = vmatprep.mubr.f32.mxu1 %v31803_v2  ;;  %s26245_s25 = smov 126   ;;  %s26246_s26 = smov 125   ;;  %vm26249_vm2 = vmmov 0   ;;  %v240_v45 = vld [vmem:[%s31798_s1] sm:$0xff]  ;;  %vm1341_vm3 = vcmask 1031168   ;;  %v25297_v58 = vld [vmem:[%s31798_s1 + $0x10] sm:$0xff] }
   0xd   : > { %s32496_s19 = smov (!%p215_p3, %s25274_s19), 1  ;;  %s26247_s27 = smov 124   ;;  %vm1910_vm4 = vcmask 1022976   ;;  %vm2479_vm5 = vcmask 1014784   ;;  %vm3048_vm6 = vcmask 785408   ;;  %vm3617_vm7 = vcmask 777216  }
   0xe   : > { %s26157_s20 = smul.u32 120, %s32496_s19  ;;  %s26248_s28 = smov 96   ;;  %vm4186_vm8 = vcmask 769024   ;;  %vm4755_vm9 = vcmask 760832   ;;  %vm5324_vm10 = vcmask 752640   ;;  %vm5893_vm11 = vcmask 523264  }
   0xf   : > { %s26250_s6 = smov 95   ;;  %s26251_s11 = smov 94   ;;  %vm6462_vm12 = vcmask 515072   ;;  %vm7031_vm13 = vcmask 506880   ;;  %vm7600_vm14 = vcmask 498688   ;;  %vm8169_vm15 = vcmask 490496  }
  0x10   : > { %s26313_s23 = scalar_lea.vmem %s31797_s0, %s26157_s20  ;;  %s26252_s14 = smov 93  }
  0x11   : > { %v26316_v0 = vld [vmem:[%s26313_s23 + $0x8] sm:$0xff]  ;;  %v26319_v1 = vld [vmem:[%s26313_s23] sm:$0xff]  ;;  %v26328_v3 = vld [vmem:[%s26313_s23 + $0x10] sm:$0xff]  ;;  %s26253_s17 = smov 92   ;;  %s26254_s22 = smov 64  }
  0x12   : > { %259 = vrot.lane.b32.xlu0 %v26316_v0, %s26244_s24  ;;  %257 = vrot.lane.b32.xlu1 %v26319_v1, %s26244_s24  ;;  %v26331_v4 = vld [vmem:[%s26313_s23 + $0x18] sm:$0xff]  ;;  %v26338_v5 = vld [vmem:[%s26313_s23 + $0x20] sm:$0xff]  ;;  %s26256_s9 = smov 62   ;;  %s26257_s12 = smov 61  }
  0x13   : > { %v26341_v6 = vld [vmem:[%s26313_s23 + $0x28] sm:$0xff]  ;;  %v26348_v7 = vld [vmem:[%s26313_s23 + $0x30] sm:$0xff]  ;;  %v26351_v8 = vld [vmem:[%s26313_s23 + $0x38] sm:$0xff]  ;;  %s26258_s15 = smov 60   ;;  %s26259_s20 = smov 32  }
  0x14   : > { %v26358_v9 = vld [vmem:[%s26313_s23 + $0x40] sm:$0xff]  ;;  %v26361_v10 = vld [vmem:[%s26313_s23 + $0x48] sm:$0xff]  ;;  %v26368_v11 = vld [vmem:[%s26313_s23 + $0x50] sm:$0xff]  ;;  %s26260_s30 = smov 31   ;;  %s26261_s8 = smov 30  }
  0x15   : > { %v26371_v12 = vld [vmem:[%s26313_s23 + $0x58] sm:$0xff]  ;;  %v26378_v13 = vld [vmem:[%s26313_s23 + $0x60] sm:$0xff]  ;;  %v26381_v14 = vld [vmem:[%s26313_s23 + $0x68] sm:$0xff]  ;;  %s26263_s16 = smov 28   ;;  %s26266_s7 = smov 120  }
  0x16   : > { %261 = vrot.lane.b32.xlu0 %v26328_v3, %s26244_s24  ;;  %263 = vrot.lane.b32.xlu1 %v26331_v4, %s26244_s24 }
  0x1a   : > { %265 = vrot.lane.b32.xlu0 %v26338_v5, %s26244_s24  ;;  %267 = vrot.lane.b32.xlu1 %v26341_v6, %s26244_s24 }
  0x1e   : > { %269 = vrot.lane.b32.xlu0 %v26348_v7, %s26244_s24  ;;  %271 = vrot.lane.b32.xlu1 %v26351_v8, %s26244_s24 }
  0x22   : > { %273 = vrot.lane.b32.xlu0 %v26358_v9, %s26244_s24  ;;  %275 = vrot.lane.b32.xlu1 %v26361_v10, %s26244_s24 }
  0x26   : > { %277 = vrot.lane.b32.xlu0 %v26368_v11, %s26244_s24  ;;  %279 = vrot.lane.b32.xlu1 %v26371_v12, %s26244_s24 }
  0x2a   : > { %281 = vrot.lane.b32.xlu0 %v26378_v13, %s26244_s24  ;;  %283 = vrot.lane.b32.xlu1 %v26381_v14, %s26244_s24 }
  0x2e   : > { %1315 = vrot.lane.b32.xlu0 %v26316_v0, %s26245_s25  ;;  %1317 = vrot.lane.b32.xlu1 %v26328_v3, %s26245_s25 }
  0x32   : > { %1313 = vrot.lane.b32.xlu0 %v26319_v1, %s26245_s25  ;;  %1319 = vrot.lane.b32.xlu1 %v26331_v4, %s26245_s25 }
  0x36   : > { %1321 = vrot.lane.b32.xlu0 %v26338_v5, %s26245_s25  ;;  %1323 = vrot.lane.b32.xlu1 %v26341_v6, %s26245_s25 }
  0x3a   : > { %1325 = vrot.lane.b32.xlu0 %v26348_v7, %s26245_s25  ;;  %1327 = vrot.lane.b32.xlu1 %v26351_v8, %s26245_s25 }
  0x3e   : > { %1329 = vrot.lane.b32.xlu0 %v26358_v9, %s26245_s25  ;;  %1331 = vrot.lane.b32.xlu1 %v26361_v10, %s26245_s25 }
  0x42   : > { %1333 = vrot.lane.b32.xlu0 %v26368_v11, %s26245_s25  ;;  %1335 = vrot.lane.b32.xlu1 %v26371_v12, %s26245_s25 }
  0x46   : > { %1337 = vrot.lane.b32.xlu0 %v26378_v13, %s26245_s25  ;;  %1339 = vrot.lane.b32.xlu1 %v26381_v14, %s26245_s25 }
  0x4a   : > { %1884 = vrot.lane.b32.xlu0 %v26316_v0, %s26246_s26  ;;  %1886 = vrot.lane.b32.xlu1 %v26328_v3, %s26246_s26 }
  0x4e   : > { %1882 = vrot.lane.b32.xlu0 %v26319_v1, %s26246_s26  ;;  %1888 = vrot.lane.b32.xlu1 %v26331_v4, %s26246_s26 }
  0x52   : > { %1890 = vrot.lane.b32.xlu0 %v26338_v5, %s26246_s26  ;;  %1892 = vrot.lane.b32.xlu1 %v26341_v6, %s26246_s26 }
  0x56   : > { %1894 = vrot.lane.b32.xlu0 %v26348_v7, %s26246_s26  ;;  %1896 = vrot.lane.b32.xlu1 %v26351_v8, %s26246_s26 }
  0x5a   : > { %1898 = vrot.lane.b32.xlu0 %v26358_v9, %s26246_s26  ;;  %1900 = vrot.lane.b32.xlu1 %v26361_v10, %s26246_s26 }
  0x5e   : > { %1902 = vrot.lane.b32.xlu0 %v26368_v11, %s26246_s26  ;;  %1904 = vrot.lane.b32.xlu1 %v26371_v12, %s26246_s26 }
  0x62   : > { %1906 = vrot.lane.b32.xlu0 %v26378_v13, %s26246_s26  ;;  %1908 = vrot.lane.b32.xlu1 %v26381_v14, %s26246_s26 }
  0x66   : > { %2453 = vrot.lane.b32.xlu0 %v26316_v0, %s26247_s27  ;;  %2455 = vrot.lane.b32.xlu1 %v26328_v3, %s26247_s27 }
  0x6a   : > { %2451 = vrot.lane.b32.xlu0 %v26319_v1, %s26247_s27  ;;  %2457 = vrot.lane.b32.xlu1 %v26331_v4, %s26247_s27 }
  0x6e   : > { %2459 = vrot.lane.b32.xlu0 %v26338_v5, %s26247_s27  ;;  %2461 = vrot.lane.b32.xlu1 %v26341_v6, %s26247_s27 }
  0x72   : > { %2463 = vrot.lane.b32.xlu0 %v26348_v7, %s26247_s27  ;;  %2465 = vrot.lane.b32.xlu1 %v26351_v8, %s26247_s27 }
  0x76   : > { %2467 = vrot.lane.b32.xlu0 %v26358_v9, %s26247_s27  ;;  %2469 = vrot.lane.b32.xlu1 %v26361_v10, %s26247_s27 }
  0x7a   : > { %2471 = vrot.lane.b32.xlu0 %v26368_v11, %s26247_s27  ;;  %2473 = vrot.lane.b32.xlu1 %v26371_v12, %s26247_s27 }
  0x7e   : > { %2475 = vrot.lane.b32.xlu0 %v26378_v13, %s26247_s27  ;;  %2477 = vrot.lane.b32.xlu1 %v26381_v14, %s26247_s27 }
  0x82   : > { %3022 = vrot.lane.b32.xlu0 %v26316_v0, %s26248_s28  ;;  %3024 = vrot.lane.b32.xlu1 %v26328_v3, %s26248_s28 }
  0x84   : > { %v260_v15 = vpop.permute.xlu0 %259  ;;  %v258_v16 = vpop.permute.xlu1 %257 }
  0x85   : > { %v286_v21 = vsel %vm285_vm0, %v258_v16, %v260_v15 }
  0x86   : > { %3020 = vrot.lane.b32.xlu0 %v26319_v1, %s26248_s28  ;;  %3026 = vrot.lane.b32.xlu1 %v26331_v4, %s26248_s28 }
  0x88   : > { %v262_v17 = vpop.permute.xlu0 %261  ;;  %v264_v18 = vpop.permute.xlu1 %263 }
  0x89   : > { %v26480_v19 = vsel %vm285_vm0, %v260_v15, %v262_v17  ;;  %v26503_v25 = vsel %vm285_vm0, %v262_v17, %v264_v18 }
  0x8a   : > { %346 = vmatprep.subr.mxu0 %v26480_v19  ;;  %3028 = vrot.lane.b32.xlu0 %v26338_v5, %s26248_s28 }
  0x8b   : > { %3030 = vrot.lane.b32.xlu1 %v26341_v6, %s26248_s28  ;;  %347 = vmatpush1.msra.mxu0 %v286_v21 }
  0x8c   : > { %v266_v22 = vpop.permute.xlu0 %265  ;;  %v268_v23 = vpop.permute.xlu1 %267  ;;  %25283 = vmatmul.mubr.msk.f32.vlgmr.msra.gmra.mxu0 %vm312_vm1, %v26485_v20 }
  0x8d   : > { %v26496_v24 = vsel %vm285_vm0, %v264_v18, %v266_v22  ;;  %522 = vmatprep.mubr.f32.mxu0 %v31803_v2  ;;  %v26518_v29 = vsel %vm285_vm0, %v266_v22, %v268_v23 }
  0x8e   : > { %3032 = vrot.lane.b32.xlu0 %v26348_v7, %s26248_s28  ;;  %417 = vmatprep.subr.mxu1 %v26496_v24 }
  0x8f   : > { %3034 = vrot.lane.b32.xlu1 %v26351_v8, %s26248_s28  ;;  %418 = vmatpush1.msra.mxu1 %v26503_v25 }
  0x90   : > { %v270_v26 = vpop.permute.xlu0 %269  ;;  %v272_v27 = vpop.permute.xlu1 %271  ;;  %25284 = vmatmul.mubr.msk.f32.vlgmr.msra.gmra.mxu1 %vm312_vm1, %v26485_v20 }
  0x91   : > { %v26511_v28 = vsel %vm285_vm0, %v268_v23, %v270_v26  ;;  %593 = vmatprep.mubr.f32.mxu1 %v31803_v2  ;;  %v26533_v33 = vsel %vm285_vm0, %v270_v26, %v272_v27 }
  0x92   : > { %3036 = vrot.lane.b32.xlu0 %v26358_v9, %s26248_s28  ;;  %488 = vmatprep.subr.mxu0 %v26511_v28 }
  0x93   : > { %3038 = vrot.lane.b32.xlu1 %v26361_v10, %s26248_s28  ;;  %489 = vmatpush1.msra.mxu0 %v26518_v29 }
  0x94   : > { %v274_v30 = vpop.permute.xlu0 %273  ;;  %v276_v31 = vpop.permute.xlu1 %275  ;;  %25285 = vmatmul.mubr.msk.f32.vlgmr.msra.gmra.mxu0 %vm312_vm1, %v26485_v20 }
  0x95   : > { %v26526_v32 = vsel %vm285_vm0, %v272_v27, %v274_v30  ;;  %664 = vmatprep.mubr.f32.mxu0 %v31803_v2  ;;  %v26548_v37 = vsel %vm285_vm0, %v274_v30, %v276_v31 }
  0x96   : > { %3040 = vrot.lane.b32.xlu0 %v26368_v11, %s26248_s28  ;;  %559 = vmatprep.subr.mxu1 %v26526_v32 }
  0x97   : > { %3042 = vrot.lane.b32.xlu1 %v26371_v12, %s26248_s28  ;;  %560 = vmatpush1.msra.mxu1 %v26533_v33 }
  0x98   : > { %v278_v34 = vpop.permute.xlu0 %277  ;;  %v280_v35 = vpop.permute.xlu1 %279  ;;  %25286 = vmatmul.mubr.msk.f32.vlgmr.msra.gmra.mxu1 %vm312_vm1, %v26485_v20 }
  0x99   : > { %v26541_v36 = vsel %vm285_vm0, %v276_v31, %v278_v34  ;;  %735 = vmatprep.mubr.f32.mxu1 %v31803_v2  ;;  %v26574_v42 = vsel %vm285_vm0, %v278_v34, %v280_v35 }
  0x9a   : > { %3044 = vrot.lane.b32.xlu0 %v26378_v13, %s26248_s28  ;;  %630 = vmatprep.subr.mxu0 %v26541_v36 }
  0x9b   : > { %3046 = vrot.lane.b32.xlu1 %v26381_v14, %s26248_s28  ;;  %631 = vmatpush1.msra.mxu0 %v26548_v37 }
  0x9c   : > { %v282_v38 = vpop.permute.xlu0 %281  ;;  %25287 = vmatmul.mubr.msk.f32.vlgmr.msra.gmra.mxu0 %vm312_vm1, %v26485_v20  ;;  %v26555_v39 = vpop.permute.xlu1 %283  ;;  %25907 = vmatprep.subr.mxu0 %v31803_v2 }
  0x9d   : > { %v26559_v40 = vsel %vm285_vm0, %v280_v35, %v282_v38  ;;  %v26563_v41 = vsel %vm285_vm0, %v282_v38, %v26555_v39  ;;  %25909 = vmatprep.mubr.msk.f32.mxu0 %vm26249_vm2, %v31803_v2 }
  0x9e   : > { %3591 = vrot.lane.b32.xlu0 %v26316_v0, %s26250_s6  ;;  %701 = vmatprep.subr.mxu1 %v26559_v40 }
  0x9f   : > { %3593 = vrot.lane.b32.xlu1 %v26328_v3, %s26250_s6  ;;  %25908 = vmatpush3.msra.mxu0 %v26563_v41 }
  0xa0   : > { %702 = vmatpush1.msra.mxu1 %v26574_v42  ;;  %v1316_v43 = vpop.permute.xlu0 %1315  ;;  %25910 = vmatmul.mubr.msk.f32.vlgmr.msra.gmra.mxu0 %vm312_vm1, %v26485_v20  ;;  %v1318_v44 = vpop.permute.xlu1 %1317 }
  0xa1   : > { %25288 = vmatmul.mubr.msk.f32.vlgmr.msra.gmra.mxu1 %vm312_vm1, %v26485_v20  ;;  %845 = vmatprep.subr.mxu1 %v26316_v0  ;;  %v26612_v50 = vsel %vm1341_vm3, %v1316_v43, %v1318_v44 }
  0xa2   : > { %3589 = vrot.lane.b32.xlu0 %v26319_v1, %s26250_s6  ;;  %916 = vmatprep.subr.mxu0 %v26331_v4 }
  0xa3   : > { %3595 = vrot.lane.b32.xlu1 %v26331_v4, %s26250_s6  ;;  %846 = vmatpush1.msra.mxu1 %v26319_v1 }
  0xa4   : > { %879 = vmatprep.mubr.f32.mxu1 %v31803_v2  ;;  %917 = vmatpush1.msra.mxu0 %v26328_v3  ;;  %v1314_v46 = vpop.permute.xlu0 %1313  ;;  %v1320_v47 = vpop.permute.xlu1 %1319 }
  0xa5   : > { %950 = vmatprep.mubr.f32.mxu0 %v31803_v2  ;;  %25290 = vmatmul.mubr.msk.f32.vlgmr.msra.gmra.mxu1 %vm312_vm1, %v240_v45  ;;  %v1342_v55 = vsel %vm1341_vm3, %v1314_v46, %v1316_v43  ;;  %v26647_v61 = vsel %vm1341_vm3, %v1318_v44, %v1320_v47  ;;  %v25305_v46 = vld [vmem:[%s31798_s1 + $0x18] sm:$0xff] }
  0xa6   : > { %25291 = vmatmul.mubr.msk.f32.vlgmr.msra.gmra.mxu0 %vm312_vm1, %v240_v45  ;;  %1058 = vmatprep.subr.mxu0 %v26351_v8 }
  0xa7   : > { %3597 = vrot.lane.b32.xlu0 %v26338_v5, %s26250_s6  ;;  %3599 = vrot.lane.b32.xlu1 %v26341_v6, %s26250_s6 }
  0xa8   : > { %987 = vmatprep.subr.mxu1 %v26341_v6  ;;  %1059 = vmatpush1.msra.mxu0 %v26348_v7  ;;  %v1322_v48 = vpop.permute.xlu0 %1321  ;;  %v1324_v49 = vpop.permute.xlu1 %1323 }
  0xa9   : > { %988 = vmatpush1.msra.mxu1 %v26338_v5  ;;  %1021 = vmatprep.mubr.f32.mxu1 %v31803_v2  ;;  %v26628_v56 = vsel %vm1341_vm3, %v1320_v47, %v1322_v48  ;;  %v26655_v63 = vsel %vm1341_vm3, %v1322_v48, %v1324_v49 }
  0xaa   : > { %1092 = vmatprep.mubr.f32.mxu0 %v31803_v2  ;;  %1200 = vmatprep.subr.mxu0 %v26371_v12 }
  0xab   : > { %25292 = vmatmul.mubr.msk.f32.vlgmr.msra.gmra.mxu1 %vm312_vm1, %v240_v45  ;;  %25293 = vmatmul.mubr.msk.f32.vlgmr.msra.gmra.mxu0 %vm312_vm1, %v240_v45 }
  0xac   : > { %1201 = vmatpush1.msra.mxu0 %v26368_v11  ;;  %1129 = vmatprep.subr.mxu1 %v26361_v10  ;;  %v1326_v51 = vpop.permute.xlu0 %1325  ;;  %v1328_v52 = vpop.permute.xlu1 %1327 }
  0xad   : > { %1401 = vmatprep.subr.mxu0 %v26612_v50  ;;  %3601 = vrot.lane.b32.xlu0 %v26348_v7, %s26250_s6  ;;  %v26631_v57 = vsel %vm1341_vm3, %v1324_v49, %v1326_v51  ;;  %v26672_v18 = vsel %vm1341_vm3, %v1326_v51, %v1328_v52 }
  0xae   : > { %3603 = vrot.lane.b32.xlu1 %v26351_v8, %s26250_s6  ;;  %1130 = vmatpush1.msra.mxu1 %v26358_v9 }
  0xaf   : > { %1163 = vmatprep.mubr.f32.mxu1 %v31803_v2  ;;  %1234 = vmatprep.mubr.f32.mxu0 %v31803_v2 }
  0xb0   : > { %25912 = vmatprep.subr.mxu1 %v31803_v2  ;;  %25294 = vmatmul.mubr.msk.f32.vlgmr.msra.gmra.mxu1 %vm312_vm1, %v240_v45  ;;  %v1330_v53 = vpop.permute.xlu0 %1329  ;;  %v1332_v54 = vpop.permute.xlu1 %1331 }
  0xb1   : > { %25295 = vmatmul.mubr.msk.f32.vlgmr.msra.gmra.mxu0 %vm312_vm1, %v240_v45  ;;  %25913 = vmatpush3.msra.mxu1 %v26378_v13  ;;  %v26650_v62 = vsel %vm1341_vm3, %v1328_v52, %v1330_v53  ;;  %v26682_v20 = vsel %vm1341_vm3, %v1330_v53, %v1332_v54 }
  0xb2   : > { %1402 = vmatpush1.msra.mxu0 %v1342_v55  ;;  %1472 = vmatprep.subr.mxu1 %v26628_v56 }
  0xb3   : > { %3605 = vrot.lane.b32.xlu0 %v26358_v9, %s26250_s6  ;;  %3607 = vrot.lane.b32.xlu1 %v26361_v10, %s26250_s6 }
  0xb4   : > { %1543 = vmatprep.subr.mxu0 %v26631_v57  ;;  %25914 = vmatprep.mubr.msk.f32.mxu1 %vm26249_vm2, %v31803_v2  ;;  %v1334_v59 = vpop.permute.xlu0 %1333  ;;  %v1336_v60 = vpop.permute.xlu1 %1335 }
  0xb5   : > { %1435 = vmatprep.mubr.f32.mxu0 %v31803_v2  ;;  %25915 = vmatmul.mubr.msk.f32.vlgmr.msra.gmra.mxu1 %vm312_vm1, %v240_v45  ;;  %v26668_v17 = vsel %vm1341_vm3, %v1332_v54, %v1334_v59  ;;  %v26707_v34 = vsel %vm1341_vm3, %v1334_v59, %v1336_v60 }
  0xb6   : > { %25298 = vmatmul.mubr.msk.f32.vlgmr.msra.gmra.mxu0 %vm312_vm1, %v25297_v58  ;;  %1473 = vmatpush1.msra.mxu1 %v26647_v61 }
  0xb7   : > { %1544 = vmatpush1.msra.mxu0 %v26655_v63  ;;  %3609 = vrot.lane.b32.xlu0 %v26368_v11, %s26250_s6 }
  0xb8   : > { %3611 = vrot.lane.b32.xlu1 %v26371_v12, %s26250_s6  ;;  %1614 = vmatprep.subr.mxu1 %v26650_v62  ;;  %v1338_v15 = vpop.permute.xlu0 %1337  ;;  %v26663_v16 = vpop.permute.xlu1 %1339 }
  0xb9   : > { %1506 = vmatprep.mubr.f32.mxu1 %v31803_v2  ;;  %1577 = vmatprep.mubr.f32.mxu0 %v31803_v2  ;;  %v26687_v23 = vsel %vm1341_vm3, %v1336_v60, %v1338_v15  ;;  %v26693_v26 = vsel %vm1341_vm3, %v1338_v15, %v26663_v16 }
  0xba   : > { %25299 = vmatmul.mubr.msk.f32.vlgmr.msra.gmra.mxu1 %vm312_vm1, %v25297_v58  ;;  %25300 = vmatmul.mubr.msk.f32.vlgmr.msra.gmra.mxu0 %vm312_vm1, %v25297_v58 }
  0xbb   : > { %1615 = vmatpush1.msra.mxu1 %v26672_v18  ;;  %3613 = vrot.lane.b32.xlu0 %v26378_v13, %s26250_s6 }
  0xbc   : > { %3615 = vrot.lane.b32.xlu1 %v26381_v14, %s26250_s6  ;;  %1685 = vmatprep.subr.mxu0 %v26668_v17  ;;  %v1885_v21 = vpop.permute.xlu0 %1884  ;;  %v1887_v22 = vpop.permute.xlu1 %1886  ;;  %s26255_s6 = smov 63  }
  0xbd   : > { %1686 = vmatpush1.msra.mxu0 %v26682_v20  ;;  %1719 = vmatprep.mubr.f32.mxu0 %v31803_v2  ;;  %v26702_v27 = vsel %vm1910_vm4, %v1885_v21, %v1887_v22 }
  0xbe   : > { %25917 = vmatprep.subr.mxu0 %v31803_v2  ;;  %1648 = vmatprep.mubr.f32.mxu1 %v31803_v2 }
  0xbf   : > { %4160 = vrot.lane.b32.xlu0 %v26316_v0, %s26251_s11  ;;  %25302 = vmatmul.mubr.msk.f32.vlgmr.msra.gmra.mxu0 %vm312_vm1, %v25297_v58 }
  0xc0   : > { %4162 = vrot.lane.b32.xlu1 %v26328_v3, %s26251_s11  ;;  %1756 = vmatprep.subr.mxu1 %v26687_v23  ;;  %v1883_v30 = vpop.permute.xlu0 %1882  ;;  %v1889_v31 = vpop.permute.xlu1 %1888 }
  0xc1   : > { %25918 = vmatpush3.msra.mxu0 %v26693_v26  ;;  %25301 = vmatmul.mubr.msk.f32.vlgmr.msra.gmra.mxu1 %vm312_vm1, %v25297_v58  ;;  %v1911_v35 = vsel %vm1910_vm4, %v1883_v30, %v1885_v21  ;;  %v26726_v45 = vsel %vm1910_vm4, %v1887_v22, %v1889_v31 }
  0xc2   : > { %1757 = vmatpush1.msra.mxu1 %v26707_v34  ;;  %1790 = vmatprep.mubr.f32.mxu1 %v31803_v2 }
  0xc3   : > { %4158 = vrot.lane.b32.xlu0 %v26319_v1, %s26251_s11  ;;  %1970 = vmatprep.subr.mxu1 %v26702_v27 }
  0xc4   : > { %4164 = vrot.lane.b32.xlu1 %v26331_v4, %s26251_s11  ;;  %v1891_v38 = vpop.permute.xlu0 %1890  ;;  %v1893_v43 = vpop.permute.xlu1 %1892  ;;  %25919 = vmatprep.mubr.msk.f32.mxu0 %vm26249_vm2, %v31803_v2 }
  0xc5   : > { %25303 = vmatmul.mubr.msk.f32.vlgmr.msra.gmra.mxu1 %vm312_vm1, %v25297_v58  ;;  %v26721_v44 = vsel %vm1910_vm4, %v1889_v31, %v1891_v38  ;;  %25920 = vmatmul.mubr.msk.f32.vlgmr.msra.gmra.mxu0 %vm312_vm1, %v25297_v58  ;;  %v26744_v51 = vsel %vm1910_vm4, %v1891_v38, %v1893_v43 }
  0xc6   : > { %31929 = vst [vmem:[#allocation2_spill] sm:$0xff] %v26721_v44  ;;  %1971 = vmatpush1.msra.mxu1 %v1911_v35  ;;  %2041 = vmatprep.subr.mxu0 %v26721_v44  ;;  %31931 = vst [vmem:[#allocation4_spill] sm:$0xff] %v26744_v51 }
  0xc7   : > { %4166 = vrot.lane.b32.xlu0 %v26338_v5, %s26251_s11  ;;  %2042 = vmatpush1.msra.mxu0 %v26726_v45 }
  0xc8   : > { %4168 = vrot.lane.b32.xlu1 %v26341_v6, %s26251_s11  ;;  %v1895_v47 = vpop.permute.xlu0 %1894  ;;  %v1897_v48 = vpop.permute.xlu1 %1896  ;;  %2004 = vmatprep.mubr.f32.mxu1 %v31803_v2 }
  0xc9   : > { %v26738_v49 = vsel %vm1910_vm4, %v1893_v43, %v1895_v47  ;;  %25306 = vmatmul.mubr.msk.f32.vlgmr.msra.gmra.mxu1 %vm312_vm1, %v25305_v46  ;;  %2075 = vmatprep.mubr.f32.mxu0 %v31803_v2  ;;  %v26760_v55 = vsel %vm1910_vm4, %v1895_v47, %v1897_v48 }
  0xca   : > { %31930 = vst [vmem:[#allocation3_spill] sm:$0xff] %v26738_v49  ;;  %2112 = vmatprep.subr.mxu1 %v26738_v49  ;;  %25307 = vmatmul.mubr.msk.f32.vlgmr.msra.gmra.mxu0 %vm312_vm1, %v25305_v46  ;;  %31933 = vst [vmem:[#allocation6_spill] sm:$0xff] %v26760_v55 }
  0xcb   : > { %4170 = vrot.lane.b32.xlu0 %v26348_v7, %s26251_s11  ;;  %2113 = vmatpush1.msra.mxu1 %v26744_v51 }
  0xcc   : > { %4172 = vrot.lane.b32.xlu1 %v26351_v8, %s26251_s11  ;;  %v1899_v52 = vpop.permute.xlu0 %1898  ;;  %v1901_v53 = vpop.permute.xlu1 %1900  ;;  %2146 = vmatprep.mubr.f32.mxu1 %v31803_v2 }
  0xcd   : > { %v26754_v54 = vsel %vm1910_vm4, %v1897_v48, %v1899_v52  ;;  %25308 = vmatmul.mubr.msk.f32.vlgmr.msra.gmra.mxu1 %vm312_vm1, %v25305_v46  ;;  %2217 = vmatprep.mubr.f32.mxu0 %v31803_v2  ;;  %v26775_v15 = vsel %vm1910_vm4, %v1899_v52, %v1901_v53 }
  0xce   : > { %31932 = vst [vmem:[#allocation5_spill] sm:$0xff] %v26754_v54  ;;  %2183 = vmatprep.subr.mxu0 %v26754_v54  ;;  %2288 = vmatprep.mubr.f32.mxu1 %v31803_v2  ;;  %31935 = vst [vmem:[#allocation8_spill] sm:$0xff] %v26775_v15 }
  0xcf   : > { %4174 = vrot.lane.b32.xlu0 %v26358_v9, %s26251_s11  ;;  %2184 = vmatpush1.msra.mxu0 %v26760_v55 }
  0xd0   : > { %4176 = vrot.lane.b32.xlu1 %v26361_v10, %s26251_s11  ;;  %v1903_v58 = vpop.permute.xlu0 %1902  ;;  %v1905_v59 = vpop.permute.xlu1 %1904  ;;  %25309 = vmatmul.mubr.msk.f32.vlgmr.msra.gmra.mxu0 %vm312_vm1, %v25305_v46 }
  0xd1   : > { %v26770_v60 = vsel %vm1910_vm4, %v1901_v53, %v1903_v58  ;;  %2359 = vmatprep.mubr.f32.mxu0 %v31803_v2  ;;  %v26796_v35 = vsel %vm1910_vm4, %v1903_v58, %v1905_v59  ;;  %v26820_v53 = vld [vmem:[%s31798_s1 + $0x20] sm:$0xff] }
  0xd2   : > { %31934 = vst [vmem:[#allocation7_spill] sm:$0xff] %v26770_v60  ;;  %2254 = vmatprep.subr.mxu1 %v26770_v60  ;;  %31939 = vst [vmem:[#allocation12_spill] sm:$0xff] %v26796_v35 }
  0xd3   : > { %4178 = vrot.lane.b32.xlu0 %v26368_v11, %s26251_s11  ;;  %2255 = vmatpush1.msra.mxu1 %v26775_v15 }
  0xd4   : > { %4180 = vrot.lane.b32.xlu1 %v26371_v12, %s26251_s11  ;;  %v1907_v21 = vpop.permute.xlu0 %1906  ;;  %v26782_v22 = vpop.permute.xlu1 %1908  ;;  %25922 = vmatprep.subr.mxu1 %v31803_v2 }
  0xd5   : > { %31936 = vst [vmem:[#allocation9_spill] sm:$0xff] %v26782_v22  ;;  %25310 = vmatmul.mubr.msk.f32.vlgmr.msra.gmra.mxu1 %vm312_vm1, %v25305_v46  ;;  %v26787_v30 = vsel %vm1910_vm4, %v1905_v59, %v1907_v21  ;;  %v26791_v31 = vsel %vm1910_vm4, %v1907_v21, %v26782_v22 }
  0xd6   : > { %31937 = vst [vmem:[#allocation10_spill] sm:$0xff] %v26787_v30  ;;  %31938 = vst [vmem:[#allocation11_spill] sm:$0xff] %v26791_v31  ;;  %2325 = vmatprep.subr.mxu0 %v26787_v30  ;;  %25923 = vmatpush3.msra.mxu1 %v26791_v31 }
  0xd7   : > { %4182 = vrot.lane.b32.xlu0 %v26378_v13, %s26251_s11  ;;  %2326 = vmatpush1.msra.mxu0 %v26796_v35 }
  0xd8   : > { %4184 = vrot.lane.b32.xlu1 %v26381_v14, %s26251_s11  ;;  %v2454_v38 = vpop.permute.xlu0 %2453  ;;  %v2456_v43 = vpop.permute.xlu1 %2455  ;;  %25311 = vmatmul.mubr.msk.f32.vlgmr.msra.gmra.mxu0 %vm312_vm1, %v25305_v46 }
  0xd9   : > { %v26805_v47 = vsel %vm2479_vm5, %v2454_v38, %v2456_v43  ;;  %25924 = vmatprep.mubr.msk.f32.mxu1 %vm26249_vm2, %v31803_v2  ;;  %2573 = vmatprep.mubr.f32.mxu0 %v31803_v2 }
  0xda   : > { %31940 = vst [vmem:[#allocation13_spill] sm:$0xff] %v26805_v47  ;;  %2539 = vmatprep.subr.mxu0 %v26805_v47  ;;  %25925 = vmatmul.mubr.msk.f32.vlgmr.msra.gmra.mxu1 %vm312_vm1, %v25305_v46 }
  0xdb   : > { %4729 = vrot.lane.b32.xlu0 %v26316_v0, %s26252_s14  ;;  %2644 = vmatprep.mubr.f32.mxu1 %v31803_v2 }
  0xdc   : > { %4731 = vrot.lane.b32.xlu1 %v26328_v3, %s26252_s14  ;;  %v2452_v48 = vpop.permute.xlu0 %2451  ;;  %v2458_v52 = vpop.permute.xlu1 %2457 }
  0xdd   : > { %v2480_v58 = vsel %vm2479_vm5, %v2452_v48, %v2454_v38  ;;  %v26835_v38 = vsel %vm2479_vm5, %v2456_v43, %v2458_v52 }
  0xde   : > { %2540 = vmatpush1.msra.mxu0 %v2480_v58  ;;  %31942 = vst [vmem:[#allocation15_spill] sm:$0xff] %v26835_v38 }
  0xdf   : > { %4727 = vrot.lane.b32.xlu0 %v26319_v1, %s26252_s14  ;;  %25314 = vmatmul.mubr.msk.f32.vlgmr.msra.gmra.mxu0 %vm312_vm1, %v26820_v53 }
  0xe0   : > { %4733 = vrot.lane.b32.xlu1 %v26331_v4, %s26252_s14  ;;  %v2460_v46 = vpop.permute.xlu0 %2459  ;;  %v2462_v59 = vpop.permute.xlu1 %2461  ;;  %2715 = vmatprep.mubr.f32.mxu0 %v31803_v2 }
  0xe1   : > { %v26831_v21 = vsel %vm2479_vm5, %v2458_v52, %v2460_v46  ;;  %v26850_v43 = vsel %vm2479_vm5, %v2460_v46, %v2462_v59 }
  0xe2   : > { %31941 = vst [vmem:[#allocation14_spill] sm:$0xff] %v26831_v21  ;;  %2610 = vmatprep.subr.mxu1 %v26831_v21  ;;  %v31944_v21 = vmov 0.0   ;;  %31945 = vst [vmem:[#allocation17_spill] sm:$0xff] %v26850_v43 }
  0xe3   : > { %4735 = vrot.lane.b32.xlu0 %v26338_v5, %s26252_s14  ;;  %2611 = vmatpush1.msra.mxu1 %v26835_v38 }
  0xe4   : > { %4737 = vrot.lane.b32.xlu1 %v26341_v6, %s26252_s14  ;;  %v2464_v48 = vpop.permute.xlu0 %2463  ;;  %v2466_v58 = vpop.permute.xlu1 %2465  ;;  %25315 = vmatmul.mubr.msk.f32.vlgmr.msra.gmra.mxu1 %vm312_vm1, %v26820_v53 }
  0xe5   : > { %v26845_v2 = vsel %vm2479_vm5, %v2462_v59, %v2464_v48  ;;  %2786 = vmatprep.mubr.f32.mxu1 %v31944_v21  ;;  %v26865_v46 = vsel %vm2479_vm5, %v2464_v48, %v2466_v58 }
  0xe6   : > { %31943 = vst [vmem:[#allocation16_spill] sm:$0xff] %v26845_v2  ;;  %2681 = vmatprep.subr.mxu0 %v26845_v2  ;;  %31947 = vst [vmem:[#allocation19_spill] sm:$0xff] %v26865_v46 }
  0xe7   : > { %4739 = vrot.lane.b32.xlu0 %v26348_v7, %s26252_s14  ;;  %2682 = vmatpush1.msra.mxu0 %v26850_v43 }
  0xe8   : > { %4741 = vrot.lane.b32.xlu1 %v26351_v8, %s26252_s14  ;;  %v2468_v52 = vpop.permute.xlu0 %2467  ;;  %v2470_v47 = vpop.permute.xlu1 %2469  ;;  %25316 = vmatmul.mubr.msk.f32.vlgmr.msra.gmra.mxu0 %vm312_vm1, %v26820_v53 }
  0xe9   : > { %v26860_v38 = vsel %vm2479_vm5, %v2466_v58, %v2468_v52  ;;  %2857 = vmatprep.mubr.f32.mxu0 %v31944_v21  ;;  %v26880_v48 = vsel %vm2479_vm5, %v2468_v52, %v2470_v47 }
  0xea   : > { %31946 = vst [vmem:[#allocation18_spill] sm:$0xff] %v26860_v38  ;;  %2752 = vmatprep.subr.mxu1 %v26860_v38  ;;  %31949 = vst [vmem:[#allocation21_spill] sm:$0xff] %v26880_v48 }
  0xeb   : > { %4743 = vrot.lane.b32.xlu0 %v26358_v9, %s26252_s14  ;;  %2753 = vmatpush1.msra.mxu1 %v26865_v46 }
  0xec   : > { %4745 = vrot.lane.b32.xlu1 %v26361_v10, %s26252_s14  ;;  %v2472_v59 = vpop.permute.xlu0 %2471  ;;  %v2474_v2 = vpop.permute.xlu1 %2473  ;;  %25317 = vmatmul.mubr.msk.f32.vlgmr.msra.gmra.mxu1 %vm312_vm1, %v26820_v53 }
  0xed   : > { %v26875_v43 = vsel %vm2479_vm5, %v2470_v47, %v2472_v59  ;;  %2928 = vmatprep.mubr.f32.mxu1 %v31944_v21  ;;  %v26902_v52 = vsel %vm2479_vm5, %v2472_v59, %v2474_v2 }
  0xee   : > { %31948 = vst [vmem:[#allocation20_spill] sm:$0xff] %v26875_v43  ;;  %2823 = vmatprep.subr.mxu0 %v26875_v43  ;;  %31953 = vst [vmem:[#allocation25_spill] sm:$0xff] %v26902_v52 }
  0xef   : > { %4747 = vrot.lane.b32.xlu0 %v26368_v11, %s26252_s14  ;;  %2824 = vmatpush1.msra.mxu0 %v26880_v48 }
  0xf0   : > { %4749 = vrot.lane.b32.xlu1 %v26371_v12, %s26252_s14  ;;  %v2476_v58 = vpop.permute.xlu0 %2475  ;;  %v26887_v38 = vpop.permute.xlu1 %2477  ;;  %25927 = vmatprep.subr.mxu0 %v31944_v21 }
  0xf1   : > { %31950 = vst [vmem:[#allocation22_spill] sm:$0xff] %v26887_v38  ;;  %25318 = vmatmul.mubr.msk.f32.vlgmr.msra.gmra.mxu0 %vm312_vm1, %v26820_v53  ;;  %v26893_v43 = vsel %vm2479_vm5, %v2474_v2, %v2476_v58  ;;  %v26897_v47 = vsel %vm2479_vm5, %v2476_v58, %v26887_v38  ;;  %v25321_v38 = vld [vmem:[%s31798_s1 + $0x28] sm:$0xff] }
  0xf2   : > { %31951 = vst [vmem:[#allocation23_spill] sm:$0xff] %v26893_v43  ;;  %31952 = vst [vmem:[#allocation24_spill] sm:$0xff] %v26897_v47  ;;  %2894 = vmatprep.subr.mxu1 %v26893_v43  ;;  %25928 = vmatpush3.msra.mxu0 %v26897_v47 }
  0xf3   : > { %4751 = vrot.lane.b32.xlu0 %v26378_v13, %s26252_s14  ;;  %2895 = vmatpush1.msra.mxu1 %v26902_v52 }
  0xf4   : > { %4753 = vrot.lane.b32.xlu1 %v26381_v14, %s26252_s14  ;;  %v3023_v48 = vpop.permute.xlu0 %3022  ;;  %v3025_v46 = vpop.permute.xlu1 %3024  ;;  %25319 = vmatmul.mubr.msk.f32.vlgmr.msra.gmra.mxu1 %vm312_vm1, %v26820_v53 }
  0xf5   : > { %v3050_v58 = vsel %vm3048_vm6, %v3023_v48, %v3025_v46  ;;  %25929 = vmatprep.mubr.msk.f32.mxu0 %vm26249_vm2, %v31944_v21  ;;  %3142 = vmatprep.mubr.f32.mxu1 %v31944_v21 }
  0xf6   : > { %3108 = vmatprep.subr.mxu1 %v3050_v58  ;;  %25930 = vmatmul.mubr.msk.f32.vlgmr.msra.gmra.mxu0 %vm312_vm1, %v26820_v53 }
  0xf7   : > { %5298 = vrot.lane.b32.xlu0 %v26316_v0, %s26253_s17  ;;  %3213 = vmatprep.mubr.f32.mxu0 %v31944_v21 }
  0xf8   : > { %5300 = vrot.lane.b32.xlu1 %v26328_v3, %s26253_s17  ;;  %v3021_v2 = vpop.permute.xlu0 %3020  ;;  %v3027_v59 = vpop.permute.xlu1 %3026 }
  0xf9   : > { %v3049_v58 = vsel %vm3048_vm6, %v3021_v2, %v3023_v48  ;;  %v3051_v52 = vsel %vm3048_vm6, %v3025_v46, %v3027_v59 }
  0xfa   : > { %3109 = vmatpush1.msra.mxu1 %v3049_v58 }
  0xfb   : > { %5296 = vrot.lane.b32.xlu0 %v26319_v1, %s26253_s17  ;;  %25322 = vmatmul.mubr.msk.f32.vlgmr.msra.gmra.mxu1 %vm312_vm1, %v25321_v38 }
  0xfc   : > { %5302 = vrot.lane.b32.xlu1 %v26331_v4, %s26253_s17  ;;  %v3029_v53 = vpop.permute.xlu0 %3028  ;;  %3284 = vmatprep.mubr.f32.mxu1 %v31944_v21 }
  0xfd   : > { %v3031_v43 = vpop.permute.xlu1 %3030  ;;  %v3052_v47 = vsel %vm3048_vm6, %v3027_v59, %v3029_v53 }
  0xfe   : > { %3179 = vmatprep.subr.mxu0 %v3052_v47  ;;  %v3053_v47 = vsel %vm3048_vm6, %v3029_v53, %v3031_v43 }
  0xff   : > { %5304 = vrot.lane.b32.xlu0 %v26338_v5, %s26253_s17  ;;  %3180 = vmatpush1.msra.mxu0 %v3051_v52 }
 0x100   : > { %5306 = vrot.lane.b32.xlu1 %v26341_v6, %s26253_s17  ;;  %v3033_v48 = vpop.permute.xlu0 %3032  ;;  %25323 = vmatmul.mubr.msk.f32.vlgmr.msra.gmra.mxu0 %vm312_vm1, %v25321_v38 }
 0x101   : > { %v3035_v2 = vpop.permute.xlu1 %3034  ;;  %v3054_v58 = vsel %vm3048_vm6, %v3031_v43, %v3033_v48  ;;  %3355 = vmatprep.mubr.f32.mxu0 %v31944_v21 }
 0x102   : > { %3250 = vmatprep.subr.mxu1 %v3054_v58  ;;  %v3055_v58 = vsel %vm3048_vm6, %v3033_v48, %v3035_v2 }
 0x103   : > { %5308 = vrot.lane.b32.xlu0 %v26348_v7, %s26253_s17  ;;  %3251 = vmatpush1.msra.mxu1 %v3053_v47 }
 0x104   : > { %5310 = vrot.lane.b32.xlu1 %v26351_v8, %s26253_s17  ;;  %v3037_v46 = vpop.permute.xlu0 %3036  ;;  %25324 = vmatmul.mubr.msk.f32.vlgmr.msra.gmra.mxu1 %vm312_vm1, %v25321_v38 }
 0x105   : > { %v3039_v52 = vpop.permute.xlu1 %3038  ;;  %v3056_v59 = vsel %vm3048_vm6, %v3035_v2, %v3037_v46  ;;  %3426 = vmatprep.mubr.f32.mxu1 %v31944_v21 }
 0x106   : > { %3321 = vmatprep.subr.mxu0 %v3056_v59  ;;  %v3057_v59 = vsel %vm3048_vm6, %v3037_v46, %v3039_v52 }
 0x107   : > { %5312 = vrot.lane.b32.xlu0 %v26358_v9, %s26253_s17  ;;  %3322 = vmatpush1.msra.mxu0 %v3055_v58 }
 0x108   : > { %5314 = vrot.lane.b32.xlu1 %v26361_v10, %s26253_s17  ;;  %v3041_v43 = vpop.permute.xlu0 %3040  ;;  %25325 = vmatmul.mubr.msk.f32.vlgmr.msra.gmra.mxu0 %vm312_vm1, %v25321_v38 }
 0x109   : > { %v3043_v53 = vpop.permute.xlu1 %3042  ;;  %v3058_v47 = vsel %vm3048_vm6, %v3039_v52, %v3041_v43  ;;  %3497 = vmatprep.mubr.f32.mxu0 %v31944_v21 }
 0x10a   : > { %3392 = vmatprep.subr.mxu1 %v3058_v47  ;;  %v3059_v46 = vsel %vm3048_vm6, %v3041_v43, %v3043_v53  ;;  %v26985_v43 = vld [vmem:[%s31798_s1 + $0x30] sm:$0xff] }
 0x10b   : > { %5316 = vrot.lane.b32.xlu0 %v26368_v11, %s26253_s17  ;;  %3393 = vmatpush1.msra.mxu1 %v3057_v59 }
 0x10c   : > { %5318 = vrot.lane.b32.xlu1 %v26371_v12, %s26253_s17  ;;  %v3045_v48 = vpop.permute.xlu0 %3044  ;;  %25932 = vmatprep.subr.mxu1 %v31944_v21 }
 0x10d   : > { %v3047_v2 = vpop.permute.xlu1 %3046  ;;  %25326 = vmatmul.mubr.msk.f32.vlgmr.msra.gmra.mxu1 %vm312_vm1, %v25321_v38  ;;  %v3060_v58 = vsel %vm3048_vm6, %v3043_v53, %v3045_v48 }
 0x10e   : > { %v3061_v30 = vsel %vm3048_vm6, %v3045_v48, %v3047_v2  ;;  %3463 = vmatprep.subr.mxu0 %v3060_v58  ;;  %25934 = vmatprep.mubr.msk.f32.mxu1 %vm26249_vm2, %v31944_v21 }
 0x10f   : > { %5320 = vrot.lane.b32.xlu0 %v26378_v13, %s26253_s17  ;;  %25933 = vmatpush3.msra.mxu1 %v3061_v30 }
 0x110   : > { %5322 = vrot.lane.b32.xlu1 %v26381_v14, %s26253_s17  ;;  %3464 = vmatpush1.msra.mxu0 %v3059_v46  ;;  %v3592_v52 = vpop.permute.xlu0 %3591  ;;  %s26268_s17 = smov 56  }
 0x111   : > { %v3594_v47 = vpop.permute.xlu1 %3593  ;;  %25327 = vmatmul.mubr.msk.f32.vlgmr.msra.gmra.mxu0 %vm312_vm1, %v25321_v38  ;;  %25935 = vmatmul.mubr.msk.f32.vlgmr.msra.gmra.mxu1 %vm312_vm1, %v25321_v38 }
 0x112   : > { %v3619_v59 = vsel %vm3617_vm7, %v3592_v52, %v3594_v47  ;;  %3711 = vmatprep.mubr.f32.mxu0 %v31944_v21  ;;  %3782 = vmatprep.mubr.f32.mxu1 %v31944_v21 }
 0x113   : > { %5867 = vrot.lane.b32.xlu0 %v26316_v0, %s26254_s22  ;;  %3677 = vmatprep.subr.mxu0 %v3619_v59 }
 0x114   : > { %5869 = vrot.lane.b32.xlu1 %v26328_v3, %s26254_s22  ;;  %v3590_v30 = vpop.permute.xlu0 %3589 }
 0x115   : > { %v3618_v38 = vsel %vm3617_vm7, %v3590_v30, %v3592_v52  ;;  %v3596_v53 = vpop.permute.xlu1 %3595  ;;  %v27040_v30 = vld [vmem:[%s26313_s23 + $0x8] sm:$0xff] }
 0x116   : > { %3678 = vmatpush1.msra.mxu0 %v3618_v38  ;;  %v3620_v2 = vsel %vm3617_vm7, %v3594_v47, %v3596_v53 }
 0x117   : > { %5865 = vrot.lane.b32.xlu0 %v26319_v1, %s26254_s22  ;;  %25330 = vmatmul.mubr.msk.f32.vlgmr.msra.gmra.mxu0 %vm312_vm1, %v26985_v43 }
 0x118   : > { %5871 = vrot.lane.b32.xlu1 %v26331_v4, %s26254_s22  ;;  %3853 = vmatprep.mubr.f32.mxu0 %v31944_v21 }
 0x119   : > { %v3598_v0 = vpop.permute.xlu0 %3597  ;;  %v3600_v3 = vpop.permute.xlu1 %3599 }
 0x11a   : > { %v3621_v48 = vsel %vm3617_vm7, %v3596_v53, %v3598_v0  ;;  %v3622_v58 = vsel %vm3617_vm7, %v3598_v0, %v3600_v3 }
 0x11b   : > { %5873 = vrot.lane.b32.xlu0 %v26338_v5, %s26254_s22  ;;  %3748 = vmatprep.subr.mxu1 %v3621_v48 }
 0x11c   : > { %5875 = vrot.lane.b32.xlu1 %v26341_v6, %s26254_s22  ;;  %3749 = vmatpush1.msra.mxu1 %v3620_v2  ;;  %v27063_v2 = vld [vmem:[%s26313_s23 + $0x18] sm:$0xff] }
 0x11d   : > { %25331 = vmatmul.mubr.msk.f32.vlgmr.msra.gmra.mxu1 %vm312_vm1, %v26985_v43 }
 0x11e   : > { %3924 = vmatprep.mubr.f32.mxu1 %v31944_v21 }
 0x11f   : > { %5877 = vrot.lane.b32.xlu0 %v26348_v7, %s26254_s22  ;;  %v3602_v1 = vpop.permute.xlu0 %3601 }
 0x120   : > { %5879 = vrot.lane.b32.xlu1 %v26351_v8, %s26254_s22  ;;  %v3604_v4 = vpop.permute.xlu1 %3603  ;;  %v3623_v5 = vsel %vm3617_vm7, %v3600_v3, %v3602_v1  ;;  %v27056_v3 = vld [vmem:[%s26313_s23] sm:$0xff] }
 0x121   : > { %3819 = vmatprep.subr.mxu0 %v3623_v5  ;;  %v3624_v46 = vsel %vm3617_vm7, %v3602_v1, %v3604_v4  ;;  %v27070_v1 = vld [vmem:[%s31798_s1 + $0x38] sm:$0xff] }
 0x122   : > { %3820 = vmatpush1.msra.mxu0 %v3622_v58  ;;  %v27074_v58 = vld [vmem:[%s26313_s23 + $0x20] sm:$0xff] }
 0x123   : > { %5881 = vrot.lane.b32.xlu0 %v26358_v9, %s26254_s22  ;;  %25332 = vmatmul.mubr.msk.f32.vlgmr.msra.gmra.mxu0 %vm312_vm1, %v26985_v43 }
 0x124   : > { %5883 = vrot.lane.b32.xlu1 %v26361_v10, %s26254_s22  ;;  %3995 = vmatprep.mubr.f32.mxu0 %v31944_v21 }
 0x125   : > { %v3606_v6 = vpop.permute.xlu0 %3605  ;;  %v3608_v7 = vpop.permute.xlu1 %3607 }
 0x126   : > { %v3625_v8 = vsel %vm3617_vm7, %v3604_v4, %v3606_v6 }
 0x127   : > { %5885 = vrot.lane.b32.xlu0 %v26368_v11, %s26254_s22  ;;  %3890 = vmatprep.subr.mxu1 %v3625_v8  ;;  %v3626_v11 = vsel %vm3617_vm7, %v3606_v6, %v3608_v7  ;;  %v27079_v6 = vld [vmem:[%s26313_s23 + $0x28] sm:$0xff] }
 0x128   : > { %5887 = vrot.lane.b32.xlu1 %v26371_v12, %s26254_s22  ;;  %3891 = vmatpush1.msra.mxu1 %v3624_v46 }
 0x129   : > { %v3610_v9 = vpop.permute.xlu0 %3609  ;;  %25333 = vmatmul.mubr.msk.f32.vlgmr.msra.gmra.mxu1 %vm312_vm1, %v26985_v43 }
 0x12a   : > { %v3612_v10 = vpop.permute.xlu1 %3611  ;;  %v3627_v52 = vsel %vm3617_vm7, %v3608_v7, %v3610_v9  ;;  %4066 = vmatprep.mubr.f32.mxu1 %v31944_v21 }
 0x12b   : > { %5889 = vrot.lane.b32.xlu0 %v26378_v13, %s26254_s22  ;;  %3961 = vmatprep.subr.mxu0 %v3627_v52  ;;  %v3628_v38 = vsel %vm3617_vm7, %v3610_v9, %v3612_v10  ;;  %v27088_v9 = vld [vmem:[%s26313_s23 + $0x30] sm:$0xff]  ;;  %v27094_v52 = vld [vmem:[%s26313_s23 + $0x38] sm:$0xff] }
 0x12c   : > { %5891 = vrot.lane.b32.xlu1 %v26381_v14, %s26254_s22  ;;  %3962 = vmatpush1.msra.mxu0 %v3626_v11  ;;  %v27045_v14 = vld [vmem:[%s26313_s23 + $0x10] sm:$0xff] }
 0x12d   : > { %v3614_v12 = vpop.permute.xlu0 %3613  ;;  %25937 = vmatprep.subr.mxu0 %v31944_v21  ;;  %25334 = vmatmul.mubr.msk.f32.vlgmr.msra.gmra.mxu0 %vm312_vm1, %v26985_v43 }
 0x12e   : > { %v3616_v47 = vpop.permute.xlu1 %3615  ;;  %v3629_v59 = vsel %vm3617_vm7, %v3612_v10, %v3614_v12  ;;  %25939 = vmatprep.mubr.msk.f32.mxu0 %vm26249_vm2, %v31944_v21 }
 0x12f   : > { %v3630_v13 = vsel %vm3617_vm7, %v3614_v12, %v3616_v47  ;;  %6436 = vrot.lane.b32.xlu0 %v27040_v30, %s26255_s6  ;;  %4032 = vmatprep.subr.mxu1 %v3629_v59  ;;  %v27103_v59 = vld [vmem:[%s26313_s23 + $0x40] sm:$0xff]  ;;  %vm8738_vm7 = vcmask 261120  }
 0x130   : > { %6438 = vrot.lane.b32.xlu1 %v27045_v14, %s26255_s6  ;;  %25938 = vmatpush3.msra.mxu0 %v3630_v13 }
 0x131   : > { %4033 = vmatpush1.msra.mxu1 %v3628_v38  ;;  %v4161_v53 = vpop.permute.xlu0 %4160  ;;  %25940 = vmatmul.mubr.msk.f32.vlgmr.msra.gmra.mxu0 %vm312_vm1, %v26985_v43  ;;  %v27109_v38 = vld [vmem:[%s26313_s23 + $0x48] sm:$0xff] }
 0x132   : > { %v4163_v0 = vpop.permute.xlu1 %4162  ;;  %25335 = vmatmul.mubr.msk.f32.vlgmr.msra.gmra.mxu1 %vm312_vm1, %v26985_v43  ;;  %4351 = vmatprep.mubr.f32.mxu0 %v31944_v21 }
 0x133   : > { %6434 = vrot.lane.b32.xlu0 %v27056_v3, %s26255_s6  ;;  %v4188_v48 = vsel %vm4186_vm8, %v4161_v53, %v4163_v0  ;;  %4280 = vmatprep.mubr.f32.mxu1 %v31944_v21 }
 0x134   : > { %6440 = vrot.lane.b32.xlu1 %v27063_v2, %s26255_s6  ;;  %4246 = vmatprep.subr.mxu1 %v4188_v48 }
 0x135   : > { %v4159_v43 = vpop.permute.xlu0 %4158 }
 0x136   : > { %v4187_v4 = vsel %vm4186_vm8, %v4159_v43, %v4161_v53  ;;  %v4165_v5 = vpop.permute.xlu1 %4164  ;;  %v27118_v43 = vld [vmem:[%s26313_s23 + $0x50] sm:$0xff] }
 0x137   : > { %6442 = vrot.lane.b32.xlu0 %v27074_v58, %s26255_s6  ;;  %4247 = vmatpush1.msra.mxu1 %v4187_v4  ;;  %v4189_v10 = vsel %vm4186_vm8, %v4163_v0, %v4165_v5 }
 0x138   : > { %6444 = vrot.lane.b32.xlu1 %v27079_v6, %s26255_s6  ;;  %25338 = vmatmul.mubr.msk.f32.vlgmr.msra.gmra.mxu1 %vm312_vm1, %v27070_v1 }
 0x139   : > { %v4167_v7 = vpop.permute.xlu0 %4166  ;;  %4422 = vmatprep.mubr.f32.mxu1 %v31944_v21 }
 0x13a   : > { %v4169_v8 = vpop.permute.xlu1 %4168  ;;  %v4190_v46 = vsel %vm4186_vm8, %v4165_v5, %v4167_v7  ;;  %v27124_v5 = vld [vmem:[%s26313_s23 + $0x58] sm:$0xff] }
 0x13b   : > { %6446 = vrot.lane.b32.xlu0 %v27088_v9, %s26255_s6  ;;  %4317 = vmatprep.subr.mxu0 %v4190_v46  ;;  %v4191_v13 = vsel %vm4186_vm8, %v4167_v7, %v4169_v8 }
 0x13c   : > { %6448 = vrot.lane.b32.xlu1 %v27094_v52, %s26255_s6  ;;  %4318 = vmatpush1.msra.mxu0 %v4189_v10  ;;  %v27133_v10 = vld [vmem:[%s26313_s23 + $0x60] sm:$0xff] }
 0x13d   : > { %v4171_v11 = vpop.permute.xlu0 %4170  ;;  %25339 = vmatmul.mubr.msk.f32.vlgmr.msra.gmra.mxu0 %vm312_vm1, %v27070_v1 }
 0x13e   : > { %v4173_v12 = vpop.permute.xlu1 %4172  ;;  %v4192_v47 = vsel %vm4186_vm8, %v4169_v8, %v4171_v11  ;;  %4493 = vmatprep.mubr.f32.mxu0 %v31944_v21 }
 0x13f   : > { %6450 = vrot.lane.b32.xlu0 %v27103_v59, %s26255_s6  ;;  %4388 = vmatprep.subr.mxu1 %v4192_v47  ;;  %v4193_v4 = vsel %vm4186_vm8, %v4171_v11, %v4173_v12 }
 0x140   : > { %6452 = vrot.lane.b32.xlu1 %v27109_v38, %s26255_s6  ;;  %4389 = vmatpush1.msra.mxu1 %v4191_v13 }
 0x141   : > { %v4175_v53 = vpop.permute.xlu0 %4174  ;;  %25340 = vmatmul.mubr.msk.f32.vlgmr.msra.gmra.mxu1 %vm312_vm1, %v27070_v1 }
 0x142   : > { %v4177_v0 = vpop.permute.xlu1 %4176  ;;  %v4194_v48 = vsel %vm4186_vm8, %v4173_v12, %v4175_v53  ;;  %4564 = vmatprep.mubr.f32.mxu1 %v31944_v21  ;;  %v27139_v12 = vld [vmem:[%s26313_s23 + $0x68] sm:$0xff] }
 0x143   : > { %6454 = vrot.lane.b32.xlu0 %v27118_v43, %s26255_s6  ;;  %4459 = vmatprep.subr.mxu0 %v4194_v48  ;;  %v4195_v11 = vsel %vm4186_vm8, %v4175_v53, %v4177_v0 }
 0x144   : > { %6456 = vrot.lane.b32.xlu1 %v27124_v5, %s26255_s6  ;;  %4460 = vmatpush1.msra.mxu0 %v4193_v4 }
 0x145   : > { %v4179_v7 = vpop.permute.xlu0 %4178  ;;  %25341 = vmatmul.mubr.msk.f32.vlgmr.msra.gmra.mxu0 %vm312_vm1, %v27070_v1 }
 0x146   : > { %v4181_v8 = vpop.permute.xlu1 %4180  ;;  %v4196_v46 = vsel %vm4186_vm8, %v4177_v0, %v4179_v7  ;;  %4635 = vmatprep.mubr.f32.mxu0 %v31944_v21 }
 0x147   : > { %6458 = vrot.lane.b32.xlu0 %v27133_v10, %s26255_s6  ;;  %4530 = vmatprep.subr.mxu1 %v4196_v46  ;;  %v4197_v0 = vsel %vm4186_vm8, %v4179_v7, %v4181_v8 }
 0x148   : > { %6460 = vrot.lane.b32.xlu1 %v27139_v12, %s26255_s6  ;;  %4531 = vmatpush1.msra.mxu1 %v4195_v11  ;;  %s26265_s6 = smov 122  }
 0x149   : > { %v4183_v47 = vpop.permute.xlu0 %4182  ;;  %25942 = vmatprep.subr.mxu1 %v31944_v21  ;;  %25342 = vmatmul.mubr.msk.f32.vlgmr.msra.gmra.mxu1 %vm312_vm1, %v27070_v1 }
 0x14a   : > { %v4185_v13 = vpop.permute.xlu1 %4184  ;;  %v4198_v48 = vsel %vm4186_vm8, %v4181_v8, %v4183_v47  ;;  %25944 = vmatprep.mubr.msk.f32.mxu1 %vm26249_vm2, %v31944_v21 }
 0x14b   : > { %v4199_v53 = vsel %vm4186_vm8, %v4183_v47, %v4185_v13  ;;  %7005 = vrot.lane.b32.xlu0 %v27040_v30, %s26256_s9  ;;  %4601 = vmatprep.subr.mxu0 %v4198_v48  ;;  %vm9307_vm8 = vcmask 252928  }
 0x14c   : > { %7007 = vrot.lane.b32.xlu1 %v27045_v14, %s26256_s9  ;;  %25943 = vmatpush3.msra.mxu1 %v4199_v53  ;;  %v27157_v46 = vpop.f32.mrf.mxu0 }
 0x14d   : > { %4602 = vmatpush1.msra.mxu0 %v4197_v0  ;;  %v4730_v4 = vpop.permute.xlu0 %4729  ;;  %25945 = vmatmul.mubr.msk.f32.vlgmr.msra.gmra.mxu1 %vm312_vm1, %v27070_v1 }
 0x14e   : > { %v4732_v11 = vpop.permute.xlu1 %4731  ;;  %25343 = vmatmul.mubr.msk.f32.vlgmr.msra.gmra.mxu0 %vm312_vm1, %v27070_v1  ;;  %4920 = vmatprep.mubr.f32.mxu1 %v31944_v21  ;;  %v27168_v7 = vpop.f32.mrf.mxu0  ;;  %v27173_v1 = vld [vmem:[%s31798_s1 + $0x40] sm:$0xff] }
 0x14f   : > { %7003 = vrot.lane.b32.xlu0 %v27056_v3, %s26256_s9  ;;  %v4757_v47 = vsel %vm4755_vm9, %v4730_v4, %v4732_v11  ;;  %4849 = vmatprep.mubr.f32.mxu0 %v31944_v21  ;;  %31954 = vst [vmem:[#allocation26_spill] sm:$0xff] %v27168_v7 }
 0x150   : > { %7009 = vrot.lane.b32.xlu1 %v27063_v2, %s26256_s9  ;;  %4815 = vmatprep.subr.mxu0 %v4757_v47  ;;  %v27175_v13 = vpop.f32.mrf.mxu1 }
 0x151   : > { %v4728_v8 = vpop.permute.xlu0 %4727 }
 0x152   : > { %v4756_v48 = vsel %vm4755_vm9, %v4728_v8, %v4730_v4  ;;  %v4734_v53 = vpop.permute.xlu1 %4733  ;;  %v27187_v7 = vpop.f32.mrf.mxu1 }
 0x153   : > { %7011 = vrot.lane.b32.xlu0 %v27074_v58, %s26256_s9  ;;  %4816 = vmatpush1.msra.mxu0 %v4756_v48  ;;  %31955 = vst [vmem:[#allocation27_spill] sm:$0xff] %v27187_v7  ;;  %v4758_v8 = vsel %vm4755_vm9, %v4732_v11, %v4734_v53 }
 0x154   : > { %7013 = vrot.lane.b32.xlu1 %v27079_v6, %s26256_s9  ;;  %25346 = vmatmul.mubr.msk.f32.vlgmr.msra.gmra.mxu0 %vm312_vm1, %v27173_v1  ;;  %v27184_v0 = vpop.f32.mrf.mxu0 }
 0x155   : > { %v4736_v47 = vpop.permute.xlu0 %4735  ;;  %4991 = vmatprep.mubr.f32.mxu0 %v31944_v21 }
 0x156   : > { %v4738_v22 = vpop.permute.xlu1 %4737  ;;  %v4759_v4 = vsel %vm4755_vm9, %v4734_v53, %v4736_v47  ;;  %v27195_v48 = vpop.f32.mrf.mxu0 }
 0x157   : > { %7015 = vrot.lane.b32.xlu0 %v27088_v9, %s26256_s9  ;;  %4886 = vmatprep.subr.mxu1 %v4759_v4  ;;  %31956 = vst [vmem:[#allocation28_spill] sm:$0xff] %v27195_v48  ;;  %v4760_v11 = vsel %vm4755_vm9, %v4736_v47, %v4738_v22 }
 0x158   : > { %7017 = vrot.lane.b32.xlu1 %v27094_v52, %s26256_s9  ;;  %4887 = vmatpush1.msra.mxu1 %v4758_v8  ;;  %v27199_v7 = vpop.f32.mrf.mxu1 }
 0x159   : > { %v4740_v31 = vpop.permute.xlu0 %4739  ;;  %25347 = vmatmul.mubr.msk.f32.vlgmr.msra.gmra.mxu1 %vm312_vm1, %v27173_v1 }
 0x15a   : > { %v4742_v60 = vpop.permute.xlu1 %4741  ;;  %v4761_v54 = vsel %vm4755_vm9, %v4738_v22, %v4740_v31  ;;  %5062 = vmatprep.mubr.f32.mxu1 %v31944_v21  ;;  %v27212_v8 = vpop.f32.mrf.mxu1 }
 0x15b   : > { %7019 = vrot.lane.b32.xlu0 %v27103_v59, %s26256_s9  ;;  %4957 = vmatprep.subr.mxu0 %v4761_v54  ;;  %31957 = vst [vmem:[#allocation29_spill] sm:$0xff] %v27212_v8  ;;  %v4762_v22 = vsel %vm4755_vm9, %v4740_v31, %v4742_v60 }
 0x15c   : > { %7021 = vrot.lane.b32.xlu1 %v27109_v38, %s26256_s9  ;;  %4958 = vmatpush1.msra.mxu0 %v4760_v11  ;;  %v27208_v53 = vpop.f32.mrf.mxu0 }
 0x15d   : > { %v4744_v4 = vpop.permute.xlu0 %4743  ;;  %25348 = vmatmul.mubr.msk.f32.vlgmr.msra.gmra.mxu0 %vm312_vm1, %v27173_v1 }
 0x15e   : > { %v4746_v48 = vpop.permute.xlu1 %4745  ;;  %v4763_v35 = vsel %vm4755_vm9, %v4742_v60, %v4744_v4  ;;  %5133 = vmatprep.mubr.f32.mxu0 %v31944_v21  ;;  %v27216_v54 = vpop.f32.mrf.mxu0 }
 0x15f   : > { %31958 = vst [vmem:[#allocation30_spill] sm:$0xff] %v27216_v54  ;;  %7023 = vrot.lane.b32.xlu0 %v27118_v43, %s26256_s9  ;;  %5028 = vmatprep.subr.mxu1 %v4763_v35  ;;  %v4764_v60 = vsel %vm4755_vm9, %v4744_v4, %v4746_v48 }
 0x160   : > { %7025 = vrot.lane.b32.xlu1 %v27124_v5, %s26256_s9  ;;  %5029 = vmatpush1.msra.mxu1 %v4762_v22  ;;  %v27223_v47 = vpop.f32.mrf.mxu0 }
 0x161   : > { %v4748_v11 = vpop.permute.xlu0 %4747  ;;  %25349 = vmatmul.mubr.msk.f32.vlgmr.msra.gmra.mxu1 %vm312_vm1, %v27173_v1  ;;  %v27227_v8 = vpop.f32.mrf.mxu1 }
 0x162   : > { %v4750_v15 = vpop.permute.xlu1 %4749  ;;  %v4765_v54 = vsel %vm4755_vm9, %v4746_v48, %v4748_v11  ;;  %5204 = vmatprep.mubr.f32.mxu1 %v31944_v21  ;;  %v25911_v35 = vpop.f32.mrf.mxu0 }
 0x163   : > { %7027 = vrot.lane.b32.xlu0 %v27133_v10, %s26256_s9  ;;  %5099 = vmatprep.subr.mxu0 %v4765_v54  ;;  %v27234_v31 = vpop.f32.mrf.mxu1 }
 0x164   : > { %31959 = vst [vmem:[#allocation31_spill] sm:$0xff] %v27234_v31  ;;  %7029 = vrot.lane.b32.xlu1 %v27139_v12, %s26256_s9  ;;  %5100 = vmatpush1.msra.mxu0 %v4764_v60 }
 0x165   : > { %v4752_v22 = vpop.permute.xlu0 %4751  ;;  %25947 = vmatprep.subr.mxu0 %v31944_v21  ;;  %25350 = vmatmul.mubr.msk.f32.vlgmr.msra.gmra.mxu0 %vm312_vm1, %v27173_v1  ;;  %v881_v49 = vpop.f32.mrf.mxu1 }
 0x166   : > { %v4754_v35 = vpop.permute.xlu1 %4753  ;;  %v4767_v44 = vsel %vm4755_vm9, %v4750_v15, %v4752_v22  ;;  %25949 = vmatprep.mubr.msk.f32.mxu0 %vm26249_vm2, %v31944_v21  ;;  %v27245_v48 = vadd.f32 %v881_v49, %v27157_v46  ;;  %v952_v4 = vpop.f32.mrf.mxu0  ;;  %v4766_v49 = vsel %vm4755_vm9, %v4748_v11, %v4750_v15 }
 0x167   : > { %v4768_v54 = vsel %vm4755_vm9, %v4752_v22, %v4754_v35  ;;  %7574 = vrot.lane.b32.xlu0 %v27040_v30, %s26257_s12  ;;  %5170 = vmatprep.subr.mxu1 %v4767_v44  ;;  %v27251_v60 = vadd.f32 %v952_v4, %v27175_v13  ;;  %v27253_v31 = vpop.f32.mrf.mxu1  ;;  %vm9876_vm9 = vcmask 244736  }
 0x168   : > { %31960 = vst [vmem:[#allocation32_spill] sm:$0xff] %v27253_v31  ;;  %7576 = vrot.lane.b32.xlu1 %v27045_v14, %s26257_s12  ;;  %25948 = vmatpush3.msra.mxu0 %v4768_v54  ;;  %v27258_v46 = vpop.f32.mrf.mxu0  ;;  %v27278_v54 = vld [vmem:[%s31798_s1 + $0x48] sm:$0xff] }
 0x169   : > { %31961 = vst [vmem:[#allocation33_spill] sm:$0xff] %v27258_v46  ;;  %5171 = vmatpush1.msra.mxu1 %v4766_v49  ;;  %v5299_v22 = vpop.permute.xlu0 %5298  ;;  %25950 = vmatmul.mubr.msk.f32.vlgmr.msra.gmra.mxu0 %vm312_vm1, %v27173_v1 }
 0x16a   : > { %v5301_v44 = vpop.permute.xlu1 %5300  ;;  %25351 = vmatmul.mubr.msk.f32.vlgmr.msra.gmra.mxu1 %vm312_vm1, %v27173_v1  ;;  %5489 = vmatprep.mubr.f32.mxu0 %v31944_v21 }
 0x16b   : > { %7572 = vrot.lane.b32.xlu0 %v27056_v3, %s26257_s12  ;;  %v5326_v13 = vsel %vm5324_vm10, %v5299_v22, %v5301_v44  ;;  %5418 = vmatprep.mubr.f32.mxu1 %v31944_v21  ;;  %v1023_v15 = vpop.f32.mrf.mxu1  ;;  %v1094_v11 = vpop.f32.mrf.mxu0 }
 0x16c   : > { %7578 = vrot.lane.b32.xlu1 %v27063_v2, %s26257_s12  ;;  %5384 = vmatprep.subr.mxu1 %v5326_v13  ;;  %v1024_v35 = vadd.f32 %v1023_v15, %v27184_v0  ;;  %v27273_v4 = vadd.f32 %v1094_v11, %v27199_v7 }
 0x16d   : > { %v5297_v1 = vpop.permute.xlu0 %5296  ;;  %v27280_v49 = vpop.f32.mrf.mxu1 }
 0x16e   : > { %31962 = vst [vmem:[#allocation34_spill] sm:$0xff] %v27280_v49  ;;  %v5325_v46 = vsel %vm5324_vm10, %v5297_v1, %v5299_v22  ;;  %v5303_v31 = vpop.permute.xlu1 %5302  ;;  %v27283_v55 = vpop.f32.mrf.mxu0 }
 0x16f   : > { %31963 = vst [vmem:[#allocation35_spill] sm:$0xff] %v27283_v55  ;;  %7580 = vrot.lane.b32.xlu0 %v27074_v58, %s26257_s12  ;;  %5385 = vmatpush1.msra.mxu1 %v5325_v46  ;;  %v5327_v55 = vsel %vm5324_vm10, %v5301_v44, %v5303_v31 }
 0x170   : > { %7582 = vrot.lane.b32.xlu1 %v27079_v6, %s26257_s12  ;;  %25354 = vmatmul.mubr.msk.f32.vlgmr.msra.gmra.mxu1 %vm312_vm1, %v27278_v54  ;;  %v1165_v7 = vpop.f32.mrf.mxu1 }
 0x171   : > { %v5305_v0 = vpop.permute.xlu0 %5304  ;;  %5560 = vmatprep.mubr.f32.mxu1 %v31944_v21  ;;  %v1166_v13 = vadd.f32 %v1165_v7, %v27208_v53  ;;  %v1236_v22 = vpop.f32.mrf.mxu0 }
 0x172   : > { %v5307_v15 = vpop.permute.xlu1 %5306  ;;  %v5328_v11 = vsel %vm5324_vm10, %v5303_v31, %v5305_v0  ;;  %v27295_v1 = vadd.f32 %v1236_v22, %v27227_v8  ;;  %v27297_v46 = vpop.f32.mrf.mxu1 }
 0x173   : > { %31964 = vst [vmem:[#allocation36_spill] sm:$0xff] %v27297_v46  ;;  %7584 = vrot.lane.b32.xlu0 %v27088_v9, %s26257_s12  ;;  %5455 = vmatprep.subr.mxu0 %v5328_v11  ;;  %v27302_v49 = vpop.f32.mrf.mxu0 }
 0x174   : > { %31965 = vst [vmem:[#allocation37_spill] sm:$0xff] %v27302_v49  ;;  %7586 = vrot.lane.b32.xlu1 %v27094_v52, %s26257_s12  ;;  %5456 = vmatpush1.msra.mxu0 %v5327_v55  ;;  %v5329_v55 = vsel %vm5324_vm10, %v5305_v0, %v5307_v15 }
 0x175   : > { %v5309_v53 = vpop.permute.xlu0 %5308  ;;  %25355 = vmatmul.mubr.msk.f32.vlgmr.msra.gmra.mxu0 %vm312_vm1, %v27278_v54  ;;  %v1307_v8 = vpop.f32.mrf.mxu1 }
 0x176   : > { %v5311_v7 = vpop.permute.xlu1 %5310  ;;  %v5330_v22 = vsel %vm5324_vm10, %v5307_v15, %v5309_v53  ;;  %5631 = vmatprep.mubr.f32.mxu0 %v31944_v21  ;;  %v27311_v11 = vadd.f32 %v1307_v8, %v27223_v47  ;;  %v1437_v31 = vpop.f32.mrf.mxu0 }
 0x177   : > { %7588 = vrot.lane.b32.xlu0 %v27103_v59, %s26257_s12  ;;  %5526 = vmatprep.subr.mxu1 %v5330_v22  ;;  %v27317_v44 = vadd.f32 %v1437_v31, %v27245_v48  ;;  %v25916_v49 = vpop.f32.mrf.mxu1  ;;  %v5331_v48 = vsel %vm5324_vm10, %v5309_v53, %v5311_v7 }
 0x178   : > { %7590 = vrot.lane.b32.xlu1 %v27109_v38, %s26257_s12  ;;  %5527 = vmatpush1.msra.mxu1 %v5329_v55  ;;  %v27321_v46 = vpop.f32.mrf.mxu0 }
 0x179   : > { %31966 = vst [vmem:[#allocation38_spill] sm:$0xff] %v27321_v46  ;;  %v5313_v51 = vpop.permute.xlu0 %5312  ;;  %25356 = vmatmul.mubr.msk.f32.vlgmr.msra.gmra.mxu1 %vm312_vm1, %v27278_v54 }
 0x17a   : > { %v5315_v47 = vpop.permute.xlu1 %5314  ;;  %v5332_v8 = vsel %vm5324_vm10, %v5311_v7, %v5313_v51  ;;  %5702 = vmatprep.mubr.f32.mxu1 %v31944_v21  ;;  %v1508_v0 = vpop.f32.mrf.mxu1 }
 0x17b   : > { %7592 = vrot.lane.b32.xlu0 %v27118_v43, %s26257_s12  ;;  %5597 = vmatprep.subr.mxu0 %v5332_v8  ;;  %v27331_v49 = vadd.f32 %v1508_v0, %v27251_v60  ;;  %v1579_v15 = vpop.f32.mrf.mxu0  ;;  %v5333_v60 = vsel %vm5324_vm10, %v5313_v51, %v5315_v47 }
 0x17c   : > { %7594 = vrot.lane.b32.xlu1 %v27124_v5, %s26257_s12  ;;  %5598 = vmatpush1.msra.mxu0 %v5331_v48  ;;  %v27335_v22 = vadd.f32 %v1579_v15, %v1024_v35  ;;  %v27337_v31 = vpop.f32.mrf.mxu1 }
 0x17d   : > { %v5317_v55 = vpop.permute.xlu0 %5316  ;;  %25357 = vmatmul.mubr.msk.f32.vlgmr.msra.gmra.mxu0 %vm312_vm1, %v27278_v54  ;;  %v27341_v46 = vpop.f32.mrf.mxu0 }
 0x17e   : > { %31967 = vst [vmem:[#allocation39_spill] sm:$0xff] %v27341_v46  ;;  %v5319_v8 = vpop.permute.xlu1 %5318  ;;  %v5334_v53 = vsel %vm5324_vm10, %v5315_v47, %v5317_v55  ;;  %5773 = vmatprep.mubr.f32.mxu0 %v31944_v21 }
 0x17f   : > { %7596 = vrot.lane.b32.xlu0 %v27133_v10, %s26257_s12  ;;  %5668 = vmatprep.subr.mxu1 %v5334_v53  ;;  %v1721_v35 = vpop.f32.mrf.mxu0 }
 0x180   : > { %7598 = vrot.lane.b32.xlu1 %v27139_v12, %s26257_s12  ;;  %5669 = vmatpush1.msra.mxu1 %v5333_v60  ;;  %v27350_v7 = vadd.f32 %v1721_v35, %v1166_v13  ;;  %v5335_v60 = vsel %vm5324_vm10, %v5317_v55, %v5319_v8  ;;  %s26262_s12 = smov 29  }
 0x181   : > { %v5321_v0 = vpop.permute.xlu0 %5320  ;;  %25952 = vmatprep.subr.mxu1 %v31944_v21  ;;  %25358 = vmatmul.mubr.msk.f32.vlgmr.msra.gmra.mxu1 %vm312_vm1, %v27278_v54  ;;  %v1650_v48 = vpop.f32.mrf.mxu1 }
 0x182   : > { %v5323_v15 = vpop.permute.xlu1 %5322  ;;  %v5336_v46 = vsel %vm5324_vm10, %v5319_v8, %v5321_v0  ;;  %25954 = vmatprep.mubr.msk.f32.mxu1 %vm26249_vm2, %v31944_v21  ;;  %v1873_v51 = vadd.f32 %v1650_v48, %v27273_v4  ;;  %v27359_v47 = vpop.f32.mrf.mxu0 }
 0x183   : > { %31968 = vst [vmem:[#allocation40_spill] sm:$0xff] %v27359_v47  ;;  %v5337_v13 = vsel %vm5324_vm10, %v5321_v0, %v5323_v15  ;;  %8143 = vrot.lane.b32.xlu0 %v27040_v30, %s26258_s15  ;;  %5739 = vmatprep.subr.mxu0 %v5336_v46  ;;  %v27364_v53 = vpop.f32.mrf.mxu1  ;;  %vm10445_vm10 = vcmask 236544  }
 0x184   : > { %31969 = vst [vmem:[#allocation41_spill] sm:$0xff] %v27364_v53  ;;  %8145 = vrot.lane.b32.xlu1 %v27045_v14, %s26258_s15  ;;  %25953 = vmatpush3.msra.mxu1 %v5337_v13  ;;  %v27391_v13 = vld [vmem:[%s31798_s1 + $0x50] sm:$0xff] }
 0x185   : > { %5740 = vmatpush1.msra.mxu0 %v5335_v60  ;;  %v5868_v4 = vpop.permute.xlu0 %5867  ;;  %25955 = vmatmul.mubr.msk.f32.vlgmr.msra.gmra.mxu1 %vm312_vm1, %v27278_v54  ;;  %v1792_v35 = vpop.f32.mrf.mxu1 }
 0x186   : > { %v5870_v0 = vpop.permute.xlu1 %5869  ;;  %25359 = vmatmul.mubr.msk.f32.vlgmr.msra.gmra.mxu0 %vm312_vm1, %v27278_v54  ;;  %6058 = vmatprep.mubr.f32.mxu1 %v31944_v21  ;;  %v27375_v46 = vadd.f32 %v1792_v35, %v27295_v1  ;;  %v1863_v48 = vpop.f32.mrf.mxu0 }
 0x187   : > { %8141 = vrot.lane.b32.xlu0 %v27056_v3, %s26258_s15  ;;  %v5895_v55 = vsel %vm5893_vm11, %v5868_v4, %v5870_v0  ;;  %5987 = vmatprep.mubr.f32.mxu0 %v31944_v21  ;;  %v27382_v8 = vadd.f32 %v1863_v48, %v27311_v11  ;;  %v27384_v15 = vpop.f32.mrf.mxu1 }
 0x188   : > { %31970 = vst [vmem:[#allocation42_spill] sm:$0xff] %v27384_v15  ;;  %8147 = vrot.lane.b32.xlu1 %v27063_v2, %s26258_s15  ;;  %5953 = vmatprep.subr.mxu0 %v5895_v55  ;;  %v25921_v54 = vpop.f32.mrf.mxu0 }
 0x189   : > { %v5866_v1 = vpop.permute.xlu0 %5865  ;;  %v2006_v60 = vpop.f32.mrf.mxu1 }
 0x18a   : > { %v5894_v35 = vsel %vm5893_vm11, %v5866_v1, %v5868_v4  ;;  %v5872_v47 = vpop.permute.xlu1 %5871  ;;  %v27395_v11 = vadd.f32 %v2006_v60, %v27317_v44  ;;  %v2077_v48 = vpop.f32.mrf.mxu0 }
 0x18b   : > { %8149 = vrot.lane.b32.xlu0 %v27074_v58, %s26258_s15  ;;  %5954 = vmatpush1.msra.mxu0 %v5894_v35  ;;  %v27400_v55 = vadd.f32 %v2077_v48, %v27331_v49  ;;  %v27402_v54 = vpop.f32.mrf.mxu1  ;;  %v5896_v48 = vsel %vm5893_vm11, %v5870_v0, %v5872_v47 }
 0x18c   : > { %31971 = vst [vmem:[#allocation43_spill] sm:$0xff] %v27402_v54  ;;  %8151 = vrot.lane.b32.xlu1 %v27079_v6, %s26258_s15  ;;  %25362 = vmatmul.mubr.msk.f32.vlgmr.msra.gmra.mxu0 %vm312_vm1, %v27391_v13  ;;  %v27408_v4 = vpop.f32.mrf.mxu0 }
 0x18d   : > { %31972 = vst [vmem:[#allocation44_spill] sm:$0xff] %v27408_v4  ;;  %v5874_v44 = vpop.permute.xlu0 %5873  ;;  %6129 = vmatprep.mubr.f32.mxu0 %v31944_v21  ;;  %v2148_v1 = vpop.f32.mrf.mxu1 }
 0x18e   : > { %v5876_v60 = vpop.permute.xlu1 %5875  ;;  %v5897_v35 = vsel %vm5893_vm11, %v5872_v47, %v5874_v44  ;;  %v27413_v49 = vadd.f32 %v2148_v1, %v27335_v22 }
 0x18f   : > { %8153 = vrot.lane.b32.xlu0 %v27088_v9, %s26258_s15  ;;  %6024 = vmatprep.subr.mxu1 %v5897_v35  ;;  %v27424_v53 = vpop.f32.mrf.mxu1  ;;  %v5898_v47 = vsel %vm5893_vm11, %v5874_v44, %v5876_v60 }
 0x190   : > { %8155 = vrot.lane.b32.xlu1 %v27094_v52, %s26258_s15  ;;  %6025 = vmatpush1.msra.mxu1 %v5896_v48  ;;  %v2219_v4 = vpop.f32.mrf.mxu0  ;;  %31973 = vst [vmem:[#allocation45_spill] sm:$0xff] %v27424_v53 }
 0x191   : > { %v5878_v54 = vpop.permute.xlu0 %5877  ;;  %25363 = vmatmul.mubr.msk.f32.vlgmr.msra.gmra.mxu1 %vm312_vm1, %v27391_v13  ;;  %v27422_v15 = vadd.f32 %v2219_v4, %v1873_v51 }
 0x192   : > { %v5880_v22 = vpop.permute.xlu1 %5879  ;;  %v5899_v1 = vsel %vm5893_vm11, %v5876_v60, %v5878_v54  ;;  %6200 = vmatprep.mubr.f32.mxu1 %v31944_v21  ;;  %v27433_v0 = vpop.f32.mrf.mxu0 }
 0x193   : > { %8157 = vrot.lane.b32.xlu0 %v27103_v59, %s26258_s15  ;;  %6095 = vmatprep.subr.mxu0 %v5899_v1  ;;  %31974 = vst [vmem:[#allocation46_spill] sm:$0xff] %v27433_v0  ;;  %v5900_v44 = vsel %vm5893_vm11, %v5878_v54, %v5880_v22 }
 0x194   : > { %8159 = vrot.lane.b32.xlu1 %v27109_v38, %s26258_s15  ;;  %6096 = vmatpush1.msra.mxu0 %v5898_v47 }
 0x195   : > { %v5882_v51 = vpop.permute.xlu0 %5881  ;;  %25364 = vmatmul.mubr.msk.f32.vlgmr.msra.gmra.mxu0 %vm312_vm1, %v27391_v13  ;;  %v2290_v4 = vpop.f32.mrf.mxu1 }
 0x196   : > { %v5884_v35 = vpop.permute.xlu1 %5883  ;;  %v5901_v48 = vsel %vm5893_vm11, %v5880_v22, %v5882_v51  ;;  %6271 = vmatprep.mubr.f32.mxu0 %v31944_v21  ;;  %v27440_v1 = vadd.f32 %v2290_v4, %v27350_v7 }
 0x197   : > { %8161 = vrot.lane.b32.xlu0 %v27118_v43, %s26258_s15  ;;  %6166 = vmatprep.subr.mxu1 %v5901_v48  ;;  %v27445_v60 = vpop.f32.mrf.mxu1  ;;  %v5902_v54 = vsel %vm5893_vm11, %v5882_v51, %v5884_v35 }
 0x198   : > { %31975 = vst [vmem:[#allocation47_spill] sm:$0xff] %v27445_v60  ;;  %8163 = vrot.lane.b32.xlu1 %v27124_v5, %s26258_s15  ;;  %6167 = vmatpush1.msra.mxu1 %v5900_v44  ;;  %v2361_v47 = vpop.f32.mrf.mxu0 }
 0x199   : > { %v5886_v0 = vpop.permute.xlu0 %5885  ;;  %25365 = vmatmul.mubr.msk.f32.vlgmr.msra.gmra.mxu1 %vm312_vm1, %v27391_v13  ;;  %v27452_v7 = vadd.f32 %v2361_v47, %v27375_v46 }
 0x19a   : > { %v5888_v4 = vpop.permute.xlu1 %5887  ;;  %v5903_v53 = vsel %vm5893_vm11, %v5884_v35, %v5886_v0  ;;  %6342 = vmatprep.mubr.f32.mxu1 %v31944_v21  ;;  %v27459_v22 = vpop.f32.mrf.mxu0 }
 0x19b   : > { %8165 = vrot.lane.b32.xlu0 %v27133_v10, %s26258_s15  ;;  %6237 = vmatprep.subr.mxu0 %v5903_v53  ;;  %31976 = vst [vmem:[#allocation48_spill] sm:$0xff] %v27459_v22  ;;  %v2432_v48 = vpop.f32.mrf.mxu1 }
 0x19c   : > { %8167 = vrot.lane.b32.xlu1 %v27139_v12, %s26258_s15  ;;  %6238 = vmatpush1.msra.mxu0 %v5902_v54  ;;  %v27464_v46 = vadd.f32 %v2432_v48, %v27382_v8  ;;  %v5904_v54 = vsel %vm5893_vm11, %v5886_v0, %v5888_v4 }
 0x19d   : > { %v5890_v44 = vpop.permute.xlu0 %5889  ;;  %25957 = vmatprep.subr.mxu0 %v31944_v21  ;;  %25366 = vmatmul.mubr.msk.f32.vlgmr.msra.gmra.mxu0 %vm312_vm1, %v27391_v13  ;;  %v25926_v47 = vpop.f32.mrf.mxu1 }
 0x19e   : > { %v5892_v53 = vpop.permute.xlu1 %5891  ;;  %v5905_v51 = vsel %vm5893_vm11, %v5888_v4, %v5890_v44  ;;  %25959 = vmatprep.mubr.msk.f32.mxu0 %vm26249_vm2, %v31944_v21 }
 0x19f   : > { %v5906_v35 = vsel %vm5893_vm11, %v5890_v44, %v5892_v53  ;;  %8712 = vrot.lane.b32.xlu0 %v27040_v30, %s26259_s20  ;;  %6308 = vmatprep.subr.mxu1 %v5905_v51  ;;  %v2575_v8 = vpop.f32.mrf.mxu0 }
 0x1a0   : > { %8714 = vrot.lane.b32.xlu1 %v27045_v14, %s26259_s20  ;;  %25958 = vmatpush3.msra.mxu0 %v5906_v35  ;;  %v27479_v48 = vadd.f32 %v2575_v8, %v27395_v11 }
 0x1a1   : > { %6309 = vmatpush1.msra.mxu1 %v5904_v54  ;;  %v6437_v47 = vpop.permute.xlu0 %6436  ;;  %25960 = vmatmul.mubr.msk.f32.vlgmr.msra.gmra.mxu0 %vm312_vm1, %v27391_v13  ;;  %v27492_v11 = vpop.f32.mrf.mxu0 }
 0x1a2   : > { %v6439_v44 = vpop.permute.xlu1 %6438  ;;  %25367 = vmatmul.mubr.msk.f32.vlgmr.msra.gmra.mxu1 %vm312_vm1, %v27391_v13  ;;  %6627 = vmatprep.mubr.f32.mxu0 %v31944_v21  ;;  %31977 = vst [vmem:[#allocation49_spill] sm:$0xff] %v27492_v11  ;;  %v27497_v13 = vld [vmem:[%s31798_s1 + $0x58] sm:$0xff] }
 0x1a3   : > { %8710 = vrot.lane.b32.xlu0 %v27056_v3, %s26259_s20  ;;  %v6464_v0 = vsel %vm6462_vm12, %v6437_v47, %v6439_v44  ;;  %6556 = vmatprep.mubr.f32.mxu1 %v31944_v21 }
 0x1a4   : > { %8716 = vrot.lane.b32.xlu1 %v27063_v2, %s26259_s20  ;;  %6522 = vmatprep.subr.mxu1 %v6464_v0  ;;  %v2646_v4 = vpop.f32.mrf.mxu1 }
 0x1a5   : > { %v6435_v53 = vpop.permute.xlu0 %6434  ;;  %v27500_v51 = vadd.f32 %v2646_v4, %v27400_v55 }
 0x1a6   : > { %v6463_v35 = vsel %vm6462_vm12, %v6435_v53, %v6437_v47  ;;  %v6441_v8 = vpop.permute.xlu1 %6440  ;;  %v27509_v0 = vpop.f32.mrf.mxu1 }
 0x1a7   : > { %8718 = vrot.lane.b32.xlu0 %v27074_v58, %s26259_s20  ;;  %6523 = vmatpush1.msra.mxu1 %v6463_v35  ;;  %31978 = vst [vmem:[#allocation50_spill] sm:$0xff] %v27509_v0  ;;  %v6465_v53 = vsel %vm6462_vm12, %v6439_v44, %v6441_v8 }
 0x1a8   : > { %8720 = vrot.lane.b32.xlu1 %v27079_v6, %s26259_s20  ;;  %25370 = vmatmul.mubr.msk.f32.vlgmr.msra.gmra.mxu1 %vm312_vm1, %v27497_v13  ;;  %v2717_v54 = vpop.f32.mrf.mxu0 }
 0x1a9   : > { %v6443_v11 = vpop.permute.xlu0 %6442  ;;  %6698 = vmatprep.mubr.f32.mxu1 %v31944_v21  ;;  %v27513_v55 = vadd.f32 %v2717_v54, %v27413_v49 }
 0x1aa   : > { %v6445_v47 = vpop.permute.xlu1 %6444  ;;  %v6466_v4 = vsel %vm6462_vm12, %v6441_v8, %v6443_v11  ;;  %v27523_v49 = vpop.f32.mrf.mxu0 }
 0x1ab   : > { %8722 = vrot.lane.b32.xlu0 %v27088_v9, %s26259_s20  ;;  %6593 = vmatprep.subr.mxu0 %v6466_v4  ;;  %31979 = vst [vmem:[#allocation51_spill] sm:$0xff] %v27523_v49  ;;  %v6467_v44 = vsel %vm6462_vm12, %v6443_v11, %v6445_v47 }
 0x1ac   : > { %8724 = vrot.lane.b32.xlu1 %v27094_v52, %s26259_s20  ;;  %6594 = vmatpush1.msra.mxu0 %v6465_v53  ;;  %v2788_v35 = vpop.f32.mrf.mxu1 }
 0x1ad   : > { %v6447_v0 = vpop.permute.xlu0 %6446  ;;  %25371 = vmatmul.mubr.msk.f32.vlgmr.msra.gmra.mxu0 %vm312_vm1, %v27497_v13  ;;  %v27526_v54 = vadd.f32 %v2788_v35, %v27422_v15 }
 0x1ae   : > { %v6449_v22 = vpop.permute.xlu1 %6448  ;;  %v6468_v60 = vsel %vm6462_vm12, %v6445_v47, %v6447_v0  ;;  %6769 = vmatprep.mubr.f32.mxu0 %v31944_v21  ;;  %v27535_v8 = vpop.f32.mrf.mxu1 }
 0x1af   : > { %8726 = vrot.lane.b32.xlu0 %v27103_v59, %s26259_s20  ;;  %6664 = vmatprep.subr.mxu1 %v6468_v60  ;;  %31980 = vst [vmem:[#allocation52_spill] sm:$0xff] %v27535_v8  ;;  %v6469_v11 = vsel %vm6462_vm12, %v6447_v0, %v6449_v22 }
 0x1b0   : > { %8728 = vrot.lane.b32.xlu1 %v27109_v38, %s26259_s20  ;;  %6665 = vmatpush1.msra.mxu1 %v6467_v44 }
 0x1b1   : > { %v6451_v4 = vpop.permute.xlu0 %6450  ;;  %25372 = vmatmul.mubr.msk.f32.vlgmr.msra.gmra.mxu1 %vm312_vm1, %v27497_v13  ;;  %v2859_v15 = vpop.f32.mrf.mxu0 }
 0x1b2   : > { %v6453_v53 = vpop.permute.xlu1 %6452  ;;  %v6470_v35 = vsel %vm6462_vm12, %v6449_v22, %v6451_v4  ;;  %6840 = vmatprep.mubr.f32.mxu1 %v31944_v21  ;;  %v27542_v60 = vadd.f32 %v2859_v15, %v27440_v1 }
 0x1b3   : > { %8730 = vrot.lane.b32.xlu0 %v27118_v43, %s26259_s20  ;;  %6735 = vmatprep.subr.mxu0 %v6470_v35  ;;  %v27547_v47 = vpop.f32.mrf.mxu0  ;;  %v6471_v0 = vsel %vm6462_vm12, %v6451_v4, %v6453_v53 }
 0x1b4   : > { %31981 = vst [vmem:[#allocation53_spill] sm:$0xff] %v27547_v47  ;;  %8732 = vrot.lane.b32.xlu1 %v27124_v5, %s26259_s20  ;;  %6736 = vmatpush1.msra.mxu0 %v6469_v11  ;;  %v2930_v44 = vpop.f32.mrf.mxu1 }
 0x1b5   : > { %v6455_v8 = vpop.permute.xlu0 %6454  ;;  %25373 = vmatmul.mubr.msk.f32.vlgmr.msra.gmra.mxu0 %vm312_vm1, %v27497_v13  ;;  %v27554_v1 = vadd.f32 %v2930_v44, %v27452_v7 }
 0x1b6   : > { %v6457_v15 = vpop.permute.xlu1 %6456  ;;  %v6472_v49 = vsel %vm6462_vm12, %v6453_v53, %v6455_v8  ;;  %6911 = vmatprep.mubr.f32.mxu0 %v31944_v21  ;;  %v3001_v22 = vpop.f32.mrf.mxu0 }
 0x1b7   : > { %8734 = vrot.lane.b32.xlu0 %v27133_v10, %s26259_s20  ;;  %6806 = vmatprep.subr.mxu1 %v6472_v49  ;;  %v27562_v35 = vadd.f32 %v3001_v22, %v27464_v46  ;;  %v27564_v11 = vpop.f32.mrf.mxu1  ;;  %v6473_v53 = vsel %vm6462_vm12, %v6455_v8, %v6457_v15 }
 0x1b8   : > { %31982 = vst [vmem:[#allocation54_spill] sm:$0xff] %v27564_v11  ;;  %8736 = vrot.lane.b32.xlu1 %v27139_v12, %s26259_s20  ;;  %6807 = vmatpush1.msra.mxu1 %v6471_v0  ;;  %v25931_v7 = vpop.f32.mrf.mxu0 }
 0x1b9   : > { %v6459_v44 = vpop.permute.xlu0 %6458  ;;  %25374 = vmatmul.mubr.msk.f32.vlgmr.msra.gmra.mxu1 %vm312_vm1, %v27497_v13  ;;  %25962 = vmatprep.subr.mxu1 %v31944_v21 }
 0x1ba   : > { %v6461_v47 = vpop.permute.xlu1 %6460  ;;  %v6474_v49 = vsel %vm6462_vm12, %v6457_v15, %v6459_v44  ;;  %25964 = vmatprep.mubr.msk.f32.mxu1 %vm26249_vm2, %v31944_v21 }
 0x1bb   : > { %v6475_v46 = vsel %vm6462_vm12, %v6459_v44, %v6461_v47  ;;  %9281 = vrot.lane.b32.xlu0 %v27040_v30, %s26260_s30  ;;  %6877 = vmatprep.subr.mxu0 %v6474_v49  ;;  %v3144_v4 = vpop.f32.mrf.mxu1  ;;  %vm11014_vm12 = vcmask 228352  }
 0x1bc   : > { %9283 = vrot.lane.b32.xlu1 %v27045_v14, %s26260_s30  ;;  %25963 = vmatpush3.msra.mxu1 %v6475_v46  ;;  %v27581_v22 = vadd.f32 %v3144_v4, %v27479_v48 }
 0x1bd   : > { %6878 = vmatpush1.msra.mxu0 %v6473_v53  ;;  %v7006_v0 = vpop.permute.xlu0 %7005  ;;  %25965 = vmatmul.mubr.msk.f32.vlgmr.msra.gmra.mxu1 %vm312_vm1, %v27497_v13  ;;  %v27594_v8 = vpop.f32.mrf.mxu1 }
 0x1be   : > { %25375 = vmatmul.mubr.msk.f32.vlgmr.msra.gmra.mxu0 %vm312_vm1, %v27497_v13  ;;  %v7008_v30 = vpop.permute.xlu1 %7007  ;;  %7196 = vmatprep.mubr.f32.mxu1 %v31944_v21  ;;  %31983 = vst [vmem:[#allocation55_spill] sm:$0xff] %v27594_v8  ;;  %v27599_v13 = vld [vmem:[%s31798_s1 + $0x60] sm:$0xff] }
 0x1bf   : > { %9279 = vrot.lane.b32.xlu0 %v27056_v3, %s26260_s30  ;;  %v7033_v14 = vsel %vm7031_vm13, %v7006_v0, %v7008_v30  ;;  %7125 = vmatprep.mubr.f32.mxu0 %v31944_v21 }
 0x1c0   : > { %9285 = vrot.lane.b32.xlu1 %v27063_v2, %s26260_s30  ;;  %7091 = vmatprep.subr.mxu0 %v7033_v14  ;;  %v3215_v48 = vpop.f32.mrf.mxu0 }
 0x1c1   : > { %v7004_v47 = vpop.permute.xlu0 %7003  ;;  %v27602_v15 = vadd.f32 %v3215_v48, %v27500_v51 }
 0x1c2   : > { %v7032_v3 = vsel %vm7031_vm13, %v7004_v47, %v7006_v0  ;;  %v7010_v7 = vpop.permute.xlu1 %7009  ;;  %v27611_v2 = vpop.f32.mrf.mxu0 }
 0x1c3   : > { %9287 = vrot.lane.b32.xlu0 %v27074_v58, %s26260_s30  ;;  %7092 = vmatpush1.msra.mxu0 %v7032_v3  ;;  %31984 = vst [vmem:[#allocation56_spill] sm:$0xff] %v27611_v2  ;;  %v7034_v58 = vsel %vm7031_vm13, %v7008_v30, %v7010_v7  ;;  %v27802_v2 = vld [vmem:[%s26313_s23 + $0x68] sm:$0xff] }
 0x1c4   : > { %9289 = vrot.lane.b32.xlu1 %v27079_v6, %s26260_s30  ;;  %25378 = vmatmul.mubr.msk.f32.vlgmr.msra.gmra.mxu0 %vm312_vm1, %v27599_v13  ;;  %v3286_v44 = vpop.f32.mrf.mxu1 }
 0x1c5   : > { %v7012_v49 = vpop.permute.xlu0 %7011  ;;  %7267 = vmatprep.mubr.f32.mxu0 %v31944_v21  ;;  %v27615_v51 = vadd.f32 %v3286_v44, %v27513_v55 }
 0x1c6   : > { %v7014_v46 = vpop.permute.xlu1 %7013  ;;  %v7035_v4 = vsel %vm7031_vm13, %v7010_v7, %v7012_v49  ;;  %v27628_v0 = vpop.f32.mrf.mxu1 }
 0x1c7   : > { %9291 = vrot.lane.b32.xlu0 %v27088_v9, %s26260_s30  ;;  %7162 = vmatprep.subr.mxu1 %v7035_v4  ;;  %31985 = vst [vmem:[#allocation57_spill] sm:$0xff] %v27628_v0 }
 0x1c8   : > { %9293 = vrot.lane.b32.xlu1 %v27094_v52, %s26260_s30  ;;  %7163 = vmatpush1.msra.mxu1 %v7034_v58  ;;  %v3357_v6 = vpop.f32.mrf.mxu0  ;;  %v7036_v52 = vsel %vm7031_vm13, %v7012_v49, %v7014_v46 }
 0x1c9   : > { %v7016_v53 = vpop.permute.xlu0 %7015  ;;  %25379 = vmatmul.mubr.msk.f32.vlgmr.msra.gmra.mxu1 %vm312_vm1, %v27599_v13  ;;  %v27626_v55 = vadd.f32 %v3357_v6, %v27526_v54 }
 0x1ca   : > { %v7018_v14 = vpop.permute.xlu1 %7017  ;;  %v7037_v9 = vsel %vm7031_vm13, %v7014_v46, %v7016_v53  ;;  %7338 = vmatprep.mubr.f32.mxu1 %v31944_v21  ;;  %v27637_v30 = vpop.f32.mrf.mxu0 }
 0x1cb   : > { %9295 = vrot.lane.b32.xlu0 %v27103_v59, %s26260_s30  ;;  %7233 = vmatprep.subr.mxu0 %v7037_v9  ;;  %31986 = vst [vmem:[#allocation58_spill] sm:$0xff] %v27637_v30  ;;  %v27678_v9 = vld [vmem:[%s26313_s23 + $0x8] sm:$0xff] }
 0x1cc   : > { %9297 = vrot.lane.b32.xlu1 %v27109_v38, %s26260_s30  ;;  %7234 = vmatpush1.msra.mxu0 %v7036_v52  ;;  %v7038_v38 = vsel %vm7031_vm13, %v7016_v53, %v7018_v14  ;;  %v27683_v52 = vld [vmem:[%s26313_s23 + $0x10] sm:$0xff] }
 0x1cd   : > { %v7020_v54 = vpop.permute.xlu0 %7019  ;;  %25380 = vmatmul.mubr.msk.f32.vlgmr.msra.gmra.mxu0 %vm312_vm1, %v27599_v13  ;;  %v3428_v48 = vpop.f32.mrf.mxu1 }
 0x1ce   : > { %v7022_v47 = vpop.permute.xlu1 %7021  ;;  %v7039_v3 = vsel %vm7031_vm13, %v7018_v14, %v7020_v54  ;;  %7409 = vmatprep.mubr.f32.mxu0 %v31944_v21  ;;  %v27644_v59 = vadd.f32 %v3428_v48, %v27542_v60 }
 0x1cf   : > { %9299 = vrot.lane.b32.xlu0 %v27118_v43, %s26260_s30  ;;  %7304 = vmatprep.subr.mxu1 %v7039_v3  ;;  %v27649_v7 = vpop.f32.mrf.mxu1 }
 0x1d0   : > { %31987 = vst [vmem:[#allocation59_spill] sm:$0xff] %v27649_v7  ;;  %9301 = vrot.lane.b32.xlu1 %v27124_v5, %s26260_s30  ;;  %7305 = vmatpush1.msra.mxu1 %v7038_v38  ;;  %v7040_v5 = vsel %vm7031_vm13, %v7020_v54, %v7022_v47  ;;  %v27697_v38 = vld [vmem:[%s26313_s23] sm:$0xff] }
 0x1d1   : > { %v7024_v44 = vpop.permute.xlu0 %7023  ;;  %25381 = vmatmul.mubr.msk.f32.vlgmr.msra.gmra.mxu1 %vm312_vm1, %v27599_v13  ;;  %v3499_v49 = vpop.f32.mrf.mxu0 }
 0x1d2   : > { %v7026_v46 = vpop.permute.xlu1 %7025  ;;  %v7041_v60 = vsel %vm7031_vm13, %v7022_v47, %v7024_v44  ;;  %7480 = vmatprep.mubr.f32.mxu1 %v31944_v21  ;;  %v27658_v43 = vadd.f32 %v3499_v49, %v27554_v1  ;;  %v3570_v4 = vpop.f32.mrf.mxu1  ;;  %v27711_v49 = vld [vmem:[%s31798_s1 + $0x68] sm:$0xff] }
 0x1d3   : > { %9303 = vrot.lane.b32.xlu0 %v27133_v10, %s26260_s30  ;;  %7375 = vmatprep.subr.mxu0 %v7041_v60  ;;  %v27663_v58 = vpop.f32.mrf.mxu0  ;;  %v27666_v6 = vadd.f32 %v3570_v4, %v27562_v35  ;;  %v7042_v54 = vsel %vm7031_vm13, %v7024_v44, %v7026_v46  ;;  %v27704_v44 = vld [vmem:[%s26313_s23 + $0x18] sm:$0xff] }
 0x1d4   : > { %31988 = vst [vmem:[#allocation60_spill] sm:$0xff] %v27663_v58  ;;  %9305 = vrot.lane.b32.xlu1 %v27139_v12, %s26260_s30  ;;  %7376 = vmatpush1.msra.mxu0 %v7040_v5  ;;  %v25936_v1 = vpop.f32.mrf.mxu1 }
 0x1d5   : > { %v7028_v53 = vpop.permute.xlu0 %7027  ;;  %25382 = vmatmul.mubr.msk.f32.vlgmr.msra.gmra.mxu0 %vm312_vm1, %v27599_v13  ;;  %25967 = vmatprep.subr.mxu0 %v31944_v21  ;;  %v27718_v1 = vld [vmem:[%s26313_s23 + $0x20] sm:$0xff] }
 0x1d6   : > { %v7030_v10 = vpop.permute.xlu1 %7029  ;;  %v7043_v14 = vsel %vm7031_vm13, %v7026_v46, %v7028_v53  ;;  %25969 = vmatprep.mubr.msk.f32.mxu0 %vm26249_vm2, %v31944_v21 }
 0x1d7   : > { %v7044_v35 = vsel %vm7031_vm13, %v7028_v53, %v7030_v10  ;;  %9850 = vrot.lane.b32.xlu0 %v27678_v9, %s26261_s8  ;;  %7446 = vmatprep.subr.mxu1 %v7043_v14  ;;  %v3713_v12 = vpop.f32.mrf.mxu0  ;;  %v27725_v10 = vld [vmem:[%s26313_s23 + $0x28] sm:$0xff] }
 0x1d8   : > { %9852 = vrot.lane.b32.xlu1 %v27683_v52, %s26261_s8  ;;  %25968 = vmatpush3.msra.mxu0 %v7044_v35  ;;  %v27689_v48 = vadd.f32 %v3713_v12, %v27581_v22  ;;  %v27734_v12 = vld [vmem:[%s26313_s23 + $0x30] sm:$0xff] }
 0x1d9   : > { %7447 = vmatpush1.msra.mxu1 %v7042_v54  ;;  %v7575_v47 = vpop.permute.xlu0 %7574  ;;  %25970 = vmatmul.mubr.msk.f32.vlgmr.msra.gmra.mxu0 %vm312_vm1, %v27599_v13  ;;  %v27722_v53 = vpop.f32.mrf.mxu0 }
 0x1da   : > { %25383 = vmatmul.mubr.msk.f32.vlgmr.msra.gmra.mxu1 %vm312_vm1, %v27599_v13  ;;  %v7577_v3 = vpop.permute.xlu1 %7576  ;;  %7765 = vmatprep.mubr.f32.mxu0 %v31944_v21  ;;  %31989 = vst [vmem:[#allocation61_spill] sm:$0xff] %v27722_v53 }
 0x1db   : > { %9848 = vrot.lane.b32.xlu0 %v27697_v38, %s26261_s8  ;;  %v7602_v22 = vsel %vm7600_vm14, %v7575_v47, %v7577_v3  ;;  %7694 = vmatprep.mubr.f32.mxu1 %v31944_v21 }
 0x1dc   : > { %9854 = vrot.lane.b32.xlu1 %v27704_v44, %s26261_s8  ;;  %7660 = vmatprep.subr.mxu1 %v7602_v22  ;;  %v27740_v22 = vld [vmem:[%s26313_s23 + $0x38] sm:$0xff] }
 0x1dd   : > { %v7573_v13 = vpop.permute.xlu0 %7572  ;;  %v3784_v46 = vpop.f32.mrf.mxu1 }
 0x1de   : > { %v7601_v60 = vsel %vm7600_vm14, %v7573_v13, %v7575_v47  ;;  %v7579_v4 = vpop.permute.xlu1 %7578  ;;  %v27715_v5 = vadd.f32 %v3784_v46, %v27602_v15 }
 0x1df   : > { %9856 = vrot.lane.b32.xlu0 %v27718_v1, %s26261_s8  ;;  %7661 = vmatpush1.msra.mxu1 %v7601_v60  ;;  %v7603_v54 = vsel %vm7600_vm14, %v7577_v3, %v7579_v4  ;;  %v27749_v60 = vpop.f32.mrf.mxu1 }
 0x1e0   : > { %9858 = vrot.lane.b32.xlu1 %v27725_v10, %s26261_s8  ;;  %25386 = vmatmul.mubr.msk.f32.vlgmr.msra.gmra.mxu1 %vm312_vm1, %v27711_v49  ;;  %31990 = vst [vmem:[#allocation62_spill] sm:$0xff] %v27749_v60 }
 0x1e1   : > { %v7581_v14 = vpop.permute.xlu0 %7580  ;;  %7836 = vmatprep.mubr.f32.mxu1 %v31944_v21 }
 0x1e2   : > { %v7583_v15 = vpop.permute.xlu1 %7582  ;;  %v7604_v35 = vsel %vm7600_vm14, %v7579_v4, %v7581_v14  ;;  %v27754_v4 = vld [vmem:[%s26313_s23 + $0x40] sm:$0xff] }
 0x1e3   : > { %9860 = vrot.lane.b32.xlu0 %v27734_v12, %s26261_s8  ;;  %7731 = vmatprep.subr.mxu0 %v7604_v35  ;;  %v3855_v47 = vpop.f32.mrf.mxu0 }
 0x1e4   : > { %9862 = vrot.lane.b32.xlu1 %v27740_v22, %s26261_s8  ;;  %7732 = vmatpush1.msra.mxu0 %v7603_v54  ;;  %v27745_v13 = vadd.f32 %v3855_v47, %v27615_v51  ;;  %v7605_v51 = vsel %vm7600_vm14, %v7581_v14, %v7583_v15  ;;  %v27760_v54 = vld [vmem:[%s26313_s23 + $0x48] sm:$0xff] }
 0x1e5   : > { %v7585_v46 = vpop.permute.xlu0 %7584  ;;  %25387 = vmatmul.mubr.msk.f32.vlgmr.msra.gmra.mxu0 %vm312_vm1, %v27711_v49  ;;  %v27764_v47 = vpop.f32.mrf.mxu0 }
 0x1e6   : > { %v7587_v35 = vpop.permute.xlu1 %7586  ;;  %v7606_v3 = vsel %vm7600_vm14, %v7583_v15, %v7585_v46  ;;  %7907 = vmatprep.mubr.f32.mxu0 %v31944_v21  ;;  %31991 = vst [vmem:[#allocation63_spill] sm:$0xff] %v27764_v47  ;;  %v27774_v15 = vld [vmem:[%s26313_s23 + $0x50] sm:$0xff] }
 0x1e7   : > { %9864 = vrot.lane.b32.xlu0 %v27754_v4, %s26261_s8  ;;  %7802 = vmatprep.subr.mxu1 %v7606_v3  ;;  %v7607_v3 = vsel %vm7600_vm14, %v7585_v46, %v7587_v35 }
 0x1e8   : > { %9866 = vrot.lane.b32.xlu1 %v27760_v54, %s26261_s8  ;;  %7803 = vmatpush1.msra.mxu1 %v7605_v51  ;;  %v27780_v51 = vld [vmem:[%s26313_s23 + $0x58] sm:$0xff] }
 0x1e9   : > { %v7589_v60 = vpop.permute.xlu0 %7588  ;;  %25388 = vmatmul.mubr.msk.f32.vlgmr.msra.gmra.mxu1 %vm312_vm1, %v27711_v49  ;;  %v3926_v53 = vpop.f32.mrf.mxu1 }
 0x1ea   : > { %v7591_v58 = vpop.permute.xlu1 %7590  ;;  %v7608_v7 = vsel %vm7600_vm14, %v7587_v35, %v7589_v60  ;;  %7978 = vmatprep.mubr.f32.mxu1 %v31944_v21  ;;  %v27771_v14 = vadd.f32 %v3926_v53, %v27626_v55  ;;  %v27794_v35 = vld [vmem:[%s26313_s23 + $0x60] sm:$0xff] }
 0x1eb   : > { %9868 = vrot.lane.b32.xlu0 %v27774_v15, %s26261_s8  ;;  %7873 = vmatprep.subr.mxu0 %v7608_v7  ;;  %v27791_v46 = vpop.f32.mrf.mxu1 }
 0x1ec   : > { %9870 = vrot.lane.b32.xlu1 %v27780_v51, %s26261_s8  ;;  %7874 = vmatpush1.msra.mxu0 %v7607_v3  ;;  %31992 = vst [vmem:[#allocation64_spill] sm:$0xff] %v27791_v46  ;;  %v7609_v3 = vsel %vm7600_vm14, %v7589_v60, %v7591_v58 }
 0x1ed   : > { %v7593_v47 = vpop.permute.xlu0 %7592  ;;  %25389 = vmatmul.mubr.msk.f32.vlgmr.msra.gmra.mxu0 %vm312_vm1, %v27711_v49  ;;  %v3997_v55 = vpop.f32.mrf.mxu0 }
 0x1ee   : > { %v7595_v53 = vpop.permute.xlu1 %7594  ;;  %v7610_v30 = vsel %vm7600_vm14, %v7591_v58, %v7593_v47  ;;  %8049 = vmatprep.mubr.f32.mxu0 %v31944_v21  ;;  %v27789_v7 = vadd.f32 %v3997_v55, %v27644_v59 }
 0x1ef   : > { %9872 = vrot.lane.b32.xlu0 %v27794_v35, %s26261_s8  ;;  %7944 = vmatprep.subr.mxu1 %v7610_v30  ;;  %v27799_v0 = vpop.f32.mrf.mxu0  ;;  %v7611_v11 = vsel %vm7600_vm14, %v7593_v47, %v7595_v53 }
 0x1f0   : > { %31993 = vst [vmem:[#allocation65_spill] sm:$0xff] %v27799_v0  ;;  %9874 = vrot.lane.b32.xlu1 %v27802_v2, %s26261_s8  ;;  %7945 = vmatpush1.msra.mxu1 %v7609_v3 }
 0x1f1   : > { %v7597_v59 = vpop.permute.xlu0 %7596  ;;  %25390 = vmatmul.mubr.msk.f32.vlgmr.msra.gmra.mxu1 %vm312_vm1, %v27711_v49  ;;  %25972 = vmatprep.subr.mxu1 %v31944_v21  ;;  %v4139_v55 = vpop.f32.mrf.mxu0 }
 0x1f2   : > { %v7599_v46 = vpop.permute.xlu1 %7598  ;;  %v7612_v30 = vsel %vm7600_vm14, %v7595_v53, %v7597_v59  ;;  %25974 = vmatprep.mubr.msk.f32.mxu1 %vm26249_vm2, %v31944_v21  ;;  %v4068_v58 = vpop.f32.mrf.mxu1  ;;  %v27813_v60 = vadd.f32 %v4139_v55, %v27666_v6 }
 0x1f3   : > { %v7613_v0 = vsel %vm7600_vm14, %v7597_v59, %v7599_v46  ;;  %10419 = vrot.lane.b32.xlu0 %v27678_v9, %s26262_s12  ;;  %8015 = vmatprep.subr.mxu0 %v7612_v30  ;;  %v27819_v3 = vadd.f32 %v4068_v58, %v27658_v43  ;;  %v25941_v8 = vpop.f32.mrf.mxu0  ;;  %vm18317_vm14 = vcmask 457728  }
 0x1f4   : > { %10421 = vrot.lane.b32.xlu1 %v27683_v52, %s26262_s12  ;;  %25973 = vmatpush3.msra.mxu1 %v7613_v0  ;;  %v27824_v6 = vpop.f32.mrf.mxu1 }
 0x1f5   : > { %31994 = vst [vmem:[#allocation66_spill] sm:$0xff] %v27824_v6  ;;  %8016 = vmatpush1.msra.mxu0 %v7611_v11  ;;  %v8144_v46 = vpop.permute.xlu0 %8143  ;;  %25975 = vmatmul.mubr.msk.f32.vlgmr.msra.gmra.mxu1 %vm312_vm1, %v27711_v49 }
 0x1f6   : > { %25391 = vmatmul.mubr.msk.f32.vlgmr.msra.gmra.mxu0 %vm312_vm1, %v27711_v49  ;;  %v8146_v43 = vpop.permute.xlu1 %8145  ;;  %8334 = vmatprep.mubr.f32.mxu1 %v31944_v21  ;;  %v27840_v49 = vld [vmem:[%s31798_s1 + $0x70] sm:$0xff] }
 0x1f7   : > { %10417 = vrot.lane.b32.xlu0 %v27697_v38, %s26262_s12  ;;  %v8171_v8 = vsel %vm8169_vm15, %v8144_v46, %v8146_v43  ;;  %8263 = vmatprep.mubr.f32.mxu0 %v31944_v21 }
 0x1f8   : > { %10423 = vrot.lane.b32.xlu1 %v27704_v44, %s26262_s12  ;;  %8229 = vmatprep.subr.mxu0 %v8171_v8  ;;  %v4282_v11 = vpop.f32.mrf.mxu1 }
 0x1f9   : > { %v8142_v0 = vpop.permute.xlu0 %8141  ;;  %v27843_v47 = vadd.f32 %v4282_v11, %v27689_v48 }
 0x1fa   : > { %v8170_v53 = vsel %vm8169_vm15, %v8142_v0, %v8144_v46  ;;  %v8148_v59 = vpop.permute.xlu1 %8147  ;;  %v27852_v55 = vpop.f32.mrf.mxu1 }
 0x1fb   : > { %10425 = vrot.lane.b32.xlu0 %v27718_v1, %s26262_s12  ;;  %8230 = vmatpush1.msra.mxu0 %v8170_v53  ;;  %31995 = vst [vmem:[#allocation67_spill] sm:$0xff] %v27852_v55  ;;  %v8172_v11 = vsel %vm8169_vm15, %v8146_v43, %v8148_v59 }
 0x1fc   : > { %10427 = vrot.lane.b32.xlu1 %v27725_v10, %s26262_s12  ;;  %25394 = vmatmul.mubr.msk.f32.vlgmr.msra.gmra.mxu0 %vm312_vm1, %v27840_v49 }
 0x1fd   : > { %v8150_v30 = vpop.permute.xlu0 %8149  ;;  %8405 = vmatprep.mubr.f32.mxu0 %v31944_v21  ;;  %v4353_v48 = vpop.f32.mrf.mxu0 }
 0x1fe   : > { %v8152_v58 = vpop.permute.xlu1 %8151  ;;  %v8173_v46 = vsel %vm8169_vm15, %v8148_v59, %v8150_v30  ;;  %v27857_v8 = vadd.f32 %v4353_v48, %v27715_v5 }
 0x1ff   : > { %10429 = vrot.lane.b32.xlu0 %v27734_v12, %s26262_s12  ;;  %8300 = vmatprep.subr.mxu1 %v8173_v46  ;;  %v27864_v0 = vpop.f32.mrf.mxu0  ;;  %v8174_v43 = vsel %vm8169_vm15, %v8150_v30, %v8152_v58 }
 0x200   : > { %10431 = vrot.lane.b32.xlu1 %v27740_v22, %s26262_s12  ;;  %8301 = vmatpush1.msra.mxu1 %v8172_v11  ;;  %31996 = vst [vmem:[#allocation68_spill] sm:$0xff] %v27864_v0 }
 0x201   : > { %v8154_v53 = vpop.permute.xlu0 %8153  ;;  %25395 = vmatmul.mubr.msk.f32.vlgmr.msra.gmra.mxu1 %vm312_vm1, %v27840_v49  ;;  %v4424_v55 = vpop.f32.mrf.mxu1 }
 0x202   : > { %v8156_v6 = vpop.permute.xlu1 %8155  ;;  %v8175_v5 = vsel %vm8169_vm15, %v8152_v58, %v8154_v53  ;;  %8476 = vmatprep.mubr.f32.mxu1 %v31944_v21  ;;  %v27871_v48 = vadd.f32 %v4424_v55, %v27745_v13 }
 0x203   : > { %10433 = vrot.lane.b32.xlu0 %v27754_v4, %s26262_s12  ;;  %8371 = vmatprep.subr.mxu0 %v8175_v5  ;;  %v27878_v59 = vpop.f32.mrf.mxu1  ;;  %v8176_v30 = vsel %vm8169_vm15, %v8154_v53, %v8156_v6 }
 0x204   : > { %10435 = vrot.lane.b32.xlu1 %v27760_v54, %s26262_s12  ;;  %8372 = vmatpush1.msra.mxu0 %v8174_v43  ;;  %31997 = vst [vmem:[#allocation69_spill] sm:$0xff] %v27878_v59 }
 0x205   : > { %v8158_v46 = vpop.permute.xlu0 %8157  ;;  %25396 = vmatmul.mubr.msk.f32.vlgmr.msra.gmra.mxu0 %vm312_vm1, %v27840_v49  ;;  %v4495_v11 = vpop.f32.mrf.mxu0 }
 0x206   : > { %v8160_v0 = vpop.permute.xlu1 %8159  ;;  %v8177_v13 = vsel %vm8169_vm15, %v8156_v6, %v8158_v46  ;;  %8547 = vmatprep.mubr.f32.mxu0 %v31944_v21  ;;  %v27885_v55 = vadd.f32 %v4495_v11, %v27771_v14 }
 0x207   : > { %10437 = vrot.lane.b32.xlu0 %v27774_v15, %s26262_s12  ;;  %8442 = vmatprep.subr.mxu1 %v8177_v13  ;;  %v27896_v14 = vpop.f32.mrf.mxu0  ;;  %v8178_v6 = vsel %vm8169_vm15, %v8158_v46, %v8160_v0 }
 0x208   : > { %10439 = vrot.lane.b32.xlu1 %v27780_v51, %s26262_s12  ;;  %8443 = vmatpush1.msra.mxu1 %v8176_v30  ;;  %31998 = vst [vmem:[#allocation70_spill] sm:$0xff] %v27896_v14 }
 0x209   : > { %v8162_v58 = vpop.permute.xlu0 %8161  ;;  %25397 = vmatmul.mubr.msk.f32.vlgmr.msra.gmra.mxu1 %vm312_vm1, %v27840_v49  ;;  %v4566_v5 = vpop.f32.mrf.mxu1 }
 0x20a   : > { %v8164_v43 = vpop.permute.xlu1 %8163  ;;  %v8179_v59 = vsel %vm8169_vm15, %v8160_v0, %v8162_v58  ;;  %8618 = vmatprep.mubr.f32.mxu1 %v31944_v21  ;;  %v27899_v11 = vadd.f32 %v4566_v5, %v27789_v7 }
 0x20b   : > { %10441 = vrot.lane.b32.xlu0 %v27794_v35, %s26262_s12  ;;  %8513 = vmatprep.subr.mxu0 %v8179_v59  ;;  %v27904_v53 = vpop.f32.mrf.mxu1  ;;  %v8180_v14 = vsel %vm8169_vm15, %v8162_v58, %v8164_v43 }
 0x20c   : > { %31999 = vst [vmem:[#allocation71_spill] sm:$0xff] %v27904_v53  ;;  %10443 = vrot.lane.b32.xlu1 %v27802_v2, %s26262_s12  ;;  %8514 = vmatpush1.msra.mxu0 %v8178_v6  ;;  %s26267_s12 = smov 58  }
 0x20d   : > { %v8166_v13 = vpop.permute.xlu0 %8165  ;;  %25398 = vmatmul.mubr.msk.f32.vlgmr.msra.gmra.mxu0 %vm312_vm1, %v27840_v49  ;;  %25977 = vmatprep.subr.mxu0 %v31944_v21  ;;  %v4708_v7 = vpop.f32.mrf.mxu1 }
 0x20e   : > { %v8168_v30 = vpop.permute.xlu1 %8167  ;;  %v8181_v5 = vsel %vm8169_vm15, %v8164_v43, %v8166_v13  ;;  %25979 = vmatprep.mubr.msk.f32.mxu0 %vm26249_vm2, %v31944_v21  ;;  %v4637_v0 = vpop.f32.mrf.mxu0  ;;  %v27915_v59 = vadd.f32 %v4708_v7, %v27813_v60 }
 0x20f   : > { %v8182_v46 = vsel %vm8169_vm15, %v8166_v13, %v8168_v30  ;;  %10988 = vrot.lane.b32.xlu0 %v27678_v9, %s26263_s16  ;;  %8584 = vmatprep.subr.mxu1 %v8181_v5  ;;  %v27921_v6 = vadd.f32 %v4637_v0, %v27819_v3  ;;  %v25946_v53 = vpop.f32.mrf.mxu1 }
 0x210   : > { %10990 = vrot.lane.b32.xlu1 %v27683_v52, %s26263_s16  ;;  %25978 = vmatpush3.msra.mxu0 %v8182_v46  ;;  %v27926_v60 = vpop.f32.mrf.mxu0 }
 0x211   : > { %8585 = vmatpush1.msra.mxu1 %v8180_v14  ;;  %v8713_v13 = vpop.permute.xlu0 %8712  ;;  %25980 = vmatmul.mubr.msk.f32.vlgmr.msra.gmra.mxu0 %vm312_vm1, %v27840_v49 }
 0x212   : > { %25399 = vmatmul.mubr.msk.f32.vlgmr.msra.gmra.mxu1 %vm312_vm1, %v27840_v49  ;;  %v8715_v9 = vpop.permute.xlu1 %8714  ;;  %8903 = vmatprep.mubr.f32.mxu0 %v31944_v21  ;;  %v27942_v49 = vld [vmem:[%s31798_s1 + $0x78] sm:$0xff] }
 0x213   : > { %10986 = vrot.lane.b32.xlu0 %v27697_v38, %s26263_s16  ;;  %v8740_v52 = vsel %vm8738_vm7, %v8713_v13, %v8715_v9  ;;  %8832 = vmatprep.mubr.f32.mxu1 %v31944_v21 }
 0x214   : > { %10992 = vrot.lane.b32.xlu1 %v27704_v44, %s26263_s16  ;;  %8798 = vmatprep.subr.mxu1 %v8740_v52  ;;  %v4851_v3 = vpop.f32.mrf.mxu0 }
 0x215   : > { %v8711_v58 = vpop.permute.xlu0 %8710  ;;  %v27945_v43 = vadd.f32 %v4851_v3, %v27843_v47 }
 0x216   : > { %v8739_v38 = vsel %vm8738_vm7, %v8711_v58, %v8713_v13  ;;  %v8717_v14 = vpop.permute.xlu1 %8716  ;;  %v27954_v44 = vpop.f32.mrf.mxu0 }
 0x217   : > { %10994 = vrot.lane.b32.xlu0 %v27718_v1, %s26263_s16  ;;  %8799 = vmatpush1.msra.mxu1 %v8739_v38  ;;  %v8741_v1 = vsel %vm8738_vm7, %v8715_v9, %v8717_v14 }
 0x218   : > { %10996 = vrot.lane.b32.xlu1 %v27725_v10, %s26263_s16  ;;  %25402 = vmatmul.mubr.msk.f32.vlgmr.msra.gmra.mxu1 %vm312_vm1, %v27942_v49 }
 0x219   : > { %v8719_v53 = vpop.permute.xlu0 %8718  ;;  %8974 = vmatprep.mubr.f32.mxu1 %v31944_v21  ;;  %v4922_v47 = vpop.f32.mrf.mxu1 }
 0x21a   : > { %v8721_v7 = vpop.permute.xlu1 %8720  ;;  %v8742_v30 = vsel %vm8738_vm7, %v8717_v14, %v8719_v53  ;;  %v27959_v5 = vadd.f32 %v4922_v47, %v27857_v8 }
 0x21b   : > { %10998 = vrot.lane.b32.xlu0 %v27734_v12, %s26263_s16  ;;  %8869 = vmatprep.subr.mxu0 %v8742_v30  ;;  %v27966_v10 = vpop.f32.mrf.mxu1  ;;  %v239_v30 = vld [vmem:[%s26313_s23 + $0x70] sm:$0xff] }
 0x21c   : > { %11000 = vrot.lane.b32.xlu1 %v27740_v22, %s26263_s16  ;;  %8870 = vmatpush1.msra.mxu0 %v8741_v1  ;;  %v8743_v22 = vsel %vm8738_vm7, %v8719_v53, %v8721_v7 }
 0x21d   : > { %v8723_v0 = vpop.permute.xlu0 %8722  ;;  %25403 = vmatmul.mubr.msk.f32.vlgmr.msra.gmra.mxu0 %vm312_vm1, %v27942_v49  ;;  %v4993_v46 = vpop.f32.mrf.mxu0 }
 0x21e   : > { %v8725_v13 = vpop.permute.xlu1 %8724  ;;  %v8744_v8 = vsel %vm8738_vm7, %v8721_v7, %v8723_v0  ;;  %9045 = vmatprep.mubr.f32.mxu0 %v31944_v21  ;;  %v27973_v12 = vadd.f32 %v4993_v46, %v27871_v48 }
 0x21f   : > { %11002 = vrot.lane.b32.xlu0 %v27754_v4, %s26263_s16  ;;  %8940 = vmatprep.subr.mxu1 %v8744_v8  ;;  %v27980_v9 = vpop.f32.mrf.mxu0 }
 0x220   : > { %11004 = vrot.lane.b32.xlu1 %v27760_v54, %s26263_s16  ;;  %8941 = vmatpush1.msra.mxu1 %v8743_v22  ;;  %v8745_v54 = vsel %vm8738_vm7, %v8723_v0, %v8725_v13 }
 0x221   : > { %v8727_v52 = vpop.permute.xlu0 %8726  ;;  %25404 = vmatmul.mubr.msk.f32.vlgmr.msra.gmra.mxu1 %vm312_vm1, %v27942_v49  ;;  %v5064_v3 = vpop.f32.mrf.mxu1 }
 0x222   : > { %v8729_v58 = vpop.permute.xlu1 %8728  ;;  %v8746_v48 = vsel %vm8738_vm7, %v8725_v13, %v8727_v52  ;;  %9116 = vmatprep.mubr.f32.mxu1 %v31944_v21  ;;  %v27987_v4 = vadd.f32 %v5064_v3, %v27885_v55 }
 0x223   : > { %11006 = vrot.lane.b32.xlu0 %v27774_v15, %s26263_s16  ;;  %9011 = vmatprep.subr.mxu0 %v8746_v48  ;;  %v28001_v47 = vpop.f32.mrf.mxu1 }
 0x224   : > { %11008 = vrot.lane.b32.xlu1 %v27780_v51, %s26263_s16  ;;  %9012 = vmatpush1.msra.mxu0 %v8745_v54  ;;  %v8747_v51 = vsel %vm8738_vm7, %v8727_v52, %v8729_v58 }
 0x225   : > { %v8731_v38 = vpop.permute.xlu0 %8730  ;;  %25405 = vmatmul.mubr.msk.f32.vlgmr.msra.gmra.mxu0 %vm312_vm1, %v27942_v49  ;;  %v5135_v14 = vpop.f32.mrf.mxu0 }
 0x226   : > { %v8733_v53 = vpop.permute.xlu1 %8732  ;;  %v8748_v55 = vsel %vm8738_vm7, %v8729_v58, %v8731_v38  ;;  %9187 = vmatprep.mubr.f32.mxu0 %v31944_v21  ;;  %v27999_v15 = vadd.f32 %v5135_v14, %v27899_v11 }
 0x227   : > { %11010 = vrot.lane.b32.xlu0 %v27794_v35, %s26263_s16  ;;  %9082 = vmatprep.subr.mxu1 %v8748_v55  ;;  %v28006_v7 = vpop.f32.mrf.mxu0  ;;  %v8749_v52 = vsel %vm8738_vm7, %v8731_v38, %v8733_v53  ;;  %v28040_v38 = vld [vmem:[%s31798_s1 + $0x80] sm:$0xff] }
 0x228   : > { %11012 = vrot.lane.b32.xlu1 %v27802_v2, %s26263_s16  ;;  %9083 = vmatpush1.msra.mxu1 %v8747_v51 }
 0x229   : > { %v8735_v1 = vpop.permute.xlu0 %8734  ;;  %25406 = vmatmul.mubr.msk.f32.vlgmr.msra.gmra.mxu1 %vm312_vm1, %v27942_v49  ;;  %25982 = vmatprep.subr.mxu1 %v31944_v21  ;;  %v5277_v11 = vpop.f32.mrf.mxu0 }
 0x22a   : > { %v8737_v0 = vpop.permute.xlu1 %8736  ;;  %v8750_v35 = vsel %vm8738_vm7, %v8733_v53, %v8735_v1  ;;  %25984 = vmatprep.mubr.msk.f32.mxu1 %vm26249_vm2, %v31944_v21  ;;  %v5206_v46 = vpop.f32.mrf.mxu1  ;;  %v28018_v13 = vadd.f32 %v5277_v11, %v27915_v59 }
 0x22b   : > { %v8751_v2 = vsel %vm8738_vm7, %v8735_v1, %v8737_v0  ;;  %12070 = vrot.lane.b32.xlu0 %v239_v30, %s26244_s24  ;;  %9153 = vmatprep.subr.mxu0 %v8750_v35  ;;  %v28023_v8 = vadd.f32 %v5206_v46, %v27921_v6  ;;  %v25951_v22 = vpop.f32.mrf.mxu0 }
 0x22c   : > { %12588 = vrot.lane.b32.xlu1 %v239_v30, %s26245_s25  ;;  %25983 = vmatpush3.msra.mxu1 %v8751_v2  ;;  %v28027_v3 = vpop.f32.mrf.mxu1 }
 0x22d   : > { %9154 = vmatpush1.msra.mxu0 %v8749_v52  ;;  %v9282_v59 = vpop.permute.xlu0 %9281  ;;  %25985 = vmatmul.mubr.msk.f32.vlgmr.msra.gmra.mxu1 %vm312_vm1, %v27942_v49 }
 0x22e   : > { %25407 = vmatmul.mubr.msk.f32.vlgmr.msra.gmra.mxu0 %vm312_vm1, %v27942_v49  ;;  %v9284_v58 = vpop.permute.xlu1 %9283  ;;  %9472 = vmatprep.mubr.f32.mxu1 %v31944_v21 }
 0x22f   : > { %13106 = vrot.lane.b32.xlu0 %v239_v30, %s26246_s26  ;;  %v9309_v6 = vsel %vm9307_vm8, %v9282_v59, %v9284_v58  ;;  %9401 = vmatprep.mubr.f32.mxu0 %v31944_v21 }
 0x230   : > { %9367 = vmatprep.subr.mxu0 %v9309_v6  ;;  %v5420_v48 = vpop.f32.mrf.mxu1 }
 0x231   : > { %v9280_v54 = vpop.permute.xlu0 %9279  ;;  %v28043_v14 = vadd.f32 %v5420_v48, %v27945_v43 }
 0x232   : > { %v9308_v49 = vsel %vm9307_vm8, %v9280_v54, %v9282_v59  ;;  %v9286_v53 = vpop.permute.xlu1 %9285  ;;  %v28049_v55 = vpop.f32.mrf.mxu1 }
 0x233   : > { %13624 = vrot.lane.b32.xlu0 %v239_v30, %s26247_s27  ;;  %9368 = vmatpush1.msra.mxu0 %v9308_v49  ;;  %v9310_v35 = vsel %vm9307_vm8, %v9284_v58, %v9286_v53 }
 0x234   : > { %25410 = vmatmul.mubr.msk.f32.vlgmr.msra.gmra.mxu0 %vm312_vm1, %v28040_v38 }
 0x235   : > { %v9288_v51 = vpop.permute.xlu0 %9287  ;;  %9543 = vmatprep.mubr.f32.mxu0 %v31944_v21  ;;  %v5491_v1 = vpop.f32.mrf.mxu0 }
 0x236   : > { %v9290_v11 = vpop.permute.xlu1 %9289  ;;  %v9311_v0 = vsel %vm9307_vm8, %v9286_v53, %v9288_v51  ;;  %v28054_v43 = vadd.f32 %v5491_v1, %v27959_v5 }
 0x237   : > { %9438 = vmatprep.subr.mxu1 %v9311_v0  ;;  %v28057_v30 = vpop.f32.mrf.mxu0  ;;  %v9312_v5 = vsel %vm9307_vm8, %v9288_v51, %v9290_v11 }
 0x238   : > { %9439 = vmatpush1.msra.mxu1 %v9310_v35 }
 0x239   : > { %v9292_v46 = vpop.permute.xlu0 %9291  ;;  %25411 = vmatmul.mubr.msk.f32.vlgmr.msra.gmra.mxu1 %vm312_vm1, %v28040_v38  ;;  %v5562_v2 = vpop.f32.mrf.mxu1 }
 0x23a   : > { %v9294_v22 = vpop.permute.xlu1 %9293  ;;  %v9313_v52 = vsel %vm9307_vm8, %v9290_v11, %v9292_v46  ;;  %9614 = vmatprep.mubr.f32.mxu1 %v31944_v21  ;;  %v28064_v59 = vadd.f32 %v5562_v2, %v27973_v12 }
 0x23b   : > { %9509 = vmatprep.subr.mxu0 %v9313_v52  ;;  %v28067_v58 = vpop.f32.mrf.mxu1  ;;  %v9314_v12 = vsel %vm9307_vm8, %v9292_v46, %v9294_v22 }
 0x23c   : > { %9510 = vmatpush1.msra.mxu0 %v9312_v5 }
 0x23d   : > { %v9296_v6 = vpop.permute.xlu0 %9295  ;;  %25412 = vmatmul.mubr.msk.f32.vlgmr.msra.gmra.mxu0 %vm312_vm1, %v28040_v38  ;;  %v5633_v48 = vpop.f32.mrf.mxu0 }
 0x23e   : > { %v9298_v54 = vpop.permute.xlu1 %9297  ;;  %v9315_v49 = vsel %vm9307_vm8, %v9294_v22, %v9296_v6  ;;  %9685 = vmatprep.mubr.f32.mxu0 %v31944_v21  ;;  %v28074_v53 = vadd.f32 %v5633_v48, %v27987_v4 }
 0x23f   : > { %9580 = vmatprep.subr.mxu1 %v9315_v49  ;;  %v28081_v35 = vpop.f32.mrf.mxu0  ;;  %v9316_v4 = vsel %vm9307_vm8, %v9296_v6, %v9298_v54 }
 0x240   : > { %9581 = vmatpush1.msra.mxu1 %v9314_v12 }
 0x241   : > { %v9300_v51 = vpop.permute.xlu0 %9299  ;;  %25413 = vmatmul.mubr.msk.f32.vlgmr.msra.gmra.mxu1 %vm312_vm1, %v28040_v38  ;;  %v5704_v1 = vpop.f32.mrf.mxu1 }
 0x242   : > { %v9302_v11 = vpop.permute.xlu1 %9301  ;;  %v9317_v0 = vsel %vm9307_vm8, %v9298_v54, %v9300_v51  ;;  %9756 = vmatprep.mubr.f32.mxu1 %v31944_v21  ;;  %v28084_v2 = vadd.f32 %v5704_v1, %v27999_v15 }
 0x243   : > { %9651 = vmatprep.subr.mxu0 %v9317_v0  ;;  %v28087_v46 = vpop.f32.mrf.mxu1  ;;  %v9318_v54 = vsel %vm9307_vm8, %v9300_v51, %v9302_v11 }
 0x244   : > { %9652 = vmatpush1.msra.mxu0 %v9316_v4 }
 0x245   : > { %v9304_v22 = vpop.permute.xlu0 %9303  ;;  %25414 = vmatmul.mubr.msk.f32.vlgmr.msra.gmra.mxu0 %vm312_vm1, %v28040_v38  ;;  %25987 = vmatprep.subr.mxu0 %v31944_v21  ;;  %v5846_v52 = vpop.f32.mrf.mxu1 }
 0x246   : > { %v9306_v5 = vpop.permute.xlu1 %9305  ;;  %v9319_v48 = vsel %vm9307_vm8, %v9302_v11, %v9304_v22  ;;  %25989 = vmatprep.mubr.msk.f32.mxu0 %vm26249_vm2, %v31944_v21  ;;  %v5775_v15 = vpop.f32.mrf.mxu0  ;;  %v28096_v49 = vadd.f32 %v5846_v52, %v28018_v13 }
 0x247   : > { %v9320_v6 = vsel %vm9307_vm8, %v9304_v22, %v9306_v5  ;;  %9722 = vmatprep.subr.mxu1 %v9319_v48  ;;  %v28101_v12 = vadd.f32 %v5775_v15, %v28023_v8  ;;  %v25956_v1 = vpop.f32.mrf.mxu1  ;;  %v28115_v22 = vld [vmem:[%s31798_s1 + $0x88] sm:$0xff] }
 0x248   : > { %25988 = vmatpush3.msra.mxu0 %v9320_v6  ;;  %9723 = vmatpush1.msra.mxu1 %v9318_v54  ;;  %v28103_v0 = vpop.f32.mrf.mxu0 }
 0x249   : > { %32000 = vst [vmem:[#allocation72_spill] sm:$0xff] %v28103_v0  ;;  %v9851_v4 = vpop.permute.xlu0 %9850  ;;  %25415 = vmatmul.mubr.msk.f32.vlgmr.msra.gmra.mxu1 %vm312_vm1, %v28040_v38  ;;  %25990 = vmatmul.mubr.msk.f32.vlgmr.msra.gmra.mxu0 %vm312_vm1, %v28040_v38 }
 0x24a   : > { %v9853_v13 = vpop.permute.xlu1 %9852  ;;  %9970 = vmatprep.mubr.f32.mxu1 %v31944_v21  ;;  %10041 = vmatprep.mubr.f32.mxu0 %v31944_v21 }
 0x24b   : > { %v9878_v8 = vsel %vm9876_vm9, %v9851_v4, %v9853_v13 }
 0x24c   : > { %9936 = vmatprep.subr.mxu1 %v9878_v8  ;;  %v5989_v51 = vpop.f32.mrf.mxu0 }
 0x24d   : > { %v9849_v11 = vpop.permute.xlu0 %9848  ;;  %v28118_v52 = vadd.f32 %v5989_v51, %v28043_v14 }
 0x24e   : > { %v9877_v38 = vsel %vm9876_vm9, %v9849_v11, %v9851_v4  ;;  %v9855_v5 = vpop.permute.xlu1 %9854  ;;  %v28123_v48 = vpop.f32.mrf.mxu0 }
 0x24f   : > { %9937 = vmatpush1.msra.mxu1 %v9877_v38  ;;  %32001 = vst [vmem:[#allocation73_spill] sm:$0xff] %v28123_v48  ;;  %v9879_v14 = vsel %vm9876_vm9, %v9853_v13, %v9855_v5 }
 0x250   : > { %25418 = vmatmul.mubr.msk.f32.vlgmr.msra.gmra.mxu1 %vm312_vm1, %v28115_v22 }
 0x251   : > { %v9857_v15 = vpop.permute.xlu0 %9856  ;;  %10112 = vmatprep.mubr.f32.mxu1 %v31944_v21  ;;  %v6060_v6 = vpop.f32.mrf.mxu1 }
 0x252   : > { %v9859_v54 = vpop.permute.xlu1 %9858  ;;  %v9880_v1 = vsel %vm9876_vm9, %v9855_v5, %v9857_v15  ;;  %v28128_v8 = vadd.f32 %v6060_v6, %v28054_v43 }
 0x253   : > { %10007 = vmatprep.subr.mxu0 %v9880_v1  ;;  %v28131_v4 = vpop.f32.mrf.mxu1  ;;  %v9881_v43 = vsel %vm9876_vm9, %v9857_v15, %v9859_v54 }
 0x254   : > { %10008 = vmatpush1.msra.mxu0 %v9879_v14  ;;  %32002 = vst [vmem:[#allocation74_spill] sm:$0xff] %v28131_v4 }
 0x255   : > { %v9861_v51 = vpop.permute.xlu0 %9860  ;;  %25419 = vmatmul.mubr.msk.f32.vlgmr.msra.gmra.mxu0 %vm312_vm1, %v28115_v22  ;;  %v6131_v11 = vpop.f32.mrf.mxu0 }
 0x256   : > { %v9863_v38 = vpop.permute.xlu1 %9862  ;;  %v9882_v48 = vsel %vm9876_vm9, %v9859_v54, %v9861_v51  ;;  %10183 = vmatprep.mubr.f32.mxu0 %v31944_v21  ;;  %v28138_v0 = vadd.f32 %v6131_v11, %v28064_v59 }
 0x257   : > { %10078 = vmatprep.subr.mxu1 %v9882_v48  ;;  %v28141_v13 = vpop.f32.mrf.mxu0  ;;  %v9883_v59 = vsel %vm9876_vm9, %v9861_v51, %v9863_v38 }
 0x258   : > { %10079 = vmatpush1.msra.mxu1 %v9881_v43  ;;  %32003 = vst [vmem:[#allocation75_spill] sm:$0xff] %v28141_v13 }
 0x259   : > { %v9865_v5 = vpop.permute.xlu0 %9864  ;;  %25420 = vmatmul.mubr.msk.f32.vlgmr.msra.gmra.mxu1 %vm312_vm1, %v28115_v22  ;;  %v6202_v6 = vpop.f32.mrf.mxu1 }
 0x25a   : > { %v9867_v1 = vpop.permute.xlu1 %9866  ;;  %v9884_v14 = vsel %vm9876_vm9, %v9863_v38, %v9865_v5  ;;  %v28147_v4 = vadd.f32 %v6202_v6, %v28074_v53  ;;  %10254 = vmatprep.mubr.f32.mxu1 %v31944_v21 }
 0x25b   : > { %10149 = vmatprep.subr.mxu0 %v9884_v14  ;;  %v28157_v13 = vpop.f32.mrf.mxu1  ;;  %v9885_v53 = vsel %vm9876_vm9, %v9865_v5, %v9867_v1 }
 0x25c   : > { %10150 = vmatpush1.msra.mxu0 %v9883_v59  ;;  %32004 = vst [vmem:[#allocation76_spill] sm:$0xff] %v28157_v13 }
 0x25d   : > { %v9869_v48 = vpop.permute.xlu0 %9868  ;;  %25421 = vmatmul.mubr.msk.f32.vlgmr.msra.gmra.mxu0 %vm312_vm1, %v28115_v22  ;;  %v6273_v15 = vpop.f32.mrf.mxu0 }
 0x25e   : > { %v9871_v54 = vpop.permute.xlu1 %9870  ;;  %v9886_v11 = vsel %vm9876_vm9, %v9867_v1, %v9869_v48  ;;  %v28155_v43 = vadd.f32 %v6273_v15, %v28084_v2  ;;  %10325 = vmatprep.mubr.f32.mxu0 %v31944_v21 }
 0x25f   : > { %10220 = vmatprep.subr.mxu1 %v9886_v11  ;;  %v28161_v51 = vpop.f32.mrf.mxu0  ;;  %v9887_v11 = vsel %vm9876_vm9, %v9869_v48, %v9871_v54 }
 0x260   : > { %32005 = vst [vmem:[#allocation77_spill] sm:$0xff] %v28161_v51  ;;  %10221 = vmatpush1.msra.mxu1 %v9885_v53 }
 0x261   : > { %v9873_v38 = vpop.permute.xlu0 %9872  ;;  %25422 = vmatmul.mubr.msk.f32.vlgmr.msra.gmra.mxu1 %vm312_vm1, %v28115_v22  ;;  %25992 = vmatprep.subr.mxu1 %v31944_v21  ;;  %v6415_v6 = vpop.f32.mrf.mxu0 }
 0x262   : > { %v9875_v14 = vpop.permute.xlu1 %9874  ;;  %v9888_v2 = vsel %vm9876_vm9, %v9871_v54, %v9873_v38  ;;  %v6344_v59 = vpop.f32.mrf.mxu1  ;;  %25994 = vmatprep.mubr.msk.f32.mxu1 %vm26249_vm2, %v31944_v21  ;;  %v28170_v15 = vadd.f32 %v6415_v6, %v28096_v49  ;;  %v28192_v6 = vld [vmem:[%s31798_s1 + $0x90] sm:$0xff] }
 0x263   : > { %v9889_v5 = vsel %vm9876_vm9, %v9873_v38, %v9875_v14  ;;  %10291 = vmatprep.subr.mxu0 %v9888_v2  ;;  %v28174_v1 = vadd.f32 %v6344_v59, %v28101_v12  ;;  %v25961_v53 = vpop.f32.mrf.mxu0 }
 0x264   : > { %25993 = vmatpush3.msra.mxu1 %v9889_v5  ;;  %10292 = vmatpush1.msra.mxu0 %v9887_v11  ;;  %v28177_v51 = vpop.f32.mrf.mxu1 }
 0x265   : > { %32006 = vst [vmem:[#allocation78_spill] sm:$0xff] %v28177_v51  ;;  %v10420_v13 = vpop.permute.xlu0 %10419  ;;  %25423 = vmatmul.mubr.msk.f32.vlgmr.msra.gmra.mxu0 %vm312_vm1, %v28115_v22  ;;  %25995 = vmatmul.mubr.msk.f32.vlgmr.msra.gmra.mxu1 %vm312_vm1, %v28115_v22 }
 0x266   : > { %v10422_v49 = vpop.permute.xlu1 %10421  ;;  %10539 = vmatprep.mubr.f32.mxu0 %v31944_v21  ;;  %10610 = vmatprep.mubr.f32.mxu1 %v31944_v21 }
 0x267   : > { %v10447_v12 = vsel %vm10445_vm10, %v10420_v13, %v10422_v49 }
 0x268   : > { %10505 = vmatprep.subr.mxu0 %v10447_v12  ;;  %v6558_v48 = vpop.f32.mrf.mxu1 }
 0x269   : > { %v28187_v54 = vadd.f32 %v6558_v48, %v28118_v52  ;;  %v10418_v38 = vpop.permute.xlu0 %10417 }
 0x26a   : > { %v10446_v22 = vsel %vm10445_vm10, %v10418_v38, %v10420_v13  ;;  %v10424_v14 = vpop.permute.xlu1 %10423  ;;  %v28202_v53 = vpop.f32.mrf.mxu1 }
 0x26b   : > { %10506 = vmatpush1.msra.mxu0 %v10446_v22  ;;  %v10448_v13 = vsel %vm10445_vm10, %v10422_v49, %v10424_v14 }
 0x26c   : > { %25426 = vmatmul.mubr.msk.f32.vlgmr.msra.gmra.mxu0 %vm312_vm1, %v28192_v6 }
 0x26d   : > { %v10426_v2 = vpop.permute.xlu0 %10425  ;;  %v6629_v59 = vpop.f32.mrf.mxu0  ;;  %10681 = vmatprep.mubr.f32.mxu0 %v31944_v21 }
 0x26e   : > { %v28199_v52 = vadd.f32 %v6629_v59, %v28128_v8  ;;  %v10428_v5 = vpop.permute.xlu1 %10427  ;;  %v10449_v11 = vsel %vm10445_vm10, %v10424_v14, %v10426_v2 }
 0x26f   : > { %10576 = vmatprep.subr.mxu1 %v10449_v11  ;;  %v28212_v59 = vpop.f32.mrf.mxu0  ;;  %v10450_v11 = vsel %vm10445_vm10, %v10426_v2, %v10428_v5 }
 0x270   : > { %10577 = vmatpush1.msra.mxu1 %v10448_v13  ;;  %32007 = vst [vmem:[#allocation79_spill] sm:$0xff] %v28212_v59 }
 0x271   : > { %v10430_v12 = vpop.permute.xlu0 %10429  ;;  %v6700_v48 = vpop.f32.mrf.mxu1  ;;  %25427 = vmatmul.mubr.msk.f32.vlgmr.msra.gmra.mxu1 %vm312_vm1, %v28192_v6 }
 0x272   : > { %v28208_v38 = vadd.f32 %v6700_v48, %v28138_v0  ;;  %v10432_v22 = vpop.permute.xlu1 %10431  ;;  %v10451_v8 = vsel %vm10445_vm10, %v10428_v5, %v10430_v12  ;;  %10752 = vmatprep.mubr.f32.mxu1 %v31944_v21 }
 0x273   : > { %10647 = vmatprep.subr.mxu0 %v10451_v8  ;;  %v28222_v51 = vpop.f32.mrf.mxu1  ;;  %v10452_v8 = vsel %vm10445_vm10, %v10430_v12, %v10432_v22 }
 0x274   : > { %10648 = vmatpush1.msra.mxu0 %v10450_v11  ;;  %32008 = vst [vmem:[#allocation80_spill] sm:$0xff] %v28222_v51 }
 0x275   : > { %v10434_v49 = vpop.permute.xlu0 %10433  ;;  %v6771_v14 = vpop.f32.mrf.mxu0  ;;  %25428 = vmatmul.mubr.msk.f32.vlgmr.msra.gmra.mxu0 %vm312_vm1, %v28192_v6 }
 0x276   : > { %v28218_v13 = vadd.f32 %v6771_v14, %v28147_v4  ;;  %v10436_v0 = vpop.permute.xlu1 %10435  ;;  %v10453_v48 = vsel %vm10445_vm10, %v10432_v22, %v10434_v49  ;;  %10823 = vmatprep.mubr.f32.mxu0 %v31944_v21 }
 0x277   : > { %10718 = vmatprep.subr.mxu1 %v10453_v48  ;;  %v10454_v48 = vsel %vm10445_vm10, %v10434_v49, %v10436_v0  ;;  %v28235_v12 = vpop.f32.mrf.mxu0 }
 0x278   : > { %10719 = vmatpush1.msra.mxu1 %v10452_v8  ;;  %32010 = vst [vmem:[#allocation82_spill] sm:$0xff] %v28235_v12 }
 0x279   : > { %v10438_v2 = vpop.permute.xlu0 %10437  ;;  %v6842_v5 = vpop.f32.mrf.mxu1  ;;  %25429 = vmatmul.mubr.msk.f32.vlgmr.msra.gmra.mxu1 %vm312_vm1, %v28192_v6 }
 0x27a   : > { %v28228_v11 = vadd.f32 %v6842_v5, %v28155_v43  ;;  %v10440_v4 = vpop.permute.xlu1 %10439  ;;  %v10455_v14 = vsel %vm10445_vm10, %v10436_v0, %v10438_v2  ;;  %10894 = vmatprep.mubr.f32.mxu1 %v31944_v21 }
 0x27b   : > { %v28232_v59 = vpop.f32.mrf.mxu1  ;;  %10789 = vmatprep.subr.mxu0 %v10455_v14  ;;  %v10456_v14 = vsel %vm10445_vm10, %v10438_v2, %v10440_v4 }
 0x27c   : > { %32009 = vst [vmem:[#allocation81_spill] sm:$0xff] %v28232_v59  ;;  %10790 = vmatpush1.msra.mxu0 %v10454_v48 }
 0x27d   : > { %v10442_v22 = vpop.permute.xlu0 %10441  ;;  %v6984_v8 = vpop.f32.mrf.mxu1  ;;  %25430 = vmatmul.mubr.msk.f32.vlgmr.msra.gmra.mxu0 %vm312_vm1, %v28192_v6  ;;  %25997 = vmatprep.subr.mxu0 %v31944_v21 }
 0x27e   : > { %v6913_v43 = vpop.f32.mrf.mxu0  ;;  %v28241_v5 = vadd.f32 %v6984_v8, %v28170_v15  ;;  %v10444_v51 = vpop.permute.xlu1 %10443  ;;  %v10457_v59 = vsel %vm10445_vm10, %v10440_v4, %v10442_v22  ;;  %25999 = vmatprep.mubr.msk.f32.mxu0 %vm26249_vm2, %v31944_v21 }
 0x27f   : > { %v28247_v49 = vadd.f32 %v6913_v43, %v28174_v1  ;;  %v10458_v0 = vsel %vm10445_vm10, %v10442_v22, %v10444_v51  ;;  %10860 = vmatprep.subr.mxu1 %v10457_v59  ;;  %v25966_v48 = vpop.f32.mrf.mxu1  ;;  %v28266_v22 = vld [vmem:[%s31798_s1 + $0x98] sm:$0xff] }
 0x280   : > { %25998 = vmatpush3.msra.mxu0 %v10458_v0  ;;  %10861 = vmatpush1.msra.mxu1 %v10456_v14  ;;  %v28255_v8 = vpop.f32.mrf.mxu0 }
 0x281   : > { %v10989_v15 = vpop.permute.xlu0 %10988  ;;  %25431 = vmatmul.mubr.msk.f32.vlgmr.msra.gmra.mxu1 %vm312_vm1, %v28192_v6  ;;  %26000 = vmatmul.mubr.msk.f32.vlgmr.msra.gmra.mxu0 %vm312_vm1, %v28192_v6  ;;  %32011 = vst [vmem:[#allocation83_spill] sm:$0xff] %v28255_v8 }
 0x282   : > { %v10991_v1 = vpop.permute.xlu1 %10990  ;;  %11108 = vmatprep.mubr.f32.mxu1 %v31944_v21  ;;  %11179 = vmatprep.mubr.f32.mxu0 %v31944_v21 }
 0x283   : > { %v11016_v51 = vsel %vm11014_vm12, %v10989_v15, %v10991_v1 }
 0x284   : > { %11074 = vmatprep.subr.mxu1 %v11016_v51  ;;  %v7127_v59 = vpop.f32.mrf.mxu0 }
 0x285   : > { %v28261_v2 = vadd.f32 %v7127_v59, %v28187_v54  ;;  %v10987_v4 = vpop.permute.xlu0 %10986 }
 0x286   : > { %v11015_v6 = vsel %vm11014_vm12, %v10987_v4, %v10989_v15  ;;  %v10993_v43 = vpop.permute.xlu1 %10992  ;;  %v28276_v59 = vpop.f32.mrf.mxu0 }
 0x287   : > { %11075 = vmatpush1.msra.mxu1 %v11015_v6  ;;  %32012 = vst [vmem:[#allocation84_spill] sm:$0xff] %v28276_v59  ;;  %v11017_v15 = vsel %vm11014_vm12, %v10991_v1, %v10993_v43 }
 0x288   : > { %25434 = vmatmul.mubr.msk.f32.vlgmr.msra.gmra.mxu1 %vm312_vm1, %v28266_v22 }
 0x289   : > { %v10995_v0 = vpop.permute.xlu0 %10994  ;;  %v7198_v14 = vpop.f32.mrf.mxu1  ;;  %11250 = vmatprep.mubr.f32.mxu1 %v31944_v21 }
 0x28a   : > { %v28273_v54 = vadd.f32 %v7198_v14, %v28199_v52  ;;  %v10997_v48 = vpop.permute.xlu1 %10996  ;;  %v11018_v51 = vsel %vm11014_vm12, %v10993_v43, %v10995_v0 }
 0x28b   : > { %11145 = vmatprep.subr.mxu0 %v11018_v51  ;;  %v28286_v14 = vpop.f32.mrf.mxu1  ;;  %v11019_v51 = vsel %vm11014_vm12, %v10995_v0, %v10997_v48 }
 0x28c   : > { %11146 = vmatpush1.msra.mxu0 %v11017_v15  ;;  %32013 = vst [vmem:[#allocation85_spill] sm:$0xff] %v28286_v14 }
 0x28d   : > { %v10999_v4 = vpop.permute.xlu0 %10998  ;;  %v7269_v6 = vpop.f32.mrf.mxu0  ;;  %25435 = vmatmul.mubr.msk.f32.vlgmr.msra.gmra.mxu0 %vm312_vm1, %v28266_v22 }
 0x28e   : > { %v28282_v8 = vadd.f32 %v7269_v6, %v28208_v38  ;;  %v11001_v12 = vpop.permute.xlu1 %11000  ;;  %v11020_v52 = vsel %vm11014_vm12, %v10997_v48, %v10999_v4  ;;  %11321 = vmatprep.mubr.f32.mxu0 %v31944_v21 }
 0x28f   : > { %11216 = vmatprep.subr.mxu1 %v11020_v52  ;;  %v28296_v59 = vpop.f32.mrf.mxu0  ;;  %v11021_v52 = vsel %vm11014_vm12, %v10999_v4, %v11001_v12 }
 0x290   : > { %11217 = vmatpush1.msra.mxu1 %v11019_v51 }
 0x291   : > { %v11003_v1 = vpop.permute.xlu0 %11002  ;;  %v7340_v43 = vpop.f32.mrf.mxu1  ;;  %25436 = vmatmul.mubr.msk.f32.vlgmr.msra.gmra.mxu1 %vm312_vm1, %v28266_v22 }
 0x292   : > { %v28292_v15 = vadd.f32 %v7340_v43, %v28218_v13  ;;  %v11005_v38 = vpop.permute.xlu1 %11004  ;;  %v11022_v6 = vsel %vm11014_vm12, %v11001_v12, %v11003_v1  ;;  %11392 = vmatprep.mubr.f32.mxu1 %v31944_v21 }
 0x293   : > { %11287 = vmatprep.subr.mxu0 %v11022_v6  ;;  %v11023_v6 = vsel %vm11014_vm12, %v11003_v1, %v11005_v38  ;;  %v28309_v12 = vpop.f32.mrf.mxu1 }
 0x294   : > { %11288 = vmatpush1.msra.mxu0 %v11021_v52  ;;  %32015 = vst [vmem:[#allocation87_spill] sm:$0xff] %v28309_v12 }
 0x295   : > { %v11007_v0 = vpop.permute.xlu0 %11006  ;;  %v7411_v48 = vpop.f32.mrf.mxu0  ;;  %25437 = vmatmul.mubr.msk.f32.vlgmr.msra.gmra.mxu0 %vm312_vm1, %v28266_v22 }
 0x296   : > { %v28302_v51 = vadd.f32 %v7411_v48, %v28228_v11  ;;  %v11009_v13 = vpop.permute.xlu1 %11008  ;;  %v11024_v43 = vsel %vm11014_vm12, %v11005_v38, %v11007_v0  ;;  %11463 = vmatprep.mubr.f32.mxu0 %v31944_v21 }
 0x297   : > { %v28306_v14 = vpop.f32.mrf.mxu0  ;;  %11358 = vmatprep.subr.mxu1 %v11024_v43 }
 0x298   : > { %32014 = vst [vmem:[#allocation86_spill] sm:$0xff] %v28306_v14  ;;  %11359 = vmatpush1.msra.mxu1 %v11023_v6  ;;  %v11025_v6 = vsel %vm11014_vm12, %v11007_v0, %v11009_v13  ;;  %v25441_v0 = vld [vmem:[%s31798_s1 + $0xa0] sm:$0xff] }
 0x299   : > { %v11011_v4 = vpop.permute.xlu0 %11010  ;;  %v7553_v52 = vpop.f32.mrf.mxu0  ;;  %25438 = vmatmul.mubr.msk.f32.vlgmr.msra.gmra.mxu1 %vm312_vm1, %v28266_v22  ;;  %26002 = vmatprep.subr.mxu1 %v31944_v21 }
 0x29a   : > { %v7482_v11 = vpop.f32.mrf.mxu1  ;;  %v28315_v48 = vadd.f32 %v7553_v52, %v28241_v5  ;;  %v11013_v14 = vpop.permute.xlu1 %11012  ;;  %v11026_v43 = vsel %vm11014_vm12, %v11009_v13, %v11011_v4  ;;  %26004 = vmatprep.mubr.msk.f32.mxu1 %vm26249_vm2, %v31944_v21  ;;  %v26224_v13 = vld [vmem:[%s26313_s23 + $0x8] sm:$0xff]  ;;  %v26226_v52 = vld [vmem:[%s26313_s23 + $0x40] sm:$0xff] }
 0x29b   : > { %v28321_v1 = vadd.f32 %v7482_v11, %v28247_v49  ;;  %v11027_v38 = vsel %vm11014_vm12, %v11011_v4, %v11013_v14  ;;  %11429 = vmatprep.subr.mxu0 %v11026_v43  ;;  %v25971_v12 = vpop.f32.mrf.mxu0  ;;  %v26222_v49 = vld [vmem:[%s26313_s23 + $0x10] sm:$0xff]  ;;  %v26223_v14 = vld [vmem:[%s26313_s23 + $0x20] sm:$0xff]  ;;  %v26228_v43 = vld [vmem:[%s26313_s23 + $0x38] sm:$0xff] }
 0x29c   : > { %26003 = vmatpush3.msra.mxu1 %v11027_v38  ;;  %11430 = vmatpush1.msra.mxu0 %v11025_v6  ;;  %v28329_v5 = vpop.f32.mrf.mxu1  ;;  %v26227_v11 = vld [vmem:[%s26313_s23 + $0x30] sm:$0xff]  ;;  %v26229_v38 = vld [vmem:[%s26313_s23 + $0x28] sm:$0xff] }
 0x29d   : > { %25439 = vmatmul.mubr.msk.f32.vlgmr.msra.gmra.mxu0 %vm312_vm1, %v28266_v22  ;;  %26005 = vmatmul.mubr.msk.f32.vlgmr.msra.gmra.mxu1 %vm312_vm1, %v28266_v22  ;;  %v26225_v22 = vld [vmem:[%s26313_s23 + $0x18] sm:$0xff] }
 0x29e   : > { %11588 = vmatprep.subr.mxu0 %v26222_v49  ;;  %11659 = vmatprep.subr.mxu1 %v26223_v14  ;;  %v26231_v14 = vld [vmem:[%s26313_s23 + $0x50] sm:$0xff] }
 0x29f   : > { %11589 = vmatpush1.msra.mxu0 %v26224_v13  ;;  %11622 = vmatprep.mubr.f32.mxu0 %v31944_v21 }
 0x2a0   : > { %v7696_v12 = vpop.f32.mrf.mxu1  ;;  %11660 = vmatpush1.msra.mxu1 %v26225_v22  ;;  %11693 = vmatprep.mubr.f32.mxu1 %v31944_v21  ;;  %v26233_v22 = vld [vmem:[%s26313_s23 + $0x48] sm:$0xff] }
 0x2a1   : > { %v28341_v4 = vadd.f32 %v7696_v12, %v28261_v2  ;;  %25442 = vmatmul.mubr.msk.f32.vlgmr.msra.gmra.mxu0 %vm312_vm1, %v25441_v0  ;;  %25443 = vmatmul.mubr.msk.f32.vlgmr.msra.gmra.mxu1 %vm312_vm1, %v25441_v0  ;;  %v26230_v2 = vld [vmem:[%s26313_s23 + $0x60] sm:$0xff]  ;;  %v26232_v12 = vld [vmem:[%s26313_s23 + $0x58] sm:$0xff] }
 0x2a2   : > { %11801 = vmatprep.subr.mxu1 %v26226_v52  ;;  %11730 = vmatprep.subr.mxu0 %v26227_v11  ;;  %v28358_v13 = vpop.f32.mrf.mxu1 }
 0x2a3   : > { %11802 = vmatpush1.msra.mxu1 %v26228_v43  ;;  %11731 = vmatpush1.msra.mxu0 %v26229_v38  ;;  %v26234_v43 = vld [vmem:[%s26313_s23 + $0x68] sm:$0xff] }
 0x2a4   : > { %11764 = vmatprep.mubr.f32.mxu0 %v31944_v21  ;;  %11835 = vmatprep.mubr.f32.mxu1 %v31944_v21 }
 0x2a5   : > { %11943 = vmatprep.subr.mxu1 %v26230_v2  ;;  %v7767_v6 = vpop.f32.mrf.mxu0  ;;  %25444 = vmatmul.mubr.msk.f32.vlgmr.msra.gmra.mxu0 %vm312_vm1, %v25441_v0  ;;  %v32021_v2 = vld [vmem:[#allocation12_spill] sm:$0xff] }
 0x2a6   : > { %v28354_v49 = vadd.f32 %v7767_v6, %v28273_v54  ;;  %25445 = vmatmul.mubr.msk.f32.vlgmr.msra.gmra.mxu1 %vm312_vm1, %v25441_v0  ;;  %11872 = vmatprep.subr.mxu0 %v26231_v14 }
 0x2a7   : > { %11944 = vmatpush1.msra.mxu1 %v26232_v12  ;;  %11873 = vmatpush1.msra.mxu0 %v26233_v22  ;;  %v28371_v11 = vpop.f32.mrf.mxu0  ;;  %v32022_v12 = vld [vmem:[#allocation5_spill] sm:$0xff]  ;;  %v32023_v22 = vld [vmem:[#allocation7_spill] sm:$0xff] }
 0x2a8   : > { %12107 = vmatprep.subr.mxu1 %v26503_v25  ;;  %11906 = vmatprep.mubr.f32.mxu0 %v31944_v21  ;;  %v25449_v25 = vld [vmem:[%s31798_s1 + $0xa8] sm:$0xff] }
 0x2a9   : > { %11977 = vmatprep.mubr.f32.mxu1 %v31944_v21  ;;  %26007 = vmatprep.subr.mxu0 %v31944_v21  ;;  %v7838_v54 = vpop.f32.mrf.mxu1 }
 0x2aa   : > { %v28367_v52 = vadd.f32 %v7838_v54, %v28282_v8  ;;  %25446 = vmatmul.mubr.msk.f32.vlgmr.msra.gmra.mxu0 %vm312_vm1, %v25441_v0  ;;  %25447 = vmatmul.mubr.msk.f32.vlgmr.msra.gmra.mxu1 %vm312_vm1, %v25441_v0 }
 0x2ab   : > { %26008 = vmatpush3.msra.mxu0 %v26234_v43  ;;  %12108 = vmatpush1.msra.mxu1 %v26480_v19  ;;  %v28388_v19 = vpop.f32.mrf.mxu1  ;;  %v32024_v43 = vld [vmem:[#allocation11_spill] sm:$0xff] }
 0x2ac   : > { %12178 = vmatprep.subr.mxu0 %v26518_v29  ;;  %12249 = vmatprep.subr.mxu1 %v26533_v33 }
 0x2ad   : > { %26009 = vmatprep.mubr.msk.f32.mxu0 %vm26249_vm2, %v31944_v21  ;;  %12141 = vmatprep.mubr.f32.mxu1 %v31944_v21  ;;  %v7909_v8 = vpop.f32.mrf.mxu0 }
 0x2ae   : > { %v28384_v38 = vadd.f32 %v7909_v8, %v28292_v15  ;;  %26010 = vmatmul.mubr.msk.f32.vlgmr.msra.gmra.mxu0 %vm312_vm1, %v25441_v0  ;;  %25450 = vmatmul.mubr.msk.f32.vlgmr.msra.gmra.mxu1 %vm312_vm1, %v25449_v25  ;;  %v12071_v15 = vpop.permute.xlu0 %12070  ;;  %v32019_v0 = vld [vmem:[#allocation3_spill] sm:$0xff]  ;;  %v32025_v8 = vld [vmem:[#allocation9_spill] sm:$0xff] }
 0x2af   : > { %12179 = vmatpush1.msra.mxu0 %v26496_v24  ;;  %12250 = vmatpush1.msra.mxu1 %v26511_v28  ;;  %v28405_v28 = vpop.f32.mrf.mxu0 }
 0x2b0   : > { %12320 = vmatprep.subr.mxu0 %v26548_v37  ;;  %12391 = vmatprep.subr.mxu1 %v26574_v42  ;;  %v12072_v42 = vsel %vm285_vm0, %v26555_v39, %v12071_v15 }
 0x2b1   : > { %12212 = vmatprep.mubr.f32.mxu0 %v31944_v21  ;;  %12283 = vmatprep.mubr.f32.mxu1 %v31944_v21  ;;  %v7980_v29 = vpop.f32.mrf.mxu1 }
 0x2b2   : > { %v28397_v33 = vadd.f32 %v7980_v29, %v28302_v51  ;;  %25451 = vmatmul.mubr.msk.f32.vlgmr.msra.gmra.mxu0 %vm312_vm1, %v25449_v25  ;;  %25452 = vmatmul.mubr.msk.f32.vlgmr.msra.gmra.mxu1 %vm312_vm1, %v25449_v25  ;;  %v13107_v14 = vpop.permute.xlu0 %13106 }
 0x2b3   : > { %12321 = vmatpush1.msra.mxu0 %v26526_v32  ;;  %12392 = vmatpush1.msra.mxu1 %v26541_v36  ;;  %v28403_v24 = vpop.f32.mrf.mxu1 }
 0x2b4   : > { %12462 = vmatprep.subr.mxu0 %v26563_v41  ;;  %12354 = vmatprep.mubr.f32.mxu0 %v31944_v21 }
 0x2b5   : > { %12425 = vmatprep.mubr.f32.mxu1 %v31944_v21  ;;  %26012 = vmatprep.subr.mxu1 %v31944_v21  ;;  %v8122_v37 = vpop.f32.mrf.mxu1 }
 0x2b6   : > { %v8051_v51 = vpop.f32.mrf.mxu0  ;;  %v28414_v32 = vadd.f32 %v8122_v37, %v28315_v48  ;;  %25453 = vmatmul.mubr.msk.f32.vlgmr.msra.gmra.mxu0 %vm312_vm1, %v25449_v25  ;;  %25454 = vmatmul.mubr.msk.f32.vlgmr.msra.gmra.mxu1 %vm312_vm1, %v25449_v25  ;;  %v32026_v37 = vld [vmem:[#allocation10_spill] sm:$0xff] }
 0x2b7   : > { %v28419_v36 = vadd.f32 %v8051_v51, %v28321_v1  ;;  %12463 = vmatpush1.msra.mxu0 %v26559_v40  ;;  %26013 = vmatpush3.msra.mxu1 %v12072_v42  ;;  %v25976_v41 = vpop.f32.mrf.mxu1  ;;  %v25457_v40 = vld [vmem:[%s31798_s1 + $0xb0] sm:$0xff]  ;;  %v32018_v1 = vld [vmem:[#allocation2_spill] sm:$0xff]  ;;  %v32027_v51 = vld [vmem:[#allocation15_spill] sm:$0xff] }
 0x2b8   : > { %12625 = vmatprep.subr.mxu0 %v26647_v61  ;;  %12696 = vmatprep.subr.mxu1 %v26655_v63  ;;  %v28427_v39 = vpop.f32.mrf.mxu0  ;;  %v32028_v41 = vld [vmem:[#allocation17_spill] sm:$0xff] }
 0x2b9   : > { %12496 = vmatprep.mubr.f32.mxu0 %v31944_v21  ;;  %26014 = vmatprep.mubr.msk.f32.mxu1 %vm26249_vm2, %v31944_v21 }
 0x2ba   : > { %25455 = vmatmul.mubr.msk.f32.vlgmr.msra.gmra.mxu0 %vm312_vm1, %v25449_v25  ;;  %26015 = vmatmul.mubr.msk.f32.vlgmr.msra.gmra.mxu1 %vm312_vm1, %v25449_v25 }
 0x2bb   : > { %12626 = vmatpush1.msra.mxu0 %v26612_v50  ;;  %12697 = vmatpush1.msra.mxu1 %v26628_v56 }
 0x2bc   : > { %12767 = vmatprep.subr.mxu0 %v26672_v18  ;;  %12838 = vmatprep.subr.mxu1 %v26682_v20  ;;  %v8265_v61 = vpop.f32.mrf.mxu0  ;;  %v12589_v18 = vpop.permute.xlu1 %12588 }
 0x2bd   : > { %v28439_v63 = vadd.f32 %v8265_v61, %v28341_v4  ;;  %12659 = vmatprep.mubr.f32.mxu0 %v31944_v21  ;;  %12730 = vmatprep.mubr.f32.mxu1 %v31944_v21  ;;  %v12590_v20 = vsel %vm1341_vm3, %v26663_v16, %v12589_v18  ;;  %v32020_v4 = vld [vmem:[#allocation8_spill] sm:$0xff]  ;;  %v25473_v61 = vld [vmem:[%s31798_s1 + $0xc0] sm:$0xff]  ;;  %v32032_v18 = vld [vmem:[#allocation21_spill] sm:$0xff] }
 0x2be   : > { %25458 = vmatmul.mubr.msk.f32.vlgmr.msra.gmra.mxu0 %vm312_vm1, %v25457_v40  ;;  %25459 = vmatmul.mubr.msk.f32.vlgmr.msra.gmra.mxu1 %vm312_vm1, %v25457_v40 }
 0x2bf   : > { %12768 = vmatpush1.msra.mxu0 %v26631_v57  ;;  %12839 = vmatpush1.msra.mxu1 %v26650_v62  ;;  %v28456_v57 = vpop.f32.mrf.mxu0 }
 0x2c0   : > { %12909 = vmatprep.subr.mxu0 %v26707_v34  ;;  %12980 = vmatprep.subr.mxu1 %v26693_v26  ;;  %v32016_v34 = vld [vmem:[#allocation4_spill] sm:$0xff] }
 0x2c1   : > { %12801 = vmatprep.mubr.f32.mxu0 %v31944_v21  ;;  %12872 = vmatprep.mubr.f32.mxu1 %v31944_v21  ;;  %v8336_v50 = vpop.f32.mrf.mxu1 }
 0x2c2   : > { %v28452_v56 = vadd.f32 %v8336_v50, %v28354_v49  ;;  %25460 = vmatmul.mubr.msk.f32.vlgmr.msra.gmra.mxu0 %vm312_vm1, %v25457_v40  ;;  %25461 = vmatmul.mubr.msk.f32.vlgmr.msra.gmra.mxu1 %vm312_vm1, %v25457_v40  ;;  %v32031_v50 = vld [vmem:[#allocation19_spill] sm:$0xff] }
 0x2c3   : > { %12910 = vmatpush1.msra.mxu0 %v26668_v17  ;;  %12981 = vmatpush1.msra.mxu1 %v26687_v23  ;;  %v28471_v17 = vpop.f32.mrf.mxu1  ;;  %v25465_v23 = vld [vmem:[%s31798_s1 + $0xb8] sm:$0xff] }
 0x2c4   : > { %13143 = vmatprep.subr.mxu1 %v26726_v45  ;;  %12943 = vmatprep.mubr.f32.mxu0 %v31944_v21  ;;  %v32017_v45 = vld [vmem:[#allocation6_spill] sm:$0xff] }
 0x2c5   : > { %13014 = vmatprep.mubr.f32.mxu1 %v31944_v21  ;;  %26017 = vmatprep.subr.mxu0 %v31944_v21  ;;  %v8407_v62 = vpop.f32.mrf.mxu0 }
 0x2c6   : > { %v28467_v26 = vadd.f32 %v8407_v62, %v28367_v52  ;;  %25462 = vmatmul.mubr.msk.f32.vlgmr.msra.gmra.mxu0 %vm312_vm1, %v25457_v40  ;;  %25463 = vmatmul.mubr.msk.f32.vlgmr.msra.gmra.mxu1 %vm312_vm1, %v25457_v40 }
 0x2c7   : > { %26018 = vmatpush3.msra.mxu0 %v12590_v20  ;;  %13144 = vmatpush1.msra.mxu1 %v26702_v27  ;;  %v28487_v27 = vpop.f32.mrf.mxu0 }
 0x2c8   : > { %13214 = vmatprep.subr.mxu0 %v32016_v34  ;;  %13285 = vmatprep.subr.mxu1 %v32017_v45  ;;  %v32034_v34 = vld [vmem:[#allocation18_spill] sm:$0xff]  ;;  %v32035_v45 = vld [vmem:[#allocation25_spill] sm:$0xff] }
 0x2c9   : > { %26019 = vmatprep.mubr.msk.f32.mxu0 %vm26249_vm2, %v31944_v21  ;;  %13177 = vmatprep.mubr.f32.mxu1 %v31944_v21  ;;  %v8478_v16 = vpop.f32.mrf.mxu1 }
 0x2ca   : > { %v28483_v48 = vadd.f32 %v8478_v16, %v28384_v38  ;;  %26020 = vmatmul.mubr.msk.f32.vlgmr.msra.gmra.mxu0 %vm312_vm1, %v25457_v40  ;;  %25466 = vmatmul.mubr.msk.f32.vlgmr.msra.gmra.mxu1 %vm312_vm1, %v25465_v23  ;;  %v13108_v38 = vsel %vm1910_vm4, %v32025_v8, %v13107_v14  ;;  %v32030_v40 = vld [vmem:[#allocation14_spill] sm:$0xff]  ;;  %v32036_v16 = vld [vmem:[#allocation24_spill] sm:$0xff]  ;;  %vm16075_vm4 = vcmask 982016  }
 0x2cb   : > { %13215 = vmatpush1.msra.mxu0 %v32018_v1  ;;  %13286 = vmatpush1.msra.mxu1 %v32019_v0  ;;  %v28504_v52 = vpop.f32.mrf.mxu1  ;;  %v13625_v0 = vpop.permute.xlu0 %13624 }
 0x2cc   : > { %13356 = vmatprep.subr.mxu0 %v32020_v4  ;;  %13427 = vmatprep.subr.mxu1 %v32021_v2  ;;  %v32037_v2 = vld [vmem:[#allocation20_spill] sm:$0xff] }
 0x2cd   : > { %13248 = vmatprep.mubr.f32.mxu0 %v31944_v21  ;;  %13319 = vmatprep.mubr.f32.mxu1 %v31944_v21  ;;  %v8549_v6 = vpop.f32.mrf.mxu0 }
 0x2ce   : > { %v28496_v49 = vadd.f32 %v8549_v6, %v28397_v33  ;;  %25467 = vmatmul.mubr.msk.f32.vlgmr.msra.gmra.mxu0 %vm312_vm1, %v25465_v23  ;;  %25468 = vmatmul.mubr.msk.f32.vlgmr.msra.gmra.mxu1 %vm312_vm1, %v25465_v23  ;;  %v32038_v6 = vld [vmem:[#allocation23_spill] sm:$0xff] }
 0x2cf   : > { %13357 = vmatpush1.msra.mxu0 %v32022_v12  ;;  %13428 = vmatpush1.msra.mxu1 %v32023_v22  ;;  %v28502_v54 = vpop.f32.mrf.mxu0  ;;  %v26264_v12 = vmov 0   ;;  %v32039_v22 = vld [vmem:[#allocation22_spill] sm:$0xff] }
 0x2d0   : > { %13498 = vmatprep.subr.mxu0 %v32024_v43  ;;  %13390 = vmatprep.mubr.f32.mxu0 %v31944_v21  ;;  %v13626_v43 = vsel %vm2479_vm5, %v32039_v22, %v13625_v0 }
 0x2d1   : > { %13461 = vmatprep.mubr.f32.mxu1 %v31944_v21  ;;  %26022 = vmatprep.subr.mxu1 %v31944_v21  ;;  %v8691_v25 = vpop.f32.mrf.mxu0 }
 0x2d2   : > { %v8620_v29 = vpop.f32.mrf.mxu1  ;;  %v28513_v33 = vadd.f32 %v8691_v25, %v28414_v32  ;;  %25469 = vmatmul.mubr.msk.f32.vlgmr.msra.gmra.mxu0 %vm312_vm1, %v25465_v23  ;;  %25470 = vmatmul.mubr.msk.f32.vlgmr.msra.gmra.mxu1 %vm312_vm1, %v25465_v23 }
 0x2d3   : > { %v28518_v15 = vadd.f32 %v8620_v29, %v28419_v36  ;;  %13499 = vmatpush1.msra.mxu0 %v32026_v37  ;;  %26023 = vmatpush3.msra.mxu1 %v13108_v38  ;;  %v25981_v42 = vpop.f32.mrf.mxu0  ;;  %v32029_v36 = vld [vmem:[#allocation13_spill] sm:$0xff] }
 0x2d4   : > { %13661 = vmatprep.subr.mxu0 %v32027_v51  ;;  %13732 = vmatprep.subr.mxu1 %v32028_v41  ;;  %v28526_v32 = vpop.f32.mrf.mxu1 }
 0x2d5   : > { %13532 = vmatprep.mubr.f32.mxu0 %v31944_v21  ;;  %26024 = vmatprep.mubr.msk.f32.mxu1 %vm26249_vm2, %v31944_v21 }
 0x2d6   : > { %25471 = vmatmul.mubr.msk.f32.vlgmr.msra.gmra.mxu0 %vm312_vm1, %v25465_v23  ;;  %26025 = vmatmul.mubr.msk.f32.vlgmr.msra.gmra.mxu1 %vm312_vm1, %v25465_v23  ;;  %v32033_v23 = vld [vmem:[#allocation16_spill] sm:$0xff] }
 0x2d7   : > { %13662 = vmatpush1.msra.mxu0 %v32029_v36  ;;  %13733 = vmatpush1.msra.mxu1 %v32030_v40 }
 0x2d8   : > { %13803 = vmatprep.subr.mxu0 %v32031_v50  ;;  %13874 = vmatprep.subr.mxu1 %v32032_v18  ;;  %v8834_v62 = vpop.f32.mrf.mxu1 }
 0x2d9   : > { %v9264_v20 = vadd.f32 %v8834_v62, %v28439_v63  ;;  %13695 = vmatprep.mubr.f32.mxu0 %v31944_v21  ;;  %13766 = vmatprep.mubr.f32.mxu1 %v31944_v21 }
 0x2da   : > { %25474 = vmatmul.mubr.msk.f32.vlgmr.msra.gmra.mxu0 %vm312_vm1, %v25473_v61  ;;  %25475 = vmatmul.mubr.msk.f32.vlgmr.msra.gmra.mxu1 %vm312_vm1, %v25473_v61  ;;  %v28551_v4 = vpop.f32.mrf.mxu1 }
 0x2db   : > { %13804 = vmatpush1.msra.mxu0 %v32033_v23  ;;  %13875 = vmatpush1.msra.mxu1 %v32034_v34 }
 0x2dc   : > { %13945 = vmatprep.subr.mxu0 %v32035_v45  ;;  %14016 = vmatprep.subr.mxu1 %v32036_v16 }
 0x2dd   : > { %13837 = vmatprep.mubr.f32.mxu0 %v31944_v21  ;;  %13908 = vmatprep.mubr.f32.mxu1 %v31944_v21  ;;  %v8905_v63 = vpop.f32.mrf.mxu0 }
 0x2de   : > { %v9266_v1 = vadd.f32 %v8905_v63, %v28452_v56  ;;  %25476 = vmatmul.mubr.msk.f32.vlgmr.msra.gmra.mxu0 %vm312_vm1, %v25473_v61  ;;  %25477 = vmatmul.mubr.msk.f32.vlgmr.msra.gmra.mxu1 %vm312_vm1, %v25473_v61  ;;  %v14140_v56 = vld [vmem:[%s31799_s2] sm:$0xff] }
 0x2df   : > { %13946 = vmatpush1.msra.mxu0 %v32037_v2  ;;  %14017 = vmatpush1.msra.mxu1 %v32038_v6  ;;  %v28566_v8 = vpop.f32.mrf.mxu0 }
 0x2e0   : > { %13979 = vmatprep.mubr.f32.mxu0 %v31944_v21  ;;  %14050 = vmatprep.mubr.f32.mxu1 %v31944_v21 }
 0x2e1   : > { %26027 = vmatprep.subr.mxu0 %v31944_v21  ;;  %v8976_v14 = vpop.f32.mrf.mxu1  ;;  %26192 = vset.pattern.permute.xlu1 %v26264_v12 }
 0x2e2   : > { %v9268_v25 = vadd.f32 %v8976_v14, %v28467_v26  ;;  %25478 = vmatmul.mubr.msk.f32.vlgmr.msra.gmra.mxu0 %vm312_vm1, %v25473_v61  ;;  %25479 = vmatmul.mubr.msk.f32.vlgmr.msra.gmra.mxu1 %vm312_vm1, %v25473_v61 }
 0x2e3   : > { %26028 = vmatpush3.msra.mxu0 %v13626_v43  ;;  %26029 = vmatprep.mubr.msk.f32.mxu0 %vm26249_vm2, %v31944_v21  ;;  %v28573_v26 = vpop.f32.mrf.mxu1  ;;  %vm15626_vm2 = vcmask 998400  }
 0x2e4   : > { %14143 = vperm.xlu1 %26192, %v14140_v56   ;;  %14447 = vmatprep.mubr.f32.mxu1 %v31944_v21 }
 0x2e5   : > { %v9047_v38 = vpop.f32.mrf.mxu0  ;;  %26193 = vset.pattern.permute.xlu0 %v26264_v12 }
 0x2e6   : > { %v9270_v29 = vadd.f32 %v9047_v38, %v28483_v48  ;;  %26030 = vmatmul.mubr.msk.f32.vlgmr.msra.gmra.mxu0 %vm312_vm1, %v25473_v61 }
 0x2e7   : > { %14524 = vmatprep.mubr.f32.mxu0 %v31944_v21  ;;  %v28579_v41 = vpop.f32.mrf.mxu0 }
 0x2e9   : > { %v9118_v37 = vpop.f32.mrf.mxu1 }
 0x2ea   : > { %v9272_v42 = vadd.f32 %v9118_v37, %v28496_v49 }
 0x2eb   : > { %v28577_v51 = vpop.f32.mrf.mxu1 }
 0x2ed   : > { %v9260_v36 = vpop.f32.mrf.mxu1 }
 0x2ee   : > { %v9189_v40 = vpop.f32.mrf.mxu0  ;;  %v9276_v50 = vadd.f32 %v9260_v36, %v28513_v33 }
 0x2ef   : > { %v9274_v18 = vadd.f32 %v9189_v40, %v28518_v15  ;;  %v25986_v48 = vpop.f32.mrf.mxu1 }
 0x2f0   : > { %v28583_v62 = vpop.f32.mrf.mxu0 }
 0x2f4   : > { %v9403_v61 = vpop.f32.mrf.mxu0 }
 0x2f5   : > { %v9833_v23 = vadd.f32 %v9403_v61, %v9264_v20 }
 0x2f6   : > { %v28585_v16 = vpop.f32.mrf.mxu0 }
 0x2f9   : > { %v9474_v34 = vpop.f32.mrf.mxu1 }
 0x2fa   : > { %v9835_v45 = vadd.f32 %v9474_v34, %v9266_v1 }
 0x2fb   : > { %v28587_v0 = vpop.f32.mrf.mxu1 }
 0x2fd   : > { %v9545_v49 = vpop.f32.mrf.mxu0 }
 0x2fe   : > { %v9837_v63 = vadd.f32 %v9545_v49, %v9268_v25 }
 0x2ff   : > { %v28589_v14 = vpop.f32.mrf.mxu0 }
 0x301   : > { %v9616_v2 = vpop.f32.mrf.mxu1 }
 0x302   : > { %v9839_v6 = vadd.f32 %v9616_v2, %v9270_v29 }
 0x303   : > { %v28591_v15 = vpop.f32.mrf.mxu1 }
 0x305   : > { %v9687_v33 = vpop.f32.mrf.mxu0 }
 0x306   : > { %v9841_v12 = vadd.f32 %v9687_v33, %v9272_v42 }
 0x307   : > { %v28593_v56 = vpop.f32.mrf.mxu0 }
 0x308   : > { %32040 = vst [vmem:[#allocation4_spill] sm:$0xff] %v28593_v56 }
 0x309   : > { %v9758_v22 = vpop.f32.mrf.mxu1  ;;  %v9829_v20 = vpop.f32.mrf.mxu0 }
 0x30a   : > { %v9843_v43 = vadd.f32 %v9758_v22, %v9274_v18  ;;  %v9845_v1 = vadd.f32 %v9829_v20, %v9276_v50 }
 0x30b   : > { %v25991_v38 = vpop.f32.mrf.mxu0  ;;  %v28595_v37 = vpop.f32.mrf.mxu1 }
 0x30c   : > { %32041 = vst [vmem:[#allocation6_spill] sm:$0xff] %v28595_v37 }
 0x310   : > { %v9972_v25 = vpop.f32.mrf.mxu1 }
 0x311   : > { %v10402_v36 = vadd.f32 %v9972_v25, %v9833_v23 }
 0x312   : > { %v28597_v29 = vpop.f32.mrf.mxu1 }
 0x315   : > { %v10043_v40 = vpop.f32.mrf.mxu0 }
 0x316   : > { %v10404_v48 = vadd.f32 %v10043_v40, %v9835_v45 }
 0x317   : > { %v28599_v42 = vpop.f32.mrf.mxu0 }
 0x318   : > { %32042 = vst [vmem:[#allocation2_spill] sm:$0xff] %v28599_v42 }
 0x319   : > { %v10114_v61 = vpop.f32.mrf.mxu1 }
 0x31a   : > { %v10406_v34 = vadd.f32 %v10114_v61, %v9837_v63 }
 0x31b   : > { %v28601_v33 = vpop.f32.mrf.mxu1 }
 0x31c   : > { %32043 = vst [vmem:[#allocation3_spill] sm:$0xff] %v28601_v33 }
 0x31d   : > { %v10185_v49 = vpop.f32.mrf.mxu0 }
 0x31e   : > { %v10408_v2 = vadd.f32 %v10185_v49, %v9839_v6 }
 0x31f   : > { %v28603_v50 = vpop.f32.mrf.mxu0 }
 0x320   : > { %32044 = vst [vmem:[#allocation8_spill] sm:$0xff] %v28603_v50 }
 0x321   : > { %v10256_v21 = vpop.f32.mrf.mxu1 }
 0x322   : > { %v10410_v18 = vadd.f32 %v10256_v21, %v9841_v12 }
 0x323   : > { %v28605_v22 = vpop.f32.mrf.mxu1 }
 0x324   : > { %32045 = vst [vmem:[#allocation12_spill] sm:$0xff] %v28605_v22 }
 0x325   : > { %v10327_v20 = vpop.f32.mrf.mxu0  ;;  %v10398_v23 = vpop.f32.mrf.mxu1 }
 0x326   : > { %v10412_v38 = vadd.f32 %v10327_v20, %v9843_v43  ;;  %v10414_v45 = vadd.f32 %v10398_v23, %v9845_v1 }
 0x327   : > { %v25996_v25 = vpop.f32.mrf.mxu1  ;;  %v28607_v40 = vpop.f32.mrf.mxu0 }
 0x328   : > { %32046 = vst [vmem:[#allocation5_spill] sm:$0xff] %v28607_v40 }
 0x32c   : > { %v10541_v63 = vpop.f32.mrf.mxu0 }
 0x32d   : > { %v10971_v61 = vadd.f32 %v10541_v63, %v10402_v36 }
 0x32e   : > { %v28611_v6 = vpop.f32.mrf.mxu0 }
 0x32f   : > { %32048 = vst [vmem:[#allocation11_spill] sm:$0xff] %v28611_v6  ;;  %v32094_v6 = vld [vmem:[#allocation46_spill] sm:$0xff] }
 0x331   : > { %v10612_v42 = vpop.f32.mrf.mxu1 }
 0x332   : > { %v28609_v37 = vadd.f32 %v10612_v42, %v10404_v48 }
 0x333   : > { %v28615_v12 = vpop.f32.mrf.mxu1 }
 0x334   : > { %32047 = vst [vmem:[#allocation7_spill] sm:$0xff] %v28609_v37  ;;  %32050 = vst [vmem:[#allocation10_spill] sm:$0xff] %v28615_v12  ;;  %v32075_v12 = vld [vmem:[#allocation30_spill] sm:$0xff]  ;;  %v32078_v37 = vld [vmem:[#allocation37_spill] sm:$0xff] }
 0x335   : > { %v10683_v49 = vpop.f32.mrf.mxu0 }
 0x336   : > { %v28613_v21 = vadd.f32 %v10683_v49, %v10406_v34 }
 0x337   : > { %v28617_v33 = vpop.f32.mrf.mxu0 }
 0x338   : > { %32049 = vst [vmem:[#allocation9_spill] sm:$0xff] %v28613_v21  ;;  %32051 = vst [vmem:[#allocation15_spill] sm:$0xff] %v28617_v33 }
 0x339   : > { %v10754_v22 = vpop.f32.mrf.mxu1 }
 0x33a   : > { %v10977_v50 = vadd.f32 %v10754_v22, %v10408_v2 }
 0x33b   : > { %v28619_v20 = vpop.f32.mrf.mxu1 }
 0x33c   : > { %32052 = vst [vmem:[#allocation17_spill] sm:$0xff] %v28619_v20 }
 0x33d   : > { %v10825_v43 = vpop.f32.mrf.mxu0 }
 0x33e   : > { %v10979_v1 = vadd.f32 %v10825_v43, %v10410_v18 }
 0x33f   : > { %v28621_v23 = vpop.f32.mrf.mxu0 }
 0x340   : > { %32053 = vst [vmem:[#allocation13_spill] sm:$0xff] %v28621_v23 }
 0x341   : > { %v10896_v36 = vpop.f32.mrf.mxu1  ;;  %v10967_v48 = vpop.f32.mrf.mxu0 }
 0x342   : > { %v10981_v42 = vadd.f32 %v10896_v36, %v10412_v38  ;;  %v10983_v25 = vadd.f32 %v10967_v48, %v10414_v45  ;;  %v32065_v48 = vld [vmem:[#allocation26_spill] sm:$0xff] }
 0x343   : > { %v26001_v63 = vpop.f32.mrf.mxu0  ;;  %v28623_v40 = vpop.f32.mrf.mxu1 }
 0x344   : > { %32054 = vst [vmem:[#allocation14_spill] sm:$0xff] %v28623_v40  ;;  %v32066_v63 = vld [vmem:[#allocation32_spill] sm:$0xff] }
 0x348   : > { %v11110_v34 = vpop.f32.mrf.mxu1 }
 0x349   : > { %v28625_v49 = vadd.f32 %v11110_v34, %v10971_v61  ;;  %v884_v34 = vadd.f32 %v32066_v63, %v32065_v48  ;;  %v32077_v63 = vld [vmem:[#allocation31_spill] sm:$0xff] }
 0x34a   : > { %v28629_v2 = vpop.f32.mrf.mxu1 }
 0x34b   : > { %32055 = vst [vmem:[#allocation19_spill] sm:$0xff] %v28625_v49  ;;  %32057 = vst [vmem:[#allocation16_spill] sm:$0xff] %v28629_v2  ;;  %v32068_v49 = vld [vmem:[#allocation27_spill] sm:$0xff] }
 0x34c   : > { %v32074_v2 = vld [vmem:[#allocation35_spill] sm:$0xff] }
 0x34d   : > { %v28627_v21 = vpop.f32.mrf.mxu0 }
 0x34e   : > { %32056 = vst [vmem:[#allocation21_spill] sm:$0xff] %v28627_v21  ;;  %v32076_v21 = vld [vmem:[#allocation36_spill] sm:$0xff] }
 0x34f   : > { %v28631_v22 = vpop.f32.mrf.mxu0  ;;  %v1168_v48 = vadd.f32 %v32076_v21, %v32075_v12  ;;  %v32086_v21 = vld [vmem:[#allocation40_spill] sm:$0xff] }
 0x350   : > { %32058 = vst [vmem:[#allocation18_spill] sm:$0xff] %v28631_v22 }
 0x351   : > { %v28633_v18 = vpop.f32.mrf.mxu1  ;;  %v1876_v12 = vadd.f32 %v32086_v21, %v1168_v48 }
 0x352   : > { %32059 = vst [vmem:[#allocation25_spill] sm:$0xff] %v28633_v18 }
 0x353   : > { %v28637_v20 = vpop.f32.mrf.mxu1 }
 0x354   : > { %32061 = vst [vmem:[#allocation20_spill] sm:$0xff] %v28637_v20 }
 0x355   : > { %v11323_v43 = vpop.f32.mrf.mxu0 }
 0x356   : > { %v28635_v23 = vadd.f32 %v11323_v43, %v10977_v50  ;;  %v32069_v50 = vld [vmem:[#allocation33_spill] sm:$0xff] }
 0x357   : > { %v28641_v36 = vpop.f32.mrf.mxu0  ;;  %v955_v43 = vadd.f32 %v32069_v50, %v32068_v49 }
 0x358   : > { %32060 = vst [vmem:[#allocation24_spill] sm:$0xff] %v28635_v23  ;;  %32063 = vst [vmem:[#allocation22_spill] sm:$0xff] %v28641_v36  ;;  %v32073_v36 = vld [vmem:[#allocation29_spill] sm:$0xff] }
 0x359   : > { %v11394_v38 = vpop.f32.mrf.mxu1 }
 0x35a   : > { %v28639_v45 = vadd.f32 %v11394_v38, %v10979_v1  ;;  %v32071_v1 = vld [vmem:[#allocation28_spill] sm:$0xff]  ;;  %v32072_v38 = vld [vmem:[#allocation34_spill] sm:$0xff] }
 0x35b   : > { %v28643_v61 = vpop.f32.mrf.mxu1 }
 0x35c   : > { %32062 = vst [vmem:[#allocation23_spill] sm:$0xff] %v28639_v45  ;;  %32064 = vst [vmem:[#allocation88_spill] sm:$0xff] %v28643_v61  ;;  %v1026_v45 = vadd.f32 %v32072_v38, %v32071_v1  ;;  %v1097_v61 = vadd.f32 %v32074_v2, %v32073_v36  ;;  %v32084_v38 = vld [vmem:[#allocation39_spill] sm:$0xff]  ;;  %v32085_v36 = vld [vmem:[#allocation41_spill] sm:$0xff] }
 0x35d   : > { %v11465_v40 = vpop.f32.mrf.mxu0  ;;  %v11536_v33 = vpop.f32.mrf.mxu1 }
 0x35e   : > { %v28647_v22 = vadd.f32 %v11465_v40, %v10981_v42  ;;  %v11552_v18 = vadd.f32 %v11536_v33, %v10983_v25  ;;  %v1239_v40 = vadd.f32 %v32078_v37, %v32077_v63  ;;  %v32079_v42 = vld [vmem:[#allocation38_spill] sm:$0xff]  ;;  %v1872_v2 = vadd.f32 %v32084_v38, %v1026_v45  ;;  %v32088_v63 = vld [vmem:[#allocation43_spill] sm:$0xff] }
 0x35f   : > { %v28651_v23 = vpop.f32.mrf.mxu0  ;;  %v26006_v20 = vpop.f32.mrf.mxu1  ;;  %v1868_v33 = vadd.f32 %v32079_v42, %v884_v34  ;;  %v32095_v38 = vld [vmem:[#allocation47_spill] sm:$0xff] }
 0x360   : > { %32067 = vst [vmem:[#allocation26_spill] sm:$0xff] %v28647_v22  ;;  %32070 = vst [vmem:[#allocation32_spill] sm:$0xff] %v28651_v23  ;;  %v1870_v20 = vadd.f32 %v27337_v31, %v955_v43  ;;  %v1874_v22 = vadd.f32 %v32085_v36, %v1097_v61  ;;  %v32087_v23 = vld [vmem:[#allocation42_spill] sm:$0xff]  ;;  %v2445_v61 = vadd.f32 %v32095_v38, %v1876_v12  ;;  %v32096_v36 = vld [vmem:[#allocation48_spill] sm:$0xff] }
 0x361   : > { %v28662_v25 = vpop.f32.mrf.mxu0  ;;  %v28664_v49 = vpop.f32.mrf.mxu1  ;;  %v1878_v37 = vadd.f32 %v32087_v23, %v1239_v40  ;;  %v2437_v34 = vadd.f32 %v32088_v63, %v1868_v33  ;;  %v32098_v23 = vld [vmem:[#allocation49_spill] sm:$0xff] }
 0x362   : > { %32080 = vst [vmem:[#allocation27_spill] sm:$0xff] %v28662_v25  ;;  %32081 = vst [vmem:[#allocation33_spill] sm:$0xff] %v28664_v49  ;;  %v32091_v49 = vld [vmem:[#allocation44_spill] sm:$0xff]  ;;  %v2443_v45 = vadd.f32 %v32094_v6, %v1874_v22  ;;  %v32105_v22 = vld [vmem:[#allocation54_spill] sm:$0xff] }
 0x363   : > { %v28667_v50 = vpop.f32.mrf.mxu0  ;;  %v28669_v1 = vpop.f32.mrf.mxu1  ;;  %v2439_v31 = vadd.f32 %v32091_v49, %v1870_v20  ;;  %v2447_v48 = vadd.f32 %v32096_v36, %v1878_v37  ;;  %v3006_v40 = vadd.f32 %v32098_v23, %v2437_v34  ;;  %v32102_v20 = vld [vmem:[#allocation51_spill] sm:$0xff] }
 0x364   : > { %32082 = vst [vmem:[#allocation28_spill] sm:$0xff] %v28667_v50  ;;  %32083 = vst [vmem:[#allocation34_spill] sm:$0xff] %v28669_v1  ;;  %v32093_v50 = vld [vmem:[#allocation45_spill] sm:$0xff]  ;;  %v32108_v36 = vld [vmem:[#allocation55_spill] sm:$0xff] }
 0x365   : > { %v28676_v42 = vpop.f32.mrf.mxu0  ;;  %v2441_v1 = vadd.f32 %v32093_v50, %v1872_v2  ;;  %v32104_v2 = vld [vmem:[#allocation53_spill] sm:$0xff]  ;;  %v3016_v12 = vadd.f32 %v32105_v22, %v2447_v48  ;;  %v3575_v34 = vadd.f32 %v32108_v36, %v3006_v40 }
 0x366   : > { %32089 = vst [vmem:[#allocation29_spill] sm:$0xff] %v28676_v42  ;;  %v28678_v25 = vpop.f32.mrf.mxu1  ;;  %v32103_v42 = vld [vmem:[#allocation52_spill] sm:$0xff]  ;;  %v3014_v6 = vadd.f32 %v32104_v2, %v2445_v61 }
 0x367   : > { %32090 = vst [vmem:[#allocation35_spill] sm:$0xff] %v28678_v25  ;;  %v28681_v43 = vpop.f32.mrf.mxu0  ;;  %v32101_v25 = vld [vmem:[#allocation50_spill] sm:$0xff]  ;;  %v3012_v50 = vadd.f32 %v32103_v42, %v2443_v45  ;;  %v32113_v45 = vld [vmem:[#allocation59_spill] sm:$0xff]  ;;  %v32114_v2 = vld [vmem:[#allocation60_spill] sm:$0xff] }
 0x368   : > { %32092 = vst [vmem:[#allocation30_spill] sm:$0xff] %v28681_v43  ;;  %v28687_v21 = vpop.f32.mrf.mxu1  ;;  %v3008_v49 = vadd.f32 %v32101_v25, %v2439_v31  ;;  %v3010_v43 = vadd.f32 %v32102_v20, %v2441_v1  ;;  %v32111_v31 = vld [vmem:[#allocation57_spill] sm:$0xff]  ;;  %v32112_v20 = vld [vmem:[#allocation58_spill] sm:$0xff]  ;;  %v3583_v61 = vadd.f32 %v32113_v45, %v3014_v6  ;;  %v3585_v48 = vadd.f32 %v32114_v2, %v3016_v12  ;;  %v32122_v2 = vld [vmem:[#allocation67_spill] sm:$0xff] }
 0x369   : > { %32097 = vst [vmem:[#allocation36_spill] sm:$0xff] %v28687_v21  ;;  %v3581_v42 = vadd.f32 %v32112_v20, %v3012_v50  ;;  %v32120_v50 = vld [vmem:[#allocation65_spill] sm:$0xff]  ;;  %v32121_v6 = vld [vmem:[#allocation66_spill] sm:$0xff] }
 0x36a   : > { %v28690_v33 = vpop.f32.mrf.mxu0  ;;  %v28692_v63 = vpop.f32.mrf.mxu1  ;;  %v3579_v1 = vadd.f32 %v32111_v31, %v3010_v43  ;;  %v32119_v43 = vld [vmem:[#allocation64_spill] sm:$0xff]  ;;  %v4152_v31 = vadd.f32 %v32120_v50, %v3583_v61  ;;  %v4154_v20 = vadd.f32 %v32121_v6, %v3585_v48 }
 0x36b   : > { %32099 = vst [vmem:[#allocation31_spill] sm:$0xff] %v28690_v33  ;;  %32100 = vst [vmem:[#allocation37_spill] sm:$0xff] %v28692_v63  ;;  %v32110_v63 = vld [vmem:[#allocation56_spill] sm:$0xff] }
 0x36c   : > { %v28699_v38 = vpop.f32.mrf.mxu0  ;;  %v28701_v37 = vpop.f32.mrf.mxu1  ;;  %v3577_v21 = vadd.f32 %v32110_v63, %v3008_v49  ;;  %v4723_v48 = vadd.f32 %v27926_v60, %v4154_v20 }
 0x36d   : > { %32106 = vst [vmem:[#allocation38_spill] sm:$0xff] %v28699_v38  ;;  %32107 = vst [vmem:[#allocation39_spill] sm:$0xff] %v28701_v37  ;;  %v32115_v37 = vld [vmem:[#allocation61_spill] sm:$0xff] }
 0x36e   : > { %v12050_v23 = vpop.f32.mrf.mxu0  ;;  %v28704_v33 = vpop.f32.mrf.mxu1  ;;  %v4144_v56 = vadd.f32 %v32115_v37, %v3575_v34  ;;  %v5292_v60 = vadd.f32 %v28027_v3, %v4723_v48  ;;  %v32135_v48 = vld [vmem:[#allocation77_spill] sm:$0xff] }
 0x36f   : > { %32109 = vst [vmem:[#allocation41_spill] sm:$0xff] %v28704_v33  ;;  %v12066_v25 = vadd.f32 %v12050_v23, %v11552_v18  ;;  %v32117_v33 = vld [vmem:[#allocation62_spill] sm:$0xff]  ;;  %v32118_v18 = vld [vmem:[#allocation63_spill] sm:$0xff]  ;;  %v4150_v23 = vadd.f32 %v32119_v43, %v3581_v42 }
 0x370   : > { %v26011_v22 = vpop.f32.mrf.mxu0  ;;  %v28711_v38 = vpop.f32.mrf.mxu1  ;;  %v4146_v63 = vadd.f32 %v32117_v33, %v3577_v21  ;;  %v4148_v49 = vadd.f32 %v32118_v18, %v3579_v1  ;;  %v4713_v37 = vadd.f32 %v32122_v2, %v4144_v56  ;;  %v32126_v33 = vld [vmem:[#allocation69_spill] sm:$0xff]  ;;  %v32127_v18 = vld [vmem:[#allocation70_spill] sm:$0xff]  ;;  %v32128_v43 = vld [vmem:[#allocation71_spill] sm:$0xff] }
 0x371   : > { %v4719_v42 = vadd.f32 %v32127_v18, %v4150_v23  ;;  %v4721_v61 = vadd.f32 %v32128_v43, %v4152_v31  ;;  %v32132_v43 = vld [vmem:[#allocation74_spill] sm:$0xff] }
 0x372   : > { %v28714_v40 = vpop.f32.mrf.mxu0  ;;  %v28716_v36 = vpop.f32.mrf.mxu1  ;;  %v4717_v1 = vadd.f32 %v32126_v33, %v4148_v49  ;;  %v5282_v56 = vadd.f32 %v27954_v44, %v4713_v37 }
 0x373   : > { %32116 = vst [vmem:[#allocation40_spill] sm:$0xff] %v28716_v36  ;;  %v32125_v36 = vld [vmem:[#allocation68_spill] sm:$0xff]  ;;  %v5288_v49 = vadd.f32 %v28001_v47, %v4719_v42  ;;  %v5290_v23 = vadd.f32 %v28006_v7, %v4721_v61 }
 0x374   : > { %v28723_v12 = vpop.f32.mrf.mxu0  ;;  %v28725_v45 = vpop.f32.mrf.mxu1  ;;  %v4715_v21 = vadd.f32 %v32125_v36, %v4146_v63  ;;  %v5286_v63 = vadd.f32 %v27980_v9, %v4717_v1  ;;  %v5851_v33 = vadd.f32 %v28049_v55, %v5282_v56  ;;  %v32130_v7 = vld [vmem:[#allocation72_spill] sm:$0xff]  ;;  %v32131_v1 = vld [vmem:[#allocation73_spill] sm:$0xff] }
 0x375   : > { %v5857_v9 = vadd.f32 %v28081_v35, %v5288_v49  ;;  %v5859_v47 = vadd.f32 %v28087_v46, %v5290_v23  ;;  %v32134_v61 = vld [vmem:[#allocation76_spill] sm:$0xff] }
 0x376   : > { %v28728_v34 = vpop.f32.mrf.mxu0  ;;  %v28730_v22 = vpop.f32.mrf.mxu1  ;;  %v6420_v55 = vadd.f32 %v32131_v1, %v5851_v33 }
 0x377   : > { %32123 = vst [vmem:[#allocation42_spill] sm:$0xff] %v28728_v34  ;;  %32124 = vst [vmem:[#allocation43_spill] sm:$0xff] %v28730_v22  ;;  %v5284_v22 = vadd.f32 %v27966_v10, %v4715_v21  ;;  %v6426_v46 = vadd.f32 %v32134_v61, %v5857_v9  ;;  %v6428_v56 = vadd.f32 %v32135_v48, %v5859_v47 }
 0x378   : > { %v28737_v50 = vpop.f32.mrf.mxu0  ;;  %v28739_v6 = vpop.f32.mrf.mxu1 }
 0x379   : > { %v5853_v10 = vadd.f32 %v28057_v30, %v5284_v22  ;;  %v32133_v22 = vld [vmem:[#allocation75_spill] sm:$0xff] }
 0x37a   : > { %v28742_v2 = vpop.f32.mrf.mxu0  ;;  %v12569_v34 = vpop.f32.mrf.mxu1 }
 0x37b   : > { %32129 = vst [vmem:[#allocation44_spill] sm:$0xff] %v28742_v2  ;;  %v12585_v36 = vadd.f32 %v12569_v34, %v12066_v25  ;;  %v5855_v25 = vadd.f32 %v28067_v58, %v5286_v63  ;;  %v5861_v34 = vadd.f32 %v32130_v7, %v5292_v60  ;;  %v6422_v30 = vadd.f32 %v32132_v43, %v5853_v10  ;;  %v32136_v63 = vld [vmem:[#allocation78_spill] sm:$0xff]  ;;  %v32138_v7 = vld [vmem:[#allocation84_spill] sm:$0xff] }
 0x37c   : > { %v28749_v31 = vpop.f32.mrf.mxu0  ;;  %v26016_v20 = vpop.f32.mrf.mxu1  ;;  %v6989_v58 = vadd.f32 %v28202_v53, %v6420_v55  ;;  %v32139_v2 = vld [vmem:[#allocation80_spill] sm:$0xff]  ;;  %v32140_v43 = vld [vmem:[#allocation82_spill] sm:$0xff]  ;;  %v32141_v55 = vld [vmem:[#allocation81_spill] sm:$0xff] }
 0x37d   : > { %v6424_v35 = vadd.f32 %v32133_v22, %v5855_v25  ;;  %v6430_v49 = vadd.f32 %v32136_v63, %v5861_v34  ;;  %v32137_v20 = vld [vmem:[#allocation79_spill] sm:$0xff]  ;;  %v6995_v53 = vadd.f32 %v32140_v43, %v6426_v46  ;;  %v6997_v25 = vadd.f32 %v32141_v55, %v6428_v56  ;;  %v32143_v34 = vld [vmem:[#allocation85_spill] sm:$0xff] }
 0x37e   : > { %v28752_v44 = vpop.f32.mrf.mxu0  ;;  %v28754_v37 = vpop.f32.mrf.mxu1  ;;  %v6991_v33 = vadd.f32 %v32137_v20, %v6422_v30  ;;  %v7558_v1 = vadd.f32 %v32138_v7, %v6989_v58  ;;  %v32142_v22 = vld [vmem:[#allocation83_spill] sm:$0xff]  ;;  %v32145_v7 = vld [vmem:[#allocation86_spill] sm:$0xff] }
 0x37f   : > { %v6993_v10 = vadd.f32 %v32139_v2, %v6424_v35  ;;  %v6999_v9 = vadd.f32 %v32142_v22, %v6430_v49  ;;  %v32144_v20 = vld [vmem:[#allocation87_spill] sm:$0xff]  ;;  %v7566_v2 = vadd.f32 %v32145_v7, %v6997_v25 }
 0x380   : > { %v28761_v3 = vpop.f32.mrf.mxu0  ;;  %v28763_v21 = vpop.f32.mrf.mxu1  ;;  %v7560_v48 = vadd.f32 %v32143_v34, %v6991_v33  ;;  %v8127_v63 = vadd.f32 %v28358_v13, %v7558_v1  ;;  %v7564_v58 = vadd.f32 %v32144_v20, %v6995_v53 }
 0x381   : > { %v7562_v30 = vadd.f32 %v28296_v59, %v6993_v10  ;;  %v7568_v35 = vadd.f32 %v28329_v5, %v6999_v9  ;;  %v8135_v59 = vadd.f32 %v28403_v24, %v7566_v2  ;;  %v32150_v2 = vld [vmem:[#allocation7_spill] sm:$0xff] }
 0x382   : > { %v28766_v18 = vpop.f32.mrf.mxu0  ;;  %v28768_v42 = vpop.f32.mrf.mxu1  ;;  %v8129_v49 = vadd.f32 %v28371_v11, %v7560_v48  ;;  %v8696_v43 = vadd.f32 %v28456_v57, %v8127_v63  ;;  %v8133_v13 = vadd.f32 %v28405_v28, %v7564_v58  ;;  %v32149_v58 = vld [vmem:[#allocation11_spill] sm:$0xff] }
 0x383   : > { %v8131_v33 = vadd.f32 %v28388_v19, %v7562_v30  ;;  %v8137_v1 = vadd.f32 %v28427_v39, %v7568_v35  ;;  %v8704_v19 = vadd.f32 %v28502_v54, %v8135_v59 }
 0x384   : > { %v28776_v23 = vpop.f32.mrf.mxu0  ;;  %v28778_v60 = vpop.f32.mrf.mxu1  ;;  %v8698_v5 = vadd.f32 %v28471_v17, %v8129_v49  ;;  %v9265_v55 = vadd.f32 %v28551_v4, %v8696_v43  ;;  %v8702_v57 = vadd.f32 %v28504_v52, %v8133_v13  ;;  %v32155_v13 = vld [vmem:[#allocation5_spill] sm:$0xff] }
 0x385   : > { %v8700_v11 = vadd.f32 %v28487_v27, %v8131_v33  ;;  %v8706_v28 = vadd.f32 %v28526_v32, %v8137_v1 }
 0x386   : > { %v28786_v61 = vpop.f32.mrf.mxu0  ;;  %v28788_v47 = vpop.f32.mrf.mxu1  ;;  %v9267_v39 = vadd.f32 %v28566_v8, %v8698_v5  ;;  %v9834_v9 = vadd.f32 %v28585_v16, %v9265_v55  ;;  %v9271_v4 = vadd.f32 %v28579_v41, %v8702_v57  ;;  %v32146_v16 = vld [vmem:[#allocation4_spill] sm:$0xff]  ;;  %v32156_v5 = vld [vmem:[#allocation10_spill] sm:$0xff] }
 0x387   : > { %v9269_v17 = vadd.f32 %v28573_v26, %v8700_v11  ;;  %v9275_v27 = vadd.f32 %v28583_v62, %v8706_v28  ;;  %v32147_v26 = vld [vmem:[#allocation6_spill] sm:$0xff]  ;;  %v32157_v11 = vld [vmem:[#allocation16_spill] sm:$0xff]  ;;  %v32159_v28 = vld [vmem:[#allocation27_spill] sm:$0xff] }
 0x388   : > { %v28796_v46 = vpop.f32.mrf.mxu0  ;;  %v28798_v56 = vpop.f32.mrf.mxu1  ;;  %v9836_v54 = vadd.f32 %v28587_v0, %v9267_v39  ;;  %v10403_v32 = vadd.f32 %v28597_v29, %v9834_v9  ;;  %v9840_v8 = vadd.f32 %v28591_v15, %v9271_v4  ;;  %v32148_v62 = vld [vmem:[#allocation2_spill] sm:$0xff]  ;;  %v32151_v0 = vld [vmem:[#allocation21_spill] sm:$0xff]  ;;  %v32152_v29 = vld [vmem:[#allocation3_spill] sm:$0xff] }
 0x389   : > { %v9838_v48 = vadd.f32 %v28589_v14, %v9269_v17  ;;  %v9844_v30 = vadd.f32 %v32147_v26, %v9275_v27  ;;  %v11542_v35 = vadd.f32 %v32151_v0, %v32150_v2  ;;  %v32153_v14 = vld [vmem:[#allocation8_spill] sm:$0xff]  ;;  %v32160_v39 = vld [vmem:[#allocation33_spill] sm:$0xff]  ;;  %v32161_v17 = vld [vmem:[#allocation15_spill] sm:$0xff] }
 0x38a   : > { %v13087_v10 = vpop.f32.mrf.mxu0  ;;  %v28806_v53 = vpop.f32.mrf.mxu1  ;;  %v10405_v20 = vadd.f32 %v32148_v62, %v9836_v54  ;;  %v10972_v7 = vadd.f32 %v32149_v58, %v10403_v32  ;;  %v10409_v43 = vadd.f32 %v32153_v14, %v9840_v8  ;;  %v32154_v15 = vld [vmem:[#allocation12_spill] sm:$0xff]  ;;  %v32163_v54 = vld [vmem:[#allocation13_spill] sm:$0xff] }
 0x38b   : > { %v13103_v25 = vadd.f32 %v13087_v10, %v12585_v36  ;;  %v9273_v36 = vadd.f32 %v28577_v51, %v8704_v19  ;;  %v10407_v49 = vadd.f32 %v32152_v29, %v9838_v48  ;;  %v10413_v59 = vadd.f32 %v32155_v13, %v9844_v30  ;;  %v32158_v19 = vld [vmem:[#allocation19_spill] sm:$0xff]  ;;  %v32164_v48 = vld [vmem:[#allocation9_spill] sm:$0xff]  ;;  %v32166_v30 = vld [vmem:[#allocation14_spill] sm:$0xff] }
 0x38c   : > { %v26021_v22 = vpop.f32.mrf.mxu0  ;;  %v28814_v24 = vpop.f32.mrf.mxu1  ;;  %v10974_v55 = vadd.f32 %v32156_v5, %v10405_v20  ;;  %v11541_v57 = vadd.f32 %v32157_v11, %v10972_v7  ;;  %v12056_v9 = vadd.f32 %v32160_v39, %v11542_v35  ;;  %v32165_v8 = vld [vmem:[#allocation25_spill] sm:$0xff]  ;;  %v32167_v20 = vld [vmem:[#allocation28_spill] sm:$0xff]  ;;  %v32169_v35 = vld [vmem:[#allocation18_spill] sm:$0xff] }
 0x38d   : > { %v9842_v63 = vadd.f32 %v32146_v16, %v9273_v36  ;;  %v12054_v22 = vadd.f32 %v32159_v28, %v32158_v19  ;;  %v10976_v4 = vadd.f32 %v32161_v17, %v10407_v49  ;;  %v32162_v36 = vld [vmem:[#allocation17_spill] sm:$0xff]  ;;  %v11544_v16 = vadd.f32 %v32165_v8, %v32164_v48  ;;  %v32170_v49 = vld [vmem:[#allocation20_spill] sm:$0xff] }
 0x38e   : > { %v13250_v52 = vpop.f32.mrf.mxu0  ;;  %v28822_v34 = vpop.f32.mrf.mxu1  ;;  %v10978_v27 = vadd.f32 %v32162_v36, %v10409_v43  ;;  %v10982_v62 = vadd.f32 %v32166_v30, %v10413_v59  ;;  %v12055_v58 = vadd.f32 %v32167_v20, %v11541_v57  ;;  %v32168_v7 = vld [vmem:[#allocation41_spill] sm:$0xff]  ;;  %v12575_v0 = vadd.f32 %v28714_v40, %v12056_v9  ;;  %v32171_v43 = vld [vmem:[#allocation22_spill] sm:$0xff]  ;;  %v32173_v40 = vld [vmem:[#allocation88_spill] sm:$0xff] }
 0x38f   : > { %v10411_v33 = vadd.f32 %v32154_v15, %v9842_v63  ;;  %v12573_v2 = vadd.f32 %v32168_v7, %v12054_v22  ;;  %v11543_v29 = vadd.f32 %v32169_v35, %v10974_v55  ;;  %v11545_v14 = vadd.f32 %v32170_v49, %v10976_v4  ;;  %v32174_v55 = vld [vmem:[#allocation32_spill] sm:$0xff]  ;;  %v32175_v9 = vld [vmem:[#allocation34_spill] sm:$0xff]  ;;  %v32182_v49 = vld [vmem:[#allocation31_spill] sm:$0xff] }
 0x390   : > { %v28830_v41 = vpop.f32.mrf.mxu0  ;;  %v28832_v51 = vpop.f32.mrf.mxu1  ;;  %v11547_v15 = vadd.f32 %v32171_v43, %v10978_v27  ;;  %v12574_v19 = vadd.f32 %v28711_v38, %v12055_v58  ;;  %v13093_v57 = vadd.f32 %v28754_v37, %v12575_v0  ;;  %v11551_v39 = vadd.f32 %v32174_v55, %v10982_v62  ;;  %v32176_v4 = vld [vmem:[#allocation30_spill] sm:$0xff]  ;;  %v32177_v48 = vld [vmem:[#allocation40_spill] sm:$0xff] }
 0x391   : > { %v10980_v32 = vadd.f32 %v32163_v54, %v10411_v33  ;;  %v32172_v33 = vld [vmem:[#allocation29_spill] sm:$0xff]  ;;  %v13091_v59 = vadd.f32 %v28752_v44, %v12573_v2  ;;  %v12057_v17 = vadd.f32 %v32175_v9, %v11543_v29  ;;  %v12059_v36 = vadd.f32 %v32176_v4, %v11545_v14  ;;  %v32180_v62 = vld [vmem:[#allocation36_spill] sm:$0xff] }
 0x392   : > { %v28842_v1 = vpop.f32.mrf.mxu0  ;;  %v28844_v10 = vpop.f32.mrf.mxu1  ;;  %v12058_v13 = vadd.f32 %v32172_v33, %v11544_v16  ;;  %v13092_v38 = vadd.f32 %v28761_v3, %v12574_v19  ;;  %v13611_v37 = vadd.f32 %v13250_v52, %v13093_v57  ;;  %v32178_v16 = vld [vmem:[#allocation24_spill] sm:$0xff]  ;;  %v12061_v20 = vadd.f32 %v32180_v62, %v11547_v15  ;;  %v32181_v52 = vld [vmem:[#allocation23_spill] sm:$0xff]  ;;  %v32183_v19 = vld [vmem:[#allocation38_spill] sm:$0xff] }
 0x393   : > { %v11549_v22 = vadd.f32 %v32173_v40, %v10980_v32  ;;  %v13609_v44 = vadd.f32 %v28806_v53, %v13091_v59  ;;  %v32179_v32 = vld [vmem:[#allocation35_spill] sm:$0xff]  ;;  %v12576_v58 = vadd.f32 %v28723_v12, %v12057_v17  ;;  %v12578_v7 = vadd.f32 %v28725_v45, %v12059_v36  ;;  %v32184_v57 = vld [vmem:[#allocation42_spill] sm:$0xff] }
 0x394   : > { %v28856_v63 = vpop.f32.mrf.mxu0  ;;  %v28858_v26 = vpop.f32.mrf.mxu1  ;;  %v12577_v8 = vadd.f32 %v32177_v48, %v12058_v13  ;;  %v12060_v30 = vadd.f32 %v32179_v32, %v32178_v16  ;;  %v13610_v3 = vadd.f32 %v28814_v24, %v13092_v38  ;;  %v12062_v14 = vadd.f32 %v32182_v49, %v32181_v52  ;;  %v32185_v36 = vld [vmem:[#allocation39_spill] sm:$0xff] }
 0x395   : > { %v12580_v43 = vadd.f32 %v28737_v50, %v12061_v20  ;;  %v13094_v33 = vadd.f32 %v28763_v21, %v12576_v58  ;;  %v13096_v15 = vadd.f32 %v28776_v23, %v12578_v7  ;;  %v12063_v59 = vadd.f32 %v32183_v19, %v11549_v22  ;;  %v32188_v32 = vld [vmem:[#allocation43_spill] sm:$0xff] }
 0x396   : > { %v28868_v5 = vpop.f32.mrf.mxu0  ;;  %v13605_v11 = vpop.f32.mrf.mxu1  ;;  %v13095_v35 = vadd.f32 %v28766_v18, %v12577_v8  ;;  %v12579_v40 = vadd.f32 %v32184_v57, %v12060_v30  ;;  %v12581_v30 = vadd.f32 %v32188_v32, %v12062_v14 }
 0x397   : > { %v28873_v28 = vadd.f32 %v13605_v11, %v13103_v25  ;;  %v28884_v25 = vpop.permute.xlu1 %14143  ;;  %v13098_v50 = vadd.f32 %v28778_v60, %v12580_v43  ;;  %v13612_v21 = vadd.f32 %v28830_v41, %v13094_v33  ;;  %v13614_v9 = vadd.f32 %v28832_v51, %v13096_v15 }
 0x398   : > { %v28879_v27 = vpop.f32.mrf.mxu0  ;;  %v26026_v54 = vpop.f32.mrf.mxu1  ;;  %v13613_v45 = vadd.f32 %v28822_v34, %v13095_v35  ;;  %v13097_v48 = vadd.f32 %v28768_v42, %v12579_v40  ;;  %v12582_v41 = vadd.f32 %v28739_v6, %v12063_v59  ;;  %v32187_v42 = vld [vmem:[#allocation37_spill] sm:$0xff] }
 0x399   : > { %v12065_v54 = vadd.f32 %v32185_v36, %v11551_v39  ;;  %v32186_v39 = vld [vmem:[#allocation26_spill] sm:$0xff] }
 0x39a   : > { %v13697_v2 = vpop.f32.mrf.mxu0  ;;  %v13768_v0 = vpop.f32.mrf.mxu1  ;;  %v12064_v16 = vadd.f32 %v32187_v42, %v32186_v39  ;;  %v13615_v20 = vadd.f32 %v28842_v1, %v13097_v48 }
 0x39b   : > { %v14127_v29 = vadd.f32 %v13697_v2, %v13609_v44  ;;  %v14129_v53 = vadd.f32 %v13768_v0, %v13611_v37  ;;  %v13616_v44 = vadd.f32 %v28856_v63, %v13098_v50  ;;  %v12584_v62 = vadd.f32 %v28749_v31, %v12065_v54 }
 0x39c   : > { %v13699_v12 = vpop.f32.mrf.mxu0  ;;  %v13770_v13 = vpop.f32.mrf.mxu1  ;;  %v13100_v63 = vadd.f32 %v28796_v46, %v12582_v41  ;;  %v13099_v0 = vadd.f32 %v28786_v61, %v12581_v30  ;;  %v32189_v46 = vld [vmem:[#allocation44_spill] sm:$0xff] }
 0x39d   : > { %v14128_v11 = vadd.f32 %v13699_v12, %v13610_v3  ;;  %v28900_v18 = vadd.f32 %v28884_v25, %v14129_v53  ;;  %v28903_v24 = vadd.f32 %v28884_v25, %v14127_v29  ;;  %v14130_v22 = vadd.f32 %v13770_v13, %v13612_v21 }
 0x39e   : > { %v13839_v23 = vpop.f32.mrf.mxu0  ;;  %v13910_v55 = vpop.f32.mrf.mxu1  ;;  %v13618_v53 = vadd.f32 %v28858_v26, %v13100_v63  ;;  %v12583_v52 = vadd.f32 %v32189_v46, %v12064_v16  ;;  %v13102_v49 = vadd.f32 %v28798_v56, %v12584_v62  ;;  %v13617_v14 = vadd.f32 %v28844_v10, %v13099_v0 }
 0x39f   : > { %v14131_v34 = vadd.f32 %v13839_v23, %v13613_v45  ;;  %v14161_v17 = vmax.f32 %v28900_v18, 0.0  ;;  %v14159_v4 = vmax.f32 %v28903_v24, 0.0  ;;  %v28915_v60 = vadd.f32 %v28884_v25, %v14128_v11 }
 0x3a0   : > { %v13841_v8 = vpop.f32.mrf.mxu0  ;;  %v13912_v38 = vpop.f32.mrf.mxu1  ;;  %v14133_v35 = vadd.f32 %v13910_v55, %v13615_v20  ;;  %v14149_v29 = vadd.f32 %v28884_v25, %v14130_v22  ;;  %v13101_v12 = vadd.f32 %v28788_v47, %v12583_v52  ;;  %v13620_v19 = vadd.f32 %v28879_v27, %v13102_v49 }
 0x3a1   : > { %v28920_v51 = vadd.f32 %v28884_v25, %v14131_v34  ;;  %v14132_v37 = vadd.f32 %v13841_v8, %v13614_v9  ;;  %14189 = vrot.lane.b32.xlu0 %v14161_v17, %s26244_s24  ;;  %14185 = vrot.lane.b32.xlu1 %v14159_v4, %s26244_s24  ;;  %v14134_v2 = vadd.f32 %v13912_v38, %v13616_v44  ;;  %v14160_v1 = vmax.f32 %v28915_v60, 0.0 }
 0x3a2   : > { %v13981_v6 = vpop.f32.mrf.mxu0  ;;  %v14052_v3 = vpop.f32.mrf.mxu1  ;;  %v14152_v13 = vadd.f32 %v28884_v25, %v14133_v35  ;;  %v14162_v11 = vmax.f32 %v14149_v29, 0.0  ;;  %v13619_v59 = vadd.f32 %v28868_v5, %v13101_v12 }
 0x3a3   : > { %v14163_v58 = vmax.f32 %v28920_v51, 0.0  ;;  %v28936_v7 = vadd.f32 %v28884_v25, %v14132_v37  ;;  %v28951_v33 = vadd.f32 %v28884_v25, %v14134_v2  ;;  %v14135_v45 = vadd.f32 %v13981_v6, %v13617_v14 }
 0x3a4   : > { %v13983_v31 = vpop.f32.mrf.mxu0  ;;  %v14054_v56 = vpop.f32.mrf.mxu1  ;;  %v14165_v47 = vmax.f32 %v14152_v13, 0.0  ;;  %v14137_v21 = vadd.f32 %v14052_v3, %v13619_v59 }
 0x3a5   : > { %14193 = vrot.lane.b32.xlu0 %v14163_v58, %s26244_s24  ;;  %14187 = vrot.lane.b32.xlu1 %v14160_v1, %s26244_s24  ;;  %v14164_v43 = vmax.f32 %v28936_v7, 0.0  ;;  %v14136_v15 = vadd.f32 %v13983_v31, %v13618_v53  ;;  %v14166_v57 = vmax.f32 %v28951_v33, 0.0  ;;  %v14138_v40 = vadd.f32 %v14054_v56, %v13620_v19 }
 0x3a6   : > { %v14123_v61 = vpop.f32.mrf.mxu0  ;;  %v14154_v50 = vadd.f32 %v28884_v25, %v14135_v45  ;;  %v14156_v55 = vadd.f32 %v28884_v25, %v14137_v21 }
 0x3a7   : > { %v28954_v26 = vadd.f32 %v14123_v61, %v28873_v28  ;;  %v14155_v28 = vadd.f32 %v28884_v25, %v14136_v15  ;;  %v28968_v23 = vadd.f32 %v28884_v25, %v14138_v40 }
 0x3a8   : > { %v26031_v10 = vpop.f32.mrf.mxu0  ;;  %v14167_v5 = vmax.f32 %v14154_v50, 0.0  ;;  %v14169_v34 = vmax.f32 %v14156_v55, 0.0 }
 0x3a9   : > { %14195 = vrot.lane.b32.xlu0 %v14164_v43, %s26244_s24  ;;  %14191 = vrot.lane.b32.xlu1 %v14162_v11, %s26244_s24  ;;  %v14168_v27 = vmax.f32 %v14155_v28, 0.0  ;;  %v14170_v9 = vmax.f32 %v28968_v23, 0.0  ;;  %v25527_v23 = vld [vmem:[%s31800_s3 + $0x40] sm:$0xff] }
 0x3ad   : > { %14199 = vrot.lane.b32.xlu0 %v14166_v57, %s26244_s24  ;;  %14197 = vrot.lane.b32.xlu1 %v14165_v47, %s26244_s24 }
 0x3b1   : > { %14203 = vrot.lane.b32.xlu0 %v14168_v27, %s26244_s24  ;;  %14201 = vrot.lane.b32.xlu1 %v14167_v5, %s26244_s24 }
 0x3b5   : > { %14207 = vrot.lane.b32.xlu0 %v14170_v9, %s26244_s24  ;;  %14205 = vrot.lane.b32.xlu1 %v14169_v34, %s26244_s24 }
 0x413   : > { %v14190_v36 = vpop.permute.xlu0 %14189  ;;  %v14186_v54 = vpop.permute.xlu1 %14185 }
 0x417   : > { %v14194_v48 = vpop.permute.xlu0 %14193  ;;  %v14188_v22 = vpop.permute.xlu1 %14187 }
 0x418   : > { %v14212_v8 = vsel %vm285_vm0, %v14188_v22, %v14190_v36  ;;  %v14211_v16 = vsel %vm285_vm0, %v14186_v54, %v14188_v22 }
 0x419   : > { %v14236_v38 = vmax.f32 %v14160_v1, %v14212_v8  ;;  %v14235_v20 = vmax.f32 %v14159_v4, %v14211_v16 }
 0x41b   : > { %v14196_v60 = vpop.permute.xlu0 %14195  ;;  %14264 = vrot.lane.b32.xlu1 %v14236_v38, %s26248_s28  ;;  %v14192_v41 = vpop.permute.xlu1 %14191 }
 0x41c   : > { %v14213_v44 = vsel %vm285_vm0, %v14190_v36, %v14192_v41  ;;  %v14214_v37 = vsel %vm285_vm0, %v14192_v41, %v14194_v48  ;;  %v14215_v32 = vsel %vm285_vm0, %v14194_v48, %v14196_v60 }
 0x41d   : > { %v14237_v39 = vmax.f32 %v14161_v17, %v14213_v44  ;;  %v14238_v42 = vmax.f32 %v14162_v11, %v14214_v37  ;;  %v14239_v6 = vmax.f32 %v14163_v58, %v14215_v32 }
 0x41f   : > { %v14200_v30 = vpop.permute.xlu0 %14199  ;;  %14268 = vrot.lane.b32.xlu1 %v14238_v42, %s26248_s28  ;;  %14266 = vrot.lane.b32.xlu0 %v14237_v39, %s26248_s28  ;;  %v14198_v62 = vpop.permute.xlu1 %14197 }
 0x420   : > { %v14216_v18 = vsel %vm285_vm0, %v14196_v60, %v14198_v62  ;;  %v14217_v17 = vsel %vm285_vm0, %v14198_v62, %v14200_v30  ;;  %v25482_v62 = vld [vmem:[%s31800_s3 + $0x18] sm:$0xff] }
 0x421   : > { %v14240_v2 = vmax.f32 %v14164_v43, %v14216_v18  ;;  %v14241_v0 = vmax.f32 %v14165_v47, %v14217_v17 }
 0x423   : > { %v14204_v63 = vpop.permute.xlu0 %14203  ;;  %14270 = vrot.lane.b32.xlu1 %v14239_v6, %s26248_s28  ;;  %14262 = vrot.lane.b32.xlu0 %v14235_v20, %s26248_s28  ;;  %v14202_v7 = vpop.permute.xlu1 %14201 }
 0x424   : > { %v14218_v35 = vsel %vm285_vm0, %v14200_v30, %v14202_v7  ;;  %v14219_v24 = vsel %vm285_vm0, %v14202_v7, %v14204_v63  ;;  %v32196_v30 = vmov 0.0  }
 0x425   : > { %v14242_v58 = vmax.f32 %v14166_v57, %v14218_v35  ;;  %v14243_v3 = vmax.f32 %v14167_v5, %v14219_v24 }
 0x427   : > { %v28998_v4 = vpop.permute.xlu0 %14207  ;;  %14274 = vrot.lane.b32.xlu1 %v14241_v0, %s26248_s28  ;;  %14272 = vrot.lane.b32.xlu0 %v14240_v2, %s26248_s28  ;;  %v14206_v51 = vpop.permute.xlu1 %14205 }
 0x428   : > { %v14220_v31 = vsel %vm285_vm0, %v14204_v63, %v14206_v51  ;;  %v14221_v1 = vsel %vm285_vm0, %v14206_v51, %v28998_v4 }
 0x429   : > { %v14244_v29 = vmax.f32 %v14168_v27, %v14220_v31  ;;  %v29007_v53 = vmax.f32 %v14169_v34, %v14221_v1 }
 0x42b   : > { %14278 = vrot.lane.b32.xlu1 %v14243_v3, %s26248_s28  ;;  %14276 = vrot.lane.b32.xlu0 %v14242_v58, %s26248_s28 }
 0x42f   : > { %14282 = vrot.lane.b32.xlu1 %v29007_v53, %s26248_s28  ;;  %14280 = vrot.lane.b32.xlu0 %v14244_v29, %s26248_s28 }
 0x48d   : > { %v14265_v46 = vpop.permute.xlu1 %14264 }
 0x491   : > { %v14267_v52 = vpop.permute.xlu0 %14266  ;;  %v14269_v49 = vpop.permute.xlu1 %14268 }
 0x492   : > { %v14289_v14 = vsel %vm3048_vm6, %v14265_v46, %v14267_v52  ;;  %v14290_v61 = vsel %vm3048_vm6, %v14267_v52, %v14269_v49 }
 0x493   : > { %v29014_v43 = vmax.f32 %v14236_v38, %v14289_v14  ;;  %v29016_v33 = vmax.f32 %v14237_v39, %v14290_v61  ;;  %v29123_v38 = vadd.f32 %v28884_v25, %v28954_v26 }
 0x495   : > { %v14263_v15 = vpop.permute.xlu0 %14262  ;;  %14341 = vrot.lane.b32.xlu0 %v29014_v43, %s26245_s25  ;;  %14343 = vrot.lane.b32.xlu1 %v29016_v33, %s26245_s25  ;;  %v14271_v12 = vpop.permute.xlu1 %14270  ;;  %v31830_v60 = vmax.f32 %v29123_v38, 0.0 }
 0x496   : > { %v14288_v13 = vsel %vm3048_vm6, %v14263_v15, %v14265_v46  ;;  %v14291_v56 = vsel %vm3048_vm6, %v14269_v49, %v14271_v12  ;;  %v14324_v49 = vld [vmem:[%s31800_s3] sm:$0xff] }
 0x497   : > { %v29023_v45 = vmax.f32 %v14235_v20, %v14288_v13  ;;  %v29030_v19 = vmax.f32 %v14238_v42, %v14291_v56  ;;  %v25481_v42 = vld [vmem:[%s31800_s3 + $0x10] sm:$0xff]  ;;  %v14325_v13 = vld [vmem:[%s31800_s3 + $0x8] sm:$0xff] }
 0x499   : > { %v14273_v11 = vpop.permute.xlu0 %14272  ;;  %14339 = vrot.lane.b32.xlu0 %v29023_v45, %s26245_s25  ;;  %15162 = vrot.lane.b32.xlu1 %v29016_v33, %s26247_s27  ;;  %v14275_v10 = vpop.permute.xlu1 %14274 }
 0x49a   : > { %v14292_v59 = vsel %vm3048_vm6, %v14271_v12, %v14273_v11  ;;  %v14293_v57 = vsel %vm3048_vm6, %v14273_v11, %v14275_v10 }
 0x49b   : > { %v29038_v47 = vmax.f32 %v14239_v6, %v14292_v59  ;;  %v29040_v50 = vmax.f32 %v14240_v2, %v14293_v57 }
 0x49d   : > { %v14277_v28 = vpop.permute.xlu0 %14276  ;;  %15160 = vrot.lane.b32.xlu0 %v29014_v43, %s26247_s27  ;;  %14345 = vrot.lane.b32.xlu1 %v29030_v19, %s26245_s25  ;;  %v14279_v40 = vpop.permute.xlu1 %14278  ;;  %32190 = vst [vmem:[#allocation45_spill] sm:$0xff] %v29038_v47  ;;  %32191 = vst [vmem:[#allocation46_spill] sm:$0xff] %v29040_v50 }
 0x49e   : > { %v14294_v21 = vsel %vm3048_vm6, %v14275_v10, %v14277_v28  ;;  %v14295_v27 = vsel %vm3048_vm6, %v14277_v28, %v14279_v40 }
 0x49f   : > { %v29050_v34 = vmax.f32 %v14241_v0, %v14294_v21  ;;  %v29052_v36 = vmax.f32 %v14242_v58, %v14295_v27 }
 0x4a1   : > { %v14281_v5 = vpop.permute.xlu0 %14280  ;;  %14347 = vrot.lane.b32.xlu0 %v29038_v47, %s26245_s25  ;;  %14349 = vrot.lane.b32.xlu1 %v29040_v50, %s26245_s25  ;;  %v29048_v55 = vpop.permute.xlu1 %14282  ;;  %32192 = vst [vmem:[#allocation47_spill] sm:$0xff] %v29050_v34  ;;  %32193 = vst [vmem:[#allocation48_spill] sm:$0xff] %v29052_v36 }
 0x4a2   : > { %v14296_v54 = vsel %vm3048_vm6, %v14279_v40, %v14281_v5  ;;  %v14297_v48 = vsel %vm3048_vm6, %v14281_v5, %v29048_v55  ;;  %v25503_v5 = vld [vmem:[%s31800_s3 + $0x20] sm:$0xff] }
 0x4a3   : > { %v29061_v22 = vmax.f32 %v14243_v3, %v14296_v54  ;;  %v29063_v8 = vmax.f32 %v14244_v29, %v14297_v48 }
 0x4a5   : > { %14351 = vrot.lane.b32.xlu0 %v29050_v34, %s26245_s25  ;;  %14353 = vrot.lane.b32.xlu1 %v29052_v36, %s26245_s25  ;;  %32194 = vst [vmem:[#allocation49_spill] sm:$0xff] %v29061_v22  ;;  %32195 = vst [vmem:[#allocation50_spill] sm:$0xff] %v29063_v8 }
 0x4a9   : > { %14355 = vrot.lane.b32.xlu0 %v29061_v22, %s26245_s25  ;;  %14357 = vrot.lane.b32.xlu1 %v29063_v8, %s26245_s25 }
 0x4ad   : > { %15158 = vrot.lane.b32.xlu0 %v29023_v45, %s26247_s27  ;;  %15164 = vrot.lane.b32.xlu1 %v29030_v19, %s26247_s27 }
 0x4b1   : > { %15166 = vrot.lane.b32.xlu0 %v29038_v47, %s26247_s27  ;;  %15168 = vrot.lane.b32.xlu1 %v29040_v50, %s26247_s27 }
 0x4b5   : > { %15170 = vrot.lane.b32.xlu0 %v29050_v34, %s26247_s27  ;;  %15610 = vrot.lane.b32.xlu1 %v29016_v33, %s26265_s6 }
 0x4b9   : > { %15608 = vrot.lane.b32.xlu0 %v29014_v43, %s26265_s6  ;;  %15614 = vrot.lane.b32.xlu1 %v29038_v47, %s26265_s6 }
 0x4bd   : > { %15612 = vrot.lane.b32.xlu0 %v29030_v19, %s26265_s6  ;;  %15616 = vrot.lane.b32.xlu1 %v29040_v50, %s26265_s6 }
 0x4c1   : > { %15606 = vrot.lane.b32.xlu0 %v29023_v45, %s26265_s6  ;;  %16059 = vrot.lane.b32.xlu1 %v29016_v33, %s26266_s7 }
 0x4c5   : > { %15618 = vrot.lane.b32.xlu0 %v29050_v34, %s26265_s6  ;;  %15172 = vrot.lane.b32.xlu1 %v29052_v36, %s26247_s27 }
 0x4c9   : > { %16057 = vrot.lane.b32.xlu0 %v29014_v43, %s26266_s7  ;;  %16061 = vrot.lane.b32.xlu1 %v29030_v19, %s26266_s7 }
 0x4cd   : > { %15174 = vrot.lane.b32.xlu0 %v29061_v22, %s26247_s27  ;;  %15176 = vrot.lane.b32.xlu1 %v29063_v8, %s26247_s27 }
 0x4d1   : > { %16055 = vrot.lane.b32.xlu0 %v29023_v45, %s26266_s7  ;;  %16065 = vrot.lane.b32.xlu1 %v29040_v50, %s26266_s7 }
 0x4d5   : > { %16063 = vrot.lane.b32.xlu0 %v29038_v47, %s26266_s7  ;;  %15620 = vrot.lane.b32.xlu1 %v29052_v36, %s26265_s6 }
 0x4d9   : > { %16067 = vrot.lane.b32.xlu0 %v29050_v34, %s26266_s7  ;;  %16508 = vrot.lane.b32.xlu1 %v29016_v33, %s26254_s22 }
 0x4dd   : > { %15622 = vrot.lane.b32.xlu0 %v29061_v22, %s26265_s6  ;;  %16512 = vrot.lane.b32.xlu1 %v29038_v47, %s26254_s22 }
 0x4e1   : > { %16506 = vrot.lane.b32.xlu0 %v29014_v43, %s26254_s22  ;;  %15624 = vrot.lane.b32.xlu1 %v29063_v8, %s26265_s6 }
 0x4e5   : > { %16510 = vrot.lane.b32.xlu0 %v29030_v19, %s26254_s22  ;;  %14209 = vrot.lane.b32.xlu1 %v31830_v60, %s26244_s24 }
 0x4e9   : > { %16504 = vrot.lane.b32.xlu0 %v29023_v45, %s26254_s22  ;;  %16516 = vrot.lane.b32.xlu1 %v29050_v34, %s26254_s22 }
 0x4ed   : > { %16514 = vrot.lane.b32.xlu0 %v29040_v50, %s26254_s22  ;;  %16069 = vrot.lane.b32.xlu1 %v29052_v36, %s26266_s7 }
 0x4f1   : > { %16071 = vrot.lane.b32.xlu0 %v29061_v22, %s26266_s7  ;;  %16073 = vrot.lane.b32.xlu1 %v29063_v8, %s26266_s7 }
 0x4f5   : > { %16956 = vrot.lane.b32.xlu0 %v29016_v33, %s26256_s9  ;;  %16954 = vrot.lane.b32.xlu1 %v29014_v43, %s26256_s9 }
 0x4f9   : > { %16958 = vrot.lane.b32.xlu0 %v29030_v19, %s26256_s9  ;;  %16952 = vrot.lane.b32.xlu1 %v29023_v45, %s26256_s9 }
 0x4fd   : > { %16518 = vrot.lane.b32.xlu0 %v29052_v36, %s26254_s22  ;;  %16520 = vrot.lane.b32.xlu1 %v29061_v22, %s26254_s22 }
 0x501   : > { %16962 = vrot.lane.b32.xlu0 %v29040_v50, %s26256_s9  ;;  %16960 = vrot.lane.b32.xlu1 %v29038_v47, %s26256_s9 }
 0x505   : > { %17404 = vrot.lane.b32.xlu0 %v29016_v33, %s26258_s15  ;;  %16964 = vrot.lane.b32.xlu1 %v29050_v34, %s26256_s9 }
 0x507   : > { %v14342_v25 = vpop.permute.xlu0 %14341  ;;  %v14344_v26 = vpop.permute.xlu1 %14343 }
 0x508   : > { %v29168_v41 = vsel %vm1341_vm3, %v14342_v25, %v14344_v26 }
 0x509   : > { %16522 = vrot.lane.b32.xlu0 %v29063_v8, %s26254_s22  ;;  %17402 = vrot.lane.b32.xlu1 %v29014_v43, %s26258_s15 }
 0x50a   : > { %14413 = vmatprep.subr.mxu1 %v29168_v41 }
 0x50b   : > { %v14340_v44 = vpop.permute.xlu0 %14339  ;;  %v29175_v37 = vpop.permute.xlu1 %15162 }
 0x50c   : > { %v14359_v39 = vsel %vm1341_vm3, %v14340_v44, %v14342_v25  ;;  %v25504_v44 = vld [vmem:[%s31800_s3 + $0x28] sm:$0xff] }
 0x50d   : > { %17408 = vrot.lane.b32.xlu0 %v29038_v47, %s26258_s15  ;;  %17406 = vrot.lane.b32.xlu1 %v29030_v19, %s26258_s15 }
 0x50e   : > { %14414 = vmatpush1.msra.mxu1 %v14359_v39 }
 0x50f   : > { %v29185_v16 = vpop.permute.xlu0 %15160  ;;  %v14346_v32 = vpop.permute.xlu1 %14345  ;;  %25483 = vmatmul.mubr.msk.f32.vlgmr.msra.gmra.mxu1 %vm312_vm1, %v25481_v42 }
 0x510   : > { %14453 = vmatprep.mubr.f32.mxu1 %v32196_v30  ;;  %v29207_v17 = vsel %vm1341_vm3, %v14344_v26, %v14346_v32  ;;  %v29290_v61 = vsel %vm2479_vm5, %v29185_v16, %v29175_v37 }
 0x511   : > { %16966 = vrot.lane.b32.xlu0 %v29052_v36, %s26256_s9  ;;  %16968 = vrot.lane.b32.xlu1 %v29061_v22, %s26256_s9  ;;  %32198 = vst [vmem:[#allocation52_spill] sm:$0xff] %v29207_v17 }
 0x513   : > { %v14348_v20 = vpop.permute.xlu0 %14347  ;;  %v14350_v6 = vpop.permute.xlu1 %14349  ;;  %25484 = vmatmul.mubr.msk.f32.gmra.mxu1 %vm312_vm1, %v25482_v62 }
 0x514   : > { %v29198_v18 = vsel %vm1341_vm3, %v14346_v32, %v14348_v20  ;;  %14601 = vmatprep.mubr.f32.mxu1 %v32196_v30  ;;  %v29221_v0 = vsel %vm1341_vm3, %v14348_v20, %v14350_v6 }
 0x515   : > { %32197 = vst [vmem:[#allocation51_spill] sm:$0xff] %v29198_v18  ;;  %17410 = vrot.lane.b32.xlu0 %v29040_v50, %s26258_s15  ;;  %17400 = vrot.lane.b32.xlu1 %v29023_v45, %s26258_s15  ;;  %32200 = vst [vmem:[#allocation54_spill] sm:$0xff] %v29221_v0 }
 0x516   : > { %14490 = vmatprep.subr.mxu0 %v29198_v18 }
 0x517   : > { %14491 = vmatpush1.msra.mxu0 %v29207_v17  ;;  %v14352_v63 = vpop.permute.xlu0 %14351  ;;  %v14354_v7 = vpop.permute.xlu1 %14353 }
 0x518   : > { %25485 = vmatmul.mubr.msk.f32.vlgmr.msra.gmra.mxu0 %vm312_vm1, %v25481_v42  ;;  %v29212_v2 = vsel %vm1341_vm3, %v14350_v6, %v14352_v63  ;;  %v29242_v3 = vsel %vm1341_vm3, %v14352_v63, %v14354_v7 }
 0x519   : > { %32199 = vst [vmem:[#allocation53_spill] sm:$0xff] %v29212_v2  ;;  %16970 = vrot.lane.b32.xlu0 %v29063_v8, %s26256_s9  ;;  %17412 = vrot.lane.b32.xlu1 %v29050_v34, %s26258_s15  ;;  %32203 = vst [vmem:[#allocation57_spill] sm:$0xff] %v29242_v3 }
 0x51a   : > { %14567 = vmatprep.subr.mxu1 %v29212_v2  ;;  %14530 = vmatprep.mubr.f32.mxu0 %v32196_v30 }
 0x51b   : > { %14568 = vmatpush1.msra.mxu1 %v29221_v0  ;;  %v14356_v35 = vpop.permute.xlu0 %14355  ;;  %v29224_v24 = vpop.permute.xlu1 %14357 }
 0x51c   : > { %25486 = vmatmul.mubr.msk.f32.gmra.mxu0 %vm312_vm1, %v25482_v62  ;;  %25487 = vmatmul.mubr.msk.f32.vlgmr.msra.gmra.mxu1 %vm312_vm1, %v25481_v42  ;;  %v29229_v51 = vsel %vm1341_vm3, %v14354_v7, %v14356_v35  ;;  %v29233_v58 = vsel %vm1341_vm3, %v14356_v35, %v29224_v24 }
 0x51d   : > { %32201 = vst [vmem:[#allocation55_spill] sm:$0xff] %v29229_v51  ;;  %32202 = vst [vmem:[#allocation56_spill] sm:$0xff] %v29233_v58  ;;  %17852 = vrot.lane.b32.xlu0 %v29016_v33, %s26267_s12  ;;  %17850 = vrot.lane.b32.xlu1 %v29014_v43, %s26267_s12 }
 0x51e   : > { %14644 = vmatprep.subr.mxu0 %v29229_v51  ;;  %26032 = vmatprep.subr.mxu1 %v29233_v58 }
 0x51f   : > { %14607 = vmatprep.mubr.f32.mxu1 %v32196_v30  ;;  %14645 = vmatpush1.msra.mxu0 %v29242_v3  ;;  %v15159_v31 = vpop.permute.xlu0 %15158  ;;  %v29246_v1 = vpop.permute.xlu1 %15164 }
 0x520   : > { %14678 = vmatprep.mubr.f32.mxu0 %v32196_v30  ;;  %26033 = vmatpush3.msra.mxu1 %v29233_v58  ;;  %v15178_v10 = vsel %vm2479_vm5, %v15159_v31, %v29185_v16  ;;  %v29357_v54 = vsel %vm2479_vm5, %v29175_v37, %v29246_v1 }
 0x521   : > { %25488 = vmatmul.mubr.msk.f32.gmra.mxu1 %vm312_vm1, %v25482_v62  ;;  %25489 = vmatmul.mubr.msk.f32.vlgmr.msra.gmra.mxu0 %vm312_vm1, %v25481_v42  ;;  %32206 = vst [vmem:[#allocation60_spill] sm:$0xff] %v29357_v54 }
 0x522   : > { %14802 = vmatprep.subr.mxu0 %v29014_v43  ;;  %14879 = vmatprep.subr.mxu1 %v29030_v19 }
 0x523   : > { %14803 = vmatpush1.msra.mxu0 %v29023_v45  ;;  %17414 = vrot.lane.b32.xlu0 %v29052_v36, %s26258_s15  ;;  %v29257_v29 = vpop.permute.xlu0 %15166  ;;  %v29259_v46 = vpop.permute.xlu1 %15168 }
 0x524   : > { %17416 = vrot.lane.b32.xlu1 %v29061_v22, %s26258_s15  ;;  %14956 = vmatprep.subr.mxu0 %v29040_v50  ;;  %v29329_v28 = vsel %vm2479_vm5, %v29246_v1, %v29257_v29  ;;  %v29368_v26 = vsel %vm2479_vm5, %v29257_v29, %v29259_v46 }
 0x525   : > { %14684 = vmatprep.mubr.f32.mxu0 %v32196_v30  ;;  %26034 = vmatprep.mubr.msk.f32.mxu1 %vm312_vm1, %v25481_v42  ;;  %32204 = vst [vmem:[#allocation58_spill] sm:$0xff] %v29329_v28  ;;  %32207 = vst [vmem:[#allocation61_spill] sm:$0xff] %v29368_v26 }
 0x526   : > { %25490 = vmatmul.mubr.msk.f32.gmra.mxu0 %vm312_vm1, %v25482_v62  ;;  %26035 = vmatmul.mubr.msk.f32.vlgmr.msra.gmra.mxu1 %vm312_vm1, %v25482_v62 }
 0x527   : > { %14880 = vmatpush1.msra.mxu1 %v29016_v33  ;;  %17854 = vrot.lane.b32.xlu0 %v29030_v19, %s26267_s12  ;;  %v29271_v52 = vpop.permute.xlu0 %15170  ;;  %v29276_v14 = vpop.permute.xlu1 %15610 }
 0x528   : > { %15033 = vmatprep.subr.mxu1 %v29052_v36  ;;  %17848 = vrot.lane.b32.xlu1 %v29023_v45, %s26267_s12  ;;  %v29334_v40 = vsel %vm2479_vm5, %v29259_v46, %v29271_v52 }
 0x529   : > { %14836 = vmatprep.mubr.f32.mxu0 %v32196_v30  ;;  %14913 = vmatprep.mubr.f32.mxu1 %v32196_v30  ;;  %32205 = vst [vmem:[#allocation59_spill] sm:$0xff] %v29334_v40 }
 0x52a   : > { %25493 = vmatmul.mubr.msk.f32.vlgmr.msra.gmra.mxu0 %vm312_vm1, %v14324_v49  ;;  %25495 = vmatmul.mubr.msk.f32.vlgmr.msra.gmra.mxu1 %vm312_vm1, %v14324_v49 }
 0x52b   : > { %14957 = vmatpush1.msra.mxu0 %v29038_v47  ;;  %15034 = vmatpush1.msra.mxu1 %v29050_v34  ;;  %v29292_v15 = vpop.permute.xlu0 %15608  ;;  %v29294_v12 = vpop.permute.xlu1 %15614 }
 0x52c   : > { %26037 = vmatprep.subr.mxu0 %v29061_v22  ;;  %15232 = vmatprep.subr.mxu1 %v29290_v61  ;;  %v29412_v6 = vsel %vm15626_vm2, %v29292_v15, %v29276_v14 }
 0x52d   : > { %17858 = vrot.lane.b32.xlu0 %v29040_v50, %s26267_s12  ;;  %17856 = vrot.lane.b32.xlu1 %v29038_v47, %s26267_s12 }
 0x52e   : > { %14842 = vmatprep.mubr.f32.mxu0 %v32196_v30  ;;  %14919 = vmatprep.mubr.f32.mxu1 %v32196_v30 }
 0x52f   : > { %25494 = vmatmul.mubr.msk.f32.gmra.mxu0 %vm312_vm1, %v14325_v13  ;;  %25496 = vmatmul.mubr.msk.f32.gmra.mxu1 %vm312_vm1, %v14325_v13  ;;  %v29309_v56 = vpop.permute.xlu0 %15612  ;;  %v29311_v11 = vpop.permute.xlu1 %15616 }
 0x530   : > { %14990 = vmatprep.mubr.f32.mxu0 %v32196_v30  ;;  %15067 = vmatprep.mubr.f32.mxu1 %v32196_v30  ;;  %v29419_v63 = vsel %vm15626_vm2, %v29309_v56, %v29294_v12 }
 0x531   : > { %17418 = vrot.lane.b32.xlu0 %v29063_v8, %s26258_s15  ;;  %17860 = vrot.lane.b32.xlu1 %v29050_v34, %s26267_s12  ;;  %32211 = vst [vmem:[#allocation65_spill] sm:$0xff] %v29419_v63 }
 0x533   : > { %25497 = vmatmul.mubr.msk.f32.vlgmr.msra.gmra.mxu0 %vm312_vm1, %v14324_v49  ;;  %25499 = vmatmul.mubr.msk.f32.vlgmr.msra.gmra.mxu1 %vm312_vm1, %v14324_v49  ;;  %v15607_v59 = vpop.permute.xlu0 %15606  ;;  %v29323_v57 = vpop.permute.xlu1 %16059 }
 0x534   : > { %26038 = vmatpush3.msra.mxu0 %v29061_v22  ;;  %15233 = vmatpush1.msra.mxu1 %v15178_v10  ;;  %v15627_v31 = vsel %vm15626_vm2, %v15607_v59, %v29292_v15 }
 0x535   : > { %15309 = vmatprep.subr.mxu0 %v29329_v28  ;;  %15386 = vmatprep.subr.mxu1 %v29334_v40 }
 0x536   : > { %18301 = vrot.lane.b32.xlu1 %v29016_v33, %s26268_s17  ;;  %14996 = vmatprep.mubr.f32.mxu0 %v32196_v30 }
 0x537   : > { %15073 = vmatprep.mubr.f32.mxu1 %v32196_v30  ;;  %25498 = vmatmul.mubr.msk.f32.gmra.mxu0 %vm312_vm1, %v14325_v13  ;;  %v29343_v21 = vpop.permute.xlu0 %15618  ;;  %v15173_v27 = vpop.permute.xlu1 %15172 }
 0x538   : > { %25500 = vmatmul.mubr.msk.f32.gmra.mxu1 %vm312_vm1, %v14325_v13  ;;  %26039 = vmatprep.mubr.msk.f32.mxu0 %vm312_vm1, %v14324_v49  ;;  %v29398_v32 = vsel %vm2479_vm5, %v29271_v52, %v15173_v27  ;;  %v29430_v1 = vsel %vm15626_vm2, %v29311_v11, %v29343_v21  ;;  %v29446_v52 = vsel %vm15626_vm2, %v29276_v14, %v29309_v56  ;;  %v25515_v49 = vld [vmem:[%s31800_s3 + $0x30] sm:$0xff]  ;;  %v25516_v56 = vld [vmem:[%s31800_s3 + $0x38] sm:$0xff] }
 0x539   : > { %15266 = vmatprep.mubr.f32.mxu1 %v32196_v30  ;;  %32210 = vst [vmem:[#allocation64_spill] sm:$0xff] %v29398_v32  ;;  %32212 = vst [vmem:[#allocation66_spill] sm:$0xff] %v29430_v1  ;;  %v29460_v14 = vsel %vm15626_vm2, %v29294_v12, %v29311_v11 }
 0x53a   : > { %17862 = vrot.lane.b32.xlu1 %v29052_v36, %s26267_s12  ;;  %32213 = vst [vmem:[#allocation67_spill] sm:$0xff] %v29446_v52  ;;  %32214 = vst [vmem:[#allocation68_spill] sm:$0xff] %v29460_v14 }
 0x53b   : > { %26040 = vmatmul.mubr.msk.f32.vlgmr.msra.gmra.mxu0 %vm312_vm1, %v14325_v13  ;;  %v29359_v48 = vpop.permute.xlu0 %16057  ;;  %v29361_v25 = vpop.permute.xlu1 %16061 }
 0x53c   : > { %25505 = vmatmul.mubr.msk.f32.vlgmr.msra.gmra.mxu1 %vm312_vm1, %v25503_v5  ;;  %15310 = vmatpush1.msra.mxu0 %v29357_v54 }
 0x53d   : > { %15387 = vmatpush1.msra.mxu1 %v29368_v26  ;;  %15272 = vmatprep.mubr.f32.mxu1 %v32196_v30 }
 0x53e   : > { %17866 = vrot.lane.b32.xlu1 %v29063_v8, %s26267_s12  ;;  %15343 = vmatprep.mubr.f32.mxu0 %v32196_v30 }
 0x53f   : > { %25507 = vmatmul.mubr.msk.f32.vlgmr.msra.gmra.mxu0 %vm312_vm1, %v25503_v5  ;;  %v15175_v37 = vpop.permute.xlu0 %15174  ;;  %v29379_v39 = vpop.permute.xlu1 %15176 }
 0x540   : > { %25506 = vmatmul.mubr.msk.f32.gmra.mxu1 %vm312_vm1, %v25504_v44  ;;  %15349 = vmatprep.mubr.f32.mxu0 %v32196_v30  ;;  %v29384_v42 = vsel %vm2479_vm5, %v15173_v27, %v15175_v37  ;;  %v29388_v16 = vsel %vm2479_vm5, %v15175_v37, %v29379_v39  ;;  %v29490_v27 = vsel %vm16075_vm4, %v29359_v48, %v29323_v57 }
 0x541   : > { %32208 = vst [vmem:[#allocation62_spill] sm:$0xff] %v29384_v42  ;;  %32209 = vst [vmem:[#allocation63_spill] sm:$0xff] %v29388_v16  ;;  %15420 = vmatprep.mubr.f32.mxu1 %v32196_v30  ;;  %15463 = vmatprep.subr.mxu0 %v29384_v42 }
 0x542   : > { %18305 = vrot.lane.b32.xlu1 %v29038_v47, %s26268_s17  ;;  %26042 = vmatprep.subr.mxu1 %v29388_v16 }
 0x543   : > { %25508 = vmatmul.mubr.msk.f32.gmra.mxu0 %vm312_vm1, %v25504_v44  ;;  %v16056_v62 = vpop.permute.xlu0 %16055  ;;  %v29400_v20 = vpop.permute.xlu1 %16065 }
 0x544   : > { %25509 = vmatmul.mubr.msk.f32.vlgmr.msra.gmra.mxu1 %vm312_vm1, %v25503_v5  ;;  %15464 = vmatpush1.msra.mxu0 %v29398_v32  ;;  %v16076_v37 = vsel %vm16075_vm4, %v16056_v62, %v29359_v48 }
 0x545   : > { %15426 = vmatprep.mubr.f32.mxu1 %v32196_v30  ;;  %15497 = vmatprep.mubr.f32.mxu0 %v32196_v30 }
 0x546   : > { %18307 = vrot.lane.b32.xlu1 %v29040_v50, %s26268_s17  ;;  %26043 = vmatpush3.msra.mxu1 %v29388_v16 }
 0x547   : > { %25511 = vmatmul.mubr.msk.f32.vlgmr.msra.gmra.mxu0 %vm312_vm1, %v25503_v5  ;;  %15681 = vmatprep.subr.mxu0 %v29412_v6  ;;  %v29421_v7 = vpop.permute.xlu0 %16063  ;;  %v15621_v35 = vpop.permute.xlu1 %15620 }
 0x548   : > { %25510 = vmatmul.mubr.msk.f32.gmra.mxu1 %vm312_vm1, %v25504_v44  ;;  %15758 = vmatprep.subr.mxu1 %v29419_v63  ;;  %v29477_v12 = vsel %vm15626_vm2, %v29343_v21, %v15621_v35 }
 0x549   : > { %15682 = vmatpush1.msra.mxu0 %v15627_v31  ;;  %15503 = vmatprep.mubr.f32.mxu0 %v32196_v30  ;;  %32216 = vst [vmem:[#allocation70_spill] sm:$0xff] %v29477_v12 }
 0x54a   : > { %18311 = vrot.lane.b32.xlu1 %v29052_v36, %s26268_s17  ;;  %15835 = vmatprep.subr.mxu0 %v29430_v1 }
 0x54b   : > { %26044 = vmatprep.mubr.msk.f32.mxu1 %vm312_vm1, %v25503_v5  ;;  %25512 = vmatmul.mubr.msk.f32.gmra.mxu0 %vm312_vm1, %v25504_v44  ;;  %v29438_v29 = vpop.permute.xlu0 %16067  ;;  %v29440_v46 = vpop.permute.xlu1 %16508 }
 0x54c   : > { %26045 = vmatmul.mubr.msk.f32.vlgmr.msra.gmra.mxu1 %vm312_vm1, %v25504_v44  ;;  %15715 = vmatprep.mubr.f32.mxu0 %v32196_v30  ;;  %v29514_v31 = vsel %vm16075_vm4, %v29400_v20, %v29438_v29 }
 0x54d   : > { %15759 = vmatpush1.msra.mxu1 %v29446_v52  ;;  %15792 = vmatprep.mubr.f32.mxu1 %v32196_v30  ;;  %32219 = vst [vmem:[#allocation73_spill] sm:$0xff] %v29514_v31 }
 0x54e   : > { %18315 = vrot.lane.b32.xlu1 %v29063_v8, %s26268_s17 }
 0x54f   : > { %25517 = vmatmul.mubr.msk.f32.vlgmr.msra.gmra.mxu0 %vm312_vm1, %v25515_v49  ;;  %v15623_v15 = vpop.permute.xlu0 %15622  ;;  %v29462_v13 = vpop.permute.xlu1 %16512 }
 0x550   : > { %25519 = vmatmul.mubr.msk.f32.vlgmr.msra.gmra.mxu1 %vm312_vm1, %v25515_v49  ;;  %15836 = vmatpush1.msra.mxu0 %v29460_v14  ;;  %v29470_v10 = vsel %vm15626_vm2, %v15621_v35, %v15623_v15 }
 0x551   : > { %32215 = vst [vmem:[#allocation69_spill] sm:$0xff] %v29470_v10  ;;  %15721 = vmatprep.mubr.f32.mxu0 %v32196_v30  ;;  %15798 = vmatprep.mubr.f32.mxu1 %v32196_v30 }
 0x552   : > { %15912 = vmatprep.subr.mxu1 %v29470_v10 }
 0x553   : > { %25518 = vmatmul.mubr.msk.f32.gmra.mxu0 %vm312_vm1, %v25516_v56  ;;  %15913 = vmatpush1.msra.mxu1 %v29477_v12  ;;  %v29481_v11 = vpop.permute.xlu0 %16506  ;;  %v29483_v59 = vpop.permute.xlu1 %15624 }
 0x554   : > { %32217 = vst [vmem:[#allocation71_spill] sm:$0xff] %v29483_v59  ;;  %25520 = vmatmul.mubr.msk.f32.gmra.mxu1 %vm312_vm1, %v25516_v56  ;;  %15869 = vmatprep.mubr.f32.mxu0 %v32196_v30  ;;  %v29494_v21 = vsel %vm15626_vm2, %v15623_v15, %v29483_v59 }
 0x555   : > { %32218 = vst [vmem:[#allocation72_spill] sm:$0xff] %v29494_v21  ;;  %15946 = vmatprep.mubr.f32.mxu1 %v32196_v30  ;;  %16130 = vmatprep.subr.mxu1 %v29490_v27 }
 0x556   : > { %26047 = vmatprep.subr.mxu0 %v29494_v21 }
 0x557   : > { %25521 = vmatmul.mubr.msk.f32.vlgmr.msra.gmra.mxu0 %vm312_vm1, %v25515_v49  ;;  %v29500_v5 = vpop.permute.xlu0 %16510  ;;  %v29502_v44 = vpop.permute.xlu1 %14209 }
 0x558   : > { %25523 = vmatmul.mubr.msk.f32.vlgmr.msra.gmra.mxu1 %vm312_vm1, %v25515_v49  ;;  %15875 = vmatprep.mubr.f32.mxu0 %v32196_v30  ;;  %v14222_v35 = vsel %vm285_vm0, %v28998_v4, %v29502_v44  ;;  %v29526_v4 = vsel %vm16075_vm4, %v29361_v25, %v29421_v7  ;;  %vm17868_vm0 = vcmask 474112  }
 0x559   : > { %16131 = vmatpush1.msra.mxu1 %v16076_v37  ;;  %15952 = vmatprep.mubr.f32.mxu1 %v32196_v30  ;;  %v29519_v15 = vmax.f32 %v14170_v9, %v14222_v35  ;;  %32220 = vst [vmem:[#allocation74_spill] sm:$0xff] %v29526_v4  ;;  %v29544_v9 = vsel %vm16075_vm4, %v29323_v57, %v29361_v25  ;;  %v25528_v57 = vld [vmem:[%s31800_s3 + $0x48] sm:$0xff] }
 0x55a   : > { %16284 = vmatprep.subr.mxu1 %v29514_v31  ;;  %26048 = vmatpush3.msra.mxu0 %v29494_v21  ;;  %32221 = vst [vmem:[#allocation75_spill] sm:$0xff] %v29544_v9 }
 0x55b   : > { %25522 = vmatmul.mubr.msk.f32.gmra.mxu0 %vm312_vm1, %v25516_v56  ;;  %16207 = vmatprep.subr.mxu0 %v29526_v4  ;;  %v16505_v48 = vpop.permute.xlu0 %16504  ;;  %v29530_v62 = vpop.permute.xlu1 %16516 }
 0x55c   : > { %25524 = vmatmul.mubr.msk.f32.gmra.mxu1 %vm312_vm1, %v25516_v56  ;;  %26049 = vmatprep.mubr.msk.f32.mxu0 %vm312_vm1, %v25515_v49  ;;  %v29551_v49 = vsel %vm16075_vm4, %v29421_v7, %v29400_v20 }
 0x55d   : > { %16164 = vmatprep.mubr.f32.mxu1 %v32196_v30  ;;  %14284 = vrot.lane.b32.xlu0 %v29519_v15, %s26248_s28  ;;  %32222 = vst [vmem:[#allocation76_spill] sm:$0xff] %v29551_v49 }
 0x55f   : > { %26050 = vmatmul.mubr.msk.f32.vlgmr.msra.gmra.mxu0 %vm312_vm1, %v25516_v56  ;;  %v16515_v37 = vpop.permute.xlu0 %16514  ;;  %v16070_v35 = vpop.permute.xlu1 %16069 }
 0x560   : > { %25529 = vmatmul.mubr.msk.f32.vlgmr.msra.gmra.mxu1 %vm312_vm1, %v25527_v23  ;;  %16208 = vmatpush1.msra.mxu0 %v29544_v9  ;;  %v29581_v60 = vsel %vm16075_vm4, %v29438_v29, %v16070_v35  ;;  %v29595_v29 = vsel %vm5893_vm11, %v29481_v11, %v29440_v46 }
 0x561   : > { %16285 = vmatpush1.msra.mxu1 %v29551_v49  ;;  %16170 = vmatprep.mubr.f32.mxu1 %v32196_v30  ;;  %32226 = vst [vmem:[#allocation84_spill] sm:$0xff] %v29581_v60  ;;  %32227 = vst [vmem:[#allocation80_spill] sm:$0xff] %v29595_v29 }
 0x562   : > { %16241 = vmatprep.mubr.f32.mxu0 %v32196_v30  ;;  %18299 = vrot.lane.b32.xlu0 %v29014_v43, %s26268_s17 }
 0x563   : > { %25531 = vmatmul.mubr.msk.f32.vlgmr.msra.gmra.mxu0 %vm312_vm1, %v25527_v23  ;;  %v16072_v25 = vpop.permute.xlu0 %16071  ;;  %v29562_v56 = vpop.permute.xlu1 %16073 }
 0x564   : > { %32223 = vst [vmem:[#allocation77_spill] sm:$0xff] %v29562_v56  ;;  %25530 = vmatmul.mubr.msk.f32.gmra.mxu1 %vm312_vm1, %v25528_v57  ;;  %16247 = vmatprep.mubr.f32.mxu0 %v32196_v30  ;;  %v29568_v20 = vsel %vm16075_vm4, %v16072_v25, %v29562_v56  ;;  %v29571_v7 = vsel %vm16075_vm4, %v16070_v35, %v16072_v25 }
 0x565   : > { %32224 = vst [vmem:[#allocation78_spill] sm:$0xff] %v29568_v20  ;;  %32225 = vst [vmem:[#allocation79_spill] sm:$0xff] %v29571_v7  ;;  %16318 = vmatprep.mubr.f32.mxu1 %v32196_v30  ;;  %16361 = vmatprep.subr.mxu0 %v29571_v7  ;;  %v29602_v35 = vsel %vm5893_vm11, %v29500_v5, %v29462_v13  ;;  %v29612_v56 = vsel %vm5893_vm11, %v16515_v37, %v29530_v62 }
 0x566   : > { %17864 = vrot.lane.b32.xlu0 %v29061_v22, %s26267_s12  ;;  %26052 = vmatprep.subr.mxu1 %v29568_v20  ;;  %32228 = vst [vmem:[#allocation82_spill] sm:$0xff] %v29602_v35  ;;  %32229 = vst [vmem:[#allocation81_spill] sm:$0xff] %v29612_v56 }
 0x567   : > { %25532 = vmatmul.mubr.msk.f32.gmra.mxu0 %vm312_vm1, %v25528_v57  ;;  %v29583_v4 = vpop.permute.xlu0 %16956  ;;  %v16955_v49 = vpop.permute.xlu1 %16954 }
 0x568   : > { %25533 = vmatmul.mubr.msk.f32.vlgmr.msra.gmra.mxu1 %vm312_vm1, %v25527_v23  ;;  %16362 = vmatpush1.msra.mxu0 %v29581_v60 }
 0x569   : > { %16324 = vmatprep.mubr.f32.mxu1 %v32196_v30  ;;  %16395 = vmatprep.mubr.f32.mxu0 %v32196_v30 }
 0x56a   : > { %26053 = vmatpush3.msra.mxu1 %v29568_v20  ;;  %18303 = vrot.lane.b32.xlu0 %v29030_v19, %s26268_s17  ;;  %v16524_v20 = vsel %vm5893_vm11, %v16505_v48, %v29481_v11 }
 0x56b   : > { %25535 = vmatmul.mubr.msk.f32.vlgmr.msra.gmra.mxu0 %vm312_vm1, %v25527_v23  ;;  %16578 = vmatprep.subr.mxu0 %v29595_v29  ;;  %v29604_v25 = vpop.permute.xlu0 %16958  ;;  %v16953_v7 = vpop.permute.xlu1 %16952 }
 0x56c   : > { %25534 = vmatmul.mubr.msk.f32.gmra.mxu1 %vm312_vm1, %v25528_v57  ;;  %16655 = vmatprep.subr.mxu1 %v29602_v35 }
 0x56d   : > { %16579 = vmatpush1.msra.mxu0 %v16524_v20  ;;  %16401 = vmatprep.mubr.f32.mxu0 %v32196_v30  ;;  %v29624_v20 = vsel %vm5893_vm11, %v29440_v46, %v29500_v5  ;;  %v29645_v46 = vsel %vm5893_vm11, %v29462_v13, %v16515_v37  ;;  %v29660_v13 = vsel %vm7031_vm13, %v16955_v49, %v29583_v4 }
 0x56e   : > { %16732 = vmatprep.subr.mxu0 %v29612_v56  ;;  %26054 = vmatprep.mubr.msk.f32.mxu1 %vm312_vm1, %v25527_v23  ;;  %32230 = vst [vmem:[#allocation83_spill] sm:$0xff] %v29624_v20  ;;  %v25539_v23 = vld [vmem:[%s31800_s3 + $0x50] sm:$0xff]  ;;  %32233 = vst [vmem:[#allocation86_spill] sm:$0xff] %v29645_v46 }
 0x56f   : > { %18297 = vrot.lane.b32.xlu0 %v29023_v45, %s26268_s17  ;;  %25536 = vmatmul.mubr.msk.f32.gmra.mxu0 %vm312_vm1, %v25528_v57  ;;  %v16519_v11 = vpop.permute.xlu0 %16518  ;;  %v16521_v48 = vpop.permute.xlu1 %16520  ;;  %32234 = vst [vmem:[#allocation4_spill] sm:$0xff] %v29660_v13 }
 0x570   : > { %26055 = vmatmul.mubr.msk.f32.vlgmr.msra.gmra.mxu1 %vm312_vm1, %v25528_v57  ;;  %16612 = vmatprep.mubr.f32.mxu0 %v32196_v30  ;;  %v29631_v56 = vsel %vm5893_vm11, %v16519_v11, %v16521_v48  ;;  %v29638_v45 = vsel %vm5893_vm11, %v29530_v62, %v16519_v11  ;;  %v25540_v62 = vld [vmem:[%s31800_s3 + $0x58] sm:$0xff] }
 0x571   : > { %32231 = vst [vmem:[#allocation85_spill] sm:$0xff] %v29631_v56  ;;  %16656 = vmatpush1.msra.mxu1 %v29624_v20  ;;  %16689 = vmatprep.mubr.f32.mxu1 %v32196_v30  ;;  %32232 = vst [vmem:[#allocation87_spill] sm:$0xff] %v29638_v45 }
 0x572   : > { %16809 = vmatprep.subr.mxu1 %v29631_v56  ;;  %v16972_v56 = vsel %vm7031_vm13, %v16953_v7, %v16955_v49 }
 0x573   : > { %18309 = vrot.lane.b32.xlu0 %v29050_v34, %s26268_s17  ;;  %25541 = vmatmul.mubr.msk.f32.vlgmr.msra.gmra.mxu0 %vm312_vm1, %v25539_v23  ;;  %v16963_v5 = vpop.permute.xlu0 %16962  ;;  %v16961_v57 = vpop.permute.xlu1 %16960 }
 0x574   : > { %25543 = vmatmul.mubr.msk.f32.vlgmr.msra.gmra.mxu1 %vm312_vm1, %v25539_v23  ;;  %16733 = vmatpush1.msra.mxu0 %v29645_v46  ;;  %v29696_v7 = vsel %vm7031_vm13, %v29604_v25, %v16961_v57 }
 0x575   : > { %16618 = vmatprep.mubr.f32.mxu0 %v32196_v30  ;;  %16695 = vmatprep.mubr.f32.mxu1 %v32196_v30  ;;  %32238 = vst [vmem:[#allocation7_spill] sm:$0xff] %v29696_v7 }
 0x576   : > { %16810 = vmatpush1.msra.mxu1 %v29638_v45 }
 0x577   : > { %18313 = vrot.lane.b32.xlu0 %v29061_v22, %s26268_s17  ;;  %25542 = vmatmul.mubr.msk.f32.gmra.mxu0 %vm312_vm1, %v25540_v62  ;;  %v29662_v37 = vpop.permute.xlu0 %17404  ;;  %v16965_v11 = vpop.permute.xlu1 %16964 }
 0x578   : > { %25544 = vmatmul.mubr.msk.f32.gmra.mxu1 %vm312_vm1, %v25540_v62  ;;  %17026 = vmatprep.subr.mxu1 %v29660_v13  ;;  %v29670_v45 = vsel %vm7031_vm13, %v16963_v5, %v16965_v11 }
 0x579   : > { %16766 = vmatprep.mubr.f32.mxu0 %v32196_v30  ;;  %16843 = vmatprep.mubr.f32.mxu1 %v32196_v30  ;;  %32235 = vst [vmem:[#allocation6_spill] sm:$0xff] %v29670_v45 }
 0x57b   : > { %25545 = vmatmul.mubr.msk.f32.vlgmr.msra.gmra.mxu0 %vm312_vm1, %v25539_v23  ;;  %v29672_v29 = vpop.permute.xlu0 %16522  ;;  %v17403_v20 = vpop.permute.xlu1 %17402 }
 0x57c   : > { %32236 = vst [vmem:[#allocation2_spill] sm:$0xff] %v29672_v29  ;;  %25547 = vmatmul.mubr.msk.f32.vlgmr.msra.gmra.mxu1 %vm312_vm1, %v25539_v23  ;;  %16772 = vmatprep.mubr.f32.mxu0 %v32196_v30  ;;  %v29679_v13 = vsel %vm5893_vm11, %v16521_v48, %v29672_v29  ;;  %v29702_v48 = vsel %vm7031_vm13, %v29583_v4, %v29604_v25  ;;  %v25552_v4 = vld [vmem:[%s31800_s3 + $0x68] sm:$0xff] }
 0x57d   : > { %32237 = vst [vmem:[#allocation11_spill] sm:$0xff] %v29679_v13  ;;  %17027 = vmatpush1.msra.mxu1 %v16972_v56  ;;  %16849 = vmatprep.mubr.f32.mxu1 %v32196_v30  ;;  %v25551_v56 = vld [vmem:[%s31800_s3 + $0x60] sm:$0xff]  ;;  %32239 = vst [vmem:[#allocation21_spill] sm:$0xff] %v29702_v48 }
 0x57e   : > { %17180 = vmatprep.subr.mxu1 %v29670_v45  ;;  %26057 = vmatprep.subr.mxu0 %v29679_v13  ;;  %v29706_v45 = vsel %vm7031_vm13, %v16961_v57, %v16963_v5 }
 0x57f   : > { %25546 = vmatmul.mubr.msk.f32.gmra.mxu0 %vm312_vm1, %v25540_v62  ;;  %v29685_v35 = vpop.permute.xlu0 %17408  ;;  %v17407_v49 = vpop.permute.xlu1 %17406  ;;  %32240 = vst [vmem:[#allocation3_spill] sm:$0xff] %v29706_v45 }
 0x580   : > { %25548 = vmatmul.mubr.msk.f32.gmra.mxu1 %vm312_vm1, %v25540_v62  ;;  %26058 = vmatpush3.msra.mxu0 %v29679_v13 }
 0x581   : > { %26059 = vmatprep.mubr.msk.f32.mxu0 %vm312_vm1, %v25539_v23  ;;  %17060 = vmatprep.mubr.f32.mxu1 %v32196_v30 }
 0x582   : > { %17103 = vmatprep.subr.mxu0 %v29696_v7 }
 0x583   : > { %26060 = vmatmul.mubr.msk.f32.vlgmr.msra.gmra.mxu0 %vm312_vm1, %v25540_v62  ;;  %v16967_v23 = vpop.permute.xlu0 %16966  ;;  %v16969_v29 = vpop.permute.xlu1 %16968  ;;  %v29730_v62 = vsel %vm8169_vm15, %v17403_v20, %v29662_v37 }
 0x584   : > { %25553 = vmatmul.mubr.msk.f32.vlgmr.msra.gmra.mxu1 %vm312_vm1, %v25551_v56  ;;  %17104 = vmatpush1.msra.mxu0 %v29702_v48  ;;  %v29711_v13 = vsel %vm7031_vm13, %v16967_v23, %v16969_v29  ;;  %v29720_v25 = vsel %vm7031_vm13, %v16965_v11, %v16967_v23  ;;  %32243 = vst [vmem:[#allocation5_spill] sm:$0xff] %v29730_v62 }
 0x585   : > { %32241 = vst [vmem:[#allocation8_spill] sm:$0xff] %v29711_v13  ;;  %17181 = vmatpush1.msra.mxu1 %v29706_v45  ;;  %17066 = vmatprep.mubr.f32.mxu1 %v32196_v30  ;;  %32242 = vst [vmem:[#allocation12_spill] sm:$0xff] %v29720_v25 }
 0x586   : > { %17137 = vmatprep.mubr.f32.mxu0 %v32196_v30  ;;  %17257 = vmatprep.subr.mxu0 %v29711_v13 }
 0x587   : > { %25555 = vmatmul.mubr.msk.f32.vlgmr.msra.gmra.mxu0 %vm312_vm1, %v25551_v56  ;;  %v17411_v5 = vpop.permute.xlu0 %17410  ;;  %v17401_v57 = vpop.permute.xlu1 %17400 }
 0x588   : > { %25554 = vmatmul.mubr.msk.f32.gmra.mxu1 %vm312_vm1, %v25552_v4  ;;  %17143 = vmatprep.mubr.f32.mxu0 %v32196_v30  ;;  %v17420_v45 = vsel %vm8169_vm15, %v17401_v57, %v17403_v20  ;;  %v29762_v20 = vsel %vm8169_vm15, %v29662_v37, %v17407_v49 }
 0x589   : > { %17214 = vmatprep.mubr.f32.mxu1 %v32196_v30  ;;  %17258 = vmatpush1.msra.mxu0 %v29720_v25  ;;  %32248 = vst [vmem:[#allocation33_spill] sm:$0xff] %v29762_v20 }
 0x58a   : > { %17474 = vmatprep.subr.mxu0 %v29730_v62  ;;  %v29750_v62 = vsel %vm8169_vm15, %v17407_v49, %v29685_v35 }
 0x58b   : > { %25556 = vmatmul.mubr.msk.f32.gmra.mxu0 %vm312_vm1, %v25552_v4  ;;  %v29734_v11 = vpop.permute.xlu0 %16970  ;;  %v17413_v23 = vpop.permute.xlu1 %17412  ;;  %32247 = vst [vmem:[#allocation27_spill] sm:$0xff] %v29750_v62 }
 0x58c   : > { %32244 = vst [vmem:[#allocation10_spill] sm:$0xff] %v29734_v11  ;;  %25557 = vmatmul.mubr.msk.f32.vlgmr.msra.gmra.mxu1 %vm312_vm1, %v25551_v56  ;;  %17291 = vmatprep.mubr.f32.mxu0 %v32196_v30  ;;  %v29740_v13 = vsel %vm7031_vm13, %v16969_v29, %v29734_v11  ;;  %v29745_v7 = vsel %vm8169_vm15, %v17411_v5, %v17413_v23 }
 0x58d   : > { %32245 = vst [vmem:[#allocation16_spill] sm:$0xff] %v29740_v13  ;;  %17220 = vmatprep.mubr.f32.mxu1 %v32196_v30  ;;  %26062 = vmatprep.subr.mxu1 %v29740_v13  ;;  %32246 = vst [vmem:[#allocation19_spill] sm:$0xff] %v29745_v7 }
 0x58e   : > { %26063 = vmatpush3.msra.mxu1 %v29740_v13 }
 0x58f   : > { %25559 = vmatmul.mubr.msk.f32.vlgmr.msra.gmra.mxu0 %vm312_vm1, %v25551_v56  ;;  %v17853_v25 = vpop.permute.xlu0 %17852  ;;  %17551 = vmatprep.subr.mxu1 %v29750_v62  ;;  %v17851_v29 = vpop.permute.xlu1 %17850 }
 0x590   : > { %25558 = vmatmul.mubr.msk.f32.gmra.mxu1 %vm312_vm1, %v25552_v4  ;;  %17475 = vmatpush1.msra.mxu0 %v17420_v45  ;;  %v25563_v45 = vld [vmem:[%s31800_s3 + $0x70] sm:$0xff] }
 0x591   : > { %17628 = vmatprep.subr.mxu0 %v29745_v7  ;;  %17297 = vmatprep.mubr.f32.mxu0 %v32196_v30  ;;  %v29773_v7 = vsel %vm8169_vm15, %v29685_v35, %v17411_v5  ;;  %v29792_v5 = vsel %vm17868_vm0, %v17851_v29, %v17853_v25 }
 0x592   : > { %26064 = vmatprep.mubr.msk.f32.mxu1 %vm312_vm1, %v25551_v56  ;;  %32249 = vst [vmem:[#allocation15_spill] sm:$0xff] %v29773_v7  ;;  %32252 = vst [vmem:[#allocation9_spill] sm:$0xff] %v29792_v5 }
 0x593   : > { %25560 = vmatmul.mubr.msk.f32.gmra.mxu0 %vm312_vm1, %v25552_v4 }
 0x594   : > { %26065 = vmatmul.mubr.msk.f32.vlgmr.msra.gmra.mxu1 %vm312_vm1, %v25552_v4  ;;  %17508 = vmatprep.mubr.f32.mxu0 %v32196_v30  ;;  %v25564_v4 = vld [vmem:[%s31800_s3 + $0x78] sm:$0xff] }
 0x595   : > { %17552 = vmatpush1.msra.mxu1 %v29762_v20  ;;  %17585 = vmatprep.mubr.f32.mxu1 %v32196_v30  ;;  %v17415_v57 = vpop.permute.xlu0 %17414 }
 0x596   : > { %v17417_v56 = vpop.permute.xlu1 %17416  ;;  %v29776_v37 = vsel %vm8169_vm15, %v17413_v23, %v17415_v57 }
 0x597   : > { %32250 = vst [vmem:[#allocation17_spill] sm:$0xff] %v29776_v37  ;;  %25565 = vmatmul.mubr.msk.f32.vlgmr.msra.gmra.mxu0 %vm312_vm1, %v25563_v45  ;;  %v29780_v49 = vsel %vm8169_vm15, %v17415_v57, %v17417_v56 }
 0x598   : > { %32251 = vst [vmem:[#allocation13_spill] sm:$0xff] %v29780_v49  ;;  %25567 = vmatmul.mubr.msk.f32.vlgmr.msra.gmra.mxu1 %vm312_vm1, %v25563_v45  ;;  %17629 = vmatpush1.msra.mxu0 %v29773_v7 }
 0x599   : > { %17705 = vmatprep.subr.mxu1 %v29780_v49  ;;  %17514 = vmatprep.mubr.f32.mxu0 %v32196_v30  ;;  %v17855_v35 = vpop.permute.xlu0 %17854 }
 0x59a   : > { %17591 = vmatprep.mubr.f32.mxu1 %v32196_v30  ;;  %17706 = vmatpush1.msra.mxu1 %v29776_v37  ;;  %v17849_v23 = vpop.permute.xlu1 %17848 }
 0x59b   : > { %25566 = vmatmul.mubr.msk.f32.gmra.mxu0 %vm312_vm1, %v25564_v4  ;;  %17923 = vmatprep.subr.mxu1 %v29792_v5  ;;  %v17869_v37 = vsel %vm17868_vm0, %v17849_v23, %v17851_v29  ;;  %v29827_v23 = vsel %vm17868_vm0, %v17853_v25, %v17855_v35  ;;  %v25576_v25 = vld [vmem:[%s31800_s3 + $0x88] sm:$0xff] }
 0x59c   : > { %25568 = vmatmul.mubr.msk.f32.gmra.mxu1 %vm312_vm1, %v25564_v4  ;;  %17662 = vmatprep.mubr.f32.mxu0 %v32196_v30  ;;  %32257 = vst [vmem:[#allocation18_spill] sm:$0xff] %v29827_v23 }
 0x59d   : > { %17739 = vmatprep.mubr.f32.mxu1 %v32196_v30 }
 0x59f   : > { %v17859_v57 = vpop.permute.xlu0 %17858  ;;  %25569 = vmatmul.mubr.msk.f32.vlgmr.msra.gmra.mxu0 %vm312_vm1, %v25563_v45  ;;  %v17857_v20 = vpop.permute.xlu1 %17856 }
 0x5a0   : > { %25571 = vmatmul.mubr.msk.f32.vlgmr.msra.gmra.mxu1 %vm312_vm1, %v25563_v45  ;;  %17668 = vmatprep.mubr.f32.mxu0 %v32196_v30 }
 0x5a1   : > { %17924 = vmatpush1.msra.mxu1 %v17869_v37  ;;  %17745 = vmatprep.mubr.f32.mxu1 %v32196_v30  ;;  %v25575_v37 = vld [vmem:[%s31800_s3 + $0x80] sm:$0xff] }
 0x5a3   : > { %v29804_v5 = vpop.permute.xlu0 %17418  ;;  %25570 = vmatmul.mubr.msk.f32.gmra.mxu0 %vm312_vm1, %v25564_v4  ;;  %v17861_v49 = vpop.permute.xlu1 %17860 }
 0x5a4   : > { %32253 = vst [vmem:[#allocation25_spill] sm:$0xff] %v29804_v5  ;;  %25572 = vmatmul.mubr.msk.f32.gmra.mxu1 %vm312_vm1, %v25564_v4  ;;  %v29810_v13 = vsel %vm8169_vm15, %v17417_v56, %v29804_v5  ;;  %v29813_v29 = vsel %vm17868_vm0, %v17859_v57, %v17861_v49  ;;  %26069 = vmatprep.mubr.msk.f32.mxu0 %vm312_vm1, %v25563_v45 }
 0x5a5   : > { %32254 = vst [vmem:[#allocation14_spill] sm:$0xff] %v29810_v13  ;;  %32255 = vst [vmem:[#allocation28_spill] sm:$0xff] %v29813_v29  ;;  %26067 = vmatprep.subr.mxu0 %v29810_v13  ;;  %18077 = vmatprep.subr.mxu1 %v29813_v29  ;;  %v29824_v56 = vsel %vm17868_vm0, %v17855_v35, %v17857_v20  ;;  %v29832_v45 = vsel %vm17868_vm0, %v17857_v20, %v17859_v57 }
 0x5a6   : > { %26068 = vmatpush3.msra.mxu0 %v29810_v13  ;;  %17957 = vmatprep.mubr.f32.mxu1 %v32196_v30  ;;  %32256 = vst [vmem:[#allocation41_spill] sm:$0xff] %v29824_v56  ;;  %32258 = vst [vmem:[#allocation20_spill] sm:$0xff] %v29832_v45 }
 0x5a7   : > { %26070 = vmatmul.mubr.msk.f32.vlgmr.msra.gmra.mxu0 %vm312_vm1, %v25564_v4  ;;  %18000 = vmatprep.subr.mxu0 %v29824_v56 }
 0x5a8   : > { %25577 = vmatmul.mubr.msk.f32.vlgmr.msra.gmra.mxu1 %vm312_vm1, %v25575_v37  ;;  %18001 = vmatpush1.msra.mxu0 %v29827_v23  ;;  %v18302_v20 = vpop.permute.xlu1 %18301 }
 0x5a9   : > { %18078 = vmatpush1.msra.mxu1 %v29832_v45  ;;  %17963 = vmatprep.mubr.f32.mxu1 %v32196_v30 }
 0x5aa   : > { %18034 = vmatprep.mubr.f32.mxu0 %v32196_v30 }
 0x5ab   : > { %25579 = vmatmul.mubr.msk.f32.vlgmr.msra.gmra.mxu0 %vm312_vm1, %v25575_v37 }
 0x5ac   : > { %25578 = vmatmul.mubr.msk.f32.gmra.mxu1 %vm312_vm1, %v25576_v25  ;;  %18040 = vmatprep.mubr.f32.mxu0 %v32196_v30  ;;  %v17863_v4 = vpop.permute.xlu1 %17862 }
 0x5ad   : > { %18111 = vmatprep.mubr.f32.mxu1 %v32196_v30  ;;  %v29888_v11 = vsel %vm17868_vm0, %v17861_v49, %v17863_v4 }
 0x5ae   : > { %32265 = vst [vmem:[#allocation40_spill] sm:$0xff] %v29888_v11 }
 0x5af   : > { %25580 = vmatmul.mubr.msk.f32.gmra.mxu0 %vm312_vm1, %v25576_v25 }
 0x5b0   : > { %25581 = vmatmul.mubr.msk.f32.vlgmr.msra.gmra.mxu1 %vm312_vm1, %v25575_v37  ;;  %18188 = vmatprep.mubr.f32.mxu0 %v32196_v30  ;;  %v29859_v45 = vpop.permute.xlu1 %17866 }
 0x5b1   : > { %18117 = vmatprep.mubr.f32.mxu1 %v32196_v30  ;;  %32259 = vst [vmem:[#allocation22_spill] sm:$0xff] %v29859_v45 }
 0x5b4   : > { %25582 = vmatmul.mubr.msk.f32.gmra.mxu1 %vm312_vm1, %v25576_v25  ;;  %v18306_v62 = vpop.permute.xlu1 %18305 }
 0x5b5   : > { %26074 = vmatprep.mubr.msk.f32.mxu1 %vm312_vm1, %v25575_v37 }
 0x5cf   : > { %v29852_v35 = vpop.permute.xlu0 %14284  ;;  %v29854_v57 = vpop.f32.mrf.mxu1 }
 0x5d0   : > { %v14298_v56 = vsel %vm3048_vm6, %v29048_v55, %v29852_v35 }
 0x5d1   : > { %v29862_v5 = vmax.f32 %v29007_v53, %v14298_v56  ;;  %v29864_v29 = vpop.f32.mrf.mxu1 }
 0x5d2   : > { %32261 = vst [vmem:[#allocation88_spill] sm:$0xff] %v29864_v29 }
 0x5d3   : > { %32260 = vst [vmem:[#allocation29_spill] sm:$0xff] %v29862_v5  ;;  %19571 = vrot.lane.b32.xlu1 %v29862_v5, %s26247_s27  ;;  %19157 = vrot.lane.b32.xlu0 %v29862_v5, %s26245_s25  ;;  %v29870_v13 = vpop.f32.mrf.mxu1 }
 0x5d4   : > { %v18300_v23 = vpop.permute.xlu0 %18299 }
 0x5d5   : > { %v29885_v7 = vpop.f32.mrf.mxu1 }
 0x5d6   : > { %32264 = vst [vmem:[#allocation30_spill] sm:$0xff] %v29885_v7 }
 0x5d7   : > { %20399 = vrot.lane.b32.xlu1 %v29862_v5, %s26266_s7  ;;  %19985 = vrot.lane.b32.xlu0 %v29862_v5, %s26265_s6 }
 0x5d8   : > { %v17865_v53 = vpop.permute.xlu0 %17864  ;;  %v29876_v55 = vpop.f32.mrf.mxu0 }
 0x5d9   : > { %v29879_v56 = vsel %vm17868_vm0, %v17863_v4, %v17865_v53  ;;  %v29883_v29 = vsel %vm17868_vm0, %v17865_v53, %v29859_v45  ;;  %v18308_v4 = vpop.permute.xlu1 %18307  ;;  %v32270_v45 = vmax.f32 %v29123_v38, 0.0 }
 0x5da   : > { %32262 = vst [vmem:[#allocation32_spill] sm:$0xff] %v29879_v56  ;;  %32263 = vst [vmem:[#allocation34_spill] sm:$0xff] %v29883_v29  ;;  %18154 = vmatprep.subr.mxu0 %v29879_v56  ;;  %26072 = vmatprep.subr.mxu1 %v29883_v29  ;;  %v29892_v48 = vpop.f32.mrf.mxu0 }
 0x5db   : > { %32266 = vst [vmem:[#allocation24_spill] sm:$0xff] %v29892_v48  ;;  %18155 = vmatpush1.msra.mxu0 %v29888_v11  ;;  %26073 = vmatpush3.msra.mxu1 %v29883_v29  ;;  %v29908_v48 = vsel %vm18317_vm14, %v18300_v23, %v18302_v20  ;;  %v14248_v11 = vmax.f32 %v32270_v45, %v29502_v44 }
 0x5dc   : > { %21227 = vrot.lane.b32.xlu1 %v29862_v5, %s26256_s9  ;;  %20813 = vrot.lane.b32.xlu0 %v29862_v5, %s26254_s22  ;;  %v18304_v53 = vpop.permute.xlu0 %18303  ;;  %v29900_v49 = vpop.f32.mrf.mxu0  ;;  %32268 = vst [vmem:[#allocation36_spill] sm:$0xff] %v29908_v48 }
 0x5dd   : > { %v29903_v7 = vsel %vm18317_vm14, %v18302_v20, %v18304_v53  ;;  %25583 = vmatmul.mubr.msk.f32.vlgmr.msra.gmra.mxu0 %vm312_vm1, %v25575_v37  ;;  %26075 = vmatmul.mubr.msk.f32.vlgmr.msra.gmra.mxu1 %vm312_vm1, %v25576_v25  ;;  %v29910_v56 = vpop.f32.mrf.mxu1  ;;  %v29913_v29 = vsel %vm18317_vm14, %v18304_v53, %v18306_v62  ;;  %v29929_v20 = vld [vmem:[%s31800_s3 + $0x90] sm:$0xff] }
 0x5de   : > { %32267 = vst [vmem:[#allocation35_spill] sm:$0xff] %v29903_v7  ;;  %32269 = vst [vmem:[#allocation23_spill] sm:$0xff] %v29913_v29  ;;  %18372 = vmatprep.subr.mxu0 %v29908_v48  ;;  %18449 = vmatprep.subr.mxu1 %v29913_v29  ;;  %v29920_v46 = vpop.f32.mrf.mxu0 }
 0x5df   : > { %32271 = vst [vmem:[#allocation31_spill] sm:$0xff] %v29920_v46  ;;  %18194 = vmatprep.mubr.f32.mxu0 %v32196_v30  ;;  %18450 = vmatpush1.msra.mxu1 %v29903_v7  ;;  %v29924_v37 = vpop.f32.mrf.mxu1  ;;  %v18312_v46 = vpop.permute.xlu1 %18311 }
 0x5e0   : > { %32272 = vst [vmem:[#allocation38_spill] sm:$0xff] %v29924_v37  ;;  %18483 = vmatprep.mubr.f32.mxu1 %v32196_v30  ;;  %14286 = vrot.lane.b32.xlu1 %v14248_v11, %s26248_s28  ;;  %v29966_v37 = vsel %vm18317_vm14, %v18306_v62, %v18308_v4 }
 0x5e1   : > { %21641 = vrot.lane.b32.xlu0 %v29862_v5, %s26258_s15  ;;  %v18298_v38 = vpop.permute.xlu0 %18297  ;;  %25584 = vmatmul.mubr.msk.f32.gmra.mxu0 %vm312_vm1, %v25576_v25  ;;  %v29936_v44 = vpop.f32.mrf.mxu1  ;;  %v25588_v25 = vld [vmem:[%s31800_s3 + $0x98] sm:$0xff]  ;;  %32276 = vst [vmem:[#allocation37_spill] sm:$0xff] %v29966_v37 }
 0x5e2   : > { %v18318_v45 = vsel %vm18317_vm14, %v18298_v38, %v18300_v23  ;;  %25591 = vmatmul.mubr.msk.f32.vlgmr.msra.gmra.mxu1 %vm312_vm1, %v29929_v20  ;;  %v14680_v53 = vpop.f32.mrf.mxu0  ;;  %18406 = vmatprep.mubr.f32.mxu0 %v32196_v30 }
 0x5e3   : > { %18373 = vmatpush1.msra.mxu0 %v18318_v45  ;;  %18489 = vmatprep.mubr.f32.mxu1 %v32196_v30  ;;  %v29943_v11 = vpop.f32.mrf.mxu1  ;;  %v29975_v29 = vpop.permute.xlu1 %18315 }
 0x5e4   : > { %32273 = vst [vmem:[#allocation42_spill] sm:$0xff] %v29943_v11  ;;  %v29948_v48 = vpop.f32.mrf.mxu0  ;;  %22469 = vrot.lane.b32.xlu1 %v29862_v5, %s26268_s17  ;;  %32279 = vst [vmem:[#allocation89_spill] sm:$0xff] %v29975_v29 }
 0x5e5   : > { %32274 = vst [vmem:[#allocation39_spill] sm:$0xff] %v29948_v48  ;;  %22055 = vrot.lane.b32.xlu0 %v29862_v5, %s26267_s12  ;;  %v18310_v23 = vpop.permute.xlu0 %18309  ;;  %25589 = vmatmul.mubr.msk.f32.vlgmr.msra.gmra.mxu0 %vm312_vm1, %v29929_v20 }
 0x5e6   : > { %25592 = vmatmul.mubr.msk.f32.gmra.mxu1 %vm312_vm1, %v25588_v25  ;;  %v29957_v38 = vpop.f32.mrf.mxu0  ;;  %v29959_v45 = vpop.f32.mrf.mxu1  ;;  %v29962_v11 = vsel %vm18317_vm14, %v18308_v4, %v18310_v23  ;;  %18412 = vmatprep.mubr.f32.mxu0 %v32196_v30 }
 0x5e7   : > { %32275 = vst [vmem:[#allocation26_spill] sm:$0xff] %v29962_v11  ;;  %18526 = vmatprep.subr.mxu0 %v29962_v11  ;;  %18637 = vmatprep.mubr.f32.mxu1 %v32196_v30  ;;  %v29987_v11 = vsel %vm18317_vm14, %v18310_v23, %v18312_v46 }
 0x5e8   : > { %18527 = vmatpush1.msra.mxu0 %v29966_v37  ;;  %v29971_v5 = vpop.f32.mrf.mxu0  ;;  %v29973_v7 = vpop.f32.mrf.mxu1  ;;  %32280 = vst [vmem:[#allocation90_spill] sm:$0xff] %v29987_v11 }
 0x5e9   : > { %32277 = vst [vmem:[#allocation43_spill] sm:$0xff] %v29971_v5  ;;  %32278 = vst [vmem:[#allocation44_spill] sm:$0xff] %v29973_v7  ;;  %v18314_v48 = vpop.permute.xlu0 %18313  ;;  %25590 = vmatmul.mubr.msk.f32.gmra.mxu0 %vm312_vm1, %v25588_v25 }
 0x5ea   : > { %v14838_v59 = vpop.f32.mrf.mxu0  ;;  %v14915_v31 = vpop.f32.mrf.mxu1  ;;  %v29979_v62 = vsel %vm18317_vm14, %v18312_v46, %v18314_v48  ;;  %v29983_v4 = vsel %vm18317_vm14, %v18314_v48, %v29975_v29  ;;  %18560 = vmatprep.mubr.f32.mxu0 %v32196_v30 }
 0x5eb   : > { %v14839_v7 = vadd.f32 %v14838_v59, %v29854_v57  ;;  %v29991_v5 = vadd.f32 %v14915_v31, %v29876_v55  ;;  %18603 = vmatprep.subr.mxu1 %v29979_v62  ;;  %26077 = vmatprep.subr.mxu0 %v29983_v4 }
 0x5ec   : > { %18604 = vmatpush1.msra.mxu1 %v29987_v11  ;;  %v29996_v37 = vpop.f32.mrf.mxu0  ;;  %v29998_v48 = vpop.f32.mrf.mxu1 }
 0x5ed   : > { %32281 = vst [vmem:[#allocation91_spill] sm:$0xff] %v29998_v48  ;;  %25593 = vmatmul.mubr.msk.f32.vlgmr.msra.gmra.mxu0 %vm312_vm1, %v29929_v20  ;;  %25595 = vmatmul.mubr.msk.f32.vlgmr.msra.gmra.mxu1 %vm312_vm1, %v29929_v20 }
 0x5ee   : > { %26078 = vmatpush3.msra.mxu0 %v29983_v4  ;;  %18782 = vmatprep.subr.mxu1 %v29016_v33 }
 0x5ef   : > { %18783 = vmatpush1.msra.mxu1 %v29014_v43  ;;  %18859 = vmatprep.subr.mxu0 %v29038_v47  ;;  %v14844_v59 = vpop.f32.mrf.mxu0  ;;  %v14921_v31 = vpop.f32.mrf.mxu1 }
 0x5f0   : > { %v14845_v46 = vadd.f32 %v14844_v59, %v29870_v13  ;;  %v14922_v57 = vadd.f32 %v14921_v31, %v29900_v49  ;;  %18936 = vmatprep.subr.mxu1 %v29050_v34  ;;  %18566 = vmatprep.mubr.f32.mxu0 %v32196_v30  ;;  %v25599_v49 = vld [vmem:[%s31800_s3 + $0xa0] sm:$0xff] }
 0x5f1   : > { %18643 = vmatprep.mubr.f32.mxu1 %v32196_v30  ;;  %v30013_v55 = vpop.f32.mrf.mxu0  ;;  %v30015_v23 = vpop.f32.mrf.mxu1  ;;  %25594 = vmatmul.mubr.msk.f32.gmra.mxu0 %vm312_vm1, %v25588_v25 }
 0x5f2   : > { %32282 = vst [vmem:[#allocation92_spill] sm:$0xff] %v30015_v23  ;;  %25596 = vmatmul.mubr.msk.f32.gmra.mxu1 %vm312_vm1, %v25588_v25  ;;  %26079 = vmatprep.mubr.msk.f32.mxu0 %vm312_vm1, %v29929_v20 }
 0x5f3   : > { %v14992_v43 = vpop.f32.mrf.mxu0  ;;  %v15069_v13 = vpop.f32.mrf.mxu1  ;;  %18816 = vmatprep.mubr.f32.mxu1 %v32196_v30 }
 0x5f4   : > { %v14993_v59 = vadd.f32 %v14992_v43, %v29910_v56  ;;  %v15070_v31 = vadd.f32 %v15069_v13, %v14680_v53  ;;  %v25600_v56 = vld [vmem:[%s31800_s3 + $0xa8] sm:$0xff] }
 0x5f5   : > { %v30026_v48 = vpop.f32.mrf.mxu0  ;;  %v30028_v23 = vpop.f32.mrf.mxu1  ;;  %26080 = vmatmul.mubr.msk.f32.vlgmr.msra.gmra.mxu0 %vm312_vm1, %v25588_v25 }
 0x5f6   : > { %25601 = vmatmul.mubr.msk.f32.vlgmr.msra.gmra.mxu1 %vm312_vm1, %v25599_v49  ;;  %18860 = vmatpush1.msra.mxu0 %v29030_v19 }
 0x5f7   : > { %18937 = vmatpush1.msra.mxu1 %v29040_v50  ;;  %19013 = vmatprep.subr.mxu0 %v29061_v22  ;;  %v14998_v20 = vpop.f32.mrf.mxu0 }
 0x5f8   : > { %26082 = vmatprep.subr.mxu1 %v29063_v8  ;;  %v14999_v53 = vadd.f32 %v14998_v20, %v29936_v44  ;;  %v15075_v43 = vpop.f32.mrf.mxu1  ;;  %18822 = vmatprep.mubr.f32.mxu1 %v32196_v30 }
 0x5f9   : > { %v15076_v25 = vadd.f32 %v15075_v43, %v29957_v38  ;;  %18893 = vmatprep.mubr.f32.mxu0 %v32196_v30  ;;  %v30043_v13 = vpop.f32.mrf.mxu0 }
 0x5fa   : > { %32283 = vst [vmem:[#allocation93_spill] sm:$0xff] %v30043_v13  ;;  %v30045_v47 = vpop.f32.mrf.mxu1  ;;  %25602 = vmatmul.mubr.msk.f32.gmra.mxu1 %vm312_vm1, %v25600_v56  ;;  %25603 = vmatmul.mubr.msk.f32.vlgmr.msra.gmra.mxu0 %vm312_vm1, %v25599_v49 }
 0x5fb   : > { %19014 = vmatpush1.msra.mxu0 %v29052_v36  ;;  %v26041_v22 = vpop.f32.mrf.mxu0  ;;  %18899 = vmatprep.mubr.f32.mxu0 %v32196_v30 }
 0x5fc   : > { %19197 = vmatprep.subr.mxu0 %v29207_v17  ;;  %v15152_v44 = vadd.f32 %v26041_v22, %v29959_v45  ;;  %v15268_v38 = vpop.f32.mrf.mxu1  ;;  %18970 = vmatprep.mubr.f32.mxu1 %v32196_v30 }
 0x5fd   : > { %v15585_v20 = vadd.f32 %v15268_v38, %v14839_v7  ;;  %v30054_v43 = vpop.f32.mrf.mxu0 }
 0x5fe   : > { %32284 = vst [vmem:[#allocation94_spill] sm:$0xff] %v30054_v43  ;;  %v30056_v50 = vpop.f32.mrf.mxu1  ;;  %25604 = vmatmul.mubr.msk.f32.gmra.mxu0 %vm312_vm1, %v25600_v56  ;;  %25605 = vmatmul.mubr.msk.f32.vlgmr.msra.gmra.mxu1 %vm312_vm1, %v25599_v49 }
 0x5ff   : > { %26083 = vmatpush3.msra.mxu1 %v29063_v8  ;;  %v15345_v29 = vpop.f32.mrf.mxu0  ;;  %18976 = vmatprep.mubr.f32.mxu1 %v32196_v30 }
 0x600   : > { %19274 = vmatprep.subr.mxu1 %v29221_v0  ;;  %v15274_v22 = vpop.f32.mrf.mxu1  ;;  %v15587_v45 = vadd.f32 %v15345_v29, %v29991_v5  ;;  %19047 = vmatprep.mubr.f32.mxu0 %v32196_v30 }
 0x601   : > { %v15594_v7 = vadd.f32 %v15274_v22, %v14845_v46  ;;  %v30065_v38 = vpop.f32.mrf.mxu0 }
 0x602   : > { %32285 = vst [vmem:[#allocation95_spill] sm:$0xff] %v30065_v38  ;;  %v30067_v43 = vpop.f32.mrf.mxu1  ;;  %25606 = vmatmul.mubr.msk.f32.gmra.mxu1 %vm312_vm1, %v25600_v56  ;;  %25607 = vmatmul.mubr.msk.f32.vlgmr.msra.gmra.mxu0 %vm312_vm1, %v25599_v49 }
 0x603   : > { %32286 = vst [vmem:[#allocation96_spill] sm:$0xff] %v30067_v43  ;;  %19198 = vmatpush1.msra.mxu0 %v29168_v41  ;;  %v15351_v17 = vpop.f32.mrf.mxu0  ;;  %19053 = vmatprep.mubr.f32.mxu0 %v32196_v30 }
 0x604   : > { %19351 = vmatprep.subr.mxu0 %v29242_v3  ;;  %v15596_v8 = vadd.f32 %v15351_v17, %v14922_v57  ;;  %v15422_v5 = vpop.f32.mrf.mxu1  ;;  %26084 = vmatprep.mubr.msk.f32.mxu1 %vm312_vm1, %v25599_v49  ;;  %v25611_v17 = vld [vmem:[%s31800_s3 + $0xb0] sm:$0xff] }
 0x605   : > { %v15589_v29 = vadd.f32 %v15422_v5, %v14993_v59  ;;  %v30075_v46 = vpop.f32.mrf.mxu0 }
 0x606   : > { %32287 = vst [vmem:[#allocation97_spill] sm:$0xff] %v30075_v46  ;;  %v30077_v22 = vpop.f32.mrf.mxu1  ;;  %25608 = vmatmul.mubr.msk.f32.gmra.mxu0 %vm312_vm1, %v25600_v56  ;;  %26085 = vmatmul.mubr.msk.f32.vlgmr.msra.gmra.mxu1 %vm312_vm1, %v25600_v56 }
 0x607   : > { %32288 = vst [vmem:[#allocation98_spill] sm:$0xff] %v30077_v22  ;;  %19275 = vmatpush1.msra.mxu1 %v29198_v18  ;;  %v15499_v41 = vpop.f32.mrf.mxu0  ;;  %19231 = vmatprep.mubr.f32.mxu0 %v32196_v30 }
 0x608   : > { %19428 = vmatprep.subr.mxu1 %v29233_v58  ;;  %v15428_v57 = vpop.f32.mrf.mxu1  ;;  %v15591_v49 = vadd.f32 %v15499_v41, %v15070_v31  ;;  %19308 = vmatprep.mubr.f32.mxu1 %v32196_v30  ;;  %v30099_v31 = vld [vmem:[%s31800_s3 + $0xb8] sm:$0xff] }
 0x609   : > { %v15598_v59 = vadd.f32 %v15428_v57, %v14999_v53  ;;  %v30088_v5 = vpop.f32.mrf.mxu0 }
 0x60a   : > { %v30090_v46 = vpop.f32.mrf.mxu1  ;;  %25613 = vmatmul.mubr.msk.f32.vlgmr.msra.gmra.mxu0 %vm312_vm1, %v25611_v17  ;;  %25615 = vmatmul.mubr.msk.f32.vlgmr.msra.gmra.mxu1 %vm312_vm1, %v25611_v17 }
 0x60b   : > { %32289 = vst [vmem:[#allocation99_spill] sm:$0xff] %v30090_v46  ;;  %19352 = vmatpush1.msra.mxu0 %v29212_v2  ;;  %19429 = vmatpush1.msra.mxu1 %v29229_v51  ;;  %v15505_v56 = vpop.f32.mrf.mxu0 }
 0x60c   : > { %19611 = vmatprep.subr.mxu1 %v29357_v54  ;;  %v15600_v53 = vadd.f32 %v15505_v56, %v15076_v25  ;;  %v26046_v41 = vpop.f32.mrf.mxu1  ;;  %19237 = vmatprep.mubr.f32.mxu0 %v32196_v30 }
 0x60d   : > { %v15602_v57 = vadd.f32 %v26046_v41, %v15152_v44  ;;  %19314 = vmatprep.mubr.f32.mxu1 %v32196_v30  ;;  %v30104_v38 = vpop.f32.mrf.mxu0 }
 0x60e   : > { %v30106_v3 = vpop.f32.mrf.mxu1  ;;  %25614 = vmatmul.mubr.msk.f32.gmra.mxu0 %vm312_vm1, %v30099_v31  ;;  %25616 = vmatmul.mubr.msk.f32.gmra.mxu1 %vm312_vm1, %v30099_v31 }
 0x60f   : > { %32290 = vst [vmem:[#allocation100_spill] sm:$0xff] %v30106_v3  ;;  %v15717_v51 = vpop.f32.mrf.mxu0  ;;  %19385 = vmatprep.mubr.f32.mxu0 %v32196_v30  ;;  %19462 = vmatprep.mubr.f32.mxu1 %v32196_v30 }
 0x610   : > { %v16034_v25 = vadd.f32 %v15717_v51, %v15585_v20  ;;  %v15794_v56 = vpop.f32.mrf.mxu1 }
 0x611   : > { %v16036_v44 = vadd.f32 %v15794_v56, %v15587_v45  ;;  %v30114_v41 = vpop.f32.mrf.mxu0 }
 0x612   : > { %32291 = vst [vmem:[#allocation101_spill] sm:$0xff] %v30114_v41  ;;  %v30116_v54 = vpop.f32.mrf.mxu1  ;;  %25617 = vmatmul.mubr.msk.f32.vlgmr.msra.gmra.mxu0 %vm312_vm1, %v25611_v17  ;;  %25619 = vmatmul.mubr.msk.f32.vlgmr.msra.gmra.mxu1 %vm312_vm1, %v25611_v17 }
 0x613   : > { %32292 = vst [vmem:[#allocation102_spill] sm:$0xff] %v30116_v54  ;;  %19612 = vmatpush1.msra.mxu1 %v29290_v61  ;;  %v15723_v3 = vpop.f32.mrf.mxu0  ;;  %19391 = vmatprep.mubr.f32.mxu0 %v32196_v30 }
 0x614   : > { %19765 = vmatprep.subr.mxu1 %v29398_v32  ;;  %v16043_v18 = vadd.f32 %v15723_v3, %v15594_v7  ;;  %v15800_v58 = vpop.f32.mrf.mxu1  ;;  %19468 = vmatprep.mubr.f32.mxu1 %v32196_v30  ;;  %v30136_v3 = vld [vmem:[%s31800_s3 + $0xc0] sm:$0xff]  ;;  %v30150_v32 = vld [vmem:[%s31800_s3 + $0xc8] sm:$0xff] }
 0x615   : > { %v16045_v51 = vadd.f32 %v15800_v58, %v15596_v8  ;;  %v30124_v20 = vpop.f32.mrf.mxu0 }
 0x616   : > { %32293 = vst [vmem:[#allocation103_spill] sm:$0xff] %v30124_v20  ;;  %v30126_v45 = vpop.f32.mrf.mxu1  ;;  %25618 = vmatmul.mubr.msk.f32.gmra.mxu0 %vm312_vm1, %v30099_v31  ;;  %25620 = vmatmul.mubr.msk.f32.gmra.mxu1 %vm312_vm1, %v30099_v31 }
 0x617   : > { %32294 = vst [vmem:[#allocation104_spill] sm:$0xff] %v30126_v45  ;;  %v15871_v61 = vpop.f32.mrf.mxu0  ;;  %19645 = vmatprep.mubr.f32.mxu1 %v32196_v30  ;;  %26089 = vmatprep.mubr.msk.f32.mxu0 %vm312_vm1, %v25611_v17 }
 0x618   : > { %v16038_v8 = vadd.f32 %v15871_v61, %v15589_v29  ;;  %v15948_v58 = vpop.f32.mrf.mxu1 }
 0x619   : > { %v16040_v7 = vadd.f32 %v15948_v58, %v15591_v49  ;;  %v30139_v56 = vpop.f32.mrf.mxu0 }
 0x61a   : > { %32295 = vst [vmem:[#allocation105_spill] sm:$0xff] %v30139_v56  ;;  %v30141_v45 = vpop.f32.mrf.mxu1  ;;  %25625 = vmatmul.mubr.msk.f32.vlgmr.msra.gmra.mxu1 %vm312_vm1, %v30136_v3 }
 0x61b   : > { %19766 = vmatpush1.msra.mxu1 %v29334_v40  ;;  %v15877_v54 = vpop.f32.mrf.mxu0  ;;  %19651 = vmatprep.mubr.f32.mxu1 %v32196_v30 }
 0x61c   : > { %v16047_v29 = vadd.f32 %v15877_v54, %v15598_v59  ;;  %v15954_v17 = vpop.f32.mrf.mxu1 }
 0x61d   : > { %v16049_v49 = vadd.f32 %v15954_v17, %v15600_v53  ;;  %v30152_v61 = vpop.f32.mrf.mxu0 }
 0x61e   : > { %32296 = vst [vmem:[#allocation106_spill] sm:$0xff] %v30152_v61  ;;  %v30154_v58 = vpop.f32.mrf.mxu1  ;;  %25626 = vmatmul.mubr.msk.f32.gmra.mxu1 %vm312_vm1, %v30150_v32 }
 0x61f   : > { %v26051_v0 = vpop.f32.mrf.mxu0  ;;  %19799 = vmatprep.mubr.f32.mxu1 %v32196_v30 }
 0x620   : > { %v16051_v40 = vadd.f32 %v26051_v0, %v15602_v57  ;;  %v16166_v2 = vpop.f32.mrf.mxu1 }
 0x621   : > { %v16483_v34 = vadd.f32 %v16166_v2, %v16034_v25  ;;  %v30159_v56 = vpop.f32.mrf.mxu0 }
 0x622   : > { %32297 = vst [vmem:[#allocation107_spill] sm:$0xff] %v30159_v56  ;;  %v30161_v46 = vpop.f32.mrf.mxu1  ;;  %25629 = vmatmul.mubr.msk.f32.vlgmr.msra.gmra.mxu1 %vm312_vm1, %v30136_v3 }
 0x623   : > { %32298 = vst [vmem:[#allocation108_spill] sm:$0xff] %v30161_v46  ;;  %v16243_v54 = vpop.f32.mrf.mxu0  ;;  %19805 = vmatprep.mubr.f32.mxu1 %v32196_v30 }
 0x624   : > { %v16172_v59 = vpop.f32.mrf.mxu1  ;;  %v16485_v53 = vadd.f32 %v16243_v54, %v16036_v44 }
 0x625   : > { %v16492_v17 = vadd.f32 %v16172_v59, %v16043_v18  ;;  %v30166_v61 = vpop.f32.mrf.mxu0 }
 0x626   : > { %32299 = vst [vmem:[#allocation109_spill] sm:$0xff] %v30166_v61  ;;  %v30168_v20 = vpop.f32.mrf.mxu1  ;;  %25630 = vmatmul.mubr.msk.f32.gmra.mxu1 %vm312_vm1, %v30150_v32 }
 0x627   : > { %32300 = vst [vmem:[#allocation110_spill] sm:$0xff] %v30168_v20  ;;  %v16249_v2 = vpop.f32.mrf.mxu0  ;;  %26094 = vmatprep.mubr.msk.f32.mxu1 %vm312_vm1, %v30136_v3 }
 0x628   : > { %v16494_v0 = vadd.f32 %v16249_v2, %v16045_v51  ;;  %v16320_v57 = vpop.f32.mrf.mxu1 }
 0x629   : > { %v16487_v25 = vadd.f32 %v16320_v57, %v16038_v8  ;;  %v30174_v56 = vpop.f32.mrf.mxu0 }
 0x62a   : > { %32301 = vst [vmem:[#allocation111_spill] sm:$0xff] %v30174_v56  ;;  %v30176_v46 = vpop.f32.mrf.mxu1 }
 0x62b   : > { %32302 = vst [vmem:[#allocation112_spill] sm:$0xff] %v30176_v46  ;;  %v16397_v44 = vpop.f32.mrf.mxu0 }
 0x62c   : > { %v16326_v18 = vpop.f32.mrf.mxu1  ;;  %v16489_v54 = vadd.f32 %v16397_v44, %v16040_v7 }
 0x62d   : > { %v16496_v59 = vadd.f32 %v16326_v18, %v16047_v29  ;;  %v30178_v61 = vpop.f32.mrf.mxu0 }
 0x62e   : > { %v30180_v20 = vpop.f32.mrf.mxu1 }
 0x62f   : > { %32303 = vst [vmem:[#allocation113_spill] sm:$0xff] %v30180_v20  ;;  %v16403_v22 = vpop.f32.mrf.mxu0 }
 0x630   : > { %v16498_v13 = vadd.f32 %v16403_v22, %v16049_v49  ;;  %v26056_v36 = vpop.f32.mrf.mxu1 }
 0x631   : > { %v16500_v11 = vadd.f32 %v26056_v36, %v16051_v40  ;;  %v30182_v41 = vpop.f32.mrf.mxu0 }
 0x632   : > { %32304 = vst [vmem:[#allocation114_spill] sm:$0xff] %v30182_v41  ;;  %v30184_v51 = vpop.f32.mrf.mxu1 }
 0x633   : > { %32305 = vst [vmem:[#allocation115_spill] sm:$0xff] %v30184_v51  ;;  %v16614_v8 = vpop.f32.mrf.mxu0 }
 0x634   : > { %v16931_v2 = vadd.f32 %v16614_v8, %v16483_v34  ;;  %v16691_v57 = vpop.f32.mrf.mxu1 }
 0x635   : > { %v16933_v56 = vadd.f32 %v16691_v57, %v16485_v53  ;;  %v30186_v46 = vpop.f32.mrf.mxu0 }
 0x636   : > { %32306 = vst [vmem:[#allocation116_spill] sm:$0xff] %v30186_v46  ;;  %v30188_v7 = vpop.f32.mrf.mxu1 }
 0x637   : > { %32307 = vst [vmem:[#allocation117_spill] sm:$0xff] %v30188_v7  ;;  %v16620_v29 = vpop.f32.mrf.mxu0 }
 0x638   : > { %v16940_v44 = vadd.f32 %v16620_v29, %v16492_v17  ;;  %v16697_v18 = vpop.f32.mrf.mxu1 }
 0x639   : > { %v16942_v20 = vadd.f32 %v16697_v18, %v16494_v0  ;;  %v30190_v43 = vpop.f32.mrf.mxu0 }
 0x63a   : > { %v30192_v22 = vpop.f32.mrf.mxu1 }
 0x63b   : > { %32308 = vst [vmem:[#allocation118_spill] sm:$0xff] %v30192_v22  ;;  %v16768_v36 = vpop.f32.mrf.mxu0 }
 0x63c   : > { %v16935_v40 = vadd.f32 %v16768_v36, %v16487_v25  ;;  %v16845_v49 = vpop.f32.mrf.mxu1 }
 0x63d   : > { %v16937_v51 = vadd.f32 %v16845_v49, %v16489_v54  ;;  %v30194_v41 = vpop.f32.mrf.mxu0 }
 0x63e   : > { %v30196_v34 = vpop.f32.mrf.mxu1 }
 0x63f   : > { %v16774_v53 = vpop.f32.mrf.mxu0 }
 0x640   : > { %v16944_v8 = vadd.f32 %v16774_v53, %v16496_v59  ;;  %v16851_v57 = vpop.f32.mrf.mxu1 }
 0x641   : > { %v16946_v7 = vadd.f32 %v16851_v57, %v16498_v13  ;;  %v30198_v46 = vpop.f32.mrf.mxu0 }
 0x642   : > { %v30200_v17 = vpop.f32.mrf.mxu1 }
 0x643   : > { %v26061_v0 = vpop.f32.mrf.mxu0 }
 0x644   : > { %v16948_v29 = vadd.f32 %v26061_v0, %v16500_v11  ;;  %v17062_v18 = vpop.f32.mrf.mxu1 }
 0x645   : > { %v30202_v22 = vadd.f32 %v17062_v18, %v16931_v2  ;;  %v30204_v25 = vpop.f32.mrf.mxu0  ;;  %v30206_v54 = vpop.permute.xlu0 %19157 }
 0x646   : > { %32309 = vst [vmem:[#allocation119_spill] sm:$0xff] %v30204_v25  ;;  %32310 = vst [vmem:[#allocation120_spill] sm:$0xff] %v30206_v54  ;;  %v30208_v36 = vpop.f32.mrf.mxu1  ;;  %v30210_v49 = vpop.permute.xlu1 %19571  ;;  %v30215_v13 = vsel %vm1341_vm3, %v29224_v24, %v30206_v54  ;;  %v32359_v25 = vld [vmem:[#allocation5_spill] sm:$0xff] }
 0x647   : > { %32311 = vst [vmem:[#allocation121_spill] sm:$0xff] %v30210_v49  ;;  %32312 = vst [vmem:[#allocation122_spill] sm:$0xff] %v30215_v13  ;;  %v17139_v59 = vpop.f32.mrf.mxu0  ;;  %26087 = vmatprep.subr.mxu0 %v30215_v13  ;;  %v30221_v11 = vsel %vm2479_vm5, %v29379_v39, %v30210_v49  ;;  %v32361_v54 = vld [vmem:[#allocation17_spill] sm:$0xff] }
 0x648   : > { %32313 = vst [vmem:[#allocation123_spill] sm:$0xff] %v30221_v11  ;;  %v17068_v2 = vpop.f32.mrf.mxu1  ;;  %v17381_v53 = vadd.f32 %v17139_v59, %v16933_v56  ;;  %26092 = vmatprep.subr.mxu1 %v30221_v11  ;;  %26088 = vmatpush3.msra.mxu0 %v30215_v13  ;;  %v32371_v13 = vld [vmem:[#allocation37_spill] sm:$0xff] }
 0x649   : > { %v30225_v57 = vadd.f32 %v17068_v2, %v16940_v44  ;;  %v30227_v0 = vpop.f32.mrf.mxu0  ;;  %26093 = vmatpush3.msra.mxu1 %v30221_v11  ;;  %26090 = vmatmul.mubr.msk.f32.vlgmr.msra.gmra.mxu0 %vm312_vm1, %v30099_v31  ;;  %v30246_v31 = vld [vmem:[%s31800_s3 + $0xd0] sm:$0xff] }
 0x64a   : > { %32314 = vst [vmem:[#allocation124_spill] sm:$0xff] %v30227_v0  ;;  %v30232_v24 = vpop.f32.mrf.mxu1  ;;  %19688 = vmatprep.subr.mxu0 %v29368_v26  ;;  %26095 = vmatmul.mubr.msk.f32.vlgmr.msra.gmra.mxu1 %vm312_vm1, %v30150_v32  ;;  %v30237_v39 = vpop.permute.xlu1 %20399 }
 0x64b   : > { %32315 = vst [vmem:[#allocation125_spill] sm:$0xff] %v30237_v39  ;;  %v17145_v56 = vpop.f32.mrf.mxu0  ;;  %20102 = vmatprep.subr.mxu1 %v29460_v14  ;;  %19689 = vmatpush1.msra.mxu0 %v29329_v28 }
 0x64c   : > { %v17390_v44 = vadd.f32 %v17145_v56, %v16942_v20  ;;  %v17216_v18 = vpop.f32.mrf.mxu1  ;;  %20103 = vmatpush1.msra.mxu1 %v29419_v63  ;;  %19842 = vmatprep.subr.mxu0 %v29388_v16 }
 0x64d   : > { %v30248_v59 = vadd.f32 %v17216_v18, %v16935_v40  ;;  %v30250_v2 = vpop.f32.mrf.mxu0  ;;  %20256 = vmatprep.subr.mxu1 %v29494_v21  ;;  %19722 = vmatprep.mubr.f32.mxu0 %v32196_v30 }
 0x64e   : > { %32316 = vst [vmem:[#allocation126_spill] sm:$0xff] %v30250_v2  ;;  %v30254_v0 = vpop.f32.mrf.mxu1  ;;  %20136 = vmatprep.mubr.f32.mxu1 %v32196_v30  ;;  %25627 = vmatmul.mubr.msk.f32.vlgmr.msra.gmra.mxu0 %vm312_vm1, %v30136_v3  ;;  %v30262_v40 = vpop.permute.xlu1 %21227  ;;  %v30269_v2 = vld [vmem:[%s31800_s3 + $0xd8] sm:$0xff] }
 0x64f   : > { %v17293_v20 = vpop.f32.mrf.mxu0  ;;  %19843 = vmatpush1.msra.mxu0 %v29384_v42  ;;  %25639 = vmatmul.mubr.msk.f32.vlgmr.msra.gmra.mxu1 %vm312_vm1, %v30246_v31 }
 0x650   : > { %v17222_v56 = vpop.f32.mrf.mxu1  ;;  %v17385_v18 = vadd.f32 %v17293_v20, %v16937_v51  ;;  %20257 = vmatpush1.msra.mxu1 %v29470_v10  ;;  %20025 = vmatprep.subr.mxu0 %v29446_v52 }
 0x651   : > { %v30271_v63 = vadd.f32 %v17222_v56, %v16944_v8  ;;  %20439 = vmatprep.subr.mxu1 %v29544_v9  ;;  %v30274_v21 = vpop.f32.mrf.mxu0  ;;  %19728 = vmatprep.mubr.f32.mxu0 %v32196_v30 }
 0x652   : > { %v30277_v16 = vpop.f32.mrf.mxu1  ;;  %20142 = vmatprep.mubr.f32.mxu1 %v32196_v30  ;;  %25628 = vmatmul.mubr.msk.f32.gmra.mxu0 %vm312_vm1, %v30150_v32  ;;  %v14287_v56 = vpop.permute.xlu1 %14286 }
 0x653   : > { %v17299_v51 = vpop.f32.mrf.mxu0  ;;  %25640 = vmatmul.mubr.msk.f32.gmra.mxu1 %vm312_vm1, %v30269_v2  ;;  %19876 = vmatprep.mubr.f32.mxu0 %v32196_v30  ;;  %v14299_v9 = vsel %vm3048_vm6, %v29852_v35, %v14287_v56 }
 0x654   : > { %v30285_v8 = vadd.f32 %v17299_v51, %v16946_v7  ;;  %v26066_v20 = vpop.f32.mrf.mxu1  ;;  %20290 = vmatprep.mubr.f32.mxu1 %v32196_v30  ;;  %v14323_v11 = vmax.f32 %v29519_v15, %v14299_v9 }
 0x655   : > { %v30288_v10 = vadd.f32 %v26066_v20, %v16948_v29  ;;  %v30292_v52 = vpop.f32.mrf.mxu0  ;;  %v30329_v20 = vld [vmem:[%s31800_s3 + $0xe0] sm:$0xff] }
 0x656   : > { %v30295_v14 = vpop.f32.mrf.mxu1  ;;  %25631 = vmatmul.mubr.msk.f32.vlgmr.msra.gmra.mxu0 %vm312_vm1, %v30136_v3  ;;  %23708 = vrot.lane.b32.xlu1 %v14323_v11, %s26247_s27 }
 0x657   : > { %32317 = vst [vmem:[#allocation127_spill] sm:$0xff] %v30295_v14  ;;  %v17510_v7 = vpop.f32.mrf.mxu0  ;;  %20026 = vmatpush1.msra.mxu0 %v29412_v6  ;;  %25643 = vmatmul.mubr.msk.f32.vlgmr.msra.gmra.mxu1 %vm312_vm1, %v30246_v31  ;;  %v32328_v14 = vld [vmem:[#allocation86_spill] sm:$0xff] }
 0x658   : > { %v17827_v29 = vadd.f32 %v17510_v7, %v30202_v22  ;;  %v17587_v51 = vpop.f32.mrf.mxu1  ;;  %20440 = vmatpush1.msra.mxu1 %v29490_v27  ;;  %23294 = vrot.lane.b32.xlu0 %v14323_v11, %s26245_s25 }
 0x659   : > { %v30305_v35 = vadd.f32 %v17587_v51, %v17381_v53  ;;  %20179 = vmatprep.subr.mxu0 %v29477_v12  ;;  %v30309_v15 = vpop.f32.mrf.mxu0  ;;  %20593 = vmatprep.subr.mxu1 %v29581_v60  ;;  %v32324_v12 = vld [vmem:[#allocation77_spill] sm:$0xff] }
 0x65a   : > { %v30312_v6 = vpop.f32.mrf.mxu1  ;;  %19882 = vmatprep.mubr.f32.mxu0 %v32196_v30  ;;  %20296 = vmatprep.mubr.f32.mxu1 %v32196_v30 }
 0x65b   : > { %32318 = vst [vmem:[#allocation128_spill] sm:$0xff] %v30312_v6  ;;  %v17516_v9 = vpop.f32.mrf.mxu0  ;;  %25632 = vmatmul.mubr.msk.f32.gmra.mxu0 %vm312_vm1, %v30150_v32  ;;  %25644 = vmatmul.mubr.msk.f32.gmra.mxu1 %vm312_vm1, %v30269_v2  ;;  %v30331_v32 = vpop.permute.xlu0 %19985  ;;  %v32327_v6 = vld [vmem:[#allocation76_spill] sm:$0xff] }
 0x65c   : > { %v17836_v27 = vadd.f32 %v17516_v9, %v30225_v57  ;;  %v17593_v3 = vpop.f32.mrf.mxu1  ;;  %24536 = vrot.lane.b32.xlu1 %v14323_v11, %s26266_s7  ;;  %24122 = vrot.lane.b32.xlu0 %v14323_v11, %s26265_s6  ;;  %32319 = vst [vmem:[#allocation129_spill] sm:$0xff] %v30331_v32  ;;  %v32321_v9 = vld [vmem:[#allocation73_spill] sm:$0xff] }
 0x65d   : > { %v17838_v22 = vadd.f32 %v17593_v3, %v17390_v44  ;;  %v30323_v53 = vpop.f32.mrf.mxu0  ;;  %20059 = vmatprep.mubr.f32.mxu0 %v32196_v30  ;;  %20473 = vmatprep.mubr.f32.mxu1 %v32196_v30  ;;  %v24948_v44 = vld [vmem:[%s31801_s4 + $0x8] sm:$0xff] }
 0x65e   : > { %v30333_v57 = vpop.f32.mrf.mxu1  ;;  %v32322_v3 = vld [vmem:[#allocation71_spill] sm:$0xff] }
 0x65f   : > { %32320 = vst [vmem:[#allocation130_spill] sm:$0xff] %v30333_v57  ;;  %v17664_v11 = vpop.f32.mrf.mxu0  ;;  %25637 = vmatmul.mubr.msk.f32.vlgmr.msra.gmra.mxu0 %vm312_vm1, %v30246_v31  ;;  %25649 = vmatmul.mubr.msk.f32.vlgmr.msra.gmra.mxu1 %vm312_vm1, %v30329_v20  ;;  %v30351_v60 = vsel %vm15626_vm2, %v32322_v3, %v30331_v32 }
 0x660   : > { %v17831_v56 = vadd.f32 %v17664_v11, %v30248_v59  ;;  %v17741_v7 = vpop.f32.mrf.mxu1  ;;  %20180 = vmatpush1.msra.mxu0 %v29430_v1  ;;  %20594 = vmatpush1.msra.mxu1 %v32321_v9  ;;  %32323 = vst [vmem:[#allocation71_spill] sm:$0xff] %v30351_v60  ;;  %v30356_v59 = vsel %vm16075_vm4, %v32324_v12, %v30237_v39  ;;  %v32360_v1 = vld [vmem:[#allocation9_spill] sm:$0xff] }
 0x661   : > { %v30345_v51 = vadd.f32 %v17741_v7, %v17385_v18  ;;  %24956 = vperm.xlu1 %26192, %v24948_v44   ;;  %32325 = vst [vmem:[#allocation77_spill] sm:$0xff] %v30356_v59  ;;  %v30358_v11 = vpop.f32.mrf.mxu0  ;;  %v30363_v18 = vld [vmem:[%s31800_s3 + $0xe8] sm:$0xff]  ;;  %26097 = vmatprep.subr.mxu0 %v30351_v60 }
 0x662   : > { %26102 = vmatprep.subr.mxu1 %v30356_v59  ;;  %v30367_v44 = vpop.f32.mrf.mxu1  ;;  %20065 = vmatprep.mubr.f32.mxu0 %v32196_v30 }
 0x663   : > { %20479 = vmatprep.mubr.f32.mxu1 %v32196_v30  ;;  %v17670_v7 = vpop.f32.mrf.mxu0  ;;  %25638 = vmatmul.mubr.msk.f32.gmra.mxu0 %vm312_vm1, %v30269_v2 }
 0x664   : > { %v17840_v12 = vadd.f32 %v17670_v7, %v30271_v63  ;;  %v17747_v3 = vpop.f32.mrf.mxu1  ;;  %25650 = vmatmul.mubr.msk.f32.gmra.mxu1 %vm312_vm1, %v30363_v18  ;;  %20213 = vmatprep.mubr.f32.mxu0 %v32196_v30 }
 0x665   : > { %v30377_v9 = vadd.f32 %v17747_v3, %v30285_v8  ;;  %v30379_v39 = vpop.f32.mrf.mxu0  ;;  %20627 = vmatprep.mubr.f32.mxu1 %v32196_v30 }
 0x666   : > { %v30383_v32 = vpop.f32.mrf.mxu1 }
 0x667   : > { %v26071_v57 = vpop.f32.mrf.mxu0  ;;  %25641 = vmatmul.mubr.msk.f32.vlgmr.msra.gmra.mxu0 %vm312_vm1, %v30246_v31 }
 0x668   : > { %v30386_v63 = vadd.f32 %v26071_v57, %v30288_v10  ;;  %v17959_v7 = vpop.f32.mrf.mxu1  ;;  %25653 = vmatmul.mubr.msk.f32.vlgmr.msra.gmra.mxu1 %vm312_vm1, %v30329_v20  ;;  %26098 = vmatpush3.msra.mxu0 %v30351_v60  ;;  %v30488_v60 = vld [vmem:[%s31800_s3 + $0x108] sm:$0xff] }
 0x669   : > { %v30392_v8 = vadd.f32 %v17959_v7, %v17827_v29  ;;  %26103 = vmatpush3.msra.mxu1 %v30356_v59  ;;  %v30396_v3 = vpop.f32.mrf.mxu0  ;;  %20516 = vmatprep.subr.mxu0 %v32327_v6 }
 0x66a   : > { %32326 = vst [vmem:[#allocation131_spill] sm:$0xff] %v30396_v3  ;;  %20930 = vmatprep.subr.mxu1 %v32328_v14  ;;  %v30400_v10 = vpop.f32.mrf.mxu1  ;;  %20219 = vmatprep.mubr.f32.mxu0 %v32196_v30  ;;  %v32332_v3 = vld [vmem:[#allocation78_spill] sm:$0xff] }
 0x66b   : > { %20633 = vmatprep.mubr.f32.mxu1 %v32196_v30  ;;  %v18036_v57 = vpop.f32.mrf.mxu0  ;;  %25642 = vmatmul.mubr.msk.f32.gmra.mxu0 %vm312_vm1, %v30269_v2 }
 0x66c   : > { %v17965_v26 = vpop.f32.mrf.mxu1  ;;  %v30405_v29 = vadd.f32 %v18036_v57, %v30305_v35  ;;  %25654 = vmatmul.mubr.msk.f32.gmra.mxu1 %vm312_vm1, %v30363_v18  ;;  %26099 = vmatprep.mubr.msk.f32.mxu0 %vm312_vm1, %v30246_v31  ;;  %v32331_v31 = vld [vmem:[#allocation82_spill] sm:$0xff] }
 0x66d   : > { %v30411_v7 = vadd.f32 %v17965_v26, %v17836_v27  ;;  %v30413_v14 = vpop.f32.mrf.mxu0  ;;  %26104 = vmatprep.mubr.msk.f32.mxu1 %vm312_vm1, %v30329_v20  ;;  %v32330_v27 = vld [vmem:[#allocation74_spill] sm:$0xff] }
 0x66e   : > { %32329 = vst [vmem:[#allocation86_spill] sm:$0xff] %v30413_v14  ;;  %v30419_v59 = vpop.f32.mrf.mxu1  ;;  %v25659_v14 = vld [vmem:[%s31800_s3 + $0xf0] sm:$0xff] }
 0x66f   : > { %v18042_v35 = vpop.f32.mrf.mxu0  ;;  %26100 = vmatmul.mubr.msk.f32.vlgmr.msra.gmra.mxu0 %vm312_vm1, %v30269_v2 }
 0x670   : > { %v30421_v57 = vadd.f32 %v18042_v35, %v17838_v22  ;;  %v18113_v6 = vpop.f32.mrf.mxu1  ;;  %26105 = vmatmul.mubr.msk.f32.vlgmr.msra.gmra.mxu1 %vm312_vm1, %v30363_v18  ;;  %20517 = vmatpush1.msra.mxu0 %v32330_v27  ;;  %v32333_v22 = vld [vmem:[#allocation11_spill] sm:$0xff]  ;;  %v32337_v27 = vld [vmem:[#allocation21_spill] sm:$0xff] }
 0x671   : > { %v30427_v26 = vadd.f32 %v18113_v6, %v17831_v56  ;;  %20931 = vmatpush1.msra.mxu1 %v32331_v31  ;;  %20670 = vmatprep.subr.mxu0 %v32332_v3  ;;  %v32334_v56 = vld [vmem:[#allocation79_spill] sm:$0xff]  ;;  %v32335_v31 = vld [vmem:[#allocation85_spill] sm:$0xff] }
 0x672   : > { %21084 = vmatprep.subr.mxu1 %v32333_v22  ;;  %v30436_v35 = vpop.f32.mrf.mxu1  ;;  %20550 = vmatprep.mubr.f32.mxu0 %v32196_v30  ;;  %v25660_v22 = vld [vmem:[%s31800_s3 + $0xf8] sm:$0xff]  ;;  %v32336_v3 = vld [vmem:[#allocation83_spill] sm:$0xff] }
 0x673   : > { %20964 = vmatprep.mubr.f32.mxu1 %v32196_v30  ;;  %25651 = vmatmul.mubr.msk.f32.vlgmr.msra.gmra.mxu0 %vm312_vm1, %v30329_v20 }
 0x674   : > { %v18119_v2 = vpop.f32.mrf.mxu1  ;;  %25663 = vmatmul.mubr.msk.f32.vlgmr.msra.gmra.mxu1 %vm312_vm1, %v25659_v14  ;;  %20671 = vmatpush1.msra.mxu0 %v32334_v56 }
 0x675   : > { %v30443_v6 = vadd.f32 %v18119_v2, %v17840_v12  ;;  %21085 = vmatpush1.msra.mxu1 %v32335_v31  ;;  %20853 = vmatprep.subr.mxu0 %v32336_v3  ;;  %v32338_v12 = vld [vmem:[#allocation80_spill] sm:$0xff]  ;;  %v20814_v31 = vpop.permute.xlu0 %20813 }
 0x676   : > { %21267 = vmatprep.subr.mxu1 %v32337_v27  ;;  %20556 = vmatprep.mubr.f32.mxu0 %v32196_v30  ;;  %v32339_v3 = vld [vmem:[#allocation4_spill] sm:$0xff]  ;;  %v32340_v27 = vld [vmem:[#allocation87_spill] sm:$0xff] }
 0x677   : > { %20970 = vmatprep.mubr.f32.mxu1 %v32196_v30  ;;  %25652 = vmatmul.mubr.msk.f32.gmra.mxu0 %vm312_vm1, %v30363_v18  ;;  %v32341_v2 = vld [vmem:[#allocation12_spill] sm:$0xff] }
 0x678   : > { %25664 = vmatmul.mubr.msk.f32.gmra.mxu1 %vm312_vm1, %v25660_v22  ;;  %20704 = vmatprep.mubr.f32.mxu0 %v32196_v30 }
 0x679   : > { %21118 = vmatprep.mubr.f32.mxu1 %v32196_v30 }
 0x67b   : > { %25655 = vmatmul.mubr.msk.f32.vlgmr.msra.gmra.mxu0 %vm312_vm1, %v30329_v20  ;;  %v25671_v20 = vld [vmem:[%s31800_s3 + $0x100] sm:$0xff] }
 0x67c   : > { %25667 = vmatmul.mubr.msk.f32.vlgmr.msra.gmra.mxu1 %vm312_vm1, %v25659_v14  ;;  %20854 = vmatpush1.msra.mxu0 %v32338_v12  ;;  %v32342_v12 = vld [vmem:[#allocation81_spill] sm:$0xff] }
 0x67d   : > { %21268 = vmatpush1.msra.mxu1 %v32339_v3  ;;  %21007 = vmatprep.subr.mxu0 %v32340_v27  ;;  %v32343_v3 = vld [vmem:[#allocation6_spill] sm:$0xff] }
 0x67e   : > { %21421 = vmatprep.subr.mxu1 %v32341_v2  ;;  %20710 = vmatprep.mubr.f32.mxu0 %v32196_v30  ;;  %v32345_v2 = vld [vmem:[#allocation10_spill] sm:$0xff] }
 0x67f   : > { %21124 = vmatprep.mubr.f32.mxu1 %v32196_v30  ;;  %25656 = vmatmul.mubr.msk.f32.gmra.mxu0 %vm312_vm1, %v30363_v18  ;;  %v32344_v18 = vld [vmem:[#allocation2_spill] sm:$0xff]  ;;  %v21229_v56 = vsel %vm7031_vm13, %v32345_v2, %v30262_v40  ;;  %v32346_v40 = vld [vmem:[#allocation3_spill] sm:$0xff]  ;;  %v30530_v2 = vld [vmem:[%s31800_s3 + $0x118] sm:$0xff] }
 0x680   : > { %25668 = vmatmul.mubr.msk.f32.gmra.mxu1 %vm312_vm1, %v25660_v22  ;;  %20887 = vmatprep.mubr.f32.mxu0 %v32196_v30  ;;  %v20815_v27 = vsel %vm5893_vm11, %v32344_v18, %v20814_v31  ;;  %v32347_v31 = vld [vmem:[#allocation15_spill] sm:$0xff]  ;;  %v32350_v18 = vld [vmem:[#allocation16_spill] sm:$0xff] }
 0x681   : > { %21301 = vmatprep.mubr.f32.mxu1 %v32196_v30 }
 0x683   : > { %25661 = vmatmul.mubr.msk.f32.vlgmr.msra.gmra.mxu0 %vm312_vm1, %v25659_v14 }
 0x684   : > { %25673 = vmatmul.mubr.msk.f32.vlgmr.msra.gmra.mxu1 %vm312_vm1, %v25671_v20  ;;  %21008 = vmatpush1.msra.mxu0 %v32342_v12  ;;  %v32349_v12 = vld [vmem:[#allocation27_spill] sm:$0xff] }
 0x685   : > { %21422 = vmatpush1.msra.mxu1 %v32343_v3  ;;  %26107 = vmatprep.subr.mxu0 %v20815_v27  ;;  %v30516_v3 = vld [vmem:[%s31800_s3 + $0x110] sm:$0xff] }
 0x686   : > { %26112 = vmatprep.subr.mxu1 %v21229_v56  ;;  %20893 = vmatprep.mubr.f32.mxu0 %v32196_v30 }
 0x687   : > { %21307 = vmatprep.mubr.f32.mxu1 %v32196_v30  ;;  %25662 = vmatmul.mubr.msk.f32.gmra.mxu0 %vm312_vm1, %v25660_v22 }
 0x688   : > { %25674 = vmatmul.mubr.msk.f32.gmra.mxu1 %vm312_vm1, %v30488_v60  ;;  %21041 = vmatprep.mubr.f32.mxu0 %v32196_v30 }
 0x689   : > { %21455 = vmatprep.mubr.f32.mxu1 %v32196_v30 }
 0x68b   : > { %25665 = vmatmul.mubr.msk.f32.vlgmr.msra.gmra.mxu0 %vm312_vm1, %v25659_v14 }
 0x68c   : > { %25677 = vmatmul.mubr.msk.f32.vlgmr.msra.gmra.mxu1 %vm312_vm1, %v25671_v20  ;;  %26108 = vmatpush3.msra.mxu0 %v20815_v27  ;;  %v32351_v27 = vld [vmem:[#allocation14_spill] sm:$0xff] }
 0x68d   : > { %26113 = vmatpush3.msra.mxu1 %v21229_v56  ;;  %21344 = vmatprep.subr.mxu0 %v32346_v40  ;;  %v32348_v56 = vld [vmem:[#allocation7_spill] sm:$0xff]  ;;  %v32354_v40 = vld [vmem:[#allocation33_spill] sm:$0xff] }
 0x68e   : > { %21758 = vmatprep.subr.mxu1 %v32347_v31  ;;  %21047 = vmatprep.mubr.f32.mxu0 %v32196_v30  ;;  %v32355_v31 = vld [vmem:[#allocation18_spill] sm:$0xff] }
 0x68f   : > { %21461 = vmatprep.mubr.f32.mxu1 %v32196_v30  ;;  %25666 = vmatmul.mubr.msk.f32.gmra.mxu0 %vm312_vm1, %v25660_v22 }
 0x690   : > { %25678 = vmatmul.mubr.msk.f32.gmra.mxu1 %vm312_vm1, %v30488_v60  ;;  %26109 = vmatprep.mubr.msk.f32.mxu0 %vm312_vm1, %v25659_v14  ;;  %v32352_v14 = vld [vmem:[#allocation8_spill] sm:$0xff] }
 0x691   : > { %26114 = vmatprep.mubr.msk.f32.mxu1 %vm312_vm1, %v25671_v20 }
 0x693   : > { %26110 = vmatmul.mubr.msk.f32.vlgmr.msra.gmra.mxu0 %vm312_vm1, %v25660_v22  ;;  %v32353_v22 = vld [vmem:[#allocation13_spill] sm:$0xff] }
 0x694   : > { %26115 = vmatmul.mubr.msk.f32.vlgmr.msra.gmra.mxu1 %vm312_vm1, %v30488_v60  ;;  %21345 = vmatpush1.msra.mxu0 %v32348_v56  ;;  %v30534_v56 = vpop.f32.mrf.mxu0 }
 0x695   : > { %21759 = vmatpush1.msra.mxu1 %v32349_v12  ;;  %21498 = vmatprep.subr.mxu0 %v32350_v18  ;;  %32356 = vst [vmem:[#allocation82_spill] sm:$0xff] %v30534_v56  ;;  %v30536_v12 = vpop.f32.mrf.mxu1  ;;  %v21642_v56 = vpop.permute.xlu0 %21641 }
 0x696   : > { %21912 = vmatprep.subr.mxu1 %v32351_v27  ;;  %21378 = vmatprep.mubr.f32.mxu0 %v32196_v30  ;;  %32357 = vst [vmem:[#allocation11_spill] sm:$0xff] %v30536_v12 }
 0x697   : > { %21792 = vmatprep.mubr.f32.mxu1 %v32196_v30  ;;  %25675 = vmatmul.mubr.msk.f32.vlgmr.msra.gmra.mxu0 %vm312_vm1, %v25671_v20 }
 0x698   : > { %25687 = vmatmul.mubr.msk.f32.vlgmr.msra.gmra.mxu1 %vm312_vm1, %v30516_v3  ;;  %21499 = vmatpush1.msra.mxu0 %v32352_v14 }
 0x699   : > { %21913 = vmatpush1.msra.mxu1 %v32353_v22  ;;  %21681 = vmatprep.subr.mxu0 %v32354_v40 }
 0x69a   : > { %22095 = vmatprep.subr.mxu1 %v32355_v31  ;;  %21384 = vmatprep.mubr.f32.mxu0 %v32196_v30 }
 0x69b   : > { %21798 = vmatprep.mubr.f32.mxu1 %v32196_v30  ;;  %25676 = vmatmul.mubr.msk.f32.gmra.mxu0 %vm312_vm1, %v30488_v60 }
 0x69c   : > { %25688 = vmatmul.mubr.msk.f32.gmra.mxu1 %vm312_vm1, %v30530_v2  ;;  %21532 = vmatprep.mubr.f32.mxu0 %v32196_v30 }
 0x69d   : > { %v18190_v18 = vpop.f32.mrf.mxu0  ;;  %v26076_v27 = vpop.f32.mrf.mxu1  ;;  %21946 = vmatprep.mubr.f32.mxu1 %v32196_v30 }
 0x69e   : > { %v18282_v14 = vadd.f32 %v18190_v18, %v30345_v51  ;;  %v30548_v22 = vadd.f32 %v26076_v27, %v30386_v63  ;;  %v32362_v51 = vld [vmem:[#allocation40_spill] sm:$0xff] }
 0x69f   : > { %v30550_v40 = vpop.f32.mrf.mxu0  ;;  %v30552_v31 = vpop.f32.mrf.mxu1  ;;  %25679 = vmatmul.mubr.msk.f32.vlgmr.msra.gmra.mxu0 %vm312_vm1, %v25671_v20 }
 0x6a0   : > { %32358 = vst [vmem:[#allocation85_spill] sm:$0xff] %v30552_v31  ;;  %25691 = vmatmul.mubr.msk.f32.vlgmr.msra.gmra.mxu1 %vm312_vm1, %v30516_v3  ;;  %21682 = vmatpush1.msra.mxu0 %v32359_v25  ;;  %v32366_v31 = vld [vmem:[#allocation25_spill] sm:$0xff] }
 0x6a1   : > { %22096 = vmatpush1.msra.mxu1 %v32360_v1  ;;  %v18196_v49 = vpop.f32.mrf.mxu0  ;;  %21835 = vmatprep.subr.mxu0 %v32361_v54  ;;  %v30580_v54 = vld [vmem:[%s31800_s3 + $0x120] sm:$0xff]  ;;  %v21643_v42 = vsel %vm8169_vm15, %v32366_v31, %v21642_v56 }
 0x6a2   : > { %22249 = vmatprep.subr.mxu1 %v32362_v51  ;;  %v18291_v63 = vadd.f32 %v18196_v49, %v30377_v9  ;;  %v18485_v18 = vpop.f32.mrf.mxu1  ;;  %21538 = vmatprep.mubr.f32.mxu0 %v32196_v30  ;;  %v22056_v49 = vpop.permute.xlu0 %22055 }
 0x6a3   : > { %v30563_v27 = vadd.f32 %v18485_v18, %v30405_v29  ;;  %21952 = vmatprep.mubr.f32.mxu1 %v32196_v30  ;;  %v30567_v20 = vpop.f32.mrf.mxu0  ;;  %25680 = vmatmul.mubr.msk.f32.gmra.mxu0 %vm312_vm1, %v30488_v60  ;;  %v32364_v18 = vld [vmem:[#allocation19_spill] sm:$0xff] }
 0x6a4   : > { %v30569_v25 = vpop.f32.mrf.mxu1  ;;  %25692 = vmatmul.mubr.msk.f32.gmra.mxu1 %vm312_vm1, %v30530_v2  ;;  %21715 = vmatprep.mubr.f32.mxu0 %v32196_v30 }
 0x6a5   : > { %32363 = vst [vmem:[#allocation83_spill] sm:$0xff] %v30569_v25  ;;  %v18408_v1 = vpop.f32.mrf.mxu0  ;;  %22129 = vmatprep.mubr.f32.mxu1 %v32196_v30  ;;  %v32365_v25 = vld [vmem:[#allocation28_spill] sm:$0xff] }
 0x6a6   : > { %v18725_v9 = vadd.f32 %v18408_v1, %v30392_v8  ;;  %v18491_v29 = vpop.f32.mrf.mxu1  ;;  %v32367_v8 = vld [vmem:[#allocation22_spill] sm:$0xff] }
 0x6a7   : > { %v30584_v51 = vadd.f32 %v18491_v29, %v30421_v57  ;;  %v30586_v60 = vpop.f32.mrf.mxu0  ;;  %25685 = vmatmul.mubr.msk.f32.vlgmr.msra.gmra.mxu0 %vm312_vm1, %v30516_v3  ;;  %v22057_v1 = vsel %vm17868_vm0, %v32367_v8, %v22056_v49  ;;  %v30601_v29 = vld [vmem:[%s31800_s3 + $0x128] sm:$0xff] }
 0x6a8   : > { %25697 = vmatmul.mubr.msk.f32.vlgmr.msra.gmra.mxu1 %vm312_vm1, %v30580_v54  ;;  %21836 = vmatpush1.msra.mxu0 %v32364_v18  ;;  %v30604_v12 = vpop.f32.mrf.mxu1 }
 0x6a9   : > { %22250 = vmatpush1.msra.mxu1 %v32365_v25  ;;  %v18414_v57 = vpop.f32.mrf.mxu0  ;;  %26117 = vmatprep.subr.mxu0 %v21643_v42  ;;  %32368 = vst [vmem:[#allocation21_spill] sm:$0xff] %v30604_v12  ;;  %v32370_v12 = vld [vmem:[#allocation20_spill] sm:$0xff] }
 0x6aa   : > { %26122 = vmatprep.subr.mxu1 %v22057_v1  ;;  %v18734_v28 = vadd.f32 %v18414_v57, %v30411_v7  ;;  %21721 = vmatprep.mubr.f32.mxu0 %v32196_v30 }
 0x6ab   : > { %22135 = vmatprep.mubr.f32.mxu1 %v32196_v30  ;;  %v30608_v56 = vpop.f32.mrf.mxu0  ;;  %25686 = vmatmul.mubr.msk.f32.gmra.mxu0 %vm312_vm1, %v30530_v2 }
 0x6ac   : > { %25698 = vmatmul.mubr.msk.f32.gmra.mxu1 %vm312_vm1, %v30601_v29  ;;  %21869 = vmatprep.mubr.f32.mxu0 %v32196_v30 }
 0x6ad   : > { %v18562_v31 = vpop.f32.mrf.mxu0  ;;  %v18639_v25 = vpop.f32.mrf.mxu1  ;;  %22283 = vmatprep.mubr.f32.mxu1 %v32196_v30 }
 0x6ae   : > { %v18729_v7 = vadd.f32 %v18562_v31, %v30427_v26  ;;  %v30617_v49 = vadd.f32 %v18639_v25, %v18282_v14 }
 0x6af   : > { %v30619_v18 = vpop.f32.mrf.mxu0  ;;  %v30621_v8 = vpop.f32.mrf.mxu1  ;;  %25689 = vmatmul.mubr.msk.f32.vlgmr.msra.gmra.mxu0 %vm312_vm1, %v30516_v3 }
 0x6b0   : > { %32369 = vst [vmem:[#allocation80_spill] sm:$0xff] %v30619_v18  ;;  %25701 = vmatmul.mubr.msk.f32.vlgmr.msra.gmra.mxu1 %vm312_vm1, %v30580_v54  ;;  %26118 = vmatpush3.msra.mxu0 %v21643_v42 }
 0x6b1   : > { %26123 = vmatpush3.msra.mxu1 %v22057_v1  ;;  %v18568_v57 = vpop.f32.mrf.mxu0  ;;  %22172 = vmatprep.subr.mxu0 %v32370_v12 }
 0x6b2   : > { %22586 = vmatprep.subr.mxu1 %v32371_v13  ;;  %v18738_v26 = vadd.f32 %v18568_v57, %v30443_v6  ;;  %v18645_v14 = vpop.f32.mrf.mxu1  ;;  %21875 = vmatprep.mubr.f32.mxu0 %v32196_v30 }
 0x6b3   : > { %v30630_v31 = vadd.f32 %v18645_v14, %v18291_v63  ;;  %22289 = vmatprep.mubr.f32.mxu1 %v32196_v30  ;;  %v30634_v25 = vpop.f32.mrf.mxu0  ;;  %25690 = vmatmul.mubr.msk.f32.gmra.mxu0 %vm312_vm1, %v30530_v2  ;;  %v32375_v14 = vld [vmem:[#allocation41_spill] sm:$0xff] }
 0x6b4   : > { %32372 = vst [vmem:[#allocation4_spill] sm:$0xff] %v30634_v25  ;;  %v30636_v18 = vpop.f32.mrf.mxu1  ;;  %25702 = vmatmul.mubr.msk.f32.gmra.mxu1 %vm312_vm1, %v30601_v29  ;;  %26119 = vmatprep.mubr.msk.f32.mxu0 %vm312_vm1, %v30516_v3  ;;  %v32374_v3 = vld [vmem:[#allocation39_spill] sm:$0xff] }
 0x6b5   : > { %v26081_v42 = vpop.f32.mrf.mxu0  ;;  %26124 = vmatprep.mubr.msk.f32.mxu1 %vm312_vm1, %v30580_v54  ;;  %v15072_v57 = vadd.f32 %v30028_v23, %v32374_v3  ;;  %v32378_v23 = vld [vmem:[#allocation43_spill] sm:$0xff] }
 0x6b6   : > { %v30647_v13 = vadd.f32 %v26081_v42, %v30548_v22  ;;  %v18818_v6 = vpop.f32.mrf.mxu1  ;;  %v32376_v22 = vld [vmem:[#allocation23_spill] sm:$0xff]  ;;  %v32377_v42 = vld [vmem:[#allocation34_spill] sm:$0xff]  ;;  %v15078_v3 = vadd.f32 %v30045_v47, %v32378_v23  ;;  %v30693_v47 = vld [vmem:[%s31800_s3 + $0x138] sm:$0xff] }
 0x6b7   : > { %v30649_v12 = vadd.f32 %v18818_v6, %v18725_v9  ;;  %v30651_v63 = vpop.f32.mrf.mxu0  ;;  %26120 = vmatmul.mubr.msk.f32.vlgmr.msra.gmra.mxu0 %vm312_vm1, %v30530_v2  ;;  %v30666_v9 = vld [vmem:[%s31800_s3 + $0x130] sm:$0xff] }
 0x6b8   : > { %32373 = vst [vmem:[#allocation87_spill] sm:$0xff] %v30651_v63  ;;  %v30653_v1 = vpop.f32.mrf.mxu1  ;;  %26125 = vmatmul.mubr.msk.f32.vlgmr.msra.gmra.mxu1 %vm312_vm1, %v30601_v29  ;;  %22173 = vmatpush1.msra.mxu0 %v32375_v14 }
 0x6b9   : > { %22587 = vmatpush1.msra.mxu1 %v32376_v22  ;;  %22326 = vmatprep.subr.mxu0 %v32377_v42 }
 0x6ba   : > { %22740 = vmatprep.subr.mxu1 %v29983_v4  ;;  %v18824_v2 = vpop.f32.mrf.mxu1  ;;  %v18895_v6 = vpop.f32.mrf.mxu0  ;;  %22206 = vmatprep.mubr.f32.mxu0 %v32196_v30  ;;  %v32380_v4 = vld [vmem:[#allocation32_spill] sm:$0xff] }
 0x6bb   : > { %v30670_v63 = vadd.f32 %v18824_v2, %v18734_v28  ;;  %v30673_v25 = vadd.f32 %v18895_v6, %v30563_v27  ;;  %22620 = vmatprep.mubr.f32.mxu1 %v32196_v30  ;;  %25699 = vmatmul.mubr.msk.f32.vlgmr.msra.gmra.mxu0 %vm312_vm1, %v30580_v54  ;;  %v15592_v28 = vadd.f32 %v30088_v5, %v15072_v57  ;;  %v32381_v27 = vld [vmem:[#allocation88_spill] sm:$0xff]  ;;  %v32382_v2 = vld [vmem:[#allocation35_spill] sm:$0xff] }
 0x6bc   : > { %v30679_v14 = vpop.f32.mrf.mxu1  ;;  %v30681_v22 = vpop.f32.mrf.mxu0  ;;  %25711 = vmatmul.mubr.msk.f32.vlgmr.msra.gmra.mxu1 %vm312_vm1, %v30666_v9  ;;  %22327 = vmatpush1.msra.mxu0 %v32380_v4  ;;  %v14841_v42 = vadd.f32 %v29996_v37, %v32381_v27 }
 0x6bd   : > { %32379 = vst [vmem:[#allocation12_spill] sm:$0xff] %v30681_v22  ;;  %22741 = vmatpush1.msra.mxu1 %v29979_v62  ;;  %22509 = vmatprep.subr.mxu0 %v32382_v2  ;;  %v15601_v62 = vadd.f32 %v30104_v38, %v15078_v3 }
 0x6be   : > { %22919 = vmatprep.subr.mxu1 %v29030_v19  ;;  %v18901_v6 = vpop.f32.mrf.mxu0  ;;  %v18972_v23 = vpop.f32.mrf.mxu1  ;;  %22212 = vmatprep.mubr.f32.mxu0 %v32196_v30  ;;  %v16041_v19 = vadd.f32 %v30141_v45, %v15592_v28  ;;  %v15586_v38 = vadd.f32 %v30056_v50, %v14841_v42  ;;  %v32385_v50 = vld [vmem:[#allocation38_spill] sm:$0xff]  ;;  %v32386_v28 = vld [vmem:[#allocation36_spill] sm:$0xff]  ;;  %v32388_v42 = vld [vmem:[#allocation101_spill] sm:$0xff] }
 0x6bf   : > { %v30700_v5 = vadd.f32 %v18901_v6, %v30584_v51  ;;  %v30702_v57 = vadd.f32 %v18972_v23, %v18729_v7  ;;  %22626 = vmatprep.mubr.f32.mxu1 %v32196_v30  ;;  %25700 = vmatmul.mubr.msk.f32.gmra.mxu0 %vm312_vm1, %v30601_v29  ;;  %v32384_v51 = vld [vmem:[#allocation30_spill] sm:$0xff]  ;;  %v16050_v23 = vadd.f32 %v30154_v58, %v15601_v62  ;;  %v32387_v58 = vld [vmem:[#allocation96_spill] sm:$0xff] }
 0x6c0   : > { %v30707_v4 = vpop.f32.mrf.mxu0  ;;  %v30709_v37 = vpop.f32.mrf.mxu1  ;;  %25712 = vmatmul.mubr.msk.f32.gmra.mxu1 %vm312_vm1, %v30693_v47  ;;  %22360 = vmatprep.mubr.f32.mxu0 %v32196_v30  ;;  %v14847_v7 = vadd.f32 %v30013_v55, %v32384_v51  ;;  %v14995_v55 = vadd.f32 %v30026_v48, %v32385_v50  ;;  %v16035_v62 = vadd.f32 %v32388_v42, %v15586_v38  ;;  %v32389_v51 = vld [vmem:[#allocation90_spill] sm:$0xff] }
 0x6c1   : > { %32383 = vst [vmem:[#allocation81_spill] sm:$0xff] %v30707_v4  ;;  %22774 = vmatprep.mubr.f32.mxu1 %v32196_v30  ;;  %v22470_v42 = vpop.permute.xlu1 %22469 }
 0x6c2   : > { %v18978_v3 = vpop.f32.mrf.mxu1  ;;  %v19049_v27 = vpop.f32.mrf.mxu0 }
 0x6c3   : > { %v30721_v2 = vadd.f32 %v18978_v3, %v18738_v26  ;;  %v30724_v6 = vadd.f32 %v19049_v27, %v30617_v49  ;;  %25703 = vmatmul.mubr.msk.f32.vlgmr.msra.gmra.mxu0 %vm312_vm1, %v30580_v54  ;;  %v16490_v26 = vadd.f32 %v30178_v61, %v16041_v19  ;;  %v15595_v49 = vadd.f32 %v32387_v58, %v14847_v7  ;;  %v32390_v3 = vld [vmem:[#allocation48_spill] sm:$0xff]  ;;  %v32393_v61 = vld [vmem:[#allocation93_spill] sm:$0xff]  ;;  %v32394_v7 = vld [vmem:[#allocation114_spill] sm:$0xff] }
 0x6c4   : > { %v30727_v4 = vpop.f32.mrf.mxu1  ;;  %v30729_v45 = vpop.f32.mrf.mxu0  ;;  %25715 = vmatmul.mubr.msk.f32.vlgmr.msra.gmra.mxu1 %vm312_vm1, %v30666_v9  ;;  %22510 = vmatpush1.msra.mxu0 %v32386_v28  ;;  %v16499_v38 = vadd.f32 %v32394_v7, %v16050_v23  ;;  %v30770_v23 = vld [vmem:[%s31800_s3 + $0x140] sm:$0xff] }
 0x6c5   : > { %22920 = vmatpush1.msra.mxu1 %v29016_v33  ;;  %22663 = vmatprep.subr.mxu0 %v32389_v51  ;;  %v32392_v33 = vld [vmem:[#allocation42_spill] sm:$0xff]  ;;  %v16938_v58 = vadd.f32 %v30196_v34, %v16490_v26  ;;  %v32397_v51 = vld [vmem:[#allocation103_spill] sm:$0xff] }
 0x6c6   : > { %23073 = vmatprep.subr.mxu1 %v32390_v3  ;;  %v19055_v54 = vpop.f32.mrf.mxu0  ;;  %v26086_v27 = vpop.f32.mrf.mxu1  ;;  %22366 = vmatprep.mubr.f32.mxu0 %v32196_v30  ;;  %v15001_v19 = vadd.f32 %v32393_v61, %v32392_v33  ;;  %v16044_v3 = vadd.f32 %v32397_v51, %v15595_v49  ;;  %v32399_v61 = vld [vmem:[#allocation99_spill] sm:$0xff] }
 0x6c7   : > { %v30745_v22 = vadd.f32 %v19055_v54, %v30630_v31  ;;  %v30748_v48 = vadd.f32 %v26086_v27, %v30647_v13  ;;  %22780 = vmatprep.mubr.f32.mxu1 %v32196_v30  ;;  %25704 = vmatmul.mubr.msk.f32.gmra.mxu0 %vm312_vm1, %v30601_v29  ;;  %v32396_v31 = vld [vmem:[#allocation98_spill] sm:$0xff]  ;;  %v32398_v29 = vld [vmem:[#allocation108_spill] sm:$0xff] }
 0x6c8   : > { %v30755_v50 = vpop.f32.mrf.mxu0  ;;  %v30757_v28 = vpop.f32.mrf.mxu1  ;;  %25716 = vmatmul.mubr.msk.f32.gmra.mxu1 %vm312_vm1, %v30693_v47  ;;  %v15590_v13 = vadd.f32 %v32396_v31, %v14995_v55  ;;  %22543 = vmatprep.mubr.f32.mxu0 %v32196_v30  ;;  %v16484_v54 = vadd.f32 %v32398_v29, %v16035_v62  ;;  %v17386_v55 = vadd.f32 %v30274_v21, %v16938_v58  ;;  %v32400_v21 = vld [vmem:[#allocation105_spill] sm:$0xff]  ;;  %v32402_v62 = vld [vmem:[#allocation47_spill] sm:$0xff]  ;;  %v32404_v58 = vld [vmem:[#allocation110_spill] sm:$0xff] }
 0x6c9   : > { %32391 = vst [vmem:[#allocation6_spill] sm:$0xff] %v30748_v48  ;;  %32395 = vst [vmem:[#allocation2_spill] sm:$0xff] %v30757_v28  ;;  %22953 = vmatprep.mubr.f32.mxu1 %v32196_v30  ;;  %v15599_v7 = vadd.f32 %v32399_v61, %v15001_v19  ;;  %v16947_v31 = vadd.f32 %v30200_v17, %v16499_v38  ;;  %v32403_v19 = vld [vmem:[#allocation89_spill] sm:$0xff]  ;;  %v30800_v38 = vld [vmem:[%s31800_s3 + $0x148] sm:$0xff]  ;;  %v16493_v51 = vadd.f32 %v32404_v58, %v16044_v3 }
 0x6ca   : > { %v19233_v27 = vpop.f32.mrf.mxu0  ;;  %v19310_v33 = vpop.f32.mrf.mxu1  ;;  %v17834_v49 = vadd.f32 %v30367_v44, %v17386_v55  ;;  %v22471_v17 = vsel %vm18317_vm14, %v32403_v19, %v22470_v42  ;;  %v32405_v29 = vld [vmem:[#allocation116_spill] sm:$0xff]  ;;  %v32406_v44 = vld [vmem:[#allocation29_spill] sm:$0xff] }
 0x6cb   : > { %v30776_v34 = vadd.f32 %v19233_v27, %v30649_v12  ;;  %v30779_v26 = vadd.f32 %v19310_v33, %v30673_v25  ;;  %25709 = vmatmul.mubr.msk.f32.vlgmr.msra.gmra.mxu0 %vm312_vm1, %v30666_v9  ;;  %v16039_v12 = vadd.f32 %v32400_v21, %v15590_v13  ;;  %v32401_v25 = vld [vmem:[#allocation26_spill] sm:$0xff]  ;;  %v16932_v27 = vadd.f32 %v32405_v29, %v16484_v54 }
 0x6cc   : > { %v30783_v48 = vpop.f32.mrf.mxu0  ;;  %v30785_v28 = vpop.f32.mrf.mxu1  ;;  %25721 = vmatmul.mubr.msk.f32.vlgmr.msra.gmra.mxu1 %vm312_vm1, %v30770_v23  ;;  %22664 = vmatpush1.msra.mxu0 %v32401_v25  ;;  %v17395_v13 = vadd.f32 %v30292_v52, %v16947_v31  ;;  %v18283_v61 = vadd.f32 %v30550_v40, %v17834_v49  ;;  %v32407_v40 = vld [vmem:[#allocation106_spill] sm:$0xff]  ;;  %v16941_v25 = vadd.f32 %v30190_v43, %v16493_v51 }
 0x6cd   : > { %23074 = vmatpush1.msra.mxu1 %v32402_v62  ;;  %26127 = vmatprep.subr.mxu0 %v22471_v17  ;;  %v17380_v3 = vadd.f32 %v30208_v36, %v16932_v27  ;;  %v32408_v36 = vld [vmem:[#allocation112_spill] sm:$0xff]  ;;  %v32410_v51 = vld [vmem:[#allocation46_spill] sm:$0xff] }
 0x6ce   : > { %26132 = vmatprep.subr.mxu1 %v32406_v44  ;;  %v19239_v33 = vpop.f32.mrf.mxu0  ;;  %v19316_v55 = vpop.f32.mrf.mxu1  ;;  %22549 = vmatprep.mubr.f32.mxu0 %v32196_v30  ;;  %v18732_v31 = vadd.f32 %v30621_v8, %v18283_v61  ;;  %v16488_v49 = vadd.f32 %v32408_v36, %v16039_v12  ;;  %v17389_v27 = vadd.f32 %v30232_v24, %v16941_v25  ;;  %v32416_v36 = vld [vmem:[#allocation80_spill] sm:$0xff] }
 0x6cf   : > { %v30808_v42 = vadd.f32 %v19239_v33, %v30670_v63  ;;  %v30811_v21 = vadd.f32 %v19316_v55, %v30700_v5  ;;  %22959 = vmatprep.mubr.f32.mxu1 %v32196_v30  ;;  %25710 = vmatmul.mubr.msk.f32.gmra.mxu0 %vm312_vm1, %v30693_v47  ;;  %v16048_v63 = vadd.f32 %v32407_v40, %v15599_v7  ;;  %v32411_v33 = vld [vmem:[#allocation53_spill] sm:$0xff] }
 0x6d0   : > { %v30816_v52 = vpop.f32.mrf.mxu0  ;;  %v30818_v54 = vpop.f32.mrf.mxu1  ;;  %25722 = vmatmul.mubr.msk.f32.gmra.mxu1 %vm312_vm1, %v30800_v38  ;;  %v17843_v5 = vadd.f32 %v30383_v32, %v17395_v13  ;;  %22697 = vmatprep.mubr.f32.mxu0 %v32196_v30  ;;  %v17828_v62 = vadd.f32 %v30309_v15, %v17380_v3  ;;  %v19142_v7 = vadd.f32 %v30729_v45, %v18732_v31  ;;  %v32409_v15 = vld [vmem:[#allocation113_spill] sm:$0xff]  ;;  %v32415_v31 = vld [vmem:[#allocation122_spill] sm:$0xff] }
 0x6d1   : > { %23107 = vmatprep.mubr.f32.mxu1 %v32196_v30  ;;  %v16936_v24 = vadd.f32 %v30194_v41, %v16488_v49 }
 0x6d2   : > { %v19387_v19 = vpop.f32.mrf.mxu0  ;;  %v19464_v58 = vpop.f32.mrf.mxu1  ;;  %v18292_v29 = vadd.f32 %v30567_v20, %v17843_v5  ;;  %v18277_v12 = vadd.f32 %v30400_v10, %v17828_v62  ;;  %v16497_v20 = vadd.f32 %v32409_v15, %v16048_v63  ;;  %v17837_v10 = vadd.f32 %v30323_v53, %v17389_v27  ;;  %v32420_v27 = vld [vmem:[#allocation51_spill] sm:$0xff]  ;;  %v32422_v15 = vld [vmem:[#allocation4_spill] sm:$0xff] }
 0x6d3   : > { %v30835_v32 = vadd.f32 %v19387_v19, %v30702_v57  ;;  %v30838_v8 = vadd.f32 %v19464_v58, %v30724_v6  ;;  %25713 = vmatmul.mubr.msk.f32.vlgmr.msra.gmra.mxu0 %vm312_vm1, %v30666_v9  ;;  %v17384_v41 = vadd.f32 %v30254_v0, %v16936_v24  ;;  %v24947_v24 = vld [vmem:[%s31801_s4] sm:$0xff] }
 0x6d4   : > { %v30842_v13 = vpop.f32.mrf.mxu0  ;;  %v19466_v43 = vpop.f32.mrf.mxu1  ;;  %25725 = vmatmul.mubr.msk.f32.vlgmr.msra.gmra.mxu1 %vm312_vm1, %v30770_v23  ;;  %v18741_v57 = vadd.f32 %v30636_v18, %v18292_v29  ;;  %26128 = vmatpush3.msra.mxu0 %v22471_v17  ;;  %v18726_v6 = vadd.f32 %v30586_v60, %v18277_v12  ;;  %v18286_v60 = vadd.f32 %v30419_v59, %v17837_v10  ;;  %v32421_v12 = vld [vmem:[#allocation58_spill] sm:$0xff] }
 0x6d5   : > { %v30850_v45 = vadd.f32 %v19466_v43, %v19142_v7  ;;  %26133 = vmatpush3.msra.mxu1 %v32406_v44  ;;  %22996 = vmatprep.subr.mxu0 %v32410_v51  ;;  %v16945_v0 = vadd.f32 %v30198_v46, %v16497_v20  ;;  %v17832_v44 = vadd.f32 %v30358_v11, %v17384_v41  ;;  %v30926_v7 = vld [vmem:[%s31800_s3 + $0x158] sm:$0xff]  ;;  %v32424_v41 = vld [vmem:[#allocation60_spill] sm:$0xff] }
 0x6d6   : > { %23411 = vmatprep.subr.mxu1 %v32411_v33  ;;  %v19393_v55 = vpop.f32.mrf.mxu0  ;;  %v19470_v61 = vpop.f32.mrf.mxu1  ;;  %v19151_v3 = vadd.f32 %v30755_v50, %v18741_v57  ;;  %22703 = vmatprep.mubr.f32.mxu0 %v32196_v30  ;;  %v18735_v40 = vadd.f32 %v30608_v56, %v18286_v60  ;;  %v32412_v56 = vld [vmem:[#allocation45_spill] sm:$0xff]  ;;  %v32426_v60 = vld [vmem:[#allocation62_spill] sm:$0xff] }
 0x6d7   : > { %v30860_v18 = vadd.f32 %v19393_v55, %v30721_v2  ;;  %v30863_v17 = vadd.f32 %v19470_v61, %v30745_v22  ;;  %23113 = vmatprep.mubr.f32.mxu1 %v32196_v30  ;;  %25714 = vmatmul.mubr.msk.f32.gmra.mxu0 %vm312_vm1, %v30693_v47  ;;  %v19136_v2 = vadd.f32 %v30653_v1, %v18726_v6 }
 0x6d8   : > { %v19472_v53 = vpop.f32.mrf.mxu1  ;;  %25726 = vmatmul.mubr.msk.f32.gmra.mxu1 %vm312_vm1, %v30800_v38  ;;  %26129 = vmatprep.mubr.msk.f32.mxu0 %vm312_vm1, %v30666_v9  ;;  %v17393_v1 = vadd.f32 %v30277_v16, %v16945_v0  ;;  %v18281_v46 = vadd.f32 %v30436_v35, %v17832_v44  ;;  %v19145_v11 = vadd.f32 %v30679_v14, %v18735_v40  ;;  %v30901_v16 = vld [vmem:[%s31800_s3 + $0x150] sm:$0xff]  ;;  %v19395_v10 = vpop.f32.mrf.mxu0 }
 0x6d9   : > { %v30874_v50 = vadd.f32 %v19472_v53, %v19151_v3  ;;  %26134 = vmatprep.mubr.msk.f32.mxu1 %vm312_vm1, %v30770_v23  ;;  %v19551_v63 = vadd.f32 %v30783_v48, %v19136_v2  ;;  %v32413_v48 = vld [vmem:[#allocation54_spill] sm:$0xff]  ;;  %24951 = vperm.xlu0 %26193, %v24947_v24   ;;  %v32423_v3 = vld [vmem:[#allocation52_spill] sm:$0xff]  ;;  %v32425_v53 = vld [vmem:[#allocation55_spill] sm:$0xff]  ;;  %v23709_v2 = vpop.permute.xlu1 %23708 }
 0x6da   : > { %v19647_v22 = vpop.f32.mrf.mxu1  ;;  %v18730_v14 = vadd.f32 %v32416_v36, %v18281_v46  ;;  %v19560_v49 = vadd.f32 %v30816_v52, %v19145_v11  ;;  %v32418_v52 = vld [vmem:[#allocation49_spill] sm:$0xff]  ;;  %v32427_v0 = vld [vmem:[#allocation44_spill] sm:$0xff]  ;;  %v30990_v11 = vld [vmem:[%s31800_s3 + $0x168] sm:$0xff] }
 0x6db   : > { %v30885_v59 = vadd.f32 %v19647_v22, %v30776_v34  ;;  %26130 = vmatmul.mubr.msk.f32.vlgmr.msra.gmra.mxu0 %vm312_vm1, %v30693_v47  ;;  %v17841_v47 = vadd.f32 %v30379_v39, %v17393_v1  ;;  %v32414_v34 = vld [vmem:[#allocation50_spill] sm:$0xff]  ;;  %v32417_v39 = vld [vmem:[#allocation11_spill] sm:$0xff]  ;;  %v32430_v40 = vld [vmem:[#allocation64_spill] sm:$0xff] }
 0x6dc   : > { %v19649_v5 = vpop.f32.mrf.mxu1  ;;  %26135 = vmatmul.mubr.msk.f32.vlgmr.msra.gmra.mxu1 %vm312_vm1, %v30800_v38  ;;  %22997 = vmatpush1.msra.mxu0 %v32412_v56  ;;  %v19140_v58 = vadd.f32 %v30709_v37, %v18730_v14  ;;  %v32428_v22 = vld [vmem:[#allocation94_spill] sm:$0xff]  ;;  %v32433_v56 = vld [vmem:[#allocation24_spill] sm:$0xff] }
 0x6dd   : > { %v30894_v9 = vadd.f32 %v19649_v5, %v19551_v63  ;;  %23412 = vmatpush1.msra.mxu1 %v32413_v48  ;;  %23150 = vmatprep.subr.mxu0 %v32414_v34  ;;  %v18290_v19 = vadd.f32 %v32417_v39, %v17841_v47  ;;  %v15147_v44 = vadd.f32 %v32428_v22, %v32427_v0  ;;  %v32431_v63 = vld [vmem:[#allocation120_spill] sm:$0xff]  ;;  %v32432_v5 = vld [vmem:[#allocation121_spill] sm:$0xff]  ;;  %v32434_v48 = vld [vmem:[#allocation91_spill] sm:$0xff] }
 0x6de   : > { %23565 = vmatprep.subr.mxu1 %v32415_v31  ;;  %v19653_v35 = vpop.f32.mrf.mxu1  ;;  %23030 = vmatprep.mubr.f32.mxu0 %v32196_v30  ;;  %v19555_v37 = vadd.f32 %v30842_v13, %v19140_v58  ;;  %v23710_v46 = vsel %vm2479_vm5, %v32432_v5, %v23709_v2  ;;  %v14918_v47 = vadd.f32 %v32434_v48, %v32433_v56  ;;  %v32435_v34 = vld [vmem:[#allocation100_spill] sm:$0xff]  ;;  %v32439_v39 = vld [vmem:[#allocation107_spill] sm:$0xff]  ;;  %v32454_v2 = vld [vmem:[#allocation117_spill] sm:$0xff] }
 0x6df   : > { %v30909_v25 = vadd.f32 %v19653_v35, %v30808_v42  ;;  %23445 = vmatprep.mubr.f32.mxu1 %v32196_v30  ;;  %25723 = vmatmul.mubr.msk.f32.vlgmr.msra.gmra.mxu0 %vm312_vm1, %v30770_v23  ;;  %v32419_v42 = vld [vmem:[#allocation56_spill] sm:$0xff]  ;;  %v18739_v20 = vadd.f32 %v32422_v15, %v18290_v19  ;;  %v15593_v31 = vadd.f32 %v32435_v34, %v15147_v44  ;;  %v32436_v35 = vld [vmem:[#allocation31_spill] sm:$0xff]  ;;  %v31058_v5 = vld [vmem:[%s31800_s3 + $0x178] sm:$0xff] }
 0x6e0   : > { %v19655_v62 = vpop.f32.mrf.mxu1  ;;  %25735 = vmatmul.mubr.msk.f32.vlgmr.msra.gmra.mxu1 %vm312_vm1, %v30901_v16  ;;  %23151 = vmatpush1.msra.mxu0 %v32418_v52  ;;  %v32437_v36 = vld [vmem:[#allocation92_spill] sm:$0xff]  ;;  %v32440_v58 = vld [vmem:[#allocation59_spill] sm:$0xff]  ;;  %v32441_v52 = vld [vmem:[#allocation66_spill] sm:$0xff] }
 0x6e1   : > { %v30919_v29 = vadd.f32 %v19655_v62, %v19560_v49  ;;  %23566 = vmatpush1.msra.mxu1 %v32419_v42  ;;  %23334 = vmatprep.subr.mxu0 %v32420_v27  ;;  %v19149_v13 = vadd.f32 %v30727_v4, %v18739_v20  ;;  %v14924_v14 = vadd.f32 %v32437_v36, %v32436_v35  ;;  %v32438_v49 = vld [vmem:[#allocation95_spill] sm:$0xff]  ;;  %v32442_v42 = vld [vmem:[#allocation97_spill] sm:$0xff]  ;;  %v32462_v34 = vld [vmem:[#allocation118_spill] sm:$0xff] }
 0x6e2   : > { %23748 = vmatprep.subr.mxu1 %v32421_v12  ;;  %v19801_v43 = vpop.f32.mrf.mxu1  ;;  %23036 = vmatprep.mubr.f32.mxu0 %v32196_v30  ;;  %v15588_v62 = vadd.f32 %v32438_v49, %v14918_v47  ;;  %v16042_v19 = vadd.f32 %v32439_v39, %v15593_v31  ;;  %v32443_v12 = vld [vmem:[#allocation102_spill] sm:$0xff]  ;;  %v32444_v15 = vld [vmem:[#allocation115_spill] sm:$0xff]  ;;  %v32460_v48 = vld [vmem:[#allocation65_spill] sm:$0xff] }
 0x6e3   : > { %v30933_v57 = vadd.f32 %v19801_v43, %v30835_v32  ;;  %23451 = vmatprep.mubr.f32.mxu1 %v32196_v30  ;;  %25724 = vmatmul.mubr.msk.f32.gmra.mxu0 %vm312_vm1, %v30800_v38  ;;  %v19564_v33 = vadd.f32 %v19395_v10, %v19149_v13  ;;  %v15597_v27 = vadd.f32 %v32442_v42, %v14924_v14  ;;  %v32446_v10 = vld [vmem:[#allocation109_spill] sm:$0xff]  ;;  %v32447_v13 = vld [vmem:[#allocation119_spill] sm:$0xff]  ;;  %v32461_v47 = vld [vmem:[#allocation74_spill] sm:$0xff] }
 0x6e4   : > { %v19803_v6 = vpop.f32.mrf.mxu1  ;;  %25736 = vmatmul.mubr.msk.f32.gmra.mxu1 %vm312_vm1, %v30926_v7  ;;  %23184 = vmatprep.mubr.f32.mxu0 %v32196_v30  ;;  %v16037_v43 = vadd.f32 %v32443_v12, %v15588_v62  ;;  %v16491_v20 = vadd.f32 %v32444_v15, %v16042_v19  ;;  %v32455_v22 = vld [vmem:[#allocation131_spill] sm:$0xff]  ;;  %v32463_v35 = vld [vmem:[#allocation128_spill] sm:$0xff]  ;;  %v32465_v62 = vld [vmem:[#allocation126_spill] sm:$0xff] }
 0x6e5   : > { %v30945_v32 = vadd.f32 %v19803_v6, %v19555_v37  ;;  %23599 = vmatprep.mubr.f32.mxu1 %v32196_v30  ;;  %v32445_v37 = vld [vmem:[#allocation104_spill] sm:$0xff]  ;;  %v32464_v14 = vld [vmem:[#allocation87_spill] sm:$0xff]  ;;  %v32466_v19 = vld [vmem:[#allocation86_spill] sm:$0xff] }
 0x6e6   : > { %v19807_v51 = vpop.f32.mrf.mxu1  ;;  %v16046_v24 = vadd.f32 %v32445_v37, %v15597_v27  ;;  %v16486_v6 = vadd.f32 %v32446_v10, %v16037_v43  ;;  %v32467_v42 = vld [vmem:[#allocation2_spill] sm:$0xff] }
 0x6e7   : > { %v30950_v55 = vadd.f32 %v19807_v51, %v30860_v18  ;;  %25727 = vmatmul.mubr.msk.f32.vlgmr.msra.gmra.mxu0 %vm312_vm1, %v30770_v23  ;;  %v30973_v23 = vld [vmem:[%s31800_s3 + $0x160] sm:$0xff]  ;;  %v23295_v18 = vpop.permute.xlu0 %23294  ;;  %v16939_v51 = vadd.f32 %v32447_v13, %v16491_v20 }
 0x6e8   : > { %v19809_v61 = vpop.f32.mrf.mxu1  ;;  %25739 = vmatmul.mubr.msk.f32.vlgmr.msra.gmra.mxu1 %vm312_vm1, %v30901_v16  ;;  %23335 = vmatpush1.msra.mxu0 %v32423_v3  ;;  %v23296_v1 = vsel %vm1341_vm3, %v32431_v63, %v23295_v18  ;;  %v32450_v3 = vld [vmem:[#allocation127_spill] sm:$0xff]  ;;  %v16934_v0 = vadd.f32 %v32454_v2, %v16486_v6  ;;  %v32468_v12 = vld [vmem:[#allocation6_spill] sm:$0xff] }
 0x6e9   : > { %v30956_v4 = vadd.f32 %v19809_v61, %v19564_v33  ;;  %23749 = vmatpush1.msra.mxu1 %v32424_v41  ;;  %23488 = vmatprep.subr.mxu0 %v32425_v53  ;;  %v32448_v33 = vld [vmem:[#allocation61_spill] sm:$0xff]  ;;  %v32449_v61 = vld [vmem:[#allocation68_spill] sm:$0xff]  ;;  %v17387_v41 = vadd.f32 %v32450_v3, %v16939_v51  ;;  %v32451_v53 = vld [vmem:[#allocation123_spill] sm:$0xff] }
 0x6ea   : > { %23902 = vmatprep.subr.mxu1 %v32426_v60  ;;  %23190 = vmatprep.mubr.f32.mxu0 %v32196_v30  ;;  %v32452_v60 = vld [vmem:[#allocation71_spill] sm:$0xff]  ;;  %v32469_v20 = vld [vmem:[#allocation130_spill] sm:$0xff] }
 0x6eb   : > { %23605 = vmatprep.mubr.f32.mxu1 %v32196_v30  ;;  %25728 = vmatmul.mubr.msk.f32.gmra.mxu0 %vm312_vm1, %v30800_v38  ;;  %v32429_v38 = vld [vmem:[#allocation57_spill] sm:$0xff]  ;;  %v32453_v18 = vld [vmem:[#allocation111_spill] sm:$0xff]  ;;  %v17835_v44 = vadd.f32 %v32455_v22, %v17387_v41  ;;  %v32472_v41 = vld [vmem:[#allocation12_spill] sm:$0xff] }
 0x6ec   : > { %25740 = vmatmul.mubr.msk.f32.gmra.mxu1 %vm312_vm1, %v30926_v7  ;;  %23368 = vmatprep.mubr.f32.mxu0 %v32196_v30  ;;  %v32457_v63 = vld [vmem:[#allocation63_spill] sm:$0xff]  ;;  %v32477_v22 = vld [vmem:[#allocation21_spill] sm:$0xff] }
 0x6ed   : > { %23782 = vmatprep.mubr.f32.mxu1 %v32196_v30  ;;  %v32476_v2 = vld [vmem:[#allocation79_spill] sm:$0xff] }
 0x6ef   : > { %25733 = vmatmul.mubr.msk.f32.vlgmr.msra.gmra.mxu0 %vm312_vm1, %v30901_v16 }
 0x6f0   : > { %25745 = vmatmul.mubr.msk.f32.vlgmr.msra.gmra.mxu1 %vm312_vm1, %v30973_v23  ;;  %23489 = vmatpush1.msra.mxu0 %v32429_v38  ;;  %v32456_v38 = vld [vmem:[#allocation124_spill] sm:$0xff] }
 0x6f1   : > { %23903 = vmatpush1.msra.mxu1 %v32430_v40  ;;  %26137 = vmatprep.subr.mxu0 %v23296_v1  ;;  %v17382_v40 = vadd.f32 %v32456_v38, %v16934_v0 }
 0x6f2   : > { %26142 = vmatprep.subr.mxu1 %v23710_v46  ;;  %23374 = vmatprep.mubr.f32.mxu0 %v32196_v30 }
 0x6f3   : > { %23788 = vmatprep.mubr.f32.mxu1 %v32196_v30  ;;  %25734 = vmatmul.mubr.msk.f32.gmra.mxu0 %vm312_vm1, %v30926_v7  ;;  %v17830_v36 = vadd.f32 %v32463_v35, %v17382_v40 }
 0x6f4   : > { %25746 = vmatmul.mubr.msk.f32.gmra.mxu1 %vm312_vm1, %v30990_v11  ;;  %23522 = vmatprep.mubr.f32.mxu0 %v32196_v30 }
 0x6f5   : > { %23936 = vmatprep.mubr.f32.mxu1 %v32196_v30 }
 0x6f7   : > { %25737 = vmatmul.mubr.msk.f32.vlgmr.msra.gmra.mxu0 %vm312_vm1, %v30901_v16 }
 0x6f8   : > { %25749 = vmatmul.mubr.msk.f32.vlgmr.msra.gmra.mxu1 %vm312_vm1, %v30973_v23  ;;  %26138 = vmatpush3.msra.mxu0 %v23296_v1  ;;  %v32458_v1 = vld [vmem:[#allocation72_spill] sm:$0xff] }
 0x6f9   : > { %26143 = vmatpush3.msra.mxu1 %v23710_v46  ;;  %23825 = vmatprep.subr.mxu0 %v32440_v58  ;;  %v32459_v46 = vld [vmem:[#allocation85_spill] sm:$0xff]  ;;  %v18279_v58 = vadd.f32 %v32466_v19, %v17830_v36 }
 0x6fa   : > { %24239 = vmatprep.subr.mxu1 %v32441_v52  ;;  %23528 = vmatprep.mubr.f32.mxu0 %v32196_v30  ;;  %v18284_v56 = vadd.f32 %v32459_v46, %v17835_v44  ;;  %v32478_v46 = vld [vmem:[#allocation81_spill] sm:$0xff] }
 0x6fb   : > { %23942 = vmatprep.mubr.f32.mxu1 %v32196_v30  ;;  %25738 = vmatmul.mubr.msk.f32.gmra.mxu0 %vm312_vm1, %v30926_v7 }
 0x6fc   : > { %25750 = vmatmul.mubr.msk.f32.gmra.mxu1 %vm312_vm1, %v30990_v11  ;;  %26139 = vmatprep.mubr.msk.f32.mxu0 %vm312_vm1, %v30901_v16  ;;  %v31038_v16 = vld [vmem:[%s31800_s3 + $0x170] sm:$0xff]  ;;  %v18733_v49 = vadd.f32 %v32464_v14, %v18284_v56 }
 0x6fd   : > { %26144 = vmatprep.mubr.msk.f32.mxu1 %vm312_vm1, %v30973_v23 }
 0x6fe   : > { %v19143_v27 = vadd.f32 %v32467_v42, %v18733_v49 }
 0x6ff   : > { %26140 = vmatmul.mubr.msk.f32.vlgmr.msra.gmra.mxu0 %vm312_vm1, %v30926_v7  ;;  %v16495_v7 = vadd.f32 %v32453_v18, %v16046_v24  ;;  %v32470_v24 = vld [vmem:[#allocation83_spill] sm:$0xff] }
 0x700   : > { %26145 = vmatmul.mubr.msk.f32.vlgmr.msra.gmra.mxu1 %vm312_vm1, %v30990_v11  ;;  %23826 = vmatpush1.msra.mxu0 %v32448_v33  ;;  %v18728_v10 = vadd.f32 %v32470_v24, %v18279_v58  ;;  %v32474_v18 = vld [vmem:[#allocation75_spill] sm:$0xff]  ;;  %v32480_v58 = vld [vmem:[#allocation70_spill] sm:$0xff] }
 0x701   : > { %24240 = vmatpush1.msra.mxu1 %v32449_v61  ;;  %23979 = vmatprep.subr.mxu0 %v32451_v53  ;;  %v16943_v31 = vadd.f32 %v32462_v34, %v16495_v7  ;;  %v32471_v61 = vld [vmem:[#allocation82_spill] sm:$0xff]  ;;  %v32475_v7 = vld [vmem:[#allocation69_spill] sm:$0xff] }
 0x702   : > { %24393 = vmatprep.subr.mxu1 %v32452_v60  ;;  %23859 = vmatprep.mubr.f32.mxu0 %v32196_v30  ;;  %v19138_v53 = vadd.f32 %v32472_v41, %v18728_v10  ;;  %v32473_v60 = vld [vmem:[#allocation67_spill] sm:$0xff] }
 0x703   : > { %24273 = vmatprep.mubr.f32.mxu1 %v32196_v30  ;;  %25747 = vmatmul.mubr.msk.f32.vlgmr.msra.gmra.mxu0 %vm312_vm1, %v30973_v23  ;;  %v17391_v39 = vadd.f32 %v32465_v62, %v16943_v31  ;;  %v32479_v62 = vld [vmem:[#allocation129_spill] sm:$0xff] }
 0x704   : > { %25759 = vmatmul.mubr.msk.f32.vlgmr.msra.gmra.mxu1 %vm312_vm1, %v31038_v16  ;;  %23980 = vmatpush1.msra.mxu0 %v32457_v63  ;;  %v19553_v38 = vadd.f32 %v30785_v28, %v19138_v53  ;;  %v32483_v53 = vld [vmem:[#allocation73_spill] sm:$0xff] }
 0x705   : > { %24394 = vmatpush1.msra.mxu1 %v32458_v1  ;;  %24162 = vmatprep.subr.mxu0 %v32460_v48  ;;  %v17839_v37 = vadd.f32 %v32469_v20, %v17391_v39  ;;  %v24123_v48 = vpop.permute.xlu0 %24122 }
 0x706   : > { %24576 = vmatprep.subr.mxu1 %v32461_v47  ;;  %23865 = vmatprep.mubr.f32.mxu0 %v32196_v30  ;;  %v24124_v39 = vsel %vm15626_vm2, %v32479_v62, %v24123_v48 }
 0x707   : > { %24279 = vmatprep.mubr.f32.mxu1 %v32196_v30  ;;  %25748 = vmatmul.mubr.msk.f32.gmra.mxu0 %vm312_vm1, %v30990_v11  ;;  %v18288_v3 = vadd.f32 %v32471_v61, %v17839_v37 }
 0x708   : > { %25760 = vmatmul.mubr.msk.f32.gmra.mxu1 %vm312_vm1, %v31058_v5  ;;  %24013 = vmatprep.mubr.f32.mxu0 %v32196_v30 }
 0x709   : > { %24427 = vmatprep.mubr.f32.mxu1 %v32196_v30  ;;  %v26091_v52 = vpop.f32.mrf.mxu0  ;;  %v18737_v44 = vadd.f32 %v32477_v22, %v18288_v3 }
 0x70a   : > { %v19567_v43 = vadd.f32 %v26091_v52, %v32468_v12  ;;  %v26096_v15 = vpop.f32.mrf.mxu1  ;;  %v32481_v52 = vld [vmem:[#allocation84_spill] sm:$0xff] }
 0x70b   : > { %v19541_v6 = vpop.f32.mrf.mxu0  ;;  %25751 = vmatmul.mubr.msk.f32.vlgmr.msra.gmra.mxu0 %vm312_vm1, %v30973_v23  ;;  %v19147_v56 = vadd.f32 %v32478_v46, %v18737_v44  ;;  %v32484_v46 = vld [vmem:[#allocation76_spill] sm:$0xff] }
 0x70c   : > { %25763 = vmatmul.mubr.msk.f32.vlgmr.msra.gmra.mxu1 %vm312_vm1, %v31038_v16  ;;  %v19558_v13 = vadd.f32 %v19541_v6, %v19143_v27  ;;  %v31084_v51 = vadd.f32 %v26096_v15, %v19567_v43  ;;  %v19955_v33 = vpop.f32.mrf.mxu1  ;;  %24163 = vmatpush1.msra.mxu0 %v32473_v60  ;;  %v31132_v43 = vld [vmem:[%s31800_s3 + $0x188] sm:$0xff] }
 0x70d   : > { %24577 = vmatpush1.msra.mxu1 %v32474_v18  ;;  %24316 = vmatprep.subr.mxu0 %v32475_v7  ;;  %v19562_v35 = vadd.f32 %v30818_v54, %v19147_v56  ;;  %v32482_v54 = vld [vmem:[#allocation125_spill] sm:$0xff] }
 0x70e   : > { %24730 = vmatprep.subr.mxu1 %v32476_v2  ;;  %v19724_v23 = vpop.f32.mrf.mxu0  ;;  %v31092_v0 = vadd.f32 %v19955_v33, %v19558_v13  ;;  %24019 = vmatprep.mubr.f32.mxu0 %v32196_v30 }
 0x70f   : > { %24433 = vmatprep.mubr.f32.mxu1 %v32196_v30  ;;  %v19966_v40 = vadd.f32 %v19724_v23, %v30779_v26  ;;  %v20138_v63 = vpop.f32.mrf.mxu1  ;;  %25752 = vmatmul.mubr.msk.f32.gmra.mxu0 %vm312_vm1, %v30990_v11  ;;  %v31111_v26 = vld [vmem:[%s31800_s3 + $0x180] sm:$0xff]  ;;  %v24537_v11 = vpop.permute.xlu1 %24536 }
 0x710   : > { %25764 = vmatmul.mubr.msk.f32.gmra.mxu1 %vm312_vm1, %v31058_v5  ;;  %v19726_v1 = vpop.f32.mrf.mxu0  ;;  %24196 = vmatprep.mubr.f32.mxu0 %v32196_v30 }
 0x711   : > { %v19967_v47 = vadd.f32 %v19726_v1, %v19553_v38  ;;  %v31104_v34 = vadd.f32 %v20138_v63, %v19966_v40  ;;  %24610 = vmatprep.mubr.f32.mxu1 %v32196_v30  ;;  %v20140_v28 = vpop.f32.mrf.mxu1 }
 0x712   : > { %v19730_v31 = vpop.f32.mrf.mxu0 }
 0x713   : > { %v19975_v36 = vadd.f32 %v19730_v31, %v30811_v21  ;;  %v31115_v14 = vadd.f32 %v20140_v28, %v19967_v47  ;;  %v20144_v49 = vpop.f32.mrf.mxu1  ;;  %25757 = vmatmul.mubr.msk.f32.vlgmr.msra.gmra.mxu0 %vm312_vm1, %v31038_v16  ;;  %v24538_v21 = vsel %vm16075_vm4, %v32482_v54, %v24537_v11 }
 0x714   : > { %25769 = vmatmul.mubr.msk.f32.vlgmr.msra.gmra.mxu1 %vm312_vm1, %v31111_v26  ;;  %v19732_v19 = vpop.f32.mrf.mxu0  ;;  %24317 = vmatpush1.msra.mxu0 %v32480_v58 }
 0x715   : > { %24731 = vmatpush1.msra.mxu1 %v32481_v52  ;;  %v19976_v42 = vadd.f32 %v19732_v19, %v19562_v35  ;;  %v31127_v27 = vadd.f32 %v20144_v49, %v19975_v36  ;;  %v20146_v12 = vpop.f32.mrf.mxu1  ;;  %26147 = vmatprep.subr.mxu0 %v24124_v39  ;;  %v32486_v35 = vld [vmem:[#allocation78_spill] sm:$0xff] }
 0x716   : > { %26152 = vmatprep.subr.mxu1 %v24538_v21  ;;  %v19878_v15 = vpop.f32.mrf.mxu0  ;;  %24202 = vmatprep.mubr.f32.mxu0 %v32196_v30 }
 0x717   : > { %24616 = vmatprep.mubr.f32.mxu1 %v32196_v30  ;;  %v19970_v20 = vadd.f32 %v19878_v15, %v30838_v8  ;;  %v31137_v37 = vadd.f32 %v20146_v12, %v19976_v42  ;;  %v20292_v24 = vpop.f32.mrf.mxu1  ;;  %25758 = vmatmul.mubr.msk.f32.gmra.mxu0 %vm312_vm1, %v31058_v5 }
 0x718   : > { %25770 = vmatmul.mubr.msk.f32.gmra.mxu1 %vm312_vm1, %v31132_v43  ;;  %v19880_v10 = vpop.f32.mrf.mxu0  ;;  %24350 = vmatprep.mubr.f32.mxu0 %v32196_v30 }
 0x719   : > { %v19971_v6 = vadd.f32 %v19880_v10, %v30850_v45  ;;  %v31144_v13 = vadd.f32 %v20292_v24, %v19970_v20  ;;  %24764 = vmatprep.mubr.f32.mxu1 %v32196_v30  ;;  %v20294_v33 = vpop.f32.mrf.mxu1 }
 0x71b   : > { %v19884_v8 = vpop.f32.mrf.mxu0  ;;  %v31148_v61 = vadd.f32 %v20294_v33, %v19971_v6  ;;  %25761 = vmatmul.mubr.msk.f32.vlgmr.msra.gmra.mxu0 %vm312_vm1, %v31038_v16  ;;  %v20298_v41 = vpop.f32.mrf.mxu1 }
 0x71c   : > { %v19979_v3 = vadd.f32 %v19884_v8, %v30863_v17  ;;  %25773 = vmatmul.mubr.msk.f32.vlgmr.msra.gmra.mxu1 %vm312_vm1, %v31111_v26  ;;  %26148 = vmatpush3.msra.mxu0 %v24124_v39 }
 0x71d   : > { %26153 = vmatpush3.msra.mxu1 %v24538_v21  ;;  %v19886_v45 = vpop.f32.mrf.mxu0  ;;  %24653 = vmatprep.subr.mxu0 %v32483_v53  ;;  %v20300_v7 = vpop.f32.mrf.mxu1 }
 0x71e   : > { %v19980_v60 = vadd.f32 %v19886_v45, %v30874_v50  ;;  %v31157_v18 = vadd.f32 %v20298_v41, %v19979_v3  ;;  %24356 = vmatprep.mubr.f32.mxu0 %v32196_v30  ;;  %24770 = vmatprep.mubr.f32.mxu1 %v32196_v30 }
 0x71f   : > { %v20061_v17 = vpop.f32.mrf.mxu0  ;;  %25762 = vmatmul.mubr.msk.f32.gmra.mxu0 %vm312_vm1, %v31058_v5  ;;  %v20475_v22 = vpop.f32.mrf.mxu1 }
 0x720   : > { %v20378_v2 = vadd.f32 %v20061_v17, %v30885_v59  ;;  %v31162_v23 = vadd.f32 %v20300_v7, %v19980_v60  ;;  %25774 = vmatmul.mubr.msk.f32.gmra.mxu1 %vm312_vm1, %v31132_v43  ;;  %26149 = vmatprep.mubr.msk.f32.mxu0 %vm312_vm1, %v31038_v16 }
 0x721   : > { %v20063_v50 = vpop.f32.mrf.mxu0  ;;  %26154 = vmatprep.mubr.msk.f32.mxu1 %vm312_vm1, %v31111_v26  ;;  %v20477_v59 = vpop.f32.mrf.mxu1 }
 0x722   : > { %v20379_v44 = vadd.f32 %v20063_v50, %v30894_v9  ;;  %v31173_v38 = vadd.f32 %v20475_v22, %v20378_v2  ;;  %v32485_v9 = vld [vmem:[#allocation77_spill] sm:$0xff] }
 0x723   : > { %v20067_v40 = vpop.f32.mrf.mxu0  ;;  %26150 = vmatmul.mubr.msk.f32.vlgmr.msra.gmra.mxu0 %vm312_vm1, %v31058_v5 }
 0x724   : > { %v31175_v63 = vadd.f32 %v20477_v59, %v20379_v44  ;;  %v20481_v1 = vpop.f32.mrf.mxu1  ;;  %26155 = vmatmul.mubr.msk.f32.vlgmr.msra.gmra.mxu1 %vm312_vm1, %v31132_v43  ;;  %v20387_v16 = vadd.f32 %v20067_v40, %v30909_v25  ;;  %24654 = vmatpush1.msra.mxu0 %v32484_v46 }
 0x725   : > { %24687 = vmatprep.mubr.f32.mxu0 %v32196_v30  ;;  %24807 = vmatprep.subr.mxu0 %v32485_v9  ;;  %v20069_v56 = vpop.f32.mrf.mxu0 }
 0x726   : > { %v20483_v48 = vpop.f32.mrf.mxu1  ;;  %v20388_v47 = vadd.f32 %v20069_v56, %v30919_v29  ;;  %v31186_v28 = vadd.f32 %v20481_v1, %v20387_v16 }
 0x727   : > { %v20215_v11 = vpop.f32.mrf.mxu0  ;;  %25771 = vmatmul.mubr.msk.f32.vlgmr.msra.gmra.mxu0 %vm312_vm1, %v31111_v26 }
 0x728   : > { %v20629_v5 = vpop.f32.mrf.mxu1  ;;  %v20382_v31 = vadd.f32 %v20215_v11, %v30933_v57  ;;  %v31191_v25 = vadd.f32 %v20483_v48, %v20388_v47  ;;  %24808 = vmatpush1.msra.mxu0 %v32486_v35  ;;  %24693 = vmatprep.mubr.f32.mxu0 %v32196_v30 }
 0x729   : > { %v20217_v36 = vpop.f32.mrf.mxu0 }
 0x72a   : > { %v20631_v49 = vpop.f32.mrf.mxu1  ;;  %v20383_v62 = vadd.f32 %v20217_v36, %v30945_v32  ;;  %v31196_v29 = vadd.f32 %v20629_v5, %v20382_v31 }
 0x72b   : > { %v20221_v39 = vpop.f32.mrf.mxu0  ;;  %25772 = vmatmul.mubr.msk.f32.gmra.mxu0 %vm312_vm1, %v31132_v43 }
 0x72c   : > { %v20635_v19 = vpop.f32.mrf.mxu1  ;;  %v20391_v58 = vadd.f32 %v20221_v39, %v30950_v55  ;;  %v31201_v57 = vadd.f32 %v20631_v49, %v20383_v62  ;;  %24841 = vmatprep.mubr.f32.mxu0 %v32196_v30 }
 0x72d   : > { %v20223_v52 = vpop.f32.mrf.mxu0 }
 0x72e   : > { %v20637_v54 = vpop.f32.mrf.mxu1  ;;  %v20392_v21 = vadd.f32 %v20223_v52, %v30956_v4  ;;  %v31205_v42 = vadd.f32 %v20635_v19, %v20391_v58 }
 0x72f   : > { %v26101_v32 = vpop.f32.mrf.mxu0  ;;  %25775 = vmatmul.mubr.msk.f32.vlgmr.msra.gmra.mxu0 %vm312_vm1, %v31111_v26 }
 0x730   : > { %v26106_v12 = vpop.f32.mrf.mxu1  ;;  %v20395_v15 = vadd.f32 %v26101_v32, %v31084_v51  ;;  %v31210_v20 = vadd.f32 %v20637_v54, %v20392_v21  ;;  %24847 = vmatprep.mubr.f32.mxu0 %v32196_v30 }
 0x731   : > { %v20369_v55 = vpop.f32.mrf.mxu0 }
 0x732   : > { %v20783_v24 = vpop.f32.mrf.mxu1  ;;  %v20386_v10 = vadd.f32 %v20369_v55, %v31092_v0  ;;  %v31214_v6 = vadd.f32 %v26106_v12, %v20395_v15 }
 0x733   : > { %v20552_v4 = vpop.f32.mrf.mxu0  ;;  %25776 = vmatmul.mubr.msk.f32.gmra.mxu0 %vm312_vm1, %v31132_v43 }
 0x734   : > { %v20966_v33 = vpop.f32.mrf.mxu1  ;;  %v20794_v26 = vadd.f32 %v20552_v4, %v31104_v34  ;;  %v31219_v8 = vadd.f32 %v20783_v24, %v20386_v10 }
 0x735   : > { %v20554_v51 = vpop.f32.mrf.mxu0 }
 0x736   : > { %v20968_v3 = vpop.f32.mrf.mxu1  ;;  %v20795_v41 = vadd.f32 %v20554_v51, %v31115_v14  ;;  %v31222_v30 = vadd.f32 %v20966_v33, %v20794_v26 }
 0x737   : > { %v20558_v45 = vpop.f32.mrf.mxu0 }
 0x738   : > { %v20972_v53 = vpop.f32.mrf.mxu1  ;;  %v20803_v0 = vadd.f32 %v20558_v45, %v31127_v27  ;;  %v31225_v60 = vadd.f32 %v20968_v3, %v20795_v41 }
 0x739   : > { %v20560_v7 = vpop.f32.mrf.mxu0 }
 0x73a   : > { %v20974_v17 = vpop.f32.mrf.mxu1  ;;  %v20804_v43 = vadd.f32 %v20560_v7, %v31137_v37  ;;  %v31228_v2 = vadd.f32 %v20972_v53, %v20803_v0 }
 0x73b   : > { %v20706_v34 = vpop.f32.mrf.mxu0 }
 0x73c   : > { %v21120_v22 = vpop.f32.mrf.mxu1  ;;  %v20798_v50 = vadd.f32 %v20706_v34, %v31144_v13  ;;  %v31231_v44 = vadd.f32 %v20974_v17, %v20804_v43 }
 0x73d   : > { %v20708_v14 = vpop.f32.mrf.mxu0 }
 0x73e   : > { %v21122_v59 = vpop.f32.mrf.mxu1  ;;  %v20799_v40 = vadd.f32 %v20708_v14, %v31148_v61  ;;  %v31234_v1 = vadd.f32 %v21120_v22, %v20798_v50 }
 0x73f   : > { %v20712_v27 = vpop.f32.mrf.mxu0 }
 0x740   : > { %v21126_v16 = vpop.f32.mrf.mxu1  ;;  %v20807_v46 = vadd.f32 %v20712_v27, %v31157_v18  ;;  %v31237_v9 = vadd.f32 %v21122_v59, %v20799_v40 }
 0x741   : > { %v20714_v37 = vpop.f32.mrf.mxu0 }
 0x742   : > { %v21128_v56 = vpop.f32.mrf.mxu1  ;;  %v20808_v48 = vadd.f32 %v20714_v37, %v31162_v23  ;;  %v31240_v47 = vadd.f32 %v21126_v16, %v20807_v46 }
 0x743   : > { %v20889_v13 = vpop.f32.mrf.mxu0 }
 0x744   : > { %v21303_v11 = vpop.f32.mrf.mxu1  ;;  %v21206_v5 = vadd.f32 %v20889_v13, %v31173_v38  ;;  %v31243_v31 = vadd.f32 %v21128_v56, %v20808_v48 }
 0x745   : > { %v20891_v61 = vpop.f32.mrf.mxu0 }
 0x746   : > { %v21305_v35 = vpop.f32.mrf.mxu1  ;;  %v21207_v36 = vadd.f32 %v20891_v61, %v31175_v63  ;;  %v31246_v49 = vadd.f32 %v21303_v11, %v21206_v5 }
 0x747   : > { %v20895_v18 = vpop.f32.mrf.mxu0 }
 0x748   : > { %v21309_v62 = vpop.f32.mrf.mxu1  ;;  %v21215_v39 = vadd.f32 %v20895_v18, %v31186_v28  ;;  %v31249_v19 = vadd.f32 %v21305_v35, %v21207_v36 }
 0x749   : > { %v20897_v23 = vpop.f32.mrf.mxu0 }
 0x74a   : > { %v21311_v58 = vpop.f32.mrf.mxu1  ;;  %v21216_v52 = vadd.f32 %v20897_v23, %v31191_v25  ;;  %v31252_v54 = vadd.f32 %v21309_v62, %v21215_v39 }
 0x74b   : > { %v21043_v38 = vpop.f32.mrf.mxu0 }
 0x74c   : > { %v21457_v21 = vpop.f32.mrf.mxu1  ;;  %v21210_v32 = vadd.f32 %v21043_v38, %v31196_v29  ;;  %v31255_v12 = vadd.f32 %v21311_v58, %v21216_v52 }
 0x74d   : > { %v21045_v63 = vpop.f32.mrf.mxu0 }
 0x74e   : > { %v21459_v15 = vpop.f32.mrf.mxu1  ;;  %v21211_v55 = vadd.f32 %v21045_v63, %v31201_v57  ;;  %v31258_v24 = vadd.f32 %v21457_v21, %v21210_v32 }
 0x74f   : > { %v21049_v28 = vpop.f32.mrf.mxu0 }
 0x750   : > { %v21463_v10 = vpop.f32.mrf.mxu1  ;;  %v21219_v4 = vadd.f32 %v21049_v28, %v31205_v42  ;;  %v31261_v33 = vadd.f32 %v21459_v15, %v21211_v55 }
 0x751   : > { %v21051_v25 = vpop.f32.mrf.mxu0 }
 0x752   : > { %v21465_v26 = vpop.f32.mrf.mxu1  ;;  %v21220_v51 = vadd.f32 %v21051_v25, %v31210_v20  ;;  %v31264_v3 = vadd.f32 %v21463_v10, %v21219_v4 }
 0x753   : > { %v26111_v29 = vpop.f32.mrf.mxu0 }
 0x754   : > { %v26116_v41 = vpop.f32.mrf.mxu1  ;;  %v21223_v45 = vadd.f32 %v26111_v29, %v31214_v6  ;;  %v31267_v53 = vadd.f32 %v21465_v26, %v21220_v51 }
 0x755   : > { %v21197_v57 = vpop.f32.mrf.mxu0 }
 0x756   : > { %v21611_v0 = vpop.f32.mrf.mxu1  ;;  %v21214_v7 = vadd.f32 %v21197_v57, %v31219_v8  ;;  %v31270_v17 = vadd.f32 %v26116_v41, %v21223_v45 }
 0x757   : > { %v21380_v42 = vpop.f32.mrf.mxu0 }
 0x758   : > { %v21794_v43 = vpop.f32.mrf.mxu1  ;;  %v21622_v34 = vadd.f32 %v21380_v42, %v31222_v30  ;;  %v31273_v22 = vadd.f32 %v21611_v0, %v21214_v7 }
 0x759   : > { %v21382_v20 = vpop.f32.mrf.mxu0 }
 0x75a   : > { %v21796_v50 = vpop.f32.mrf.mxu1  ;;  %v21623_v14 = vadd.f32 %v21382_v20, %v31225_v60  ;;  %v31276_v59 = vadd.f32 %v21794_v43, %v21622_v34 }
 0x75b   : > { %v21386_v6 = vpop.f32.mrf.mxu0 }
 0x75c   : > { %v21800_v40 = vpop.f32.mrf.mxu1  ;;  %v21631_v27 = vadd.f32 %v21386_v6, %v31228_v2  ;;  %v31279_v16 = vadd.f32 %v21796_v50, %v21623_v14 }
 0x75d   : > { %v21388_v8 = vpop.f32.mrf.mxu0 }
 0x75e   : > { %v21802_v46 = vpop.f32.mrf.mxu1  ;;  %v21632_v37 = vadd.f32 %v21388_v8, %v31231_v44  ;;  %v31282_v56 = vadd.f32 %v21800_v40, %v21631_v27 }
 0x75f   : > { %v21534_v30 = vpop.f32.mrf.mxu0 }
 0x760   : > { %v21948_v48 = vpop.f32.mrf.mxu1  ;;  %v21626_v13 = vadd.f32 %v21534_v30, %v31234_v1  ;;  %v31285_v11 = vadd.f32 %v21802_v46, %v21632_v37 }
 0x761   : > { %v21536_v60 = vpop.f32.mrf.mxu0 }
 0x762   : > { %v21950_v5 = vpop.f32.mrf.mxu1  ;;  %v21627_v61 = vadd.f32 %v21536_v60, %v31237_v9  ;;  %v31288_v35 = vadd.f32 %v21948_v48, %v21626_v13 }
 0x763   : > { %v21540_v2 = vpop.f32.mrf.mxu0 }
 0x764   : > { %v21954_v36 = vpop.f32.mrf.mxu1  ;;  %v21635_v18 = vadd.f32 %v21540_v2, %v31240_v47  ;;  %v31291_v62 = vadd.f32 %v21950_v5, %v21627_v61 }
 0x765   : > { %v21542_v44 = vpop.f32.mrf.mxu0 }
 0x766   : > { %v21956_v39 = vpop.f32.mrf.mxu1  ;;  %v21636_v23 = vadd.f32 %v21542_v44, %v31243_v31  ;;  %v31294_v58 = vadd.f32 %v21954_v36, %v21635_v18 }
 0x767   : > { %v21717_v1 = vpop.f32.mrf.mxu0 }
 0x768   : > { %v22131_v52 = vpop.f32.mrf.mxu1  ;;  %v22034_v38 = vadd.f32 %v21717_v1, %v31246_v49  ;;  %v31297_v21 = vadd.f32 %v21956_v39, %v21636_v23 }
 0x769   : > { %v21719_v9 = vpop.f32.mrf.mxu0 }
 0x76a   : > { %v22133_v32 = vpop.f32.mrf.mxu1  ;;  %v22035_v63 = vadd.f32 %v21719_v9, %v31249_v19  ;;  %v31300_v15 = vadd.f32 %v22131_v52, %v22034_v38 }
 0x76b   : > { %v21723_v47 = vpop.f32.mrf.mxu0 }
 0x76c   : > { %v22137_v55 = vpop.f32.mrf.mxu1  ;;  %v22043_v28 = vadd.f32 %v21723_v47, %v31252_v54  ;;  %v31303_v10 = vadd.f32 %v22133_v32, %v22035_v63 }
 0x76d   : > { %v21725_v31 = vpop.f32.mrf.mxu0 }
 0x76e   : > { %v22139_v4 = vpop.f32.mrf.mxu1  ;;  %v22044_v25 = vadd.f32 %v21725_v31, %v31255_v12  ;;  %v31306_v26 = vadd.f32 %v22137_v55, %v22043_v28 }
 0x76f   : > { %v21871_v49 = vpop.f32.mrf.mxu0 }
 0x770   : > { %v22285_v51 = vpop.f32.mrf.mxu1  ;;  %v22038_v29 = vadd.f32 %v21871_v49, %v31258_v24  ;;  %v31309_v41 = vadd.f32 %v22139_v4, %v22044_v25 }
 0x771   : > { %v21873_v19 = vpop.f32.mrf.mxu0 }
 0x772   : > { %v22287_v45 = vpop.f32.mrf.mxu1  ;;  %v22039_v57 = vadd.f32 %v21873_v19, %v31261_v33  ;;  %v31312_v0 = vadd.f32 %v22285_v51, %v22038_v29 }
 0x773   : > { %v21877_v54 = vpop.f32.mrf.mxu0 }
 0x774   : > { %v22291_v7 = vpop.f32.mrf.mxu1  ;;  %v22047_v42 = vadd.f32 %v21877_v54, %v31264_v3  ;;  %v31315_v43 = vadd.f32 %v22287_v45, %v22039_v57 }
 0x775   : > { %v21879_v12 = vpop.f32.mrf.mxu0 }
 0x776   : > { %v22293_v34 = vpop.f32.mrf.mxu1  ;;  %v22048_v20 = vadd.f32 %v21879_v12, %v31267_v53  ;;  %v31318_v50 = vadd.f32 %v22291_v7, %v22047_v42 }
 0x777   : > { %v26121_v24 = vpop.f32.mrf.mxu0 }
 0x778   : > { %v26126_v14 = vpop.f32.mrf.mxu1  ;;  %v22051_v6 = vadd.f32 %v26121_v24, %v31270_v17  ;;  %v31321_v40 = vadd.f32 %v22293_v34, %v22048_v20 }
 0x779   : > { %v22025_v33 = vpop.f32.mrf.mxu0 }
 0x77a   : > { %v22439_v27 = vpop.f32.mrf.mxu1  ;;  %v22042_v8 = vadd.f32 %v22025_v33, %v31273_v22  ;;  %v31324_v46 = vadd.f32 %v26126_v14, %v22051_v6 }
 0x77b   : > { %v22208_v3 = vpop.f32.mrf.mxu0 }
 0x77c   : > { %v22622_v37 = vpop.f32.mrf.mxu1  ;;  %v22450_v30 = vadd.f32 %v22208_v3, %v31276_v59  ;;  %v31327_v48 = vadd.f32 %v22439_v27, %v22042_v8 }
 0x77d   : > { %v22210_v53 = vpop.f32.mrf.mxu0 }
 0x77e   : > { %v22624_v13 = vpop.f32.mrf.mxu1  ;;  %v22451_v60 = vadd.f32 %v22210_v53, %v31279_v16  ;;  %v31330_v5 = vadd.f32 %v22622_v37, %v22450_v30 }
 0x77f   : > { %v22214_v17 = vpop.f32.mrf.mxu0 }
 0x780   : > { %v22628_v61 = vpop.f32.mrf.mxu1  ;;  %v22459_v2 = vadd.f32 %v22214_v17, %v31282_v56  ;;  %v31333_v36 = vadd.f32 %v22624_v13, %v22451_v60 }
 0x781   : > { %v22216_v22 = vpop.f32.mrf.mxu0 }
 0x782   : > { %v22630_v18 = vpop.f32.mrf.mxu1  ;;  %v22460_v44 = vadd.f32 %v22216_v22, %v31285_v11  ;;  %v31336_v39 = vadd.f32 %v22628_v61, %v22459_v2 }
 0x783   : > { %v22362_v59 = vpop.f32.mrf.mxu0 }
 0x784   : > { %v22776_v23 = vpop.f32.mrf.mxu1  ;;  %v22454_v1 = vadd.f32 %v22362_v59, %v31288_v35  ;;  %v31339_v52 = vadd.f32 %v22630_v18, %v22460_v44 }
 0x785   : > { %v22364_v16 = vpop.f32.mrf.mxu0 }
 0x786   : > { %v22778_v38 = vpop.f32.mrf.mxu1  ;;  %v22455_v9 = vadd.f32 %v22364_v16, %v31291_v62  ;;  %v31342_v32 = vadd.f32 %v22776_v23, %v22454_v1 }
 0x787   : > { %v22368_v56 = vpop.f32.mrf.mxu0 }
 0x788   : > { %v22782_v63 = vpop.f32.mrf.mxu1  ;;  %v22463_v47 = vadd.f32 %v22368_v56, %v31294_v58  ;;  %v31345_v55 = vadd.f32 %v22778_v38, %v22455_v9 }
 0x789   : > { %v22370_v11 = vpop.f32.mrf.mxu0 }
 0x78a   : > { %v22784_v28 = vpop.f32.mrf.mxu1  ;;  %v22464_v31 = vadd.f32 %v22370_v11, %v31297_v21  ;;  %v31348_v4 = vadd.f32 %v22782_v63, %v22463_v47 }
 0x78b   : > { %v22545_v35 = vpop.f32.mrf.mxu0 }
 0x78c   : > { %v22955_v25 = vpop.f32.mrf.mxu1  ;;  %v22862_v49 = vadd.f32 %v22545_v35, %v31300_v15  ;;  %v31351_v51 = vadd.f32 %v22784_v28, %v22464_v31 }
 0x78d   : > { %v22547_v62 = vpop.f32.mrf.mxu0 }
 0x78e   : > { %v22957_v29 = vpop.f32.mrf.mxu1  ;;  %v22863_v19 = vadd.f32 %v22547_v62, %v31303_v10  ;;  %v31354_v45 = vadd.f32 %v22955_v25, %v22862_v49 }
 0x78f   : > { %v22551_v58 = vpop.f32.mrf.mxu0 }
 0x790   : > { %v22961_v57 = vpop.f32.mrf.mxu1  ;;  %v22871_v54 = vadd.f32 %v22551_v58, %v31306_v26  ;;  %v31357_v7 = vadd.f32 %v22957_v29, %v22863_v19 }
 0x791   : > { %v22553_v21 = vpop.f32.mrf.mxu0 }
 0x792   : > { %v22963_v42 = vpop.f32.mrf.mxu1  ;;  %v22872_v12 = vadd.f32 %v22553_v21, %v31309_v41  ;;  %v31360_v34 = vadd.f32 %v22961_v57, %v22871_v54 }
 0x793   : > { %v22699_v15 = vpop.f32.mrf.mxu0 }
 0x794   : > { %v23109_v20 = vpop.f32.mrf.mxu1  ;;  %v22866_v24 = vadd.f32 %v22699_v15, %v31312_v0  ;;  %v31363_v14 = vadd.f32 %v22963_v42, %v22872_v12 }
 0x795   : > { %v22701_v10 = vpop.f32.mrf.mxu0 }
 0x796   : > { %v23111_v6 = vpop.f32.mrf.mxu1  ;;  %v22867_v33 = vadd.f32 %v22701_v10, %v31315_v43  ;;  %v31366_v27 = vadd.f32 %v23109_v20, %v22866_v24 }
 0x797   : > { %v22705_v26 = vpop.f32.mrf.mxu0 }
 0x798   : > { %v23115_v8 = vpop.f32.mrf.mxu1  ;;  %v22875_v3 = vadd.f32 %v22705_v26, %v31318_v50  ;;  %v31369_v37 = vadd.f32 %v23111_v6, %v22867_v33 }
 0x799   : > { %v22707_v41 = vpop.f32.mrf.mxu0 }
 0x79a   : > { %v23117_v30 = vpop.f32.mrf.mxu1  ;;  %v22876_v53 = vadd.f32 %v22707_v41, %v31321_v40  ;;  %v31372_v13 = vadd.f32 %v23115_v8, %v22875_v3 }
 0x79b   : > { %v26131_v0 = vpop.f32.mrf.mxu0 }
 0x79c   : > { %v26136_v60 = vpop.f32.mrf.mxu1  ;;  %v22879_v17 = vadd.f32 %v26131_v0, %v31324_v46  ;;  %v31375_v61 = vadd.f32 %v23117_v30, %v22876_v53 }
 0x79d   : > { %v22853_v43 = vpop.f32.mrf.mxu0 }
 0x79e   : > { %v23263_v2 = vpop.f32.mrf.mxu1  ;;  %v22870_v22 = vadd.f32 %v22853_v43, %v31327_v48  ;;  %v23289_v18 = vadd.f32 %v26136_v60, %v22879_v17 }
 0x79f   : > { %v23032_v50 = vpop.f32.mrf.mxu0 }
 0x7a0   : > { %v23447_v44 = vpop.f32.mrf.mxu1  ;;  %v23274_v59 = vadd.f32 %v23032_v50, %v31330_v5  ;;  %v31379_v23 = vadd.f32 %v23263_v2, %v22870_v22 }
 0x7a1   : > { %v23034_v40 = vpop.f32.mrf.mxu0 }
 0x7a2   : > { %v23449_v1 = vpop.f32.mrf.mxu1  ;;  %v23275_v16 = vadd.f32 %v23034_v40, %v31333_v36  ;;  %v31382_v38 = vadd.f32 %v23447_v44, %v23274_v59 }
 0x7a3   : > { %v23038_v46 = vpop.f32.mrf.mxu0 }
 0x7a4   : > { %v23453_v9 = vpop.f32.mrf.mxu1  ;;  %v23283_v56 = vadd.f32 %v23038_v46, %v31336_v39  ;;  %v31385_v63 = vadd.f32 %v23449_v1, %v23275_v16 }
 0x7a5   : > { %v23040_v48 = vpop.f32.mrf.mxu0 }
 0x7a6   : > { %v23455_v47 = vpop.f32.mrf.mxu1  ;;  %v23284_v11 = vadd.f32 %v23040_v48, %v31339_v52  ;;  %v31388_v28 = vadd.f32 %v23453_v9, %v23283_v56 }
 0x7a7   : > { %v23186_v5 = vpop.f32.mrf.mxu0 }
 0x7a8   : > { %v23601_v31 = vpop.f32.mrf.mxu1  ;;  %v23278_v35 = vadd.f32 %v23186_v5, %v31342_v32  ;;  %v31391_v25 = vadd.f32 %v23455_v47, %v23284_v11 }
 0x7a9   : > { %v23188_v36 = vpop.f32.mrf.mxu0 }
 0x7aa   : > { %v23603_v49 = vpop.f32.mrf.mxu1  ;;  %v23279_v62 = vadd.f32 %v23188_v36, %v31345_v55  ;;  %v31394_v29 = vadd.f32 %v23601_v31, %v23278_v35 }
 0x7ab   : > { %v23192_v39 = vpop.f32.mrf.mxu0 }
 0x7ac   : > { %v23607_v19 = vpop.f32.mrf.mxu1  ;;  %v23287_v58 = vadd.f32 %v23192_v39, %v31348_v4  ;;  %v31397_v57 = vadd.f32 %v23603_v49, %v23279_v62 }
 0x7ad   : > { %v23194_v52 = vpop.f32.mrf.mxu0 }
 0x7ae   : > { %v23609_v54 = vpop.f32.mrf.mxu1  ;;  %v23288_v21 = vadd.f32 %v23194_v52, %v31351_v51  ;;  %v31400_v42 = vadd.f32 %v23607_v19, %v23287_v58 }
 0x7af   : > { %v23370_v32 = vpop.f32.mrf.mxu0 }
 0x7b0   : > { %v23784_v12 = vpop.f32.mrf.mxu1  ;;  %v31402_v15 = vadd.f32 %v23609_v54, %v23288_v21  ;;  %v23687_v11 = vadd.f32 %v23370_v32, %v31354_v45  ;;  %v31448_v54 = vpop.permute.xlu0 %24951 }
 0x7b1   : > { %v23372_v20 = vpop.f32.mrf.mxu0 }
 0x7b2   : > { %v23786_v55 = vpop.f32.mrf.mxu1  ;;  %v23688_v35 = vadd.f32 %v23372_v20, %v31357_v7  ;;  %v24101_v62 = vadd.f32 %v23784_v12, %v23687_v11 }
 0x7b3   : > { %v23376_v24 = vpop.f32.mrf.mxu0 }
 0x7b4   : > { %v31404_v10 = vpop.f32.mrf.mxu1  ;;  %v24102_v58 = vadd.f32 %v23786_v55, %v23688_v35 }
 0x7b5   : > { %v23378_v6 = vpop.f32.mrf.mxu0 }
 0x7b6   : > { %v23792_v33 = vpop.f32.mrf.mxu1 }
 0x7b7   : > { %v23524_v4 = vpop.f32.mrf.mxu0 }
 0x7b8   : > { %v31406_v26 = vpop.f32.mrf.mxu1 }
 0x7b9   : > { %v31408_v8 = vpop.f32.mrf.mxu0 }
 0x7ba   : > { %v31410_v3 = vpop.f32.mrf.mxu1 }
 0x7bb   : > { %v31412_v51 = vpop.f32.mrf.mxu0 }
 0x7bc   : > { %v31414_v41 = vpop.f32.mrf.mxu1 }
 0x7bd   : > { %v31416_v30 = vpop.f32.mrf.mxu0 }
 0x7be   : > { %v31418_v53 = vpop.f32.mrf.mxu1 }
 0x7bf   : > { %v26141_v0 = vpop.f32.mrf.mxu0 }
 0x7c0   : > { %v26146_v60 = vpop.f32.mrf.mxu1  ;;  %v23704_v17 = vadd.f32 %v26141_v0, %v23289_v18 }
 0x7c1   : > { %v31420_v43 = vpop.f32.mrf.mxu0 }
 0x7c2   : > { %v31422_v2 = vpop.f32.mrf.mxu1  ;;  %v31424_v22 = vadd.f32 %v26146_v60, %v23704_v17 }
 0x7c3   : > { %v23861_v50 = vpop.f32.mrf.mxu0 }
 0x7c4   : > { %32487 = vst [vmem:[#allocation10_spill] sm:$0xff] %v31424_v22  ;;  %v24275_v44 = vpop.f32.mrf.mxu1 }
 0x7c5   : > { %v23863_v59 = vpop.f32.mrf.mxu0 }
 0x7c6   : > { %v24277_v40 = vpop.f32.mrf.mxu1 }
 0x7c7   : > { %v23867_v1 = vpop.f32.mrf.mxu0 }
 0x7c8   : > { %v31426_v16 = vpop.f32.mrf.mxu1 }
 0x7c9   : > { %v23869_v46 = vpop.f32.mrf.mxu0 }
 0x7ca   : > { %v31428_v9 = vpop.f32.mrf.mxu1 }
 0x7cb   : > { %v31430_v56 = vpop.f32.mrf.mxu0 }
 0x7cc   : > { %v31432_v48 = vpop.f32.mrf.mxu1 }
 0x7cd   : > { %v31434_v18 = vpop.f32.mrf.mxu0 }
 0x7ce   : > { %v31436_v47 = vpop.f32.mrf.mxu1 }
 0x7cf   : > { %v31439_v5 = vpop.f32.mrf.mxu0 }
 0x7d0   : > { %v31441_v31 = vpop.f32.mrf.mxu1 }
 0x7d1   : > { %v31444_v36 = vpop.f32.mrf.mxu0 }
 0x7d2   : > { %v31446_v49 = vpop.f32.mrf.mxu1 }
 0x7d3   : > { %v24198_v39 = vpop.f32.mrf.mxu0 }
 0x7d4   : > { %v24612_v19 = vpop.f32.mrf.mxu1  ;;  %v24515_v52 = vadd.f32 %v24198_v39, %v24101_v62  ;;  %v23697_v39 = vadd.f32 %v23378_v6, %v31363_v14  ;;  %v24104_v6 = vadd.f32 %v23863_v59, %v31385_v63  ;;  %v24113_v63 = vadd.f32 %v23869_v46, %v31391_v25 }
 0x7d5   : > { %v24200_v21 = vpop.f32.mrf.mxu0 }
 0x7d6   : > { %v24614_v0 = vpop.f32.mrf.mxu1  ;;  %v24516_v45 = vadd.f32 %v24200_v21, %v24102_v58  ;;  %v24929_v32 = vadd.f32 %v24612_v19, %v24515_v52  ;;  %v23696_v58 = vadd.f32 %v23376_v24, %v31360_v34 }
 0x7d7   : > { %v24204_v60 = vpop.f32.mrf.mxu0 }
 0x7d8   : > { %v24930_v17 = vadd.f32 %v24614_v0, %v24516_v45  ;;  %v31451_v22 = vadd.f32 %v31448_v54, %v24929_v32  ;;  %v24618_v35 = vpop.f32.mrf.mxu1  ;;  %v23691_v0 = vadd.f32 %v23524_v4, %v31366_v27  ;;  %v24111_v45 = vadd.f32 %v23792_v33, %v23697_v39 }
 0x7d9   : > { %v24206_v7 = vpop.f32.mrf.mxu0  ;;  %v24103_v32 = vadd.f32 %v23861_v50, %v31382_v38  ;;  %v24110_v14 = vadd.f32 %v31404_v10, %v23696_v58  ;;  %v23692_v27 = vadd.f32 %v31408_v8, %v31369_v37  ;;  %v24112_v33 = vadd.f32 %v23867_v1, %v31388_v28 }
 0x7da   : > { %32488 = vst [vmem:[#allocation3_spill] sm:$0xff] %v31451_v22  ;;  %v31454_v20 = vadd.f32 %v31448_v54, %v24930_v17  ;;  %v31925_v12 = vmax.f32 %v31451_v22, 0.0  ;;  %v24620_v52 = vpop.f32.mrf.mxu1  ;;  %v24105_v34 = vadd.f32 %v31406_v26, %v23691_v0  ;;  %v24518_v4 = vadd.f32 %v24277_v40, %v24104_v6 }
 0x7db   : > { %v24352_v11 = vpop.f32.mrf.mxu0  ;;  %v24517_v24 = vadd.f32 %v24275_v44, %v24103_v32  ;;  %v24524_v22 = vadd.f32 %v24204_v60, %v24110_v14  ;;  %v31486_v44 = vpop.permute.xlu1 %24956  ;;  %v24106_v37 = vadd.f32 %v31410_v3, %v23692_v27  ;;  %v24526_v28 = vadd.f32 %v31426_v16, %v24112_v33 }
 0x7dc   : > { %32489 = vst [vmem:[#allocation15_spill] sm:$0xff] %v31454_v20  ;;  %v31926_v55 = vmax.f32 %v31454_v20, 0.0  ;;  %25013 = vrot.lane.b32.xlu1 %v31925_v12, %s26245_s25  ;;  %v24525_v12 = vadd.f32 %v24206_v7, %v24111_v45  ;;  %v24519_v50 = vadd.f32 %v24352_v11, %v24105_v34  ;;  %v24107_v60 = vadd.f32 %v31430_v56, %v31394_v29 }
 0x7dd   : > { %v24354_v62 = vpop.f32.mrf.mxu0  ;;  %v24938_v58 = vadd.f32 %v24618_v35, %v24524_v22  ;;  %v23701_v22 = vadd.f32 %v31416_v30, %v31375_v61  ;;  %v24527_v3 = vadd.f32 %v31428_v9, %v24113_v63  ;;  %v23700_v61 = vadd.f32 %v31412_v51, %v31372_v13 }
 0x7de   : > { %25015 = vrot.lane.b32.xlu0 %v31926_v55, %s26245_s25  ;;  %v24766_v55 = vpop.f32.mrf.mxu1  ;;  %v24939_v39 = vadd.f32 %v24620_v52, %v24525_v12  ;;  %v24520_v35 = vadd.f32 %v24354_v62, %v24106_v37  ;;  %v24108_v29 = vadd.f32 %v31434_v18, %v31397_v57  ;;  %v23695_v32 = vadd.f32 %v31420_v43, %v31379_v23 }
 0x7df   : > { %v31465_v19 = vpop.f32.mrf.mxu0  ;;  %v24933_v1 = vadd.f32 %v24766_v55, %v24519_v50  ;;  %v31503_v11 = vadd.f32 %v31486_v44, %v24938_v58  ;;  %v24115_v0 = vadd.f32 %v31418_v53, %v23701_v22  ;;  %v24521_v51 = vadd.f32 %v31432_v48, %v24107_v60 }
 0x7e0   : > { %v24768_v59 = vpop.f32.mrf.mxu1  ;;  %v31491_v40 = vadd.f32 %v31486_v44, %v24939_v39  ;;  %v24114_v6 = vadd.f32 %v31414_v41, %v23700_v61  ;;  %v24522_v53 = vadd.f32 %v31436_v47, %v24108_v29  ;;  %v24109_v27 = vadd.f32 %v31422_v2, %v23695_v32 }
 0x7e1   : > { %v31468_v21 = vpop.f32.mrf.mxu0  ;;  %v31515_v56 = vadd.f32 %v31448_v54, %v24933_v1  ;;  %v24986_v57 = vmax.f32 %v31503_v11, 0.0  ;;  %v24934_v18 = vadd.f32 %v24768_v59, %v24520_v35  ;;  %v32491_v32 = vld [vmem:[#allocation3_spill] sm:$0xff] }
 0x7e2   : > { %v24772_v12 = vpop.f32.mrf.mxu1  ;;  %v24987_v9 = vmax.f32 %v31491_v40, 0.0  ;;  %v24529_v43 = vadd.f32 %v31468_v21, %v24115_v0  ;;  %v24528_v41 = vadd.f32 %v31465_v19, %v24114_v6  ;;  %v24116_v21 = vadd.f32 %v31439_v5, %v31400_v42 }
 0x7e3   : > { %v31472_v17 = vpop.f32.mrf.mxu0  ;;  %v24981_v23 = vmax.f32 %v31515_v56, 0.0  ;;  %v31544_v47 = vadd.f32 %v31448_v54, %v24934_v18 }
 0x7e4   : > { %v24774_v13 = vpop.f32.mrf.mxu1  ;;  %v24942_v42 = vadd.f32 %v24772_v12, %v24528_v41 }
 0x7e5   : > { %v31476_v20 = vpop.f32.mrf.mxu0  ;;  %v24943_v50 = vadd.f32 %v24774_v13, %v24529_v43  ;;  %v32492_v13 = vmax.f32 %v32491_v32, 0.0 }
 0x7e6   : > { %v26156_v33 = vpop.f32.mrf.mxu1  ;;  %v24523_v39 = vadd.f32 %v31476_v20, %v24109_v27  ;;  %v24530_v20 = vadd.f32 %v31441_v31, %v24116_v21 }
 0x7e7   : > { %v24689_v38 = vpop.f32.mrf.mxu0  ;;  %v31571_v58 = vadd.f32 %v31486_v44, %v24943_v50 }
 0x7e8   : > { %v24931_v10 = vadd.f32 %v24689_v38, %v24517_v24  ;;  %v24920_v63 = vpop.f32.mrf.mxu1 }
 0x7e9   : > { %v24691_v7 = vpop.f32.mrf.mxu0  ;;  %v24991_v60 = vmax.f32 %v31571_v58, 0.0 }
 0x7ea   : > { %v31484_v45 = vadd.f32 %v31448_v54, %v24931_v10  ;;  %v24932_v26 = vadd.f32 %v24691_v7, %v24518_v4  ;;  %v24117_v10 = vadd.f32 %v31444_v36, %v31402_v15  ;;  %v24982_v7 = vmax.f32 %v31544_v47, 0.0 }
 0x7eb   : > { %v24695_v8 = vpop.f32.mrf.mxu0 }
 0x7ec   : > { %v24979_v25 = vmax.f32 %v31484_v45, 0.0  ;;  %v31495_v46 = vadd.f32 %v31448_v54, %v24932_v26  ;;  %v24940_v52 = vadd.f32 %v24695_v8, %v24526_v28  ;;  %v24937_v26 = vadd.f32 %v24920_v63, %v24523_v39  ;;  %v32490_v8 = vld [vmem:[#allocation10_spill] sm:$0xff] }
 0x7ed   : > { %v24697_v16 = vpop.f32.mrf.mxu0  ;;  %v24531_v36 = vadd.f32 %v31446_v49, %v24117_v10  ;;  %v31579_v28 = vadd.f32 %v31486_v44, %v24942_v42  ;;  %v24532_v1 = vadd.f32 %v31472_v17, %v32490_v8 }
 0x7ee   : > { %v24980_v55 = vmax.f32 %v31495_v46, 0.0  ;;  %25017 = vrot.lane.b32.xlu1 %v24979_v25, %s26245_s25  ;;  %v24941_v62 = vadd.f32 %v24697_v16, %v24527_v3  ;;  %v31526_v14 = vadd.f32 %v31486_v44, %v24940_v52  ;;  %v31589_v3 = vadd.f32 %v31448_v54, %v24937_v26 }
 0x7ef   : > { %v24843_v30 = vpop.f32.mrf.mxu0  ;;  %v24990_v12 = vmax.f32 %v31579_v28, 0.0  ;;  %v24946_v17 = vadd.f32 %v26156_v33, %v24532_v1 }
 0x7f0   : > { %25019 = vrot.lane.b32.xlu0 %v24980_v55, %s26245_s25  ;;  %v31536_v48 = vadd.f32 %v31486_v44, %v24941_v62  ;;  %v24935_v24 = vadd.f32 %v24843_v30, %v24521_v51  ;;  %v24988_v38 = vmax.f32 %v31526_v14, 0.0  ;;  %v24985_v35 = vmax.f32 %v31589_v3, 0.0 }
 0x7f1   : > { %v24845_v34 = vpop.f32.mrf.mxu0  ;;  %v31607_v52 = vadd.f32 %v31486_v44, %v24946_v17 }
 0x7f2   : > { %25033 = vrot.lane.b32.xlu1 %v24987_v9, %s26245_s25  ;;  %v24936_v4 = vadd.f32 %v24845_v34, %v24522_v53  ;;  %v24989_v2 = vmax.f32 %v31536_v48, 0.0  ;;  %v31555_v19 = vadd.f32 %v31448_v54, %v24935_v24  ;;  %v32493_v53 = vld [vmem:[#allocation15_spill] sm:$0xff] }
 0x7f3   : > { %v24849_v59 = vpop.f32.mrf.mxu0  ;;  %v24994_v30 = vmax.f32 %v31607_v52, 0.0  ;;  %v32494_v34 = vmax.f32 %v32493_v53, 0.0 }
 0x7f4   : > { %25031 = vrot.lane.b32.xlu0 %v24986_v57, %s26245_s25  ;;  %v31564_v5 = vadd.f32 %v31448_v54, %v24936_v4  ;;  %v24983_v15 = vmax.f32 %v31555_v19, 0.0  ;;  %v24944_v22 = vadd.f32 %v24849_v59, %v24530_v20 }
 0x7f5   : > { %v24851_v37 = vpop.f32.mrf.mxu0 }
 0x7f6   : > { %25021 = vrot.lane.b32.xlu1 %v24981_v23, %s26245_s25  ;;  %v24984_v31 = vmax.f32 %v31564_v5, 0.0  ;;  %v24945_v49 = vadd.f32 %v24851_v37, %v24531_v36  ;;  %v31596_v16 = vadd.f32 %v31486_v44, %v24944_v22 }
 0x7f8   : > { %25035 = vrot.lane.b32.xlu0 %v24988_v38, %s26245_s25  ;;  %v31603_v54 = vadd.f32 %v31486_v44, %v24945_v49  ;;  %v24992_v61 = vmax.f32 %v31596_v16, 0.0 }
 0x7fa   : > { %25037 = vrot.lane.b32.xlu1 %v24989_v2, %s26245_s25  ;;  %v24993_v29 = vmax.f32 %v31603_v54, 0.0 }
 0x7fc   : > { %25023 = vrot.lane.b32.xlu0 %v24982_v7, %s26245_s25 }
 0x7fe   : > { %25025 = vrot.lane.b32.xlu1 %v24983_v15, %s26245_s25 }
 0x800   : > { %25027 = vrot.lane.b32.xlu0 %v24984_v31, %s26245_s25 }
 0x802   : > { %25041 = vrot.lane.b32.xlu1 %v24991_v60, %s26245_s25 }
 0x804   : > { %25039 = vrot.lane.b32.xlu0 %v24990_v12, %s26245_s25 }
 0x806   : > { %25029 = vrot.lane.b32.xlu1 %v24985_v35, %s26245_s25 }
 0x808   : > { %25043 = vrot.lane.b32.xlu0 %v24992_v61, %s26245_s25 }
 0x80a   : > { %25045 = vrot.lane.b32.xlu1 %v24993_v29, %s26245_s25 }
 0x80c   : > { %25047 = vrot.lane.b32.xlu0 %v24994_v30, %s26245_s25  ;;  %s25781_s25 = sshll.u32 %s32496_s19, 7 }
 0x80d   : > { %s31744_s30 = scalar_lea.vmem %s31802_s5, %s25781_s25 }
 0x84e   : > { %v25014_v44 = vpop.permute.xlu1 %25013 }
 0x850   : > { %v25016_v62 = vpop.permute.xlu0 %25015 }
 0x851   : > { %v25049_v0 = vsel %vm1341_vm3, %v25014_v44, %v25016_v62 }
 0x852   : > { %v31627_v51 = vmax.f32 %v32492_v13, %v25049_v0 }
 0x854   : > { %25119 = vrot.lane.b32.xlu1 %v31627_v51, %s26254_s22 }
 0x860   : > { %v25018_v18 = vpop.permute.xlu1 %25017 }
 0x861   : > { %v25050_v6 = vsel %vm1341_vm3, %v25016_v62, %v25018_v18 }
 0x862   : > { %v31634_v43 = vmax.f32 %v32494_v34, %v25050_v6  ;;  %v25020_v24 = vpop.permute.xlu0 %25019 }
 0x863   : > { %v25051_v27 = vsel %vm1341_vm3, %v25018_v18, %v25020_v24 }
 0x864   : > { %v31639_v33 = vmax.f32 %v24979_v25, %v25051_v27  ;;  %25121 = vrot.lane.b32.xlu0 %v31634_v43, %s26254_s22  ;;  %v25034_v41 = vpop.permute.xlu1 %25033 }
 0x866   : > { %v25032_v4 = vpop.permute.xlu0 %25031  ;;  %25123 = vrot.lane.b32.xlu1 %v31639_v33, %s26254_s22 }
 0x867   : > { %v25057_v21 = vsel %vm1341_vm3, %v25032_v4, %v25034_v41 }
 0x868   : > { %v31648_v50 = vmax.f32 %v24986_v57, %v25057_v21  ;;  %v25022_v39 = vpop.permute.xlu1 %25021 }
 0x869   : > { %v25052_v10 = vsel %vm1341_vm3, %v25020_v24, %v25022_v39 }
 0x86a   : > { %v25036_v45 = vpop.permute.xlu0 %25035  ;;  %25137 = vrot.lane.b32.xlu0 %v31648_v50, %s26254_s22  ;;  %v31656_v63 = vmax.f32 %v24980_v55, %v25052_v10 }
 0x86b   : > { %v25058_v25 = vsel %vm1341_vm3, %v25034_v41, %v25036_v45 }
 0x86c   : > { %v31660_v59 = vmax.f32 %v24987_v9, %v25058_v25  ;;  %v25038_v11 = vpop.permute.xlu1 %25037 }
 0x86d   : > { %v25059_v57 = vsel %vm1341_vm3, %v25036_v45, %v25038_v11 }
 0x86e   : > { %v25024_v42 = vpop.permute.xlu0 %25023  ;;  %25139 = vrot.lane.b32.xlu1 %v31660_v59, %s26254_s22  ;;  %25125 = vrot.lane.b32.xlu0 %v31656_v63, %s26254_s22  ;;  %v31670_v46 = vmax.f32 %v24988_v38, %v25059_v57 }
 0x86f   : > { %v25053_v20 = vsel %vm1341_vm3, %v25022_v39, %v25024_v42 }
 0x870   : > { %v31674_v40 = vmax.f32 %v24981_v23, %v25053_v20  ;;  %v25026_v55 = vpop.permute.xlu1 %25025 }
 0x871   : > { %v25054_v9 = vsel %vm1341_vm3, %v25024_v42, %v25026_v55 }
 0x872   : > { %v25028_v26 = vpop.permute.xlu0 %25027  ;;  %25127 = vrot.lane.b32.xlu1 %v31674_v40, %s26254_s22  ;;  %25141 = vrot.lane.b32.xlu0 %v31670_v46, %s26254_s22  ;;  %v31684_v14 = vmax.f32 %v24982_v7, %v25054_v9 }
 0x873   : > { %v25055_v36 = vsel %vm1341_vm3, %v25026_v55, %v25028_v26 }
 0x874   : > { %v31688_v56 = vmax.f32 %v24983_v15, %v25055_v36  ;;  %v25042_v23 = vpop.permute.xlu1 %25041 }
 0x876   : > { %v25040_v38 = vpop.permute.xlu0 %25039  ;;  %25131 = vrot.lane.b32.xlu1 %v31688_v56, %s26254_s22  ;;  %25129 = vrot.lane.b32.xlu0 %v31684_v14, %s26254_s22 }
 0x877   : > { %v25060_v37 = vsel %vm1341_vm3, %v25038_v11, %v25040_v38  ;;  %v25061_v28 = vsel %vm1341_vm3, %v25040_v38, %v25042_v23 }
 0x878   : > { %v31698_v47 = vmax.f32 %v24989_v2, %v25060_v37  ;;  %v31700_v7 = vmax.f32 %v24990_v12, %v25061_v28  ;;  %v25030_v19 = vpop.permute.xlu1 %25029 }
 0x879   : > { %v25056_v12 = vsel %vm1341_vm3, %v25028_v26, %v25030_v19  ;;  %v25099_v17 = vmax.f32 %v24985_v35, %v25030_v19 }
 0x87a   : > { %v25044_v15 = vpop.permute.xlu0 %25043  ;;  %25143 = vrot.lane.b32.xlu1 %v31698_v47, %s26254_s22  ;;  %25145 = vrot.lane.b32.xlu0 %v31700_v7, %s26254_s22 }
 0x87b   : > { %v25062_v8 = vsel %vm1341_vm3, %v25042_v23, %v25044_v15 }
 0x87c   : > { %v31709_v1 = vmax.f32 %v24991_v60, %v25062_v8  ;;  %v25046_v22 = vpop.permute.xlu1 %25045  ;;  %v31726_v60 = vmax.f32 %v24984_v31, %v25056_v12 }
 0x87d   : > { %v25063_v48 = vsel %vm1341_vm3, %v25044_v15, %v25046_v22 }
 0x87e   : > { %v31714_v2 = vmax.f32 %v24992_v61, %v25063_v48  ;;  %v25048_v49 = vpop.permute.xlu0 %25047  ;;  %25147 = vrot.lane.b32.xlu1 %v31709_v1, %s26254_s22 }
 0x87f   : > { %v25064_v58 = vsel %vm1341_vm3, %v25046_v22, %v25048_v49  ;;  %v25100_v3 = vmax.f32 %v24994_v30, %v25048_v49 }
 0x880   : > { %25149 = vrot.lane.b32.xlu0 %v31714_v2, %s26254_s22  ;;  %v31731_v16 = vmax.f32 %v24993_v29, %v25064_v58 }
 0x882   : > { %25135 = vrot.lane.b32.xlu1 %v25099_v17, %s26254_s22 }
 0x884   : > { %25133 = vrot.lane.b32.xlu0 %v31726_v60, %s26254_s22 }
 0x886   : > { %25151 = vrot.lane.b32.xlu1 %v31731_v16, %s26254_s22 }
 0x888   : > { %25153 = vrot.lane.b32.xlu0 %v25100_v3, %s26254_s22 }
 0x8c6   : > { %v25120_v5 = vpop.permute.xlu1 %25119 }
 0x8d6   : > { %v25122_v31 = vpop.permute.xlu0 %25121 }
 0x8d7   : > { %v25155_v35 = vsel %vm5893_vm11, %v25120_v5, %v25122_v31 }
 0x8d8   : > { %v25187_v54 = vmax.f32 %v31627_v51, %v25155_v35  ;;  %v25124_v52 = vpop.permute.xlu1 %25123 }
 0x8d9   : > { %v25156_v61 = vsel %vm5893_vm11, %v25122_v31, %v25124_v52 }
 0x8da   : > { %25203 = vst [vmem:[%s31744_s30] sm:$0xff] %v25187_v54  ;;  %v25188_v29 = vmax.f32 %v31634_v43, %v25156_v61 }
 0x8dc   : > { %25204 = vst [vmem:[%s31744_s30 + $0x8] sm:$0xff] %v25188_v29  ;;  %v25138_v30 = vpop.permute.xlu0 %25137 }
 0x8e0   : > { %v25126_v44 = vpop.permute.xlu0 %25125  ;;  %v25140_v62 = vpop.permute.xlu1 %25139 }
 0x8e1   : > { %v25157_v0 = vsel %vm5893_vm11, %v25124_v52, %v25126_v44  ;;  %v25163_v32 = vsel %vm5893_vm11, %v25138_v30, %v25140_v62 }
 0x8e2   : > { %v25189_v13 = vmax.f32 %v31639_v33, %v25157_v0  ;;  %v25195_v51 = vmax.f32 %v31648_v50, %v25163_v32 }
 0x8e4   : > { %25205 = vst [vmem:[%s31744_s30 + $0x10] sm:$0xff] %v25189_v13  ;;  %25211 = vst [vmem:[%s31744_s30 + $0x40] sm:$0xff] %v25195_v51  ;;  %v25142_v18 = vpop.permute.xlu0 %25141  ;;  %v25128_v6 = vpop.permute.xlu1 %25127 }
 0x8e5   : > { %v25164_v53 = vsel %vm5893_vm11, %v25140_v62, %v25142_v18  ;;  %v25158_v34 = vsel %vm5893_vm11, %v25126_v44, %v25128_v6 }
 0x8e6   : > { %v25196_v43 = vmax.f32 %v31660_v59, %v25164_v53  ;;  %v25190_v24 = vmax.f32 %v31656_v63, %v25158_v34 }
 0x8e8   : > { %25212 = vst [vmem:[%s31744_s30 + $0x48] sm:$0xff] %v25196_v43  ;;  %25206 = vst [vmem:[%s31744_s30 + $0x18] sm:$0xff] %v25190_v24  ;;  %v25130_v27 = vpop.permute.xlu0 %25129  ;;  %v25132_v33 = vpop.permute.xlu1 %25131 }
 0x8e9   : > { %v25159_v41 = vsel %vm5893_vm11, %v25128_v6, %v25130_v27  ;;  %v25160_v4 = vsel %vm5893_vm11, %v25130_v27, %v25132_v33 }
 0x8ea   : > { %v25191_v21 = vmax.f32 %v31674_v40, %v25159_v41  ;;  %v25192_v50 = vmax.f32 %v31684_v14, %v25160_v4 }
 0x8ec   : > { %25207 = vst [vmem:[%s31744_s30 + $0x20] sm:$0xff] %v25191_v21  ;;  %25208 = vst [vmem:[%s31744_s30 + $0x28] sm:$0xff] %v25192_v50  ;;  %v25146_v39 = vpop.permute.xlu0 %25145  ;;  %v25144_v10 = vpop.permute.xlu1 %25143 }
 0x8ed   : > { %v25165_v45 = vsel %vm5893_vm11, %v25142_v18, %v25144_v10  ;;  %v25166_v25 = vsel %vm5893_vm11, %v25144_v10, %v25146_v39 }
 0x8ee   : > { %v25197_v63 = vmax.f32 %v31670_v46, %v25165_v45  ;;  %v25198_v59 = vmax.f32 %v31698_v47, %v25166_v25 }
 0x8f0   : > { %25213 = vst [vmem:[%s31744_s30 + $0x50] sm:$0xff] %v25197_v63  ;;  %25214 = vst [vmem:[%s31744_s30 + $0x58] sm:$0xff] %v25198_v59  ;;  %v25148_v11 = vpop.permute.xlu1 %25147 }
 0x8f1   : > { %v25167_v57 = vsel %vm5893_vm11, %v25146_v39, %v25148_v11 }
 0x8f2   : > { %v25199_v42 = vmax.f32 %v31700_v7, %v25167_v57  ;;  %v25150_v20 = vpop.permute.xlu0 %25149 }
 0x8f3   : > { %v25168_v40 = vsel %vm5893_vm11, %v25148_v11, %v25150_v20 }
 0x8f4   : > { %25215 = vst [vmem:[%s31744_s30 + $0x60] sm:$0xff] %v25199_v42  ;;  %v25200_v55 = vmax.f32 %v31709_v1, %v25168_v40  ;;  %v25136_v9 = vpop.permute.xlu1 %25135 }
 0x8f6   : > { %25216 = vst [vmem:[%s31744_s30 + $0x68] sm:$0xff] %v25200_v55  ;;  %v25134_v46 = vpop.permute.xlu0 %25133 }
 0x8f7   : > { %v25161_v26 = vsel %vm5893_vm11, %v25132_v33, %v25134_v46  ;;  %v25162_v36 = vsel %vm5893_vm11, %v25134_v46, %v25136_v9 }
 0x8f8   : > { %v25193_v14 = vmax.f32 %v31688_v56, %v25161_v26  ;;  %v25194_v23 = vmax.f32 %v31726_v60, %v25162_v36  ;;  %v25152_v38 = vpop.permute.xlu1 %25151 }
 0x8f9   : > { %v25169_v37 = vsel %vm5893_vm11, %v25150_v20, %v25152_v38 }
 0x8fa   : > { %25209 = vst [vmem:[%s31744_s30 + $0x30] sm:$0xff] %v25193_v14  ;;  %25210 = vst [vmem:[%s31744_s30 + $0x38] sm:$0xff] %v25194_v23  ;;  %v25201_v28 = vmax.f32 %v31714_v2, %v25169_v37  ;;  %v25154_v47 = vpop.permute.xlu0 %25153 }
 0x8fb   : > { %v25170_v7 = vsel %vm5893_vm11, %v25152_v38, %v25154_v47 }
 0x8fc   : > { %25217 = vst [vmem:[%s31744_s30 + $0x70] sm:$0xff] %v25201_v28  ;;  %v25202_v19 = vmax.f32 %v31731_v16, %v25170_v7 }
 0x8fe   : > { %25218 = vst [vmem:[%s31744_s30 + $0x78] sm:$0xff] %v25202_v19 }
 0x8ff PF: > { %s15_s18 = sadd.s32 1, %s26241_s18  }
 0x900   : > { %p12_p4 = scmp.ge.s32.totalorder %s15_s18, 4  }
 0x902   :  { %14 = sbr.rel (!%p12_p4) target bundleno = 1 (0x1), region = 118 }

</bundles_post_ra>
